<compile_context>
chip_gen: v7x
topology: tpu7x:2x2x1
jax: 0.10.0
libtpu: 0.0.40
codegen_flags: <defaults>
</compile_context>

<pallas_src>
import functools

import jax
import jax.numpy as jnp
import numpy as np
from jax.experimental import pallas as pl
from jax.experimental.pallas import tpu as pltpu

_F32 = jnp.float32
_BF16 = jnp.bfloat16


# ----------------------------------------------------------------------------
# Fused U-Net generator kernel (whole netG forward in one pallas_call)
# ----------------------------------------------------------------------------
def _unet_kernel(x_ref,
                 w_e1a, b_e1a, w_e1b, b_e1b,
                 w_e2a, b_e2a, w_e2b, b_e2b,
                 w_ba, b_ba, w_bb, b_bb,
                 w_d2r, b_d2r, w_d2a, b_d2a, w_d2b, b_d2b,
                 w_d1r, b_d1r, w_d1a, b_d1a, w_d1b, b_d1b,
                 w_fin, b_fin,
                 m1_ref, m2_ref, m3_ref,
                 sub1_ref, sub2_ref, up32_ref, up21_ref,
                 o_ref,
                 tap_ref, asm_ref,
                 *, h, w, guard):
    h2, w2, h3, w3 = h // 2, w // 2, h // 4, w // 4
    wp1, wp2, wp3 = w + 2, w2 + 2, w3 + 2
    p1, p2, p3 = (h + 2) * wp1, (h2 + 2) * wp2, (h3 + 2) * wp3
    g = guard

    # Ring masks (f32, (1, P)) loaded once; applied with a single multiply per conv.
    m1, m2, m3 = m1_ref[...], m2_ref[...], m3_ref[...]

    def conv3x3(act, w_ref, b_ref, wp, p, mask, residual=None):
        # 3x3 same-conv as ONE deep-K matmul (Cout, 9*Cin) @ (9*Cin, P).
        # The nine shifted taps are written into a persistent VMEM scratch with slice
        # stores (no per-conv concatenate); guard lanes inside the read window are
        # zeroed explicitly so no stale data is ever read.
        cout, nine_cin = w_ref.shape
        cin = nine_cin // 9
        for a in range(3):
            for b in range(3):
                k = a * 3 + b
                delta = (a - 1) * wp + (b - 1)      # tap_k[j] = act[j + delta]
                r0 = k * cin
                tap_ref[r0:r0 + cin, g - delta:g - delta + p] = act
                if delta > 0:
                    tap_ref[r0:r0 + cin, g + p - delta:g + p] = (
                        jnp.zeros((cin, delta), _F32))
                elif delta < 0:
                    tap_ref[r0:r0 + cin, g:g - delta] = (
                        jnp.zeros((cin, -delta), _F32))
        big = tap_ref[0:nine_cin, g:g + p].astype(_BF16)        # bf16 MXU operand
        out = jnp.dot(w_ref[...], big, preferred_element_type=_F32)
        out = out + b_ref[...]                                  # (Cout, 1) f32
        if residual is not None:
            out = out + residual                                # summation skip
        return jnp.maximum(out, 0.0) * mask                     # ReLU + halo re-zero

    def maxpool2x2(act, hh, ww, sub_ref):
        # 2x2 maxpool: shifted elementwise maxima, then per-coarse-row subsample +
        # re-pad via a tiny (ww+2, ww/2+2) column-selection matmul into asm_ref.
        c = act.shape[0]
        wpf = ww + 2
        hc, wc = hh // 2, ww // 2
        wpc = wc + 2
        pc = (hc + 2) * wpc
        pm = act.shape[1] - wpf - 1
        mx = jnp.maximum(
            jnp.maximum(act[:, 0:pm], act[:, 1:1 + pm]),
            jnp.maximum(act[:, wpf:wpf + pm], act[:, wpf + 1:wpf + 1 + pm]))
        asm_ref[0:c, 0:pc] = jnp.zeros((c, pc), _F32)           # zero halo rows/stale
        for i in range(hc):
            row = mx[:, (1 + 2 * i) * wpf:(1 + 2 * i) * wpf + wpf]
            asm_ref[0:c, (1 + i) * wpc:(2 + i) * wpc] = jnp.dot(
                row, sub_ref[...], preferred_element_type=_F32)
        return asm_ref[0:c, 0:pc]

    def upsample2x(act, hc, wc, up_ref):
        # nearest-neighbour 2x upsample + re-pad: per-coarse-row duplication via a tiny
        # (wc+2, 2*wc+2) selection matmul, each fine row pair stored twice into asm_ref.
        c = act.shape[0]
        wpc = wc + 2
        wpf = 2 * wc + 2
        pf = (2 * hc + 2) * wpf
        asm_ref[0:c, 0:pf] = jnp.zeros((c, pf), _F32)
        for i in range(hc):
            rowc = act[:, (1 + i) * wpc:(2 + i) * wpc]
            rowf = jnp.dot(rowc, up_ref[...], preferred_element_type=_F32)
            asm_ref[0:c, (1 + 2 * i) * wpf:(1 + 2 * i) * wpf + wpf] = rowf
            asm_ref[0:c, (2 + 2 * i) * wpf:(2 + 2 * i) * wpf + wpf] = rowf
        return asm_ref[0:c, 0:pf]

    x = x_ref[0]                                                # (8, P1) f32
    e1 = conv3x3(x, w_e1a, b_e1a, wp1, p1, m1)
    e1 = conv3x3(e1, w_e1b, b_e1b, wp1, p1, m1)
    p1a = maxpool2x2(e1, h, w, sub1_ref)
    e2 = conv3x3(p1a, w_e2a, b_e2a, wp2, p2, m2)
    e2 = conv3x3(e2, w_e2b, b_e2b, wp2, p2, m2)
    p2a = maxpool2x2(e2, h2, w2, sub2_ref)
    bt = conv3x3(p2a, w_ba, b_ba, wp3, p3, m3)
    bt = conv3x3(bt, w_bb, b_bb, wp3, p3, m3)
    u2 = upsample2x(bt, h3, w3, up32_ref)
    d2 = conv3x3(u2, w_d2r, b_d2r, wp2, p2, m2, residual=e2)    # summation skip
    d2 = conv3x3(d2, w_d2a, b_d2a, wp2, p2, m2)
    d2 = conv3x3(d2, w_d2b, b_d2b, wp2, p2, m2)
    u1 = upsample2x(d2, h2, w2, up21_ref)
    d1 = conv3x3(u1, w_d1r, b_d1r, wp1, p1, m1, residual=e1)    # summation skip
    d1 = conv3x3(d1, w_d1a, b_d1a, wp1, p1, m1)
    d1 = conv3x3(d1, w_d1b, b_d1b, wp1, p1, m1)
    # fused 1x1 head (Cout=1, no ReLU); padded row stored, halo stripped in wrapper
    y = jnp.dot(w_fin[...], d1.astype(_BF16),
                preferred_element_type=_F32) + b_fin[...]        # (1, P1) f32
    o_ref[0] = y.astype(o_ref.dtype)


# ----------------------------------------------------------------------------
# Host-side constant builders (ring masks, per-row column selection matrices)
# ----------------------------------------------------------------------------
def _ring_mask_np(h, w):
    m = np.zeros((h + 2, w + 2), np.float32)
    m[1:h + 1, 1:w + 1] = 1.0
    return m.reshape(1, -1)


def _col_pool_mat_np(w_fine):
    # (w_fine+2, w_fine/2+2): picks columns 1,3,5,... into interior of the coarse row.
    wpf, wpc = w_fine + 2, w_fine // 2 + 2
    s = np.zeros((wpf, wpc), np.float32)
    for j in range(w_fine // 2):
        s[1 + 2 * j, 1 + j] = 1.0
    return s


def _col_up_mat_np(w_coarse):
    # (w_coarse+2, 2*w_coarse+2): duplicates each interior column into two fine columns.
    wpc, wpf = w_coarse + 2, 2 * w_coarse + 2
    s = np.zeros((wpc, wpf), np.float32)
    for j in range(w_coarse):
        s[1 + j, 1 + 2 * j] = 1.0
        s[1 + j, 2 + 2 * j] = 1.0
    return s


def _prep_conv(w, b, cin_pad=None):
    # (KH, KW, Cin, Cout) -> bf16 (Cout, KH*KW*Cin) matching the in-kernel tap order.
    kh, kw, ci, co = w.shape
    if cin_pad is not None and ci < cin_pad:
        w = jnp.pad(w, ((0, 0), (0, 0), (0, cin_pad - ci), (0, 0)))
        ci = cin_pad
    wbig = jnp.transpose(w, (3, 0, 1, 2)).reshape(co, kh * kw * ci).astype(_BF16)
    return wbig, b.reshape(co, 1).astype(_F32)


_LAYERS = ["enc1a", "enc1b", "enc2a", "enc2b", "bot_a", "bot_b",
           "dec2r", "dec2a", "dec2b", "dec1r", "dec1a", "dec1b", "final"]


@jax.jit
def pgan_forward_pallas(params, inputs_nchw, target_nchw):
    """PGAN.forward: self.fake = netG(inputs).  Whole generator in one Pallas kernel."""
    del target_nchw  # stored by the torch module, not used by the forward compute
    n, cin, h, w = inputs_nchw.shape
    assert h % 4 == 0 and w % 4 == 0
    cp = 8                                           # pad input channels to sublane tile
    assert cin <= cp
    h2, w2, h3, w3 = h // 2, w // 2, h // 4, w // 4
    wp1, wp2, wp3 = w + 2, w2 + 2, w3 + 2
    p1, p2, p3 = (h + 2) * wp1, (h2 + 2) * wp2, (h3 + 2) * wp3
    guard = max(128, -(-(wp1 + 1) // 128) * 128)     # lane-aligned halo guard

    # NCHW already puts channels on the sublane axis: pad ring + channels, flatten HW.
    x = inputs_nchw.astype(_F32)
    x = jnp.pad(x, ((0, 0), (0, cp - cin), (1, 1), (1, 1))).reshape(n, cp, p1)

    wb = []
    for name in _LAYERS:
        wgt, bias = params[name]
        wb.extend(_prep_conv(wgt, bias, cin_pad=cp if name == "enc1a" else None))

    consts = [
        jnp.asarray(_ring_mask_np(h, w)),        # (1, P1)
        jnp.asarray(_ring_mask_np(h2, w2)),      # (1, P2)
        jnp.asarray(_ring_mask_np(h3, w3)),      # (1, P3)
        jnp.asarray(_col_pool_mat_np(w)),        # (wp1, wp2)
        jnp.asarray(_col_pool_mat_np(w2)),       # (wp2, wp3)
        jnp.asarray(_col_up_mat_np(w3)),         # (wp3, wp2)
        jnp.asarray(_col_up_mat_np(w2)),         # (wp2, wp1)
    ]
    operands = [x] + wb + consts

    cmax = max([cp] + [max(pv[0].shape[2], pv[0].shape[3]) for pv in params.values()])
    cmax = -(-cmax // 8) * 8

    def _const_spec(a):
        return pl.BlockSpec(a.shape, lambda i, _nd=a.ndim: (0,) * _nd)

    in_specs = [pl.BlockSpec((1, cp, p1), lambda i: (i, 0, 0))]
    in_specs += [_const_spec(a) for a in wb + consts]

    out = pl.pallas_call(
        functools.partial(_unet_kernel, h=h, w=w, guard=guard),
        out_shape=jax.ShapeDtypeStruct((n, 1, p1), _F32),
        grid=(n,),
        in_specs=in_specs,
        out_specs=pl.BlockSpec((1, 1, p1), lambda i: (i, 0, 0)),
        scratch_shapes=[
            pltpu.VMEM((9 * cmax, p1 + 2 * guard), _F32),   # shifted-tap staging
            pltpu.VMEM((cmax, p1), _F32),                   # pool/upsample assembly
        ],
        compiler_params=pltpu.CompilerParams(dimension_semantics=("parallel",)),
    )(*operands)
    # Strip the halo ring with a cheap XLA slice (replaces the old val_ref gather matmul).
    return out.reshape(n, 1, h + 2, w + 2)[:, :, 1:h + 1, 1:w + 1].astype(inputs_nchw.dtype)


# ----------------------------------------------------------------------------
# Pure-JAX reference of the same generator (correctness check only).
# It mirrors the kernel's MXU precision: bf16 matmul operands, f32 accumulation,
# f32 bias/residual/ReLU epilogue.
# ----------------------------------------------------------------------------
def conv2d_ref(x, w, b, *, relu, residual=None):
    N, H, W, Cin = x.shape
    KH, KW, _, Cout = w.shape
    ph, pw = (KH - 1) // 2, (KW - 1) // 2
    xp = jnp.pad(x, ((0, 0), (ph, ph), (pw, pw), (0, 0))).astype(_BF16)
    wb = w.astype(_BF16)
    out = jnp.zeros((N, H, W, Cout), jnp.float32)
    for dh in range(KH):
        for dw in range(KW):
            out = out + jnp.einsum("nhwc,co->nhwo",
                                   xp[:, dh:dh + H, dw:dw + W, :], wb[dh, dw],
                                   preferred_element_type=jnp.float32)
    out = out + b
    if residual is not None:
        out = out + residual
    if relu:
        out = jnp.maximum(out, 0.0)
    return out


def maxpool2x2_ref(x):
    N, H, W, C = x.shape
    return x.reshape(N, H // 2, 2, W // 2, 2, C).max(axis=(2, 4))


def upsample2x_nearest(x):
    return jnp.repeat(jnp.repeat(x, 2, axis=1), 2, axis=2)


def unet_ref(params, x):
    p = params
    e1 = conv2d_ref(x, *p["enc1a"], relu=True)
    e1 = conv2d_ref(e1, *p["enc1b"], relu=True)
    x2 = maxpool2x2_ref(e1)
    e2 = conv2d_ref(x2, *p["enc2a"], relu=True)
    e2 = conv2d_ref(e2, *p["enc2b"], relu=True)
    x3 = maxpool2x2_ref(e2)
    bt = conv2d_ref(x3, *p["bot_a"], relu=True)
    bt = conv2d_ref(bt, *p["bot_b"], relu=True)
    u2 = upsample2x_nearest(bt)
    d2 = conv2d_ref(u2, *p["dec2r"], relu=True, residual=e2)
    d2 = conv2d_ref(d2, *p["dec2a"], relu=True)
    d2 = conv2d_ref(d2, *p["dec2b"], relu=True)
    u1 = upsample2x_nearest(d2)
    d1 = conv2d_ref(u1, *p["dec1r"], relu=True, residual=e1)
    d1 = conv2d_ref(d1, *p["dec1a"], relu=True)
    d1 = conv2d_ref(d1, *p["dec1b"], relu=True)
    return conv2d_ref(d1, *p["final"], relu=False)


def pgan_forward_ref(params, inputs_nchw):
    x = jnp.transpose(inputs_nchw, (0, 2, 3, 1))
    return jnp.transpose(unet_ref(params, x), (0, 3, 1, 2))


# ----------------------------------------------------------------------------
# Deterministic parameter init
# ----------------------------------------------------------------------------
def init_conv(key, kh, kw, cin, cout):
    wk, bk = jax.random.split(key)
    fan_in = kh * kw * cin
    w = jax.random.normal(wk, (kh, kw, cin, cout), jnp.float32) * np.sqrt(2.0 / fan_in)
    b = 0.01 * jax.random.normal(bk, (cout,), jnp.float32)
    return w, b


def init_params(key, cin=4, f=8, cout=1):
    names_and_shapes = [
        ("enc1a", 3, 3, cin, f), ("enc1b", 3, 3, f, f),
        ("enc2a", 3, 3, f, 2 * f), ("enc2b", 3, 3, 2 * f, 2 * f),
        ("bot_a", 3, 3, 2 * f, 4 * f), ("bot_b", 3, 3, 4 * f, 4 * f),
        ("dec2r", 3, 3, 4 * f, 2 * f), ("dec2a", 3, 3, 2 * f, 2 * f),
        ("dec2b", 3, 3, 2 * f, 2 * f),
        ("dec1r", 3, 3, 2 * f, f), ("dec1a", 3, 3, f, f), ("dec1b", 3, 3, f, f),
        ("final", 1, 1, f, cout),
    ]
    keys = jax.random.split(key, len(names_and_shapes))
    return {
        name: init_conv(k, kh, kw, ci, co)
        for k, (name, kh, kw, ci, co) in zip(keys, names_and_shapes)
    }


# ----------------------------------------------------------------------------
if __name__ == "__main__":
    key = jax.random.PRNGKey(0)
    k_in, k_tgt, k_par = jax.random.split(key, 3)

    N, CIN, H, W = 2, 4, 16, 16
    inputs = jax.random.normal(k_in, (N, CIN, H, W), jnp.float32)   # NCHW
    target = jax.random.normal(k_tgt, (N, 1, H, W), jnp.float32)    # NCHW
    params = init_params(k_par, cin=CIN, f=8, cout=1)

    fake = pgan_forward_pallas(params, inputs, target)
    fake = jax.block_until_ready(fake)

    fake_ref = jax.block_until_ready(pgan_forward_ref(params, inputs))

    assert fake.shape == (N, 1, H, W), fake.shape
    np.testing.assert_allclose(np.asarray(fake), np.asarray(fake_ref),
                               rtol=2e-2, atol=2e-2)
    print("KERNEL_OK")
</pallas_src>

<mosaic_0001>
module attributes {stable_mosaic.version = 11 : i64} {
  func.func @_unet_kernel(%arg0: i32, %arg1: memref<1x8x324xf32, #tpu.memory_space<vmem>>, %arg2: memref<8x72xbf16, #tpu.memory_space<vmem>>, %arg3: memref<8x1xf32, #tpu.memory_space<vmem>>, %arg4: memref<8x72xbf16, #tpu.memory_space<vmem>>, %arg5: memref<8x1xf32, #tpu.memory_space<vmem>>, %arg6: memref<16x72xbf16, #tpu.memory_space<vmem>>, %arg7: memref<16x1xf32, #tpu.memory_space<vmem>>, %arg8: memref<16x144xbf16, #tpu.memory_space<vmem>>, %arg9: memref<16x1xf32, #tpu.memory_space<vmem>>, %arg10: memref<32x144xbf16, #tpu.memory_space<vmem>>, %arg11: memref<32x1xf32, #tpu.memory_space<vmem>>, %arg12: memref<32x288xbf16, #tpu.memory_space<vmem>>, %arg13: memref<32x1xf32, #tpu.memory_space<vmem>>, %arg14: memref<16x288xbf16, #tpu.memory_space<vmem>>, %arg15: memref<16x1xf32, #tpu.memory_space<vmem>>, %arg16: memref<16x144xbf16, #tpu.memory_space<vmem>>, %arg17: memref<16x1xf32, #tpu.memory_space<vmem>>, %arg18: memref<16x144xbf16, #tpu.memory_space<vmem>>, %arg19: memref<16x1xf32, #tpu.memory_space<vmem>>, %arg20: memref<8x144xbf16, #tpu.memory_space<vmem>>, %arg21: memref<8x1xf32, #tpu.memory_space<vmem>>, %arg22: memref<8x72xbf16, #tpu.memory_space<vmem>>, %arg23: memref<8x1xf32, #tpu.memory_space<vmem>>, %arg24: memref<8x72xbf16, #tpu.memory_space<vmem>>, %arg25: memref<8x1xf32, #tpu.memory_space<vmem>>, %arg26: memref<1x8xbf16, #tpu.memory_space<vmem>>, %arg27: memref<1x1xf32, #tpu.memory_space<vmem>>, %arg28: memref<1x324xf32, #tpu.memory_space<vmem>>, %arg29: memref<1x100xf32, #tpu.memory_space<vmem>>, %arg30: memref<1x36xf32, #tpu.memory_space<vmem>>, %arg31: memref<18x10xf32, #tpu.memory_space<vmem>>, %arg32: memref<10x6xf32, #tpu.memory_space<vmem>>, %arg33: memref<6x10xf32, #tpu.memory_space<vmem>>, %arg34: memref<10x18xf32, #tpu.memory_space<vmem>>, %arg35: memref<1x1x324xf32, #tpu.memory_space<vmem>>, %arg36: memref<288x580xf32, #tpu.memory_space<vmem>>, %arg37: memref<32x324xf32, #tpu.memory_space<vmem>>) attributes {dimension_semantics = [#tpu.dimension_semantics<parallel>], iteration_bounds = array<i64: 2>, scalar_prefetch = 0 : i64, scratch_operands = 2 : i64, tpu.core_type = #tpu.core_type<tc>, window_params = [{transform_indices = @transform_0, window_bounds = array<i64: 1, 8, 324>}, {pipeline_mode = #tpu.pipeline_mode<synchronous>, transform_indices = @transform_1, window_bounds = array<i64: 8, 72>}, {pipeline_mode = #tpu.pipeline_mode<synchronous>, transform_indices = @transform_2, window_bounds = array<i64: 8, 1>}, {pipeline_mode = #tpu.pipeline_mode<synchronous>, transform_indices = @transform_3, window_bounds = array<i64: 8, 72>}, {pipeline_mode = #tpu.pipeline_mode<synchronous>, transform_indices = @transform_4, window_bounds = array<i64: 8, 1>}, {pipeline_mode = #tpu.pipeline_mode<synchronous>, transform_indices = @transform_5, window_bounds = array<i64: 16, 72>}, {pipeline_mode = #tpu.pipeline_mode<synchronous>, transform_indices = @transform_6, window_bounds = array<i64: 16, 1>}, {pipeline_mode = #tpu.pipeline_mode<synchronous>, transform_indices = @transform_7, window_bounds = array<i64: 16, 144>}, {pipeline_mode = #tpu.pipeline_mode<synchronous>, transform_indices = @transform_8, window_bounds = array<i64: 16, 1>}, {pipeline_mode = #tpu.pipeline_mode<synchronous>, transform_indices = @transform_9, window_bounds = array<i64: 32, 144>}, {pipeline_mode = #tpu.pipeline_mode<synchronous>, transform_indices = @transform_10, window_bounds = array<i64: 32, 1>}, {pipeline_mode = #tpu.pipeline_mode<synchronous>, transform_indices = @transform_11, window_bounds = array<i64: 32, 288>}, {pipeline_mode = #tpu.pipeline_mode<synchronous>, transform_indices = @transform_12, window_bounds = array<i64: 32, 1>}, {pipeline_mode = #tpu.pipeline_mode<synchronous>, transform_indices = @transform_13, window_bounds = array<i64: 16, 288>}, {pipeline_mode = #tpu.pipeline_mode<synchronous>, transform_indices = @transform_14, window_bounds = array<i64: 16, 1>}, {pipeline_mode = #tpu.pipeline_mode<synchronous>, transform_indices = @transform_15, window_bounds = array<i64: 16, 144>}, {pipeline_mode = #tpu.pipeline_mode<synchronous>, transform_indices = @transform_16, window_bounds = array<i64: 16, 1>}, {pipeline_mode = #tpu.pipeline_mode<synchronous>, transform_indices = @transform_17, window_bounds = array<i64: 16, 144>}, {pipeline_mode = #tpu.pipeline_mode<synchronous>, transform_indices = @transform_18, window_bounds = array<i64: 16, 1>}, {pipeline_mode = #tpu.pipeline_mode<synchronous>, transform_indices = @transform_19, window_bounds = array<i64: 8, 144>}, {pipeline_mode = #tpu.pipeline_mode<synchronous>, transform_indices = @transform_20, window_bounds = array<i64: 8, 1>}, {pipeline_mode = #tpu.pipeline_mode<synchronous>, transform_indices = @transform_21, window_bounds = array<i64: 8, 72>}, {pipeline_mode = #tpu.pipeline_mode<synchronous>, transform_indices = @transform_22, window_bounds = array<i64: 8, 1>}, {pipeline_mode = #tpu.pipeline_mode<synchronous>, transform_indices = @transform_23, window_bounds = array<i64: 8, 72>}, {pipeline_mode = #tpu.pipeline_mode<synchronous>, transform_indices = @transform_24, window_bounds = array<i64: 8, 1>}, {pipeline_mode = #tpu.pipeline_mode<synchronous>, transform_indices = @transform_25, window_bounds = array<i64: 1, 8>}, {pipeline_mode = #tpu.pipeline_mode<synchronous>, transform_indices = @transform_26, window_bounds = array<i64: 1, 1>}, {pipeline_mode = #tpu.pipeline_mode<synchronous>, transform_indices = @transform_27, window_bounds = array<i64: 1, 324>}, {pipeline_mode = #tpu.pipeline_mode<synchronous>, transform_indices = @transform_28, window_bounds = array<i64: 1, 100>}, {pipeline_mode = #tpu.pipeline_mode<synchronous>, transform_indices = @transform_29, window_bounds = array<i64: 1, 36>}, {pipeline_mode = #tpu.pipeline_mode<synchronous>, transform_indices = @transform_30, window_bounds = array<i64: 18, 10>}, {pipeline_mode = #tpu.pipeline_mode<synchronous>, transform_indices = @transform_31, window_bounds = array<i64: 10, 6>}, {pipeline_mode = #tpu.pipeline_mode<synchronous>, transform_indices = @transform_32, window_bounds = array<i64: 6, 10>}, {pipeline_mode = #tpu.pipeline_mode<synchronous>, transform_indices = @transform_33, window_bounds = array<i64: 10, 18>}, {transform_indices = @transform_34, window_bounds = array<i64: 1, 1, 324>}]} {
    %c0 = arith.constant 0 : index
    %c0_0 = arith.constant 0 : index
    %0 = vector.load %arg28[%c0, %c0_0] : memref<1x324xf32, #tpu.memory_space<vmem>>, vector<1x324xf32>
    %c0_1 = arith.constant 0 : index
    %c0_2 = arith.constant 0 : index
    %1 = vector.load %arg29[%c0_1, %c0_2] : memref<1x100xf32, #tpu.memory_space<vmem>>, vector<1x100xf32>
    %c0_3 = arith.constant 0 : index
    %c0_4 = arith.constant 0 : index
    %2 = vector.load %arg30[%c0_3, %c0_4] : memref<1x36xf32, #tpu.memory_space<vmem>>, vector<1x36xf32>
    %c0_5 = arith.constant 0 : index
    %c0_6 = arith.constant 0 : index
    %c0_7 = arith.constant 0 : index
    %3 = vector.load %arg1[%c0_5, %c0_6, %c0_7] : memref<1x8x324xf32, #tpu.memory_space<vmem>>, vector<1x8x324xf32>
    %4 = vector.shape_cast %3 : vector<1x8x324xf32> to vector<8x324xf32>
    %c0_8 = arith.constant 0 : index
    %c147 = arith.constant 147 : index
    %5 = vector.load %arg36[%c0_8, %c147] : memref<288x580xf32, #tpu.memory_space<vmem>>, vector<8x324xf32>
    tpu.vector_store %arg36[%c0_8, %c147], %4 {strides = array<i32>} : memref<288x580xf32, #tpu.memory_space<vmem>>, vector<8x324xf32>,
    %cst = arith.constant 0.000000e+00 : f32
    %6 = vector.broadcast %cst : f32 to vector<8x19xf32>
    %c0_9 = arith.constant 0 : index
    %c128 = arith.constant 128 : index
    %7 = vector.load %arg36[%c0_9, %c128] : memref<288x580xf32, #tpu.memory_space<vmem>>, vector<8x19xf32>
    tpu.vector_store %arg36[%c0_9, %c128], %6 {strides = array<i32>} : memref<288x580xf32, #tpu.memory_space<vmem>>, vector<8x19xf32>,
    %c8 = arith.constant 8 : index
    %c146 = arith.constant 146 : index
    %8 = vector.load %arg36[%c8, %c146] : memref<288x580xf32, #tpu.memory_space<vmem>>, vector<8x324xf32>
    tpu.vector_store %arg36[%c8, %c146], %4 {strides = array<i32>} : memref<288x580xf32, #tpu.memory_space<vmem>>, vector<8x324xf32>,
    %cst_10 = arith.constant 0.000000e+00 : f32
    %9 = vector.broadcast %cst_10 : f32 to vector<8x18xf32>
    %c8_11 = arith.constant 8 : index
    %c128_12 = arith.constant 128 : index
    %10 = vector.load %arg36[%c8_11, %c128_12] : memref<288x580xf32, #tpu.memory_space<vmem>>, vector<8x18xf32>
    tpu.vector_store %arg36[%c8_11, %c128_12], %9 {strides = array<i32>} : memref<288x580xf32, #tpu.memory_space<vmem>>, vector<8x18xf32>,
    %c16 = arith.constant 16 : index
    %c145 = arith.constant 145 : index
    %11 = vector.load %arg36[%c16, %c145] : memref<288x580xf32, #tpu.memory_space<vmem>>, vector<8x324xf32>
    tpu.vector_store %arg36[%c16, %c145], %4 {strides = array<i32>} : memref<288x580xf32, #tpu.memory_space<vmem>>, vector<8x324xf32>,
    %cst_13 = arith.constant 0.000000e+00 : f32
    %12 = vector.broadcast %cst_13 : f32 to vector<8x17xf32>
    %c16_14 = arith.constant 16 : index
    %c128_15 = arith.constant 128 : index
    %13 = vector.load %arg36[%c16_14, %c128_15] : memref<288x580xf32, #tpu.memory_space<vmem>>, vector<8x17xf32>
    tpu.vector_store %arg36[%c16_14, %c128_15], %12 {strides = array<i32>} : memref<288x580xf32, #tpu.memory_space<vmem>>, vector<8x17xf32>,
    %c24 = arith.constant 24 : index
    %c129 = arith.constant 129 : index
    %14 = vector.load %arg36[%c24, %c129] : memref<288x580xf32, #tpu.memory_space<vmem>>, vector<8x324xf32>
    tpu.vector_store %arg36[%c24, %c129], %4 {strides = array<i32>} : memref<288x580xf32, #tpu.memory_space<vmem>>, vector<8x324xf32>,
    %cst_16 = arith.constant 0.000000e+00 : f32
    %15 = vector.broadcast %cst_16 : f32 to vector<8x1xf32>
    %c24_17 = arith.constant 24 : index
    %c128_18 = arith.constant 128 : index
    %16 = vector.load %arg36[%c24_17, %c128_18] : memref<288x580xf32, #tpu.memory_space<vmem>>, vector<8x1xf32>
    tpu.vector_store %arg36[%c24_17, %c128_18], %15 {strides = array<i32>} : memref<288x580xf32, #tpu.memory_space<vmem>>, vector<8x1xf32>,
    %c32 = arith.constant 32 : index
    %c128_19 = arith.constant 128 : index
    %17 = vector.load %arg36[%c32, %c128_19] : memref<288x580xf32, #tpu.memory_space<vmem>>, vector<8x324xf32>
    tpu.vector_store %arg36[%c32, %c128_19], %4 {strides = array<i32>} : memref<288x580xf32, #tpu.memory_space<vmem>>, vector<8x324xf32>,
    %c40 = arith.constant 40 : index
    %c127 = arith.constant 127 : index
    %18 = vector.load %arg36[%c40, %c127] : memref<288x580xf32, #tpu.memory_space<vmem>>, vector<8x324xf32>
    tpu.vector_store %arg36[%c40, %c127], %4 {strides = array<i32>} : memref<288x580xf32, #tpu.memory_space<vmem>>, vector<8x324xf32>,
    %cst_20 = arith.constant 0.000000e+00 : f32
    %19 = vector.broadcast %cst_20 : f32 to vector<8x1xf32>
    %c40_21 = arith.constant 40 : index
    %c451 = arith.constant 451 : index
    %20 = vector.load %arg36[%c40_21, %c451] : memref<288x580xf32, #tpu.memory_space<vmem>>, vector<8x1xf32>
    tpu.vector_store %arg36[%c40_21, %c451], %19 {strides = array<i32>} : memref<288x580xf32, #tpu.memory_space<vmem>>, vector<8x1xf32>,
    %c48 = arith.constant 48 : index
    %c111 = arith.constant 111 : index
    %21 = vector.load %arg36[%c48, %c111] : memref<288x580xf32, #tpu.memory_space<vmem>>, vector<8x324xf32>
    tpu.vector_store %arg36[%c48, %c111], %4 {strides = array<i32>} : memref<288x580xf32, #tpu.memory_space<vmem>>, vector<8x324xf32>,
    %cst_22 = arith.constant 0.000000e+00 : f32
    %22 = vector.broadcast %cst_22 : f32 to vector<8x17xf32>
    %c48_23 = arith.constant 48 : index
    %c435 = arith.constant 435 : index
    %23 = vector.load %arg36[%c48_23, %c435] : memref<288x580xf32, #tpu.memory_space<vmem>>, vector<8x17xf32>
    tpu.vector_store %arg36[%c48_23, %c435], %22 {strides = array<i32>} : memref<288x580xf32, #tpu.memory_space<vmem>>, vector<8x17xf32>,
    %c56 = arith.constant 56 : index
    %c110 = arith.constant 110 : index
    %24 = vector.load %arg36[%c56, %c110] : memref<288x580xf32, #tpu.memory_space<vmem>>, vector<8x324xf32>
    tpu.vector_store %arg36[%c56, %c110], %4 {strides = array<i32>} : memref<288x580xf32, #tpu.memory_space<vmem>>, vector<8x324xf32>,
    %cst_24 = arith.constant 0.000000e+00 : f32
    %25 = vector.broadcast %cst_24 : f32 to vector<8x18xf32>
    %c56_25 = arith.constant 56 : index
    %c434 = arith.constant 434 : index
    %26 = vector.load %arg36[%c56_25, %c434] : memref<288x580xf32, #tpu.memory_space<vmem>>, vector<8x18xf32>
    tpu.vector_store %arg36[%c56_25, %c434], %25 {strides = array<i32>} : memref<288x580xf32, #tpu.memory_space<vmem>>, vector<8x18xf32>,
    %c64 = arith.constant 64 : index
    %c109 = arith.constant 109 : index
    %27 = vector.load %arg36[%c64, %c109] : memref<288x580xf32, #tpu.memory_space<vmem>>, vector<8x324xf32>
    tpu.vector_store %arg36[%c64, %c109], %4 {strides = array<i32>} : memref<288x580xf32, #tpu.memory_space<vmem>>, vector<8x324xf32>,
    %cst_26 = arith.constant 0.000000e+00 : f32
    %28 = vector.broadcast %cst_26 : f32 to vector<8x19xf32>
    %c64_27 = arith.constant 64 : index
    %c433 = arith.constant 433 : index
    %29 = vector.load %arg36[%c64_27, %c433] : memref<288x580xf32, #tpu.memory_space<vmem>>, vector<8x19xf32>
    tpu.vector_store %arg36[%c64_27, %c433], %28 {strides = array<i32>} : memref<288x580xf32, #tpu.memory_space<vmem>>, vector<8x19xf32>,
    %c0_28 = arith.constant 0 : index
    %c128_29 = arith.constant 128 : index
    %30 = vector.load %arg36[%c0_28, %c128_29] : memref<288x580xf32, #tpu.memory_space<vmem>>, vector<72x324xf32>
    %31 = arith.truncf %30 : vector<72x324xf32> to vector<72x324xbf16>
    %c0_30 = arith.constant 0 : index
    %c0_31 = arith.constant 0 : index
    %32 = vector.load %arg2[%c0_30, %c0_31] : memref<8x72xbf16, #tpu.memory_space<vmem>>, vector<8x72xbf16>
    %cst_32 = arith.constant dense<0.000000e+00> : vector<8x324xf32>
    %33 = tpu.matmul %32, %31, %cst_32 {dimension_numbers = #tpu.dot_dimension_numbers<[1], [0], [0], [1], [0, 0, 1, 1], [], []>} : vector<8x72xbf16>, vector<72x324xbf16>, vector<8x324xf32> -> vector<8x324xf32>
    %c0_33 = arith.constant 0 : index
    %c0_34 = arith.constant 0 : index
    %34 = vector.load %arg3[%c0_33, %c0_34] : memref<8x1xf32, #tpu.memory_space<vmem>>, vector<8x1xf32>
    %35 = vector.broadcast %34 : vector<8x1xf32> to vector<8x324xf32>
    %36 = arith.addf %33, %35 : vector<8x324xf32>
    %cst_35 = arith.constant 0.000000e+00 : f32
    %37 = vector.broadcast %cst_35 : f32 to vector<8x324xf32>
    %38 = arith.maximumf %36, %37 : vector<8x324xf32>
    %39 = vector.broadcast %0 : vector<1x324xf32> to vector<8x324xf32>
    %40 = arith.mulf %38, %39 : vector<8x324xf32>
    %c0_36 = arith.constant 0 : index
    %c147_37 = arith.constant 147 : index
    %41 = vector.load %arg36[%c0_36, %c147_37] : memref<288x580xf32, #tpu.memory_space<vmem>>, vector<8x324xf32>
    tpu.vector_store %arg36[%c0_36, %c147_37], %40 {strides = array<i32>} : memref<288x580xf32, #tpu.memory_space<vmem>>, vector<8x324xf32>,
    %cst_38 = arith.constant 0.000000e+00 : f32
    %42 = vector.broadcast %cst_38 : f32 to vector<8x19xf32>
    %c0_39 = arith.constant 0 : index
    %c128_40 = arith.constant 128 : index
    %43 = vector.load %arg36[%c0_39, %c128_40] : memref<288x580xf32, #tpu.memory_space<vmem>>, vector<8x19xf32>
    tpu.vector_store %arg36[%c0_39, %c128_40], %42 {strides = array<i32>} : memref<288x580xf32, #tpu.memory_space<vmem>>, vector<8x19xf32>,
    %c8_41 = arith.constant 8 : index
    %c146_42 = arith.constant 146 : index
    %44 = vector.load %arg36[%c8_41, %c146_42] : memref<288x580xf32, #tpu.memory_space<vmem>>, vector<8x324xf32>
    tpu.vector_store %arg36[%c8_41, %c146_42], %40 {strides = array<i32>} : memref<288x580xf32, #tpu.memory_space<vmem>>, vector<8x324xf32>,
    %cst_43 = arith.constant 0.000000e+00 : f32
    %45 = vector.broadcast %cst_43 : f32 to vector<8x18xf32>
    %c8_44 = arith.constant 8 : index
    %c128_45 = arith.constant 128 : index
    %46 = vector.load %arg36[%c8_44, %c128_45] : memref<288x580xf32, #tpu.memory_space<vmem>>, vector<8x18xf32>
    tpu.vector_store %arg36[%c8_44, %c128_45], %45 {strides = array<i32>} : memref<288x580xf32, #tpu.memory_space<vmem>>, vector<8x18xf32>,
    %c16_46 = arith.constant 16 : index
    %c145_47 = arith.constant 145 : index
    %47 = vector.load %arg36[%c16_46, %c145_47] : memref<288x580xf32, #tpu.memory_space<vmem>>, vector<8x324xf32>
    tpu.vector_store %arg36[%c16_46, %c145_47], %40 {strides = array<i32>} : memref<288x580xf32, #tpu.memory_space<vmem>>, vector<8x324xf32>,
    %cst_48 = arith.constant 0.000000e+00 : f32
    %48 = vector.broadcast %cst_48 : f32 to vector<8x17xf32>
    %c16_49 = arith.constant 16 : index
    %c128_50 = arith.constant 128 : index
    %49 = vector.load %arg36[%c16_49, %c128_50] : memref<288x580xf32, #tpu.memory_space<vmem>>, vector<8x17xf32>
    tpu.vector_store %arg36[%c16_49, %c128_50], %48 {strides = array<i32>} : memref<288x580xf32, #tpu.memory_space<vmem>>, vector<8x17xf32>,
    %c24_51 = arith.constant 24 : index
    %c129_52 = arith.constant 129 : index
    %50 = vector.load %arg36[%c24_51, %c129_52] : memref<288x580xf32, #tpu.memory_space<vmem>>, vector<8x324xf32>
    tpu.vector_store %arg36[%c24_51, %c129_52], %40 {strides = array<i32>} : memref<288x580xf32, #tpu.memory_space<vmem>>, vector<8x324xf32>,
    %cst_53 = arith.constant 0.000000e+00 : f32
    %51 = vector.broadcast %cst_53 : f32 to vector<8x1xf32>
    %c24_54 = arith.constant 24 : index
    %c128_55 = arith.constant 128 : index
    %52 = vector.load %arg36[%c24_54, %c128_55] : memref<288x580xf32, #tpu.memory_space<vmem>>, vector<8x1xf32>
    tpu.vector_store %arg36[%c24_54, %c128_55], %51 {strides = array<i32>} : memref<288x580xf32, #tpu.memory_space<vmem>>, vector<8x1xf32>,
    %c32_56 = arith.constant 32 : index
    %c128_57 = arith.constant 128 : index
    %53 = vector.load %arg36[%c32_56, %c128_57] : memref<288x580xf32, #tpu.memory_space<vmem>>, vector<8x324xf32>
    tpu.vector_store %arg36[%c32_56, %c128_57], %40 {strides = array<i32>} : memref<288x580xf32, #tpu.memory_space<vmem>>, vector<8x324xf32>,
    %c40_58 = arith.constant 40 : index
    %c127_59 = arith.constant 127 : index
    %54 = vector.load %arg36[%c40_58, %c127_59] : memref<288x580xf32, #tpu.memory_space<vmem>>, vector<8x324xf32>
    tpu.vector_store %arg36[%c40_58, %c127_59], %40 {strides = array<i32>} : memref<288x580xf32, #tpu.memory_space<vmem>>, vector<8x324xf32>,
    %cst_60 = arith.constant 0.000000e+00 : f32
    %55 = vector.broadcast %cst_60 : f32 to vector<8x1xf32>
    %c40_61 = arith.constant 40 : index
    %c451_62 = arith.constant 451 : index
    %56 = vector.load %arg36[%c40_61, %c451_62] : memref<288x580xf32, #tpu.memory_space<vmem>>, vector<8x1xf32>
    tpu.vector_store %arg36[%c40_61, %c451_62], %55 {strides = array<i32>} : memref<288x580xf32, #tpu.memory_space<vmem>>, vector<8x1xf32>,
    %c48_63 = arith.constant 48 : index
    %c111_64 = arith.constant 111 : index
    %57 = vector.load %arg36[%c48_63, %c111_64] : memref<288x580xf32, #tpu.memory_space<vmem>>, vector<8x324xf32>
    tpu.vector_store %arg36[%c48_63, %c111_64], %40 {strides = array<i32>} : memref<288x580xf32, #tpu.memory_space<vmem>>, vector<8x324xf32>,
    %cst_65 = arith.constant 0.000000e+00 : f32
    %58 = vector.broadcast %cst_65 : f32 to vector<8x17xf32>
    %c48_66 = arith.constant 48 : index
    %c435_67 = arith.constant 435 : index
    %59 = vector.load %arg36[%c48_66, %c435_67] : memref<288x580xf32, #tpu.memory_space<vmem>>, vector<8x17xf32>
    tpu.vector_store %arg36[%c48_66, %c435_67], %58 {strides = array<i32>} : memref<288x580xf32, #tpu.memory_space<vmem>>, vector<8x17xf32>,
    %c56_68 = arith.constant 56 : index
    %c110_69 = arith.constant 110 : index
    %60 = vector.load %arg36[%c56_68, %c110_69] : memref<288x580xf32, #tpu.memory_space<vmem>>, vector<8x324xf32>
    tpu.vector_store %arg36[%c56_68, %c110_69], %40 {strides = array<i32>} : memref<288x580xf32, #tpu.memory_space<vmem>>, vector<8x324xf32>,
    %cst_70 = arith.constant 0.000000e+00 : f32
    %61 = vector.broadcast %cst_70 : f32 to vector<8x18xf32>
    %c56_71 = arith.constant 56 : index
    %c434_72 = arith.constant 434 : index
    %62 = vector.load %arg36[%c56_71, %c434_72] : memref<288x580xf32, #tpu.memory_space<vmem>>, vector<8x18xf32>
    tpu.vector_store %arg36[%c56_71, %c434_72], %61 {strides = array<i32>} : memref<288x580xf32, #tpu.memory_space<vmem>>, vector<8x18xf32>,
    %c64_73 = arith.constant 64 : index
    %c109_74 = arith.constant 109 : index
    %63 = vector.load %arg36[%c64_73, %c109_74] : memref<288x580xf32, #tpu.memory_space<vmem>>, vector<8x324xf32>
    tpu.vector_store %arg36[%c64_73, %c109_74], %40 {strides = array<i32>} : memref<288x580xf32, #tpu.memory_space<vmem>>, vector<8x324xf32>,
    %cst_75 = arith.constant 0.000000e+00 : f32
    %64 = vector.broadcast %cst_75 : f32 to vector<8x19xf32>
    %c64_76 = arith.constant 64 : index
    %c433_77 = arith.constant 433 : index
    %65 = vector.load %arg36[%c64_76, %c433_77] : memref<288x580xf32, #tpu.memory_space<vmem>>, vector<8x19xf32>
    tpu.vector_store %arg36[%c64_76, %c433_77], %64 {strides = array<i32>} : memref<288x580xf32, #tpu.memory_space<vmem>>, vector<8x19xf32>,
    %c0_78 = arith.constant 0 : index
    %c128_79 = arith.constant 128 : index
    %66 = vector.load %arg36[%c0_78, %c128_79] : memref<288x580xf32, #tpu.memory_space<vmem>>, vector<72x324xf32>
    %67 = arith.truncf %66 : vector<72x324xf32> to vector<72x324xbf16>
    %c0_80 = arith.constant 0 : index
    %c0_81 = arith.constant 0 : index
    %68 = vector.load %arg4[%c0_80, %c0_81] : memref<8x72xbf16, #tpu.memory_space<vmem>>, vector<8x72xbf16>
    %cst_82 = arith.constant dense<0.000000e+00> : vector<8x324xf32>
    %69 = tpu.matmul %68, %67, %cst_82 {dimension_numbers = #tpu.dot_dimension_numbers<[1], [0], [0], [1], [0, 0, 1, 1], [], []>} : vector<8x72xbf16>, vector<72x324xbf16>, vector<8x324xf32> -> vector<8x324xf32>
    %c0_83 = arith.constant 0 : index
    %c0_84 = arith.constant 0 : index
    %70 = vector.load %arg5[%c0_83, %c0_84] : memref<8x1xf32, #tpu.memory_space<vmem>>, vector<8x1xf32>
    %71 = vector.broadcast %70 : vector<8x1xf32> to vector<8x324xf32>
    %72 = arith.addf %69, %71 : vector<8x324xf32>
    %cst_85 = arith.constant 0.000000e+00 : f32
    %73 = vector.broadcast %cst_85 : f32 to vector<8x324xf32>
    %74 = arith.maximumf %72, %73 : vector<8x324xf32>
    %75 = vector.broadcast %0 : vector<1x324xf32> to vector<8x324xf32>
    %76 = arith.mulf %74, %75 : vector<8x324xf32>
    %77 = vector.extract_strided_slice %76 {offsets = [0, 0], sizes = [8, 305], strides = [1, 1]} : vector<8x324xf32> to vector<8x305xf32>
    %78 = vector.extract_strided_slice %76 {offsets = [0, 1], sizes = [8, 305], strides = [1, 1]} : vector<8x324xf32> to vector<8x305xf32>
    %79 = arith.maximumf %77, %78 : vector<8x305xf32>
    %80 = vector.extract_strided_slice %76 {offsets = [0, 18], sizes = [8, 305], strides = [1, 1]} : vector<8x324xf32> to vector<8x305xf32>
    %81 = vector.extract_strided_slice %76 {offsets = [0, 19], sizes = [8, 305], strides = [1, 1]} : vector<8x324xf32> to vector<8x305xf32>
    %82 = arith.maximumf %80, %81 : vector<8x305xf32>
    %83 = arith.maximumf %79, %82 : vector<8x305xf32>
    %cst_86 = arith.constant 0.000000e+00 : f32
    %84 = vector.broadcast %cst_86 : f32 to vector<8x100xf32>
    %c0_87 = arith.constant 0 : index
    %c0_88 = arith.constant 0 : index
    %85 = vector.load %arg37[%c0_87, %c0_88] : memref<32x324xf32, #tpu.memory_space<vmem>>, vector<8x100xf32>
    tpu.vector_store %arg37[%c0_87, %c0_88], %84 {strides = array<i32>} : memref<32x324xf32, #tpu.memory_space<vmem>>, vector<8x100xf32>,
    %86 = vector.extract_strided_slice %83 {offsets = [0, 18], sizes = [8, 18], strides = [1, 1]} : vector<8x305xf32> to vector<8x18xf32>
    %c0_89 = arith.constant 0 : index
    %c0_90 = arith.constant 0 : index
    %87 = vector.load %arg31[%c0_89, %c0_90] : memref<18x10xf32, #tpu.memory_space<vmem>>, vector<18x10xf32>
    %cst_91 = arith.constant dense<0.000000e+00> : vector<8x10xf32>
    %88 = tpu.matmul %86, %87, %cst_91 {dimension_numbers = #tpu.dot_dimension_numbers<[1], [0], [0], [1], [0, 0, 1, 1], [], []>} : vector<8x18xf32>, vector<18x10xf32>, vector<8x10xf32> -> vector<8x10xf32>
    %c0_92 = arith.constant 0 : index
    %c10 = arith.constant 10 : index
    %89 = vector.load %arg37[%c0_92, %c10] : memref<32x324xf32, #tpu.memory_space<vmem>>, vector<8x10xf32>
    tpu.vector_store %arg37[%c0_92, %c10], %88 {strides = array<i32>} : memref<32x324xf32, #tpu.memory_space<vmem>>, vector<8x10xf32>,
    %90 = vector.extract_strided_slice %83 {offsets = [0, 54], sizes = [8, 18], strides = [1, 1]} : vector<8x305xf32> to vector<8x18xf32>
    %c0_93 = arith.constant 0 : index
    %c0_94 = arith.constant 0 : index
    %91 = vector.load %arg31[%c0_93, %c0_94] : memref<18x10xf32, #tpu.memory_space<vmem>>, vector<18x10xf32>
    %cst_95 = arith.constant dense<0.000000e+00> : vector<8x10xf32>
    %92 = tpu.matmul %90, %91, %cst_95 {dimension_numbers = #tpu.dot_dimension_numbers<[1], [0], [0], [1], [0, 0, 1, 1], [], []>} : vector<8x18xf32>, vector<18x10xf32>, vector<8x10xf32> -> vector<8x10xf32>
    %c0_96 = arith.constant 0 : index
    %c20 = arith.constant 20 : index
    %93 = vector.load %arg37[%c0_96, %c20] : memref<32x324xf32, #tpu.memory_space<vmem>>, vector<8x10xf32>
    tpu.vector_store %arg37[%c0_96, %c20], %92 {strides = array<i32>} : memref<32x324xf32, #tpu.memory_space<vmem>>, vector<8x10xf32>,
    %94 = vector.extract_strided_slice %83 {offsets = [0, 90], sizes = [8, 18], strides = [1, 1]} : vector<8x305xf32> to vector<8x18xf32>
    %c0_97 = arith.constant 0 : index
    %c0_98 = arith.constant 0 : index
    %95 = vector.load %arg31[%c0_97, %c0_98] : memref<18x10xf32, #tpu.memory_space<vmem>>, vector<18x10xf32>
    %cst_99 = arith.constant dense<0.000000e+00> : vector<8x10xf32>
    %96 = tpu.matmul %94, %95, %cst_99 {dimension_numbers = #tpu.dot_dimension_numbers<[1], [0], [0], [1], [0, 0, 1, 1], [], []>} : vector<8x18xf32>, vector<18x10xf32>, vector<8x10xf32> -> vector<8x10xf32>
    %c0_100 = arith.constant 0 : index
    %c30 = arith.constant 30 : index
    %97 = vector.load %arg37[%c0_100, %c30] : memref<32x324xf32, #tpu.memory_space<vmem>>, vector<8x10xf32>
    tpu.vector_store %arg37[%c0_100, %c30], %96 {strides = array<i32>} : memref<32x324xf32, #tpu.memory_space<vmem>>, vector<8x10xf32>,
    %98 = vector.extract_strided_slice %83 {offsets = [0, 126], sizes = [8, 18], strides = [1, 1]} : vector<8x305xf32> to vector<8x18xf32>
    %c0_101 = arith.constant 0 : index
    %c0_102 = arith.constant 0 : index
    %99 = vector.load %arg31[%c0_101, %c0_102] : memref<18x10xf32, #tpu.memory_space<vmem>>, vector<18x10xf32>
    %cst_103 = arith.constant dense<0.000000e+00> : vector<8x10xf32>
    %100 = tpu.matmul %98, %99, %cst_103 {dimension_numbers = #tpu.dot_dimension_numbers<[1], [0], [0], [1], [0, 0, 1, 1], [], []>} : vector<8x18xf32>, vector<18x10xf32>, vector<8x10xf32> -> vector<8x10xf32>
    %c0_104 = arith.constant 0 : index
    %c40_105 = arith.constant 40 : index
    %101 = vector.load %arg37[%c0_104, %c40_105] : memref<32x324xf32, #tpu.memory_space<vmem>>, vector<8x10xf32>
    tpu.vector_store %arg37[%c0_104, %c40_105], %100 {strides = array<i32>} : memref<32x324xf32, #tpu.memory_space<vmem>>, vector<8x10xf32>,
    %102 = vector.extract_strided_slice %83 {offsets = [0, 162], sizes = [8, 18], strides = [1, 1]} : vector<8x305xf32> to vector<8x18xf32>
    %c0_106 = arith.constant 0 : index
    %c0_107 = arith.constant 0 : index
    %103 = vector.load %arg31[%c0_106, %c0_107] : memref<18x10xf32, #tpu.memory_space<vmem>>, vector<18x10xf32>
    %cst_108 = arith.constant dense<0.000000e+00> : vector<8x10xf32>
    %104 = tpu.matmul %102, %103, %cst_108 {dimension_numbers = #tpu.dot_dimension_numbers<[1], [0], [0], [1], [0, 0, 1, 1], [], []>} : vector<8x18xf32>, vector<18x10xf32>, vector<8x10xf32> -> vector<8x10xf32>
    %c0_109 = arith.constant 0 : index
    %c50 = arith.constant 50 : index
    %105 = vector.load %arg37[%c0_109, %c50] : memref<32x324xf32, #tpu.memory_space<vmem>>, vector<8x10xf32>
    tpu.vector_store %arg37[%c0_109, %c50], %104 {strides = array<i32>} : memref<32x324xf32, #tpu.memory_space<vmem>>, vector<8x10xf32>,
    %106 = vector.extract_strided_slice %83 {offsets = [0, 198], sizes = [8, 18], strides = [1, 1]} : vector<8x305xf32> to vector<8x18xf32>
    %c0_110 = arith.constant 0 : index
    %c0_111 = arith.constant 0 : index
    %107 = vector.load %arg31[%c0_110, %c0_111] : memref<18x10xf32, #tpu.memory_space<vmem>>, vector<18x10xf32>
    %cst_112 = arith.constant dense<0.000000e+00> : vector<8x10xf32>
    %108 = tpu.matmul %106, %107, %cst_112 {dimension_numbers = #tpu.dot_dimension_numbers<[1], [0], [0], [1], [0, 0, 1, 1], [], []>} : vector<8x18xf32>, vector<18x10xf32>, vector<8x10xf32> -> vector<8x10xf32>
    %c0_113 = arith.constant 0 : index
    %c60 = arith.constant 60 : index
    %109 = vector.load %arg37[%c0_113, %c60] : memref<32x324xf32, #tpu.memory_space<vmem>>, vector<8x10xf32>
    tpu.vector_store %arg37[%c0_113, %c60], %108 {strides = array<i32>} : memref<32x324xf32, #tpu.memory_space<vmem>>, vector<8x10xf32>,
    %110 = vector.extract_strided_slice %83 {offsets = [0, 234], sizes = [8, 18], strides = [1, 1]} : vector<8x305xf32> to vector<8x18xf32>
    %c0_114 = arith.constant 0 : index
    %c0_115 = arith.constant 0 : index
    %111 = vector.load %arg31[%c0_114, %c0_115] : memref<18x10xf32, #tpu.memory_space<vmem>>, vector<18x10xf32>
    %cst_116 = arith.constant dense<0.000000e+00> : vector<8x10xf32>
    %112 = tpu.matmul %110, %111, %cst_116 {dimension_numbers = #tpu.dot_dimension_numbers<[1], [0], [0], [1], [0, 0, 1, 1], [], []>} : vector<8x18xf32>, vector<18x10xf32>, vector<8x10xf32> -> vector<8x10xf32>
    %c0_117 = arith.constant 0 : index
    %c70 = arith.constant 70 : index
    %113 = vector.load %arg37[%c0_117, %c70] : memref<32x324xf32, #tpu.memory_space<vmem>>, vector<8x10xf32>
    tpu.vector_store %arg37[%c0_117, %c70], %112 {strides = array<i32>} : memref<32x324xf32, #tpu.memory_space<vmem>>, vector<8x10xf32>,
    %114 = vector.extract_strided_slice %83 {offsets = [0, 270], sizes = [8, 18], strides = [1, 1]} : vector<8x305xf32> to vector<8x18xf32>
    %c0_118 = arith.constant 0 : index
    %c0_119 = arith.constant 0 : index
    %115 = vector.load %arg31[%c0_118, %c0_119] : memref<18x10xf32, #tpu.memory_space<vmem>>, vector<18x10xf32>
    %cst_120 = arith.constant dense<0.000000e+00> : vector<8x10xf32>
    %116 = tpu.matmul %114, %115, %cst_120 {dimension_numbers = #tpu.dot_dimension_numbers<[1], [0], [0], [1], [0, 0, 1, 1], [], []>} : vector<8x18xf32>, vector<18x10xf32>, vector<8x10xf32> -> vector<8x10xf32>
    %c0_121 = arith.constant 0 : index
    %c80 = arith.constant 80 : index
    %117 = vector.load %arg37[%c0_121, %c80] : memref<32x324xf32, #tpu.memory_space<vmem>>, vector<8x10xf32>
    tpu.vector_store %arg37[%c0_121, %c80], %116 {strides = array<i32>} : memref<32x324xf32, #tpu.memory_space<vmem>>, vector<8x10xf32>,
    %c0_122 = arith.constant 0 : index
    %c0_123 = arith.constant 0 : index
    %118 = vector.load %arg37[%c0_122, %c0_123] : memref<32x324xf32, #tpu.memory_space<vmem>>, vector<8x100xf32>
    %c0_124 = arith.constant 0 : index
    %c139 = arith.constant 139 : index
    %119 = vector.load %arg36[%c0_124, %c139] : memref<288x580xf32, #tpu.memory_space<vmem>>, vector<8x100xf32>
    tpu.vector_store %arg36[%c0_124, %c139], %118 {strides = array<i32>} : memref<288x580xf32, #tpu.memory_space<vmem>>, vector<8x100xf32>,
    %cst_125 = arith.constant 0.000000e+00 : f32
    %120 = vector.broadcast %cst_125 : f32 to vector<8x11xf32>
    %c0_126 = arith.constant 0 : index
    %c128_127 = arith.constant 128 : index
    %121 = vector.load %arg36[%c0_126, %c128_127] : memref<288x580xf32, #tpu.memory_space<vmem>>, vector<8x11xf32>
    tpu.vector_store %arg36[%c0_126, %c128_127], %120 {strides = array<i32>} : memref<288x580xf32, #tpu.memory_space<vmem>>, vector<8x11xf32>,
    %c8_128 = arith.constant 8 : index
    %c138 = arith.constant 138 : index
    %122 = vector.load %arg36[%c8_128, %c138] : memref<288x580xf32, #tpu.memory_space<vmem>>, vector<8x100xf32>
    tpu.vector_store %arg36[%c8_128, %c138], %118 {strides = array<i32>} : memref<288x580xf32, #tpu.memory_space<vmem>>, vector<8x100xf32>,
    %cst_129 = arith.constant 0.000000e+00 : f32
    %123 = vector.broadcast %cst_129 : f32 to vector<8x10xf32>
    %c8_130 = arith.constant 8 : index
    %c128_131 = arith.constant 128 : index
    %124 = vector.load %arg36[%c8_130, %c128_131] : memref<288x580xf32, #tpu.memory_space<vmem>>, vector<8x10xf32>
    tpu.vector_store %arg36[%c8_130, %c128_131], %123 {strides = array<i32>} : memref<288x580xf32, #tpu.memory_space<vmem>>, vector<8x10xf32>,
    %c16_132 = arith.constant 16 : index
    %c137 = arith.constant 137 : index
    %125 = vector.load %arg36[%c16_132, %c137] : memref<288x580xf32, #tpu.memory_space<vmem>>, vector<8x100xf32>
    tpu.vector_store %arg36[%c16_132, %c137], %118 {strides = array<i32>} : memref<288x580xf32, #tpu.memory_space<vmem>>, vector<8x100xf32>,
    %cst_133 = arith.constant 0.000000e+00 : f32
    %126 = vector.broadcast %cst_133 : f32 to vector<8x9xf32>
    %c16_134 = arith.constant 16 : index
    %c128_135 = arith.constant 128 : index
    %127 = vector.load %arg36[%c16_134, %c128_135] : memref<288x580xf32, #tpu.memory_space<vmem>>, vector<8x9xf32>
    tpu.vector_store %arg36[%c16_134, %c128_135], %126 {strides = array<i32>} : memref<288x580xf32, #tpu.memory_space<vmem>>, vector<8x9xf32>,
    %c24_136 = arith.constant 24 : index
    %c129_137 = arith.constant 129 : index
    %128 = vector.load %arg36[%c24_136, %c129_137] : memref<288x580xf32, #tpu.memory_space<vmem>>, vector<8x100xf32>
    tpu.vector_store %arg36[%c24_136, %c129_137], %118 {strides = array<i32>} : memref<288x580xf32, #tpu.memory_space<vmem>>, vector<8x100xf32>,
    %cst_138 = arith.constant 0.000000e+00 : f32
    %129 = vector.broadcast %cst_138 : f32 to vector<8x1xf32>
    %c24_139 = arith.constant 24 : index
    %c128_140 = arith.constant 128 : index
    %130 = vector.load %arg36[%c24_139, %c128_140] : memref<288x580xf32, #tpu.memory_space<vmem>>, vector<8x1xf32>
    tpu.vector_store %arg36[%c24_139, %c128_140], %129 {strides = array<i32>} : memref<288x580xf32, #tpu.memory_space<vmem>>, vector<8x1xf32>,
    %c32_141 = arith.constant 32 : index
    %c128_142 = arith.constant 128 : index
    %131 = vector.load %arg36[%c32_141, %c128_142] : memref<288x580xf32, #tpu.memory_space<vmem>>, vector<8x100xf32>
    tpu.vector_store %arg36[%c32_141, %c128_142], %118 {strides = array<i32>} : memref<288x580xf32, #tpu.memory_space<vmem>>, vector<8x100xf32>,
    %c40_143 = arith.constant 40 : index
    %c127_144 = arith.constant 127 : index
    %132 = vector.load %arg36[%c40_143, %c127_144] : memref<288x580xf32, #tpu.memory_space<vmem>>, vector<8x100xf32>
    tpu.vector_store %arg36[%c40_143, %c127_144], %118 {strides = array<i32>} : memref<288x580xf32, #tpu.memory_space<vmem>>, vector<8x100xf32>,
    %cst_145 = arith.constant 0.000000e+00 : f32
    %133 = vector.broadcast %cst_145 : f32 to vector<8x1xf32>
    %c40_146 = arith.constant 40 : index
    %c227 = arith.constant 227 : index
    %134 = vector.load %arg36[%c40_146, %c227] : memref<288x580xf32, #tpu.memory_space<vmem>>, vector<8x1xf32>
    tpu.vector_store %arg36[%c40_146, %c227], %133 {strides = array<i32>} : memref<288x580xf32, #tpu.memory_space<vmem>>, vector<8x1xf32>,
    %c48_147 = arith.constant 48 : index
    %c119 = arith.constant 119 : index
    %135 = vector.load %arg36[%c48_147, %c119] : memref<288x580xf32, #tpu.memory_space<vmem>>, vector<8x100xf32>
    tpu.vector_store %arg36[%c48_147, %c119], %118 {strides = array<i32>} : memref<288x580xf32, #tpu.memory_space<vmem>>, vector<8x100xf32>,
    %cst_148 = arith.constant 0.000000e+00 : f32
    %136 = vector.broadcast %cst_148 : f32 to vector<8x9xf32>
    %c48_149 = arith.constant 48 : index
    %c219 = arith.constant 219 : index
    %137 = vector.load %arg36[%c48_149, %c219] : memref<288x580xf32, #tpu.memory_space<vmem>>, vector<8x9xf32>
    tpu.vector_store %arg36[%c48_149, %c219], %136 {strides = array<i32>} : memref<288x580xf32, #tpu.memory_space<vmem>>, vector<8x9xf32>,
    %c56_150 = arith.constant 56 : index
    %c118 = arith.constant 118 : index
    %138 = vector.load %arg36[%c56_150, %c118] : memref<288x580xf32, #tpu.memory_space<vmem>>, vector<8x100xf32>
    tpu.vector_store %arg36[%c56_150, %c118], %118 {strides = array<i32>} : memref<288x580xf32, #tpu.memory_space<vmem>>, vector<8x100xf32>,
    %cst_151 = arith.constant 0.000000e+00 : f32
    %139 = vector.broadcast %cst_151 : f32 to vector<8x10xf32>
    %c56_152 = arith.constant 56 : index
    %c218 = arith.constant 218 : index
    %140 = vector.load %arg36[%c56_152, %c218] : memref<288x580xf32, #tpu.memory_space<vmem>>, vector<8x10xf32>
    tpu.vector_store %arg36[%c56_152, %c218], %139 {strides = array<i32>} : memref<288x580xf32, #tpu.memory_space<vmem>>, vector<8x10xf32>,
    %c64_153 = arith.constant 64 : index
    %c117 = arith.constant 117 : index
    %141 = vector.load %arg36[%c64_153, %c117] : memref<288x580xf32, #tpu.memory_space<vmem>>, vector<8x100xf32>
    tpu.vector_store %arg36[%c64_153, %c117], %118 {strides = array<i32>} : memref<288x580xf32, #tpu.memory_space<vmem>>, vector<8x100xf32>,
    %cst_154 = arith.constant 0.000000e+00 : f32
    %142 = vector.broadcast %cst_154 : f32 to vector<8x11xf32>
    %c64_155 = arith.constant 64 : index
    %c217 = arith.constant 217 : index
    %143 = vector.load %arg36[%c64_155, %c217] : memref<288x580xf32, #tpu.memory_space<vmem>>, vector<8x11xf32>
    tpu.vector_store %arg36[%c64_155, %c217], %142 {strides = array<i32>} : memref<288x580xf32, #tpu.memory_space<vmem>>, vector<8x11xf32>,
    %c0_156 = arith.constant 0 : index
    %c128_157 = arith.constant 128 : index
    %144 = vector.load %arg36[%c0_156, %c128_157] : memref<288x580xf32, #tpu.memory_space<vmem>>, vector<72x100xf32>
    %145 = arith.truncf %144 : vector<72x100xf32> to vector<72x100xbf16>
    %c0_158 = arith.constant 0 : index
    %c0_159 = arith.constant 0 : index
    %146 = vector.load %arg6[%c0_158, %c0_159] : memref<16x72xbf16, #tpu.memory_space<vmem>>, vector<16x72xbf16>
    %cst_160 = arith.constant dense<0.000000e+00> : vector<16x100xf32>
    %147 = tpu.matmul %146, %145, %cst_160 {dimension_numbers = #tpu.dot_dimension_numbers<[1], [0], [0], [1], [0, 0, 1, 1], [], []>} : vector<16x72xbf16>, vector<72x100xbf16>, vector<16x100xf32> -> vector<16x100xf32>
    %c0_161 = arith.constant 0 : index
    %c0_162 = arith.constant 0 : index
    %148 = vector.load %arg7[%c0_161, %c0_162] : memref<16x1xf32, #tpu.memory_space<vmem>>, vector<16x1xf32>
    %149 = vector.broadcast %148 : vector<16x1xf32> to vector<16x100xf32>
    %150 = arith.addf %147, %149 : vector<16x100xf32>
    %cst_163 = arith.constant 0.000000e+00 : f32
    %151 = vector.broadcast %cst_163 : f32 to vector<16x100xf32>
    %152 = arith.maximumf %150, %151 : vector<16x100xf32>
    %153 = vector.broadcast %1 : vector<1x100xf32> to vector<16x100xf32>
    %154 = arith.mulf %152, %153 : vector<16x100xf32>
    %c0_164 = arith.constant 0 : index
    %c139_165 = arith.constant 139 : index
    %155 = vector.load %arg36[%c0_164, %c139_165] : memref<288x580xf32, #tpu.memory_space<vmem>>, vector<16x100xf32>
    tpu.vector_store %arg36[%c0_164, %c139_165], %154 {strides = array<i32>} : memref<288x580xf32, #tpu.memory_space<vmem>>, vector<16x100xf32>,
    %cst_166 = arith.constant 0.000000e+00 : f32
    %156 = vector.broadcast %cst_166 : f32 to vector<16x11xf32>
    %c0_167 = arith.constant 0 : index
    %c128_168 = arith.constant 128 : index
    %157 = vector.load %arg36[%c0_167, %c128_168] : memref<288x580xf32, #tpu.memory_space<vmem>>, vector<16x11xf32>
    tpu.vector_store %arg36[%c0_167, %c128_168], %156 {strides = array<i32>} : memref<288x580xf32, #tpu.memory_space<vmem>>, vector<16x11xf32>,
    %c16_169 = arith.constant 16 : index
    %c138_170 = arith.constant 138 : index
    %158 = vector.load %arg36[%c16_169, %c138_170] : memref<288x580xf32, #tpu.memory_space<vmem>>, vector<16x100xf32>
    tpu.vector_store %arg36[%c16_169, %c138_170], %154 {strides = array<i32>} : memref<288x580xf32, #tpu.memory_space<vmem>>, vector<16x100xf32>,
    %cst_171 = arith.constant 0.000000e+00 : f32
    %159 = vector.broadcast %cst_171 : f32 to vector<16x10xf32>
    %c16_172 = arith.constant 16 : index
    %c128_173 = arith.constant 128 : index
    %160 = vector.load %arg36[%c16_172, %c128_173] : memref<288x580xf32, #tpu.memory_space<vmem>>, vector<16x10xf32>
    tpu.vector_store %arg36[%c16_172, %c128_173], %159 {strides = array<i32>} : memref<288x580xf32, #tpu.memory_space<vmem>>, vector<16x10xf32>,
    %c32_174 = arith.constant 32 : index
    %c137_175 = arith.constant 137 : index
    %161 = vector.load %arg36[%c32_174, %c137_175] : memref<288x580xf32, #tpu.memory_space<vmem>>, vector<16x100xf32>
    tpu.vector_store %arg36[%c32_174, %c137_175], %154 {strides = array<i32>} : memref<288x580xf32, #tpu.memory_space<vmem>>, vector<16x100xf32>,
    %cst_176 = arith.constant 0.000000e+00 : f32
    %162 = vector.broadcast %cst_176 : f32 to vector<16x9xf32>
    %c32_177 = arith.constant 32 : index
    %c128_178 = arith.constant 128 : index
    %163 = vector.load %arg36[%c32_177, %c128_178] : memref<288x580xf32, #tpu.memory_space<vmem>>, vector<16x9xf32>
    tpu.vector_store %arg36[%c32_177, %c128_178], %162 {strides = array<i32>} : memref<288x580xf32, #tpu.memory_space<vmem>>, vector<16x9xf32>,
    %c48_179 = arith.constant 48 : index
    %c129_180 = arith.constant 129 : index
    %164 = vector.load %arg36[%c48_179, %c129_180] : memref<288x580xf32, #tpu.memory_space<vmem>>, vector<16x100xf32>
    tpu.vector_store %arg36[%c48_179, %c129_180], %154 {strides = array<i32>} : memref<288x580xf32, #tpu.memory_space<vmem>>, vector<16x100xf32>,
    %cst_181 = arith.constant 0.000000e+00 : f32
    %165 = vector.broadcast %cst_181 : f32 to vector<16x1xf32>
    %c48_182 = arith.constant 48 : index
    %c128_183 = arith.constant 128 : index
    %166 = vector.load %arg36[%c48_182, %c128_183] : memref<288x580xf32, #tpu.memory_space<vmem>>, vector<16x1xf32>
    tpu.vector_store %arg36[%c48_182, %c128_183], %165 {strides = array<i32>} : memref<288x580xf32, #tpu.memory_space<vmem>>, vector<16x1xf32>,
    %c64_184 = arith.constant 64 : index
    %c128_185 = arith.constant 128 : index
    %167 = vector.load %arg36[%c64_184, %c128_185] : memref<288x580xf32, #tpu.memory_space<vmem>>, vector<16x100xf32>
    tpu.vector_store %arg36[%c64_184, %c128_185], %154 {strides = array<i32>} : memref<288x580xf32, #tpu.memory_space<vmem>>, vector<16x100xf32>,
    %c80_186 = arith.constant 80 : index
    %c127_187 = arith.constant 127 : index
    %168 = vector.load %arg36[%c80_186, %c127_187] : memref<288x580xf32, #tpu.memory_space<vmem>>, vector<16x100xf32>
    tpu.vector_store %arg36[%c80_186, %c127_187], %154 {strides = array<i32>} : memref<288x580xf32, #tpu.memory_space<vmem>>, vector<16x100xf32>,
    %cst_188 = arith.constant 0.000000e+00 : f32
    %169 = vector.broadcast %cst_188 : f32 to vector<16x1xf32>
    %c80_189 = arith.constant 80 : index
    %c227_190 = arith.constant 227 : index
    %170 = vector.load %arg36[%c80_189, %c227_190] : memref<288x580xf32, #tpu.memory_space<vmem>>, vector<16x1xf32>
    tpu.vector_store %arg36[%c80_189, %c227_190], %169 {strides = array<i32>} : memref<288x580xf32, #tpu.memory_space<vmem>>, vector<16x1xf32>,
    %c96 = arith.constant 96 : index
    %c119_191 = arith.constant 119 : index
    %171 = vector.load %arg36[%c96, %c119_191] : memref<288x580xf32, #tpu.memory_space<vmem>>, vector<16x100xf32>
    tpu.vector_store %arg36[%c96, %c119_191], %154 {strides = array<i32>} : memref<288x580xf32, #tpu.memory_space<vmem>>, vector<16x100xf32>,
    %cst_192 = arith.constant 0.000000e+00 : f32
    %172 = vector.broadcast %cst_192 : f32 to vector<16x9xf32>
    %c96_193 = arith.constant 96 : index
    %c219_194 = arith.constant 219 : index
    %173 = vector.load %arg36[%c96_193, %c219_194] : memref<288x580xf32, #tpu.memory_space<vmem>>, vector<16x9xf32>
    tpu.vector_store %arg36[%c96_193, %c219_194], %172 {strides = array<i32>} : memref<288x580xf32, #tpu.memory_space<vmem>>, vector<16x9xf32>,
    %c112 = arith.constant 112 : index
    %c118_195 = arith.constant 118 : index
    %174 = vector.load %arg36[%c112, %c118_195] : memref<288x580xf32, #tpu.memory_space<vmem>>, vector<16x100xf32>
    tpu.vector_store %arg36[%c112, %c118_195], %154 {strides = array<i32>} : memref<288x580xf32, #tpu.memory_space<vmem>>, vector<16x100xf32>,
    %cst_196 = arith.constant 0.000000e+00 : f32
    %175 = vector.broadcast %cst_196 : f32 to vector<16x10xf32>
    %c112_197 = arith.constant 112 : index
    %c218_198 = arith.constant 218 : index
    %176 = vector.load %arg36[%c112_197, %c218_198] : memref<288x580xf32, #tpu.memory_space<vmem>>, vector<16x10xf32>
    tpu.vector_store %arg36[%c112_197, %c218_198], %175 {strides = array<i32>} : memref<288x580xf32, #tpu.memory_space<vmem>>, vector<16x10xf32>,
    %c128_199 = arith.constant 128 : index
    %c117_200 = arith.constant 117 : index
    %177 = vector.load %arg36[%c128_199, %c117_200] : memref<288x580xf32, #tpu.memory_space<vmem>>, vector<16x100xf32>
    tpu.vector_store %arg36[%c128_199, %c117_200], %154 {strides = array<i32>} : memref<288x580xf32, #tpu.memory_space<vmem>>, vector<16x100xf32>,
    %cst_201 = arith.constant 0.000000e+00 : f32
    %178 = vector.broadcast %cst_201 : f32 to vector<16x11xf32>
    %c128_202 = arith.constant 128 : index
    %c217_203 = arith.constant 217 : index
    %179 = vector.load %arg36[%c128_202, %c217_203] : memref<288x580xf32, #tpu.memory_space<vmem>>, vector<16x11xf32>
    tpu.vector_store %arg36[%c128_202, %c217_203], %178 {strides = array<i32>} : memref<288x580xf32, #tpu.memory_space<vmem>>, vector<16x11xf32>,
    %c0_204 = arith.constant 0 : index
    %c128_205 = arith.constant 128 : index
    %180 = vector.load %arg36[%c0_204, %c128_205] : memref<288x580xf32, #tpu.memory_space<vmem>>, vector<144x100xf32>
    %181 = arith.truncf %180 : vector<144x100xf32> to vector<144x100xbf16>
    %c0_206 = arith.constant 0 : index
    %c0_207 = arith.constant 0 : index
    %182 = vector.load %arg8[%c0_206, %c0_207] : memref<16x144xbf16, #tpu.memory_space<vmem>>, vector<16x144xbf16>
    %cst_208 = arith.constant dense<0.000000e+00> : vector<16x100xf32>
    %183 = tpu.matmul %182, %181, %cst_208 {dimension_numbers = #tpu.dot_dimension_numbers<[1], [0], [0], [1], [0, 0, 1, 1], [], []>} : vector<16x144xbf16>, vector<144x100xbf16>, vector<16x100xf32> -> vector<16x100xf32>
    %c0_209 = arith.constant 0 : index
    %c0_210 = arith.constant 0 : index
    %184 = vector.load %arg9[%c0_209, %c0_210] : memref<16x1xf32, #tpu.memory_space<vmem>>, vector<16x1xf32>
    %185 = vector.broadcast %184 : vector<16x1xf32> to vector<16x100xf32>
    %186 = arith.addf %183, %185 : vector<16x100xf32>
    %cst_211 = arith.constant 0.000000e+00 : f32
    %187 = vector.broadcast %cst_211 : f32 to vector<16x100xf32>
    %188 = arith.maximumf %186, %187 : vector<16x100xf32>
    %189 = vector.broadcast %1 : vector<1x100xf32> to vector<16x100xf32>
    %190 = arith.mulf %188, %189 : vector<16x100xf32>
    %191 = vector.extract_strided_slice %190 {offsets = [0, 0], sizes = [16, 89], strides = [1, 1]} : vector<16x100xf32> to vector<16x89xf32>
    %192 = vector.extract_strided_slice %190 {offsets = [0, 1], sizes = [16, 89], strides = [1, 1]} : vector<16x100xf32> to vector<16x89xf32>
    %193 = arith.maximumf %191, %192 : vector<16x89xf32>
    %194 = vector.extract_strided_slice %190 {offsets = [0, 10], sizes = [16, 89], strides = [1, 1]} : vector<16x100xf32> to vector<16x89xf32>
    %195 = vector.extract_strided_slice %190 {offsets = [0, 11], sizes = [16, 89], strides = [1, 1]} : vector<16x100xf32> to vector<16x89xf32>
    %196 = arith.maximumf %194, %195 : vector<16x89xf32>
    %197 = arith.maximumf %193, %196 : vector<16x89xf32>
    %cst_212 = arith.constant 0.000000e+00 : f32
    %198 = vector.broadcast %cst_212 : f32 to vector<16x36xf32>
    %c0_213 = arith.constant 0 : index
    %c0_214 = arith.constant 0 : index
    %199 = vector.load %arg37[%c0_213, %c0_214] : memref<32x324xf32, #tpu.memory_space<vmem>>, vector<16x36xf32>
    tpu.vector_store %arg37[%c0_213, %c0_214], %198 {strides = array<i32>} : memref<32x324xf32, #tpu.memory_space<vmem>>, vector<16x36xf32>,
    %200 = vector.extract_strided_slice %197 {offsets = [0, 10], sizes = [16, 10], strides = [1, 1]} : vector<16x89xf32> to vector<16x10xf32>
    %c0_215 = arith.constant 0 : index
    %c0_216 = arith.constant 0 : index
    %201 = vector.load %arg32[%c0_215, %c0_216] : memref<10x6xf32, #tpu.memory_space<vmem>>, vector<10x6xf32>
    %cst_217 = arith.constant dense<0.000000e+00> : vector<16x6xf32>
    %202 = tpu.matmul %200, %201, %cst_217 {dimension_numbers = #tpu.dot_dimension_numbers<[1], [0], [0], [1], [0, 0, 1, 1], [], []>} : vector<16x10xf32>, vector<10x6xf32>, vector<16x6xf32> -> vector<16x6xf32>
    %c0_218 = arith.constant 0 : index
    %c6 = arith.constant 6 : index
    %203 = vector.load %arg37[%c0_218, %c6] : memref<32x324xf32, #tpu.memory_space<vmem>>, vector<16x6xf32>
    tpu.vector_store %arg37[%c0_218, %c6], %202 {strides = array<i32>} : memref<32x324xf32, #tpu.memory_space<vmem>>, vector<16x6xf32>,
    %204 = vector.extract_strided_slice %197 {offsets = [0, 30], sizes = [16, 10], strides = [1, 1]} : vector<16x89xf32> to vector<16x10xf32>
    %c0_219 = arith.constant 0 : index
    %c0_220 = arith.constant 0 : index
    %205 = vector.load %arg32[%c0_219, %c0_220] : memref<10x6xf32, #tpu.memory_space<vmem>>, vector<10x6xf32>
    %cst_221 = arith.constant dense<0.000000e+00> : vector<16x6xf32>
    %206 = tpu.matmul %204, %205, %cst_221 {dimension_numbers = #tpu.dot_dimension_numbers<[1], [0], [0], [1], [0, 0, 1, 1], [], []>} : vector<16x10xf32>, vector<10x6xf32>, vector<16x6xf32> -> vector<16x6xf32>
    %c0_222 = arith.constant 0 : index
    %c12 = arith.constant 12 : index
    %207 = vector.load %arg37[%c0_222, %c12] : memref<32x324xf32, #tpu.memory_space<vmem>>, vector<16x6xf32>
    tpu.vector_store %arg37[%c0_222, %c12], %206 {strides = array<i32>} : memref<32x324xf32, #tpu.memory_space<vmem>>, vector<16x6xf32>,
    %208 = vector.extract_strided_slice %197 {offsets = [0, 50], sizes = [16, 10], strides = [1, 1]} : vector<16x89xf32> to vector<16x10xf32>
    %c0_223 = arith.constant 0 : index
    %c0_224 = arith.constant 0 : index
    %209 = vector.load %arg32[%c0_223, %c0_224] : memref<10x6xf32, #tpu.memory_space<vmem>>, vector<10x6xf32>
    %cst_225 = arith.constant dense<0.000000e+00> : vector<16x6xf32>
    %210 = tpu.matmul %208, %209, %cst_225 {dimension_numbers = #tpu.dot_dimension_numbers<[1], [0], [0], [1], [0, 0, 1, 1], [], []>} : vector<16x10xf32>, vector<10x6xf32>, vector<16x6xf32> -> vector<16x6xf32>
    %c0_226 = arith.constant 0 : index
    %c18 = arith.constant 18 : index
    %211 = vector.load %arg37[%c0_226, %c18] : memref<32x324xf32, #tpu.memory_space<vmem>>, vector<16x6xf32>
    tpu.vector_store %arg37[%c0_226, %c18], %210 {strides = array<i32>} : memref<32x324xf32, #tpu.memory_space<vmem>>, vector<16x6xf32>,
    %212 = vector.extract_strided_slice %197 {offsets = [0, 70], sizes = [16, 10], strides = [1, 1]} : vector<16x89xf32> to vector<16x10xf32>
    %c0_227 = arith.constant 0 : index
    %c0_228 = arith.constant 0 : index
    %213 = vector.load %arg32[%c0_227, %c0_228] : memref<10x6xf32, #tpu.memory_space<vmem>>, vector<10x6xf32>
    %cst_229 = arith.constant dense<0.000000e+00> : vector<16x6xf32>
    %214 = tpu.matmul %212, %213, %cst_229 {dimension_numbers = #tpu.dot_dimension_numbers<[1], [0], [0], [1], [0, 0, 1, 1], [], []>} : vector<16x10xf32>, vector<10x6xf32>, vector<16x6xf32> -> vector<16x6xf32>
    %c0_230 = arith.constant 0 : index
    %c24_231 = arith.constant 24 : index
    %215 = vector.load %arg37[%c0_230, %c24_231] : memref<32x324xf32, #tpu.memory_space<vmem>>, vector<16x6xf32>
    tpu.vector_store %arg37[%c0_230, %c24_231], %214 {strides = array<i32>} : memref<32x324xf32, #tpu.memory_space<vmem>>, vector<16x6xf32>,
    %c0_232 = arith.constant 0 : index
    %c0_233 = arith.constant 0 : index
    %216 = vector.load %arg37[%c0_232, %c0_233] : memref<32x324xf32, #tpu.memory_space<vmem>>, vector<16x36xf32>
    %c0_234 = arith.constant 0 : index
    %c135 = arith.constant 135 : index
    %217 = vector.load %arg36[%c0_234, %c135] : memref<288x580xf32, #tpu.memory_space<vmem>>, vector<16x36xf32>
    tpu.vector_store %arg36[%c0_234, %c135], %216 {strides = array<i32>} : memref<288x580xf32, #tpu.memory_space<vmem>>, vector<16x36xf32>,
    %cst_235 = arith.constant 0.000000e+00 : f32
    %218 = vector.broadcast %cst_235 : f32 to vector<16x7xf32>
    %c0_236 = arith.constant 0 : index
    %c128_237 = arith.constant 128 : index
    %219 = vector.load %arg36[%c0_236, %c128_237] : memref<288x580xf32, #tpu.memory_space<vmem>>, vector<16x7xf32>
    tpu.vector_store %arg36[%c0_236, %c128_237], %218 {strides = array<i32>} : memref<288x580xf32, #tpu.memory_space<vmem>>, vector<16x7xf32>,
    %c16_238 = arith.constant 16 : index
    %c134 = arith.constant 134 : index
    %220 = vector.load %arg36[%c16_238, %c134] : memref<288x580xf32, #tpu.memory_space<vmem>>, vector<16x36xf32>
    tpu.vector_store %arg36[%c16_238, %c134], %216 {strides = array<i32>} : memref<288x580xf32, #tpu.memory_space<vmem>>, vector<16x36xf32>,
    %cst_239 = arith.constant 0.000000e+00 : f32
    %221 = vector.broadcast %cst_239 : f32 to vector<16x6xf32>
    %c16_240 = arith.constant 16 : index
    %c128_241 = arith.constant 128 : index
    %222 = vector.load %arg36[%c16_240, %c128_241] : memref<288x580xf32, #tpu.memory_space<vmem>>, vector<16x6xf32>
    tpu.vector_store %arg36[%c16_240, %c128_241], %221 {strides = array<i32>} : memref<288x580xf32, #tpu.memory_space<vmem>>, vector<16x6xf32>,
    %c32_242 = arith.constant 32 : index
    %c133 = arith.constant 133 : index
    %223 = vector.load %arg36[%c32_242, %c133] : memref<288x580xf32, #tpu.memory_space<vmem>>, vector<16x36xf32>
    tpu.vector_store %arg36[%c32_242, %c133], %216 {strides = array<i32>} : memref<288x580xf32, #tpu.memory_space<vmem>>, vector<16x36xf32>,
    %cst_243 = arith.constant 0.000000e+00 : f32
    %224 = vector.broadcast %cst_243 : f32 to vector<16x5xf32>
    %c32_244 = arith.constant 32 : index
    %c128_245 = arith.constant 128 : index
    %225 = vector.load %arg36[%c32_244, %c128_245] : memref<288x580xf32, #tpu.memory_space<vmem>>, vector<16x5xf32>
    tpu.vector_store %arg36[%c32_244, %c128_245], %224 {strides = array<i32>} : memref<288x580xf32, #tpu.memory_space<vmem>>, vector<16x5xf32>,
    %c48_246 = arith.constant 48 : index
    %c129_247 = arith.constant 129 : index
    %226 = vector.load %arg36[%c48_246, %c129_247] : memref<288x580xf32, #tpu.memory_space<vmem>>, vector<16x36xf32>
    tpu.vector_store %arg36[%c48_246, %c129_247], %216 {strides = array<i32>} : memref<288x580xf32, #tpu.memory_space<vmem>>, vector<16x36xf32>,
    %cst_248 = arith.constant 0.000000e+00 : f32
    %227 = vector.broadcast %cst_248 : f32 to vector<16x1xf32>
    %c48_249 = arith.constant 48 : index
    %c128_250 = arith.constant 128 : index
    %228 = vector.load %arg36[%c48_249, %c128_250] : memref<288x580xf32, #tpu.memory_space<vmem>>, vector<16x1xf32>
    tpu.vector_store %arg36[%c48_249, %c128_250], %227 {strides = array<i32>} : memref<288x580xf32, #tpu.memory_space<vmem>>, vector<16x1xf32>,
    %c64_251 = arith.constant 64 : index
    %c128_252 = arith.constant 128 : index
    %229 = vector.load %arg36[%c64_251, %c128_252] : memref<288x580xf32, #tpu.memory_space<vmem>>, vector<16x36xf32>
    tpu.vector_store %arg36[%c64_251, %c128_252], %216 {strides = array<i32>} : memref<288x580xf32, #tpu.memory_space<vmem>>, vector<16x36xf32>,
    %c80_253 = arith.constant 80 : index
    %c127_254 = arith.constant 127 : index
    %230 = vector.load %arg36[%c80_253, %c127_254] : memref<288x580xf32, #tpu.memory_space<vmem>>, vector<16x36xf32>
    tpu.vector_store %arg36[%c80_253, %c127_254], %216 {strides = array<i32>} : memref<288x580xf32, #tpu.memory_space<vmem>>, vector<16x36xf32>,
    %cst_255 = arith.constant 0.000000e+00 : f32
    %231 = vector.broadcast %cst_255 : f32 to vector<16x1xf32>
    %c80_256 = arith.constant 80 : index
    %c163 = arith.constant 163 : index
    %232 = vector.load %arg36[%c80_256, %c163] : memref<288x580xf32, #tpu.memory_space<vmem>>, vector<16x1xf32>
    tpu.vector_store %arg36[%c80_256, %c163], %231 {strides = array<i32>} : memref<288x580xf32, #tpu.memory_space<vmem>>, vector<16x1xf32>,
    %c96_257 = arith.constant 96 : index
    %c123 = arith.constant 123 : index
    %233 = vector.load %arg36[%c96_257, %c123] : memref<288x580xf32, #tpu.memory_space<vmem>>, vector<16x36xf32>
    tpu.vector_store %arg36[%c96_257, %c123], %216 {strides = array<i32>} : memref<288x580xf32, #tpu.memory_space<vmem>>, vector<16x36xf32>,
    %cst_258 = arith.constant 0.000000e+00 : f32
    %234 = vector.broadcast %cst_258 : f32 to vector<16x5xf32>
    %c96_259 = arith.constant 96 : index
    %c159 = arith.constant 159 : index
    %235 = vector.load %arg36[%c96_259, %c159] : memref<288x580xf32, #tpu.memory_space<vmem>>, vector<16x5xf32>
    tpu.vector_store %arg36[%c96_259, %c159], %234 {strides = array<i32>} : memref<288x580xf32, #tpu.memory_space<vmem>>, vector<16x5xf32>,
    %c112_260 = arith.constant 112 : index
    %c122 = arith.constant 122 : index
    %236 = vector.load %arg36[%c112_260, %c122] : memref<288x580xf32, #tpu.memory_space<vmem>>, vector<16x36xf32>
    tpu.vector_store %arg36[%c112_260, %c122], %216 {strides = array<i32>} : memref<288x580xf32, #tpu.memory_space<vmem>>, vector<16x36xf32>,
    %cst_261 = arith.constant 0.000000e+00 : f32
    %237 = vector.broadcast %cst_261 : f32 to vector<16x6xf32>
    %c112_262 = arith.constant 112 : index
    %c158 = arith.constant 158 : index
    %238 = vector.load %arg36[%c112_262, %c158] : memref<288x580xf32, #tpu.memory_space<vmem>>, vector<16x6xf32>
    tpu.vector_store %arg36[%c112_262, %c158], %237 {strides = array<i32>} : memref<288x580xf32, #tpu.memory_space<vmem>>, vector<16x6xf32>,
    %c128_263 = arith.constant 128 : index
    %c121 = arith.constant 121 : index
    %239 = vector.load %arg36[%c128_263, %c121] : memref<288x580xf32, #tpu.memory_space<vmem>>, vector<16x36xf32>
    tpu.vector_store %arg36[%c128_263, %c121], %216 {strides = array<i32>} : memref<288x580xf32, #tpu.memory_space<vmem>>, vector<16x36xf32>,
    %cst_264 = arith.constant 0.000000e+00 : f32
    %240 = vector.broadcast %cst_264 : f32 to vector<16x7xf32>
    %c128_265 = arith.constant 128 : index
    %c157 = arith.constant 157 : index
    %241 = vector.load %arg36[%c128_265, %c157] : memref<288x580xf32, #tpu.memory_space<vmem>>, vector<16x7xf32>
    tpu.vector_store %arg36[%c128_265, %c157], %240 {strides = array<i32>} : memref<288x580xf32, #tpu.memory_space<vmem>>, vector<16x7xf32>,
    %c0_266 = arith.constant 0 : index
    %c128_267 = arith.constant 128 : index
    %242 = vector.load %arg36[%c0_266, %c128_267] : memref<288x580xf32, #tpu.memory_space<vmem>>, vector<144x36xf32>
    %243 = arith.truncf %242 : vector<144x36xf32> to vector<144x36xbf16>
    %c0_268 = arith.constant 0 : index
    %c0_269 = arith.constant 0 : index
    %244 = vector.load %arg10[%c0_268, %c0_269] : memref<32x144xbf16, #tpu.memory_space<vmem>>, vector<32x144xbf16>
    %cst_270 = arith.constant dense<0.000000e+00> : vector<32x36xf32>
    %245 = tpu.matmul %244, %243, %cst_270 {dimension_numbers = #tpu.dot_dimension_numbers<[1], [0], [0], [1], [0, 0, 1, 1], [], []>} : vector<32x144xbf16>, vector<144x36xbf16>, vector<32x36xf32> -> vector<32x36xf32>
    %c0_271 = arith.constant 0 : index
    %c0_272 = arith.constant 0 : index
    %246 = vector.load %arg11[%c0_271, %c0_272] : memref<32x1xf32, #tpu.memory_space<vmem>>, vector<32x1xf32>
    %247 = vector.broadcast %246 : vector<32x1xf32> to vector<32x36xf32>
    %248 = arith.addf %245, %247 : vector<32x36xf32>
    %cst_273 = arith.constant 0.000000e+00 : f32
    %249 = vector.broadcast %cst_273 : f32 to vector<32x36xf32>
    %250 = arith.maximumf %248, %249 : vector<32x36xf32>
    %251 = vector.broadcast %2 : vector<1x36xf32> to vector<32x36xf32>
    %252 = arith.mulf %250, %251 : vector<32x36xf32>
    %c0_274 = arith.constant 0 : index
    %c135_275 = arith.constant 135 : index
    %253 = vector.load %arg36[%c0_274, %c135_275] : memref<288x580xf32, #tpu.memory_space<vmem>>, vector<32x36xf32>
    tpu.vector_store %arg36[%c0_274, %c135_275], %252 {strides = array<i32>} : memref<288x580xf32, #tpu.memory_space<vmem>>, vector<32x36xf32>,
    %cst_276 = arith.constant 0.000000e+00 : f32
    %254 = vector.broadcast %cst_276 : f32 to vector<32x7xf32>
    %c0_277 = arith.constant 0 : index
    %c128_278 = arith.constant 128 : index
    %255 = vector.load %arg36[%c0_277, %c128_278] : memref<288x580xf32, #tpu.memory_space<vmem>>, vector<32x7xf32>
    tpu.vector_store %arg36[%c0_277, %c128_278], %254 {strides = array<i32>} : memref<288x580xf32, #tpu.memory_space<vmem>>, vector<32x7xf32>,
    %c32_279 = arith.constant 32 : index
    %c134_280 = arith.constant 134 : index
    %256 = vector.load %arg36[%c32_279, %c134_280] : memref<288x580xf32, #tpu.memory_space<vmem>>, vector<32x36xf32>
    tpu.vector_store %arg36[%c32_279, %c134_280], %252 {strides = array<i32>} : memref<288x580xf32, #tpu.memory_space<vmem>>, vector<32x36xf32>,
    %cst_281 = arith.constant 0.000000e+00 : f32
    %257 = vector.broadcast %cst_281 : f32 to vector<32x6xf32>
    %c32_282 = arith.constant 32 : index
    %c128_283 = arith.constant 128 : index
    %258 = vector.load %arg36[%c32_282, %c128_283] : memref<288x580xf32, #tpu.memory_space<vmem>>, vector<32x6xf32>
    tpu.vector_store %arg36[%c32_282, %c128_283], %257 {strides = array<i32>} : memref<288x580xf32, #tpu.memory_space<vmem>>, vector<32x6xf32>,
    %c64_284 = arith.constant 64 : index
    %c133_285 = arith.constant 133 : index
    %259 = vector.load %arg36[%c64_284, %c133_285] : memref<288x580xf32, #tpu.memory_space<vmem>>, vector<32x36xf32>
    tpu.vector_store %arg36[%c64_284, %c133_285], %252 {strides = array<i32>} : memref<288x580xf32, #tpu.memory_space<vmem>>, vector<32x36xf32>,
    %cst_286 = arith.constant 0.000000e+00 : f32
    %260 = vector.broadcast %cst_286 : f32 to vector<32x5xf32>
    %c64_287 = arith.constant 64 : index
    %c128_288 = arith.constant 128 : index
    %261 = vector.load %arg36[%c64_287, %c128_288] : memref<288x580xf32, #tpu.memory_space<vmem>>, vector<32x5xf32>
    tpu.vector_store %arg36[%c64_287, %c128_288], %260 {strides = array<i32>} : memref<288x580xf32, #tpu.memory_space<vmem>>, vector<32x5xf32>,
    %c96_289 = arith.constant 96 : index
    %c129_290 = arith.constant 129 : index
    %262 = vector.load %arg36[%c96_289, %c129_290] : memref<288x580xf32, #tpu.memory_space<vmem>>, vector<32x36xf32>
    tpu.vector_store %arg36[%c96_289, %c129_290], %252 {strides = array<i32>} : memref<288x580xf32, #tpu.memory_space<vmem>>, vector<32x36xf32>,
    %cst_291 = arith.constant 0.000000e+00 : f32
    %263 = vector.broadcast %cst_291 : f32 to vector<32x1xf32>
    %c96_292 = arith.constant 96 : index
    %c128_293 = arith.constant 128 : index
    %264 = vector.load %arg36[%c96_292, %c128_293] : memref<288x580xf32, #tpu.memory_space<vmem>>, vector<32x1xf32>
    tpu.vector_store %arg36[%c96_292, %c128_293], %263 {strides = array<i32>} : memref<288x580xf32, #tpu.memory_space<vmem>>, vector<32x1xf32>,
    %c128_294 = arith.constant 128 : index
    %c128_295 = arith.constant 128 : index
    %265 = vector.load %arg36[%c128_294, %c128_295] : memref<288x580xf32, #tpu.memory_space<vmem>>, vector<32x36xf32>
    tpu.vector_store %arg36[%c128_294, %c128_295], %252 {strides = array<i32>} : memref<288x580xf32, #tpu.memory_space<vmem>>, vector<32x36xf32>,
    %c160 = arith.constant 160 : index
    %c127_296 = arith.constant 127 : index
    %266 = vector.load %arg36[%c160, %c127_296] : memref<288x580xf32, #tpu.memory_space<vmem>>, vector<32x36xf32>
    tpu.vector_store %arg36[%c160, %c127_296], %252 {strides = array<i32>} : memref<288x580xf32, #tpu.memory_space<vmem>>, vector<32x36xf32>,
    %cst_297 = arith.constant 0.000000e+00 : f32
    %267 = vector.broadcast %cst_297 : f32 to vector<32x1xf32>
    %c160_298 = arith.constant 160 : index
    %c163_299 = arith.constant 163 : index
    %268 = vector.load %arg36[%c160_298, %c163_299] : memref<288x580xf32, #tpu.memory_space<vmem>>, vector<32x1xf32>
    tpu.vector_store %arg36[%c160_298, %c163_299], %267 {strides = array<i32>} : memref<288x580xf32, #tpu.memory_space<vmem>>, vector<32x1xf32>,
    %c192 = arith.constant 192 : index
    %c123_300 = arith.constant 123 : index
    %269 = vector.load %arg36[%c192, %c123_300] : memref<288x580xf32, #tpu.memory_space<vmem>>, vector<32x36xf32>
    tpu.vector_store %arg36[%c192, %c123_300], %252 {strides = array<i32>} : memref<288x580xf32, #tpu.memory_space<vmem>>, vector<32x36xf32>,
    %cst_301 = arith.constant 0.000000e+00 : f32
    %270 = vector.broadcast %cst_301 : f32 to vector<32x5xf32>
    %c192_302 = arith.constant 192 : index
    %c159_303 = arith.constant 159 : index
    %271 = vector.load %arg36[%c192_302, %c159_303] : memref<288x580xf32, #tpu.memory_space<vmem>>, vector<32x5xf32>
    tpu.vector_store %arg36[%c192_302, %c159_303], %270 {strides = array<i32>} : memref<288x580xf32, #tpu.memory_space<vmem>>, vector<32x5xf32>,
    %c224 = arith.constant 224 : index
    %c122_304 = arith.constant 122 : index
    %272 = vector.load %arg36[%c224, %c122_304] : memref<288x580xf32, #tpu.memory_space<vmem>>, vector<32x36xf32>
    tpu.vector_store %arg36[%c224, %c122_304], %252 {strides = array<i32>} : memref<288x580xf32, #tpu.memory_space<vmem>>, vector<32x36xf32>,
    %cst_305 = arith.constant 0.000000e+00 : f32
    %273 = vector.broadcast %cst_305 : f32 to vector<32x6xf32>
    %c224_306 = arith.constant 224 : index
    %c158_307 = arith.constant 158 : index
    %274 = vector.load %arg36[%c224_306, %c158_307] : memref<288x580xf32, #tpu.memory_space<vmem>>, vector<32x6xf32>
    tpu.vector_store %arg36[%c224_306, %c158_307], %273 {strides = array<i32>} : memref<288x580xf32, #tpu.memory_space<vmem>>, vector<32x6xf32>,
    %c256 = arith.constant 256 : index
    %c121_308 = arith.constant 121 : index
    %275 = vector.load %arg36[%c256, %c121_308] : memref<288x580xf32, #tpu.memory_space<vmem>>, vector<32x36xf32>
    tpu.vector_store %arg36[%c256, %c121_308], %252 {strides = array<i32>} : memref<288x580xf32, #tpu.memory_space<vmem>>, vector<32x36xf32>,
    %cst_309 = arith.constant 0.000000e+00 : f32
    %276 = vector.broadcast %cst_309 : f32 to vector<32x7xf32>
    %c256_310 = arith.constant 256 : index
    %c157_311 = arith.constant 157 : index
    %277 = vector.load %arg36[%c256_310, %c157_311] : memref<288x580xf32, #tpu.memory_space<vmem>>, vector<32x7xf32>
    tpu.vector_store %arg36[%c256_310, %c157_311], %276 {strides = array<i32>} : memref<288x580xf32, #tpu.memory_space<vmem>>, vector<32x7xf32>,
    %c0_312 = arith.constant 0 : index
    %c128_313 = arith.constant 128 : index
    %278 = vector.load %arg36[%c0_312, %c128_313] : memref<288x580xf32, #tpu.memory_space<vmem>>, vector<288x36xf32>
    %279 = arith.truncf %278 : vector<288x36xf32> to vector<288x36xbf16>
    %c0_314 = arith.constant 0 : index
    %c0_315 = arith.constant 0 : index
    %280 = vector.load %arg12[%c0_314, %c0_315] : memref<32x288xbf16, #tpu.memory_space<vmem>>, vector<32x288xbf16>
    %cst_316 = arith.constant dense<0.000000e+00> : vector<32x36xf32>
    %281 = tpu.matmul %280, %279, %cst_316 {dimension_numbers = #tpu.dot_dimension_numbers<[1], [0], [0], [1], [0, 0, 1, 1], [], []>} : vector<32x288xbf16>, vector<288x36xbf16>, vector<32x36xf32> -> vector<32x36xf32>
    %c0_317 = arith.constant 0 : index
    %c0_318 = arith.constant 0 : index
    %282 = vector.load %arg13[%c0_317, %c0_318] : memref<32x1xf32, #tpu.memory_space<vmem>>, vector<32x1xf32>
    %283 = vector.broadcast %282 : vector<32x1xf32> to vector<32x36xf32>
    %284 = arith.addf %281, %283 : vector<32x36xf32>
    %cst_319 = arith.constant 0.000000e+00 : f32
    %285 = vector.broadcast %cst_319 : f32 to vector<32x36xf32>
    %286 = arith.maximumf %284, %285 : vector<32x36xf32>
    %287 = vector.broadcast %2 : vector<1x36xf32> to vector<32x36xf32>
    %288 = arith.mulf %286, %287 : vector<32x36xf32>
    %cst_320 = arith.constant 0.000000e+00 : f32
    %289 = vector.broadcast %cst_320 : f32 to vector<32x100xf32>
    %c0_321 = arith.constant 0 : index
    %c0_322 = arith.constant 0 : index
    %290 = vector.load %arg37[%c0_321, %c0_322] : memref<32x324xf32, #tpu.memory_space<vmem>>, vector<32x100xf32>
    tpu.vector_store %arg37[%c0_321, %c0_322], %289 {strides = array<i32>} : memref<32x324xf32, #tpu.memory_space<vmem>>, vector<32x100xf32>,
    %291 = vector.extract_strided_slice %288 {offsets = [0, 6], sizes = [32, 6], strides = [1, 1]} : vector<32x36xf32> to vector<32x6xf32>
    %c0_323 = arith.constant 0 : index
    %c0_324 = arith.constant 0 : index
    %292 = vector.load %arg33[%c0_323, %c0_324] : memref<6x10xf32, #tpu.memory_space<vmem>>, vector<6x10xf32>
    %cst_325 = arith.constant dense<0.000000e+00> : vector<32x10xf32>
    %293 = tpu.matmul %291, %292, %cst_325 {dimension_numbers = #tpu.dot_dimension_numbers<[1], [0], [0], [1], [0, 0, 1, 1], [], []>} : vector<32x6xf32>, vector<6x10xf32>, vector<32x10xf32> -> vector<32x10xf32>
    %c0_326 = arith.constant 0 : index
    %c10_327 = arith.constant 10 : index
    %294 = vector.load %arg37[%c0_326, %c10_327] : memref<32x324xf32, #tpu.memory_space<vmem>>, vector<32x10xf32>
    tpu.vector_store %arg37[%c0_326, %c10_327], %293 {strides = array<i32>} : memref<32x324xf32, #tpu.memory_space<vmem>>, vector<32x10xf32>,
    %c0_328 = arith.constant 0 : index
    %c20_329 = arith.constant 20 : index
    %295 = vector.load %arg37[%c0_328, %c20_329] : memref<32x324xf32, #tpu.memory_space<vmem>>, vector<32x10xf32>
    tpu.vector_store %arg37[%c0_328, %c20_329], %293 {strides = array<i32>} : memref<32x324xf32, #tpu.memory_space<vmem>>, vector<32x10xf32>,
    %296 = vector.extract_strided_slice %288 {offsets = [0, 12], sizes = [32, 6], strides = [1, 1]} : vector<32x36xf32> to vector<32x6xf32>
    %c0_330 = arith.constant 0 : index
    %c0_331 = arith.constant 0 : index
    %297 = vector.load %arg33[%c0_330, %c0_331] : memref<6x10xf32, #tpu.memory_space<vmem>>, vector<6x10xf32>
    %cst_332 = arith.constant dense<0.000000e+00> : vector<32x10xf32>
    %298 = tpu.matmul %296, %297, %cst_332 {dimension_numbers = #tpu.dot_dimension_numbers<[1], [0], [0], [1], [0, 0, 1, 1], [], []>} : vector<32x6xf32>, vector<6x10xf32>, vector<32x10xf32> -> vector<32x10xf32>
    %c0_333 = arith.constant 0 : index
    %c30_334 = arith.constant 30 : index
    %299 = vector.load %arg37[%c0_333, %c30_334] : memref<32x324xf32, #tpu.memory_space<vmem>>, vector<32x10xf32>
    tpu.vector_store %arg37[%c0_333, %c30_334], %298 {strides = array<i32>} : memref<32x324xf32, #tpu.memory_space<vmem>>, vector<32x10xf32>,
    %c0_335 = arith.constant 0 : index
    %c40_336 = arith.constant 40 : index
    %300 = vector.load %arg37[%c0_335, %c40_336] : memref<32x324xf32, #tpu.memory_space<vmem>>, vector<32x10xf32>
    tpu.vector_store %arg37[%c0_335, %c40_336], %298 {strides = array<i32>} : memref<32x324xf32, #tpu.memory_space<vmem>>, vector<32x10xf32>,
    %301 = vector.extract_strided_slice %288 {offsets = [0, 18], sizes = [32, 6], strides = [1, 1]} : vector<32x36xf32> to vector<32x6xf32>
    %c0_337 = arith.constant 0 : index
    %c0_338 = arith.constant 0 : index
    %302 = vector.load %arg33[%c0_337, %c0_338] : memref<6x10xf32, #tpu.memory_space<vmem>>, vector<6x10xf32>
    %cst_339 = arith.constant dense<0.000000e+00> : vector<32x10xf32>
    %303 = tpu.matmul %301, %302, %cst_339 {dimension_numbers = #tpu.dot_dimension_numbers<[1], [0], [0], [1], [0, 0, 1, 1], [], []>} : vector<32x6xf32>, vector<6x10xf32>, vector<32x10xf32> -> vector<32x10xf32>
    %c0_340 = arith.constant 0 : index
    %c50_341 = arith.constant 50 : index
    %304 = vector.load %arg37[%c0_340, %c50_341] : memref<32x324xf32, #tpu.memory_space<vmem>>, vector<32x10xf32>
    tpu.vector_store %arg37[%c0_340, %c50_341], %303 {strides = array<i32>} : memref<32x324xf32, #tpu.memory_space<vmem>>, vector<32x10xf32>,
    %c0_342 = arith.constant 0 : index
    %c60_343 = arith.constant 60 : index
    %305 = vector.load %arg37[%c0_342, %c60_343] : memref<32x324xf32, #tpu.memory_space<vmem>>, vector<32x10xf32>
    tpu.vector_store %arg37[%c0_342, %c60_343], %303 {strides = array<i32>} : memref<32x324xf32, #tpu.memory_space<vmem>>, vector<32x10xf32>,
    %306 = vector.extract_strided_slice %288 {offsets = [0, 24], sizes = [32, 6], strides = [1, 1]} : vector<32x36xf32> to vector<32x6xf32>
    %c0_344 = arith.constant 0 : index
    %c0_345 = arith.constant 0 : index
    %307 = vector.load %arg33[%c0_344, %c0_345] : memref<6x10xf32, #tpu.memory_space<vmem>>, vector<6x10xf32>
    %cst_346 = arith.constant dense<0.000000e+00> : vector<32x10xf32>
    %308 = tpu.matmul %306, %307, %cst_346 {dimension_numbers = #tpu.dot_dimension_numbers<[1], [0], [0], [1], [0, 0, 1, 1], [], []>} : vector<32x6xf32>, vector<6x10xf32>, vector<32x10xf32> -> vector<32x10xf32>
    %c0_347 = arith.constant 0 : index
    %c70_348 = arith.constant 70 : index
    %309 = vector.load %arg37[%c0_347, %c70_348] : memref<32x324xf32, #tpu.memory_space<vmem>>, vector<32x10xf32>
    tpu.vector_store %arg37[%c0_347, %c70_348], %308 {strides = array<i32>} : memref<32x324xf32, #tpu.memory_space<vmem>>, vector<32x10xf32>,
    %c0_349 = arith.constant 0 : index
    %c80_350 = arith.constant 80 : index
    %310 = vector.load %arg37[%c0_349, %c80_350] : memref<32x324xf32, #tpu.memory_space<vmem>>, vector<32x10xf32>
    tpu.vector_store %arg37[%c0_349, %c80_350], %308 {strides = array<i32>} : memref<32x324xf32, #tpu.memory_space<vmem>>, vector<32x10xf32>,
    %c0_351 = arith.constant 0 : index
    %c0_352 = arith.constant 0 : index
    %311 = vector.load %arg37[%c0_351, %c0_352] : memref<32x324xf32, #tpu.memory_space<vmem>>, vector<32x100xf32>
    %c0_353 = arith.constant 0 : index
    %c139_354 = arith.constant 139 : index
    %312 = vector.load %arg36[%c0_353, %c139_354] : memref<288x580xf32, #tpu.memory_space<vmem>>, vector<32x100xf32>
    tpu.vector_store %arg36[%c0_353, %c139_354], %311 {strides = array<i32>} : memref<288x580xf32, #tpu.memory_space<vmem>>, vector<32x100xf32>,
    %cst_355 = arith.constant 0.000000e+00 : f32
    %313 = vector.broadcast %cst_355 : f32 to vector<32x11xf32>
    %c0_356 = arith.constant 0 : index
    %c128_357 = arith.constant 128 : index
    %314 = vector.load %arg36[%c0_356, %c128_357] : memref<288x580xf32, #tpu.memory_space<vmem>>, vector<32x11xf32>
    tpu.vector_store %arg36[%c0_356, %c128_357], %313 {strides = array<i32>} : memref<288x580xf32, #tpu.memory_space<vmem>>, vector<32x11xf32>,
    %c32_358 = arith.constant 32 : index
    %c138_359 = arith.constant 138 : index
    %315 = vector.load %arg36[%c32_358, %c138_359] : memref<288x580xf32, #tpu.memory_space<vmem>>, vector<32x100xf32>
    tpu.vector_store %arg36[%c32_358, %c138_359], %311 {strides = array<i32>} : memref<288x580xf32, #tpu.memory_space<vmem>>, vector<32x100xf32>,
    %cst_360 = arith.constant 0.000000e+00 : f32
    %316 = vector.broadcast %cst_360 : f32 to vector<32x10xf32>
    %c32_361 = arith.constant 32 : index
    %c128_362 = arith.constant 128 : index
    %317 = vector.load %arg36[%c32_361, %c128_362] : memref<288x580xf32, #tpu.memory_space<vmem>>, vector<32x10xf32>
    tpu.vector_store %arg36[%c32_361, %c128_362], %316 {strides = array<i32>} : memref<288x580xf32, #tpu.memory_space<vmem>>, vector<32x10xf32>,
    %c64_363 = arith.constant 64 : index
    %c137_364 = arith.constant 137 : index
    %318 = vector.load %arg36[%c64_363, %c137_364] : memref<288x580xf32, #tpu.memory_space<vmem>>, vector<32x100xf32>
    tpu.vector_store %arg36[%c64_363, %c137_364], %311 {strides = array<i32>} : memref<288x580xf32, #tpu.memory_space<vmem>>, vector<32x100xf32>,
    %cst_365 = arith.constant 0.000000e+00 : f32
    %319 = vector.broadcast %cst_365 : f32 to vector<32x9xf32>
    %c64_366 = arith.constant 64 : index
    %c128_367 = arith.constant 128 : index
    %320 = vector.load %arg36[%c64_366, %c128_367] : memref<288x580xf32, #tpu.memory_space<vmem>>, vector<32x9xf32>
    tpu.vector_store %arg36[%c64_366, %c128_367], %319 {strides = array<i32>} : memref<288x580xf32, #tpu.memory_space<vmem>>, vector<32x9xf32>,
    %c96_368 = arith.constant 96 : index
    %c129_369 = arith.constant 129 : index
    %321 = vector.load %arg36[%c96_368, %c129_369] : memref<288x580xf32, #tpu.memory_space<vmem>>, vector<32x100xf32>
    tpu.vector_store %arg36[%c96_368, %c129_369], %311 {strides = array<i32>} : memref<288x580xf32, #tpu.memory_space<vmem>>, vector<32x100xf32>,
    %cst_370 = arith.constant 0.000000e+00 : f32
    %322 = vector.broadcast %cst_370 : f32 to vector<32x1xf32>
    %c96_371 = arith.constant 96 : index
    %c128_372 = arith.constant 128 : index
    %323 = vector.load %arg36[%c96_371, %c128_372] : memref<288x580xf32, #tpu.memory_space<vmem>>, vector<32x1xf32>
    tpu.vector_store %arg36[%c96_371, %c128_372], %322 {strides = array<i32>} : memref<288x580xf32, #tpu.memory_space<vmem>>, vector<32x1xf32>,
    %c128_373 = arith.constant 128 : index
    %c128_374 = arith.constant 128 : index
    %324 = vector.load %arg36[%c128_373, %c128_374] : memref<288x580xf32, #tpu.memory_space<vmem>>, vector<32x100xf32>
    tpu.vector_store %arg36[%c128_373, %c128_374], %311 {strides = array<i32>} : memref<288x580xf32, #tpu.memory_space<vmem>>, vector<32x100xf32>,
    %c160_375 = arith.constant 160 : index
    %c127_376 = arith.constant 127 : index
    %325 = vector.load %arg36[%c160_375, %c127_376] : memref<288x580xf32, #tpu.memory_space<vmem>>, vector<32x100xf32>
    tpu.vector_store %arg36[%c160_375, %c127_376], %311 {strides = array<i32>} : memref<288x580xf32, #tpu.memory_space<vmem>>, vector<32x100xf32>,
    %cst_377 = arith.constant 0.000000e+00 : f32
    %326 = vector.broadcast %cst_377 : f32 to vector<32x1xf32>
    %c160_378 = arith.constant 160 : index
    %c227_379 = arith.constant 227 : index
    %327 = vector.load %arg36[%c160_378, %c227_379] : memref<288x580xf32, #tpu.memory_space<vmem>>, vector<32x1xf32>
    tpu.vector_store %arg36[%c160_378, %c227_379], %326 {strides = array<i32>} : memref<288x580xf32, #tpu.memory_space<vmem>>, vector<32x1xf32>,
    %c192_380 = arith.constant 192 : index
    %c119_381 = arith.constant 119 : index
    %328 = vector.load %arg36[%c192_380, %c119_381] : memref<288x580xf32, #tpu.memory_space<vmem>>, vector<32x100xf32>
    tpu.vector_store %arg36[%c192_380, %c119_381], %311 {strides = array<i32>} : memref<288x580xf32, #tpu.memory_space<vmem>>, vector<32x100xf32>,
    %cst_382 = arith.constant 0.000000e+00 : f32
    %329 = vector.broadcast %cst_382 : f32 to vector<32x9xf32>
    %c192_383 = arith.constant 192 : index
    %c219_384 = arith.constant 219 : index
    %330 = vector.load %arg36[%c192_383, %c219_384] : memref<288x580xf32, #tpu.memory_space<vmem>>, vector<32x9xf32>
    tpu.vector_store %arg36[%c192_383, %c219_384], %329 {strides = array<i32>} : memref<288x580xf32, #tpu.memory_space<vmem>>, vector<32x9xf32>,
    %c224_385 = arith.constant 224 : index
    %c118_386 = arith.constant 118 : index
    %331 = vector.load %arg36[%c224_385, %c118_386] : memref<288x580xf32, #tpu.memory_space<vmem>>, vector<32x100xf32>
    tpu.vector_store %arg36[%c224_385, %c118_386], %311 {strides = array<i32>} : memref<288x580xf32, #tpu.memory_space<vmem>>, vector<32x100xf32>,
    %cst_387 = arith.constant 0.000000e+00 : f32
    %332 = vector.broadcast %cst_387 : f32 to vector<32x10xf32>
    %c224_388 = arith.constant 224 : index
    %c218_389 = arith.constant 218 : index
    %333 = vector.load %arg36[%c224_388, %c218_389] : memref<288x580xf32, #tpu.memory_space<vmem>>, vector<32x10xf32>
    tpu.vector_store %arg36[%c224_388, %c218_389], %332 {strides = array<i32>} : memref<288x580xf32, #tpu.memory_space<vmem>>, vector<32x10xf32>,
    %c256_390 = arith.constant 256 : index
    %c117_391 = arith.constant 117 : index
    %334 = vector.load %arg36[%c256_390, %c117_391] : memref<288x580xf32, #tpu.memory_space<vmem>>, vector<32x100xf32>
    tpu.vector_store %arg36[%c256_390, %c117_391], %311 {strides = array<i32>} : memref<288x580xf32, #tpu.memory_space<vmem>>, vector<32x100xf32>,
    %cst_392 = arith.constant 0.000000e+00 : f32
    %335 = vector.broadcast %cst_392 : f32 to vector<32x11xf32>
    %c256_393 = arith.constant 256 : index
    %c217_394 = arith.constant 217 : index
    %336 = vector.load %arg36[%c256_393, %c217_394] : memref<288x580xf32, #tpu.memory_space<vmem>>, vector<32x11xf32>
    tpu.vector_store %arg36[%c256_393, %c217_394], %335 {strides = array<i32>} : memref<288x580xf32, #tpu.memory_space<vmem>>, vector<32x11xf32>,
    %c0_395 = arith.constant 0 : index
    %c128_396 = arith.constant 128 : index
    %337 = vector.load %arg36[%c0_395, %c128_396] : memref<288x580xf32, #tpu.memory_space<vmem>>, vector<288x100xf32>
    %338 = arith.truncf %337 : vector<288x100xf32> to vector<288x100xbf16>
    %c0_397 = arith.constant 0 : index
    %c0_398 = arith.constant 0 : index
    %339 = vector.load %arg14[%c0_397, %c0_398] : memref<16x288xbf16, #tpu.memory_space<vmem>>, vector<16x288xbf16>
    %cst_399 = arith.constant dense<0.000000e+00> : vector<16x100xf32>
    %340 = tpu.matmul %339, %338, %cst_399 {dimension_numbers = #tpu.dot_dimension_numbers<[1], [0], [0], [1], [0, 0, 1, 1], [], []>} : vector<16x288xbf16>, vector<288x100xbf16>, vector<16x100xf32> -> vector<16x100xf32>
    %c0_400 = arith.constant 0 : index
    %c0_401 = arith.constant 0 : index
    %341 = vector.load %arg15[%c0_400, %c0_401] : memref<16x1xf32, #tpu.memory_space<vmem>>, vector<16x1xf32>
    %342 = vector.broadcast %341 : vector<16x1xf32> to vector<16x100xf32>
    %343 = arith.addf %340, %342 : vector<16x100xf32>
    %344 = arith.addf %343, %190 : vector<16x100xf32>
    %cst_402 = arith.constant 0.000000e+00 : f32
    %345 = vector.broadcast %cst_402 : f32 to vector<16x100xf32>
    %346 = arith.maximumf %344, %345 : vector<16x100xf32>
    %347 = vector.broadcast %1 : vector<1x100xf32> to vector<16x100xf32>
    %348 = arith.mulf %346, %347 : vector<16x100xf32>
    %c0_403 = arith.constant 0 : index
    %c139_404 = arith.constant 139 : index
    %349 = vector.load %arg36[%c0_403, %c139_404] : memref<288x580xf32, #tpu.memory_space<vmem>>, vector<16x100xf32>
    tpu.vector_store %arg36[%c0_403, %c139_404], %348 {strides = array<i32>} : memref<288x580xf32, #tpu.memory_space<vmem>>, vector<16x100xf32>,
    %cst_405 = arith.constant 0.000000e+00 : f32
    %350 = vector.broadcast %cst_405 : f32 to vector<16x11xf32>
    %c0_406 = arith.constant 0 : index
    %c128_407 = arith.constant 128 : index
    %351 = vector.load %arg36[%c0_406, %c128_407] : memref<288x580xf32, #tpu.memory_space<vmem>>, vector<16x11xf32>
    tpu.vector_store %arg36[%c0_406, %c128_407], %350 {strides = array<i32>} : memref<288x580xf32, #tpu.memory_space<vmem>>, vector<16x11xf32>,
    %c16_408 = arith.constant 16 : index
    %c138_409 = arith.constant 138 : index
    %352 = vector.load %arg36[%c16_408, %c138_409] : memref<288x580xf32, #tpu.memory_space<vmem>>, vector<16x100xf32>
    tpu.vector_store %arg36[%c16_408, %c138_409], %348 {strides = array<i32>} : memref<288x580xf32, #tpu.memory_space<vmem>>, vector<16x100xf32>,
    %cst_410 = arith.constant 0.000000e+00 : f32
    %353 = vector.broadcast %cst_410 : f32 to vector<16x10xf32>
    %c16_411 = arith.constant 16 : index
    %c128_412 = arith.constant 128 : index
    %354 = vector.load %arg36[%c16_411, %c128_412] : memref<288x580xf32, #tpu.memory_space<vmem>>, vector<16x10xf32>
    tpu.vector_store %arg36[%c16_411, %c128_412], %353 {strides = array<i32>} : memref<288x580xf32, #tpu.memory_space<vmem>>, vector<16x10xf32>,
    %c32_413 = arith.constant 32 : index
    %c137_414 = arith.constant 137 : index
    %355 = vector.load %arg36[%c32_413, %c137_414] : memref<288x580xf32, #tpu.memory_space<vmem>>, vector<16x100xf32>
    tpu.vector_store %arg36[%c32_413, %c137_414], %348 {strides = array<i32>} : memref<288x580xf32, #tpu.memory_space<vmem>>, vector<16x100xf32>,
    %cst_415 = arith.constant 0.000000e+00 : f32
    %356 = vector.broadcast %cst_415 : f32 to vector<16x9xf32>
    %c32_416 = arith.constant 32 : index
    %c128_417 = arith.constant 128 : index
    %357 = vector.load %arg36[%c32_416, %c128_417] : memref<288x580xf32, #tpu.memory_space<vmem>>, vector<16x9xf32>
    tpu.vector_store %arg36[%c32_416, %c128_417], %356 {strides = array<i32>} : memref<288x580xf32, #tpu.memory_space<vmem>>, vector<16x9xf32>,
    %c48_418 = arith.constant 48 : index
    %c129_419 = arith.constant 129 : index
    %358 = vector.load %arg36[%c48_418, %c129_419] : memref<288x580xf32, #tpu.memory_space<vmem>>, vector<16x100xf32>
    tpu.vector_store %arg36[%c48_418, %c129_419], %348 {strides = array<i32>} : memref<288x580xf32, #tpu.memory_space<vmem>>, vector<16x100xf32>,
    %cst_420 = arith.constant 0.000000e+00 : f32
    %359 = vector.broadcast %cst_420 : f32 to vector<16x1xf32>
    %c48_421 = arith.constant 48 : index
    %c128_422 = arith.constant 128 : index
    %360 = vector.load %arg36[%c48_421, %c128_422] : memref<288x580xf32, #tpu.memory_space<vmem>>, vector<16x1xf32>
    tpu.vector_store %arg36[%c48_421, %c128_422], %359 {strides = array<i32>} : memref<288x580xf32, #tpu.memory_space<vmem>>, vector<16x1xf32>,
    %c64_423 = arith.constant 64 : index
    %c128_424 = arith.constant 128 : index
    %361 = vector.load %arg36[%c64_423, %c128_424] : memref<288x580xf32, #tpu.memory_space<vmem>>, vector<16x100xf32>
    tpu.vector_store %arg36[%c64_423, %c128_424], %348 {strides = array<i32>} : memref<288x580xf32, #tpu.memory_space<vmem>>, vector<16x100xf32>,
    %c80_425 = arith.constant 80 : index
    %c127_426 = arith.constant 127 : index
    %362 = vector.load %arg36[%c80_425, %c127_426] : memref<288x580xf32, #tpu.memory_space<vmem>>, vector<16x100xf32>
    tpu.vector_store %arg36[%c80_425, %c127_426], %348 {strides = array<i32>} : memref<288x580xf32, #tpu.memory_space<vmem>>, vector<16x100xf32>,
    %cst_427 = arith.constant 0.000000e+00 : f32
    %363 = vector.broadcast %cst_427 : f32 to vector<16x1xf32>
    %c80_428 = arith.constant 80 : index
    %c227_429 = arith.constant 227 : index
    %364 = vector.load %arg36[%c80_428, %c227_429] : memref<288x580xf32, #tpu.memory_space<vmem>>, vector<16x1xf32>
    tpu.vector_store %arg36[%c80_428, %c227_429], %363 {strides = array<i32>} : memref<288x580xf32, #tpu.memory_space<vmem>>, vector<16x1xf32>,
    %c96_430 = arith.constant 96 : index
    %c119_431 = arith.constant 119 : index
    %365 = vector.load %arg36[%c96_430, %c119_431] : memref<288x580xf32, #tpu.memory_space<vmem>>, vector<16x100xf32>
    tpu.vector_store %arg36[%c96_430, %c119_431], %348 {strides = array<i32>} : memref<288x580xf32, #tpu.memory_space<vmem>>, vector<16x100xf32>,
    %cst_432 = arith.constant 0.000000e+00 : f32
    %366 = vector.broadcast %cst_432 : f32 to vector<16x9xf32>
    %c96_433 = arith.constant 96 : index
    %c219_434 = arith.constant 219 : index
    %367 = vector.load %arg36[%c96_433, %c219_434] : memref<288x580xf32, #tpu.memory_space<vmem>>, vector<16x9xf32>
    tpu.vector_store %arg36[%c96_433, %c219_434], %366 {strides = array<i32>} : memref<288x580xf32, #tpu.memory_space<vmem>>, vector<16x9xf32>,
    %c112_435 = arith.constant 112 : index
    %c118_436 = arith.constant 118 : index
    %368 = vector.load %arg36[%c112_435, %c118_436] : memref<288x580xf32, #tpu.memory_space<vmem>>, vector<16x100xf32>
    tpu.vector_store %arg36[%c112_435, %c118_436], %348 {strides = array<i32>} : memref<288x580xf32, #tpu.memory_space<vmem>>, vector<16x100xf32>,
    %cst_437 = arith.constant 0.000000e+00 : f32
    %369 = vector.broadcast %cst_437 : f32 to vector<16x10xf32>
    %c112_438 = arith.constant 112 : index
    %c218_439 = arith.constant 218 : index
    %370 = vector.load %arg36[%c112_438, %c218_439] : memref<288x580xf32, #tpu.memory_space<vmem>>, vector<16x10xf32>
    tpu.vector_store %arg36[%c112_438, %c218_439], %369 {strides = array<i32>} : memref<288x580xf32, #tpu.memory_space<vmem>>, vector<16x10xf32>,
    %c128_440 = arith.constant 128 : index
    %c117_441 = arith.constant 117 : index
    %371 = vector.load %arg36[%c128_440, %c117_441] : memref<288x580xf32, #tpu.memory_space<vmem>>, vector<16x100xf32>
    tpu.vector_store %arg36[%c128_440, %c117_441], %348 {strides = array<i32>} : memref<288x580xf32, #tpu.memory_space<vmem>>, vector<16x100xf32>,
    %cst_442 = arith.constant 0.000000e+00 : f32
    %372 = vector.broadcast %cst_442 : f32 to vector<16x11xf32>
    %c128_443 = arith.constant 128 : index
    %c217_444 = arith.constant 217 : index
    %373 = vector.load %arg36[%c128_443, %c217_444] : memref<288x580xf32, #tpu.memory_space<vmem>>, vector<16x11xf32>
    tpu.vector_store %arg36[%c128_443, %c217_444], %372 {strides = array<i32>} : memref<288x580xf32, #tpu.memory_space<vmem>>, vector<16x11xf32>,
    %c0_445 = arith.constant 0 : index
    %c128_446 = arith.constant 128 : index
    %374 = vector.load %arg36[%c0_445, %c128_446] : memref<288x580xf32, #tpu.memory_space<vmem>>, vector<144x100xf32>
    %375 = arith.truncf %374 : vector<144x100xf32> to vector<144x100xbf16>
    %c0_447 = arith.constant 0 : index
    %c0_448 = arith.constant 0 : index
    %376 = vector.load %arg16[%c0_447, %c0_448] : memref<16x144xbf16, #tpu.memory_space<vmem>>, vector<16x144xbf16>
    %cst_449 = arith.constant dense<0.000000e+00> : vector<16x100xf32>
    %377 = tpu.matmul %376, %375, %cst_449 {dimension_numbers = #tpu.dot_dimension_numbers<[1], [0], [0], [1], [0, 0, 1, 1], [], []>} : vector<16x144xbf16>, vector<144x100xbf16>, vector<16x100xf32> -> vector<16x100xf32>
    %c0_450 = arith.constant 0 : index
    %c0_451 = arith.constant 0 : index
    %378 = vector.load %arg17[%c0_450, %c0_451] : memref<16x1xf32, #tpu.memory_space<vmem>>, vector<16x1xf32>
    %379 = vector.broadcast %378 : vector<16x1xf32> to vector<16x100xf32>
    %380 = arith.addf %377, %379 : vector<16x100xf32>
    %cst_452 = arith.constant 0.000000e+00 : f32
    %381 = vector.broadcast %cst_452 : f32 to vector<16x100xf32>
    %382 = arith.maximumf %380, %381 : vector<16x100xf32>
    %383 = vector.broadcast %1 : vector<1x100xf32> to vector<16x100xf32>
    %384 = arith.mulf %382, %383 : vector<16x100xf32>
    %c0_453 = arith.constant 0 : index
    %c139_454 = arith.constant 139 : index
    %385 = vector.load %arg36[%c0_453, %c139_454] : memref<288x580xf32, #tpu.memory_space<vmem>>, vector<16x100xf32>
    tpu.vector_store %arg36[%c0_453, %c139_454], %384 {strides = array<i32>} : memref<288x580xf32, #tpu.memory_space<vmem>>, vector<16x100xf32>,
    %cst_455 = arith.constant 0.000000e+00 : f32
    %386 = vector.broadcast %cst_455 : f32 to vector<16x11xf32>
    %c0_456 = arith.constant 0 : index
    %c128_457 = arith.constant 128 : index
    %387 = vector.load %arg36[%c0_456, %c128_457] : memref<288x580xf32, #tpu.memory_space<vmem>>, vector<16x11xf32>
    tpu.vector_store %arg36[%c0_456, %c128_457], %386 {strides = array<i32>} : memref<288x580xf32, #tpu.memory_space<vmem>>, vector<16x11xf32>,
    %c16_458 = arith.constant 16 : index
    %c138_459 = arith.constant 138 : index
    %388 = vector.load %arg36[%c16_458, %c138_459] : memref<288x580xf32, #tpu.memory_space<vmem>>, vector<16x100xf32>
    tpu.vector_store %arg36[%c16_458, %c138_459], %384 {strides = array<i32>} : memref<288x580xf32, #tpu.memory_space<vmem>>, vector<16x100xf32>,
    %cst_460 = arith.constant 0.000000e+00 : f32
    %389 = vector.broadcast %cst_460 : f32 to vector<16x10xf32>
    %c16_461 = arith.constant 16 : index
    %c128_462 = arith.constant 128 : index
    %390 = vector.load %arg36[%c16_461, %c128_462] : memref<288x580xf32, #tpu.memory_space<vmem>>, vector<16x10xf32>
    tpu.vector_store %arg36[%c16_461, %c128_462], %389 {strides = array<i32>} : memref<288x580xf32, #tpu.memory_space<vmem>>, vector<16x10xf32>,
    %c32_463 = arith.constant 32 : index
    %c137_464 = arith.constant 137 : index
    %391 = vector.load %arg36[%c32_463, %c137_464] : memref<288x580xf32, #tpu.memory_space<vmem>>, vector<16x100xf32>
    tpu.vector_store %arg36[%c32_463, %c137_464], %384 {strides = array<i32>} : memref<288x580xf32, #tpu.memory_space<vmem>>, vector<16x100xf32>,
    %cst_465 = arith.constant 0.000000e+00 : f32
    %392 = vector.broadcast %cst_465 : f32 to vector<16x9xf32>
    %c32_466 = arith.constant 32 : index
    %c128_467 = arith.constant 128 : index
    %393 = vector.load %arg36[%c32_466, %c128_467] : memref<288x580xf32, #tpu.memory_space<vmem>>, vector<16x9xf32>
    tpu.vector_store %arg36[%c32_466, %c128_467], %392 {strides = array<i32>} : memref<288x580xf32, #tpu.memory_space<vmem>>, vector<16x9xf32>,
    %c48_468 = arith.constant 48 : index
    %c129_469 = arith.constant 129 : index
    %394 = vector.load %arg36[%c48_468, %c129_469] : memref<288x580xf32, #tpu.memory_space<vmem>>, vector<16x100xf32>
    tpu.vector_store %arg36[%c48_468, %c129_469], %384 {strides = array<i32>} : memref<288x580xf32, #tpu.memory_space<vmem>>, vector<16x100xf32>,
    %cst_470 = arith.constant 0.000000e+00 : f32
    %395 = vector.broadcast %cst_470 : f32 to vector<16x1xf32>
    %c48_471 = arith.constant 48 : index
    %c128_472 = arith.constant 128 : index
    %396 = vector.load %arg36[%c48_471, %c128_472] : memref<288x580xf32, #tpu.memory_space<vmem>>, vector<16x1xf32>
    tpu.vector_store %arg36[%c48_471, %c128_472], %395 {strides = array<i32>} : memref<288x580xf32, #tpu.memory_space<vmem>>, vector<16x1xf32>,
    %c64_473 = arith.constant 64 : index
    %c128_474 = arith.constant 128 : index
    %397 = vector.load %arg36[%c64_473, %c128_474] : memref<288x580xf32, #tpu.memory_space<vmem>>, vector<16x100xf32>
    tpu.vector_store %arg36[%c64_473, %c128_474], %384 {strides = array<i32>} : memref<288x580xf32, #tpu.memory_space<vmem>>, vector<16x100xf32>,
    %c80_475 = arith.constant 80 : index
    %c127_476 = arith.constant 127 : index
    %398 = vector.load %arg36[%c80_475, %c127_476] : memref<288x580xf32, #tpu.memory_space<vmem>>, vector<16x100xf32>
    tpu.vector_store %arg36[%c80_475, %c127_476], %384 {strides = array<i32>} : memref<288x580xf32, #tpu.memory_space<vmem>>, vector<16x100xf32>,
    %cst_477 = arith.constant 0.000000e+00 : f32
    %399 = vector.broadcast %cst_477 : f32 to vector<16x1xf32>
    %c80_478 = arith.constant 80 : index
    %c227_479 = arith.constant 227 : index
    %400 = vector.load %arg36[%c80_478, %c227_479] : memref<288x580xf32, #tpu.memory_space<vmem>>, vector<16x1xf32>
    tpu.vector_store %arg36[%c80_478, %c227_479], %399 {strides = array<i32>} : memref<288x580xf32, #tpu.memory_space<vmem>>, vector<16x1xf32>,
    %c96_480 = arith.constant 96 : index
    %c119_481 = arith.constant 119 : index
    %401 = vector.load %arg36[%c96_480, %c119_481] : memref<288x580xf32, #tpu.memory_space<vmem>>, vector<16x100xf32>
    tpu.vector_store %arg36[%c96_480, %c119_481], %384 {strides = array<i32>} : memref<288x580xf32, #tpu.memory_space<vmem>>, vector<16x100xf32>,
    %cst_482 = arith.constant 0.000000e+00 : f32
    %402 = vector.broadcast %cst_482 : f32 to vector<16x9xf32>
    %c96_483 = arith.constant 96 : index
    %c219_484 = arith.constant 219 : index
    %403 = vector.load %arg36[%c96_483, %c219_484] : memref<288x580xf32, #tpu.memory_space<vmem>>, vector<16x9xf32>
    tpu.vector_store %arg36[%c96_483, %c219_484], %402 {strides = array<i32>} : memref<288x580xf32, #tpu.memory_space<vmem>>, vector<16x9xf32>,
    %c112_485 = arith.constant 112 : index
    %c118_486 = arith.constant 118 : index
    %404 = vector.load %arg36[%c112_485, %c118_486] : memref<288x580xf32, #tpu.memory_space<vmem>>, vector<16x100xf32>
    tpu.vector_store %arg36[%c112_485, %c118_486], %384 {strides = array<i32>} : memref<288x580xf32, #tpu.memory_space<vmem>>, vector<16x100xf32>,
    %cst_487 = arith.constant 0.000000e+00 : f32
    %405 = vector.broadcast %cst_487 : f32 to vector<16x10xf32>
    %c112_488 = arith.constant 112 : index
    %c218_489 = arith.constant 218 : index
    %406 = vector.load %arg36[%c112_488, %c218_489] : memref<288x580xf32, #tpu.memory_space<vmem>>, vector<16x10xf32>
    tpu.vector_store %arg36[%c112_488, %c218_489], %405 {strides = array<i32>} : memref<288x580xf32, #tpu.memory_space<vmem>>, vector<16x10xf32>,
    %c128_490 = arith.constant 128 : index
    %c117_491 = arith.constant 117 : index
    %407 = vector.load %arg36[%c128_490, %c117_491] : memref<288x580xf32, #tpu.memory_space<vmem>>, vector<16x100xf32>
    tpu.vector_store %arg36[%c128_490, %c117_491], %384 {strides = array<i32>} : memref<288x580xf32, #tpu.memory_space<vmem>>, vector<16x100xf32>,
    %cst_492 = arith.constant 0.000000e+00 : f32
    %408 = vector.broadcast %cst_492 : f32 to vector<16x11xf32>
    %c128_493 = arith.constant 128 : index
    %c217_494 = arith.constant 217 : index
    %409 = vector.load %arg36[%c128_493, %c217_494] : memref<288x580xf32, #tpu.memory_space<vmem>>, vector<16x11xf32>
    tpu.vector_store %arg36[%c128_493, %c217_494], %408 {strides = array<i32>} : memref<288x580xf32, #tpu.memory_space<vmem>>, vector<16x11xf32>,
    %c0_495 = arith.constant 0 : index
    %c128_496 = arith.constant 128 : index
    %410 = vector.load %arg36[%c0_495, %c128_496] : memref<288x580xf32, #tpu.memory_space<vmem>>, vector<144x100xf32>
    %411 = arith.truncf %410 : vector<144x100xf32> to vector<144x100xbf16>
    %c0_497 = arith.constant 0 : index
    %c0_498 = arith.constant 0 : index
    %412 = vector.load %arg18[%c0_497, %c0_498] : memref<16x144xbf16, #tpu.memory_space<vmem>>, vector<16x144xbf16>
    %cst_499 = arith.constant dense<0.000000e+00> : vector<16x100xf32>
    %413 = tpu.matmul %412, %411, %cst_499 {dimension_numbers = #tpu.dot_dimension_numbers<[1], [0], [0], [1], [0, 0, 1, 1], [], []>} : vector<16x144xbf16>, vector<144x100xbf16>, vector<16x100xf32> -> vector<16x100xf32>
    %c0_500 = arith.constant 0 : index
    %c0_501 = arith.constant 0 : index
    %414 = vector.load %arg19[%c0_500, %c0_501] : memref<16x1xf32, #tpu.memory_space<vmem>>, vector<16x1xf32>
    %415 = vector.broadcast %414 : vector<16x1xf32> to vector<16x100xf32>
    %416 = arith.addf %413, %415 : vector<16x100xf32>
    %cst_502 = arith.constant 0.000000e+00 : f32
    %417 = vector.broadcast %cst_502 : f32 to vector<16x100xf32>
    %418 = arith.maximumf %416, %417 : vector<16x100xf32>
    %419 = vector.broadcast %1 : vector<1x100xf32> to vector<16x100xf32>
    %420 = arith.mulf %418, %419 : vector<16x100xf32>
    %cst_503 = arith.constant 0.000000e+00 : f32
    %421 = vector.broadcast %cst_503 : f32 to vector<16x324xf32>
    %c0_504 = arith.constant 0 : index
    %c0_505 = arith.constant 0 : index
    %422 = vector.load %arg37[%c0_504, %c0_505] : memref<32x324xf32, #tpu.memory_space<vmem>>, vector<16x324xf32>
    tpu.vector_store %arg37[%c0_504, %c0_505], %421 {strides = array<i32>} : memref<32x324xf32, #tpu.memory_space<vmem>>, vector<16x324xf32>,
    %423 = vector.extract_strided_slice %420 {offsets = [0, 10], sizes = [16, 10], strides = [1, 1]} : vector<16x100xf32> to vector<16x10xf32>
    %c0_506 = arith.constant 0 : index
    %c0_507 = arith.constant 0 : index
    %424 = vector.load %arg34[%c0_506, %c0_507] : memref<10x18xf32, #tpu.memory_space<vmem>>, vector<10x18xf32>
    %cst_508 = arith.constant dense<0.000000e+00> : vector<16x18xf32>
    %425 = tpu.matmul %423, %424, %cst_508 {dimension_numbers = #tpu.dot_dimension_numbers<[1], [0], [0], [1], [0, 0, 1, 1], [], []>} : vector<16x10xf32>, vector<10x18xf32>, vector<16x18xf32> -> vector<16x18xf32>
    %c0_509 = arith.constant 0 : index
    %c18_510 = arith.constant 18 : index
    %426 = vector.load %arg37[%c0_509, %c18_510] : memref<32x324xf32, #tpu.memory_space<vmem>>, vector<16x18xf32>
    tpu.vector_store %arg37[%c0_509, %c18_510], %425 {strides = array<i32>} : memref<32x324xf32, #tpu.memory_space<vmem>>, vector<16x18xf32>,
    %c0_511 = arith.constant 0 : index
    %c36 = arith.constant 36 : index
    %427 = vector.load %arg37[%c0_511, %c36] : memref<32x324xf32, #tpu.memory_space<vmem>>, vector<16x18xf32>
    tpu.vector_store %arg37[%c0_511, %c36], %425 {strides = array<i32>} : memref<32x324xf32, #tpu.memory_space<vmem>>, vector<16x18xf32>,
    %428 = vector.extract_strided_slice %420 {offsets = [0, 20], sizes = [16, 10], strides = [1, 1]} : vector<16x100xf32> to vector<16x10xf32>
    %c0_512 = arith.constant 0 : index
    %c0_513 = arith.constant 0 : index
    %429 = vector.load %arg34[%c0_512, %c0_513] : memref<10x18xf32, #tpu.memory_space<vmem>>, vector<10x18xf32>
    %cst_514 = arith.constant dense<0.000000e+00> : vector<16x18xf32>
    %430 = tpu.matmul %428, %429, %cst_514 {dimension_numbers = #tpu.dot_dimension_numbers<[1], [0], [0], [1], [0, 0, 1, 1], [], []>} : vector<16x10xf32>, vector<10x18xf32>, vector<16x18xf32> -> vector<16x18xf32>
    %c0_515 = arith.constant 0 : index
    %c54 = arith.constant 54 : index
    %431 = vector.load %arg37[%c0_515, %c54] : memref<32x324xf32, #tpu.memory_space<vmem>>, vector<16x18xf32>
    tpu.vector_store %arg37[%c0_515, %c54], %430 {strides = array<i32>} : memref<32x324xf32, #tpu.memory_space<vmem>>, vector<16x18xf32>,
    %c0_516 = arith.constant 0 : index
    %c72 = arith.constant 72 : index
    %432 = vector.load %arg37[%c0_516, %c72] : memref<32x324xf32, #tpu.memory_space<vmem>>, vector<16x18xf32>
    tpu.vector_store %arg37[%c0_516, %c72], %430 {strides = array<i32>} : memref<32x324xf32, #tpu.memory_space<vmem>>, vector<16x18xf32>,
    %433 = vector.extract_strided_slice %420 {offsets = [0, 30], sizes = [16, 10], strides = [1, 1]} : vector<16x100xf32> to vector<16x10xf32>
    %c0_517 = arith.constant 0 : index
    %c0_518 = arith.constant 0 : index
    %434 = vector.load %arg34[%c0_517, %c0_518] : memref<10x18xf32, #tpu.memory_space<vmem>>, vector<10x18xf32>
    %cst_519 = arith.constant dense<0.000000e+00> : vector<16x18xf32>
    %435 = tpu.matmul %433, %434, %cst_519 {dimension_numbers = #tpu.dot_dimension_numbers<[1], [0], [0], [1], [0, 0, 1, 1], [], []>} : vector<16x10xf32>, vector<10x18xf32>, vector<16x18xf32> -> vector<16x18xf32>
    %c0_520 = arith.constant 0 : index
    %c90 = arith.constant 90 : index
    %436 = vector.load %arg37[%c0_520, %c90] : memref<32x324xf32, #tpu.memory_space<vmem>>, vector<16x18xf32>
    tpu.vector_store %arg37[%c0_520, %c90], %435 {strides = array<i32>} : memref<32x324xf32, #tpu.memory_space<vmem>>, vector<16x18xf32>,
    %c0_521 = arith.constant 0 : index
    %c108 = arith.constant 108 : index
    %437 = vector.load %arg37[%c0_521, %c108] : memref<32x324xf32, #tpu.memory_space<vmem>>, vector<16x18xf32>
    tpu.vector_store %arg37[%c0_521, %c108], %435 {strides = array<i32>} : memref<32x324xf32, #tpu.memory_space<vmem>>, vector<16x18xf32>,
    %438 = vector.extract_strided_slice %420 {offsets = [0, 40], sizes = [16, 10], strides = [1, 1]} : vector<16x100xf32> to vector<16x10xf32>
    %c0_522 = arith.constant 0 : index
    %c0_523 = arith.constant 0 : index
    %439 = vector.load %arg34[%c0_522, %c0_523] : memref<10x18xf32, #tpu.memory_space<vmem>>, vector<10x18xf32>
    %cst_524 = arith.constant dense<0.000000e+00> : vector<16x18xf32>
    %440 = tpu.matmul %438, %439, %cst_524 {dimension_numbers = #tpu.dot_dimension_numbers<[1], [0], [0], [1], [0, 0, 1, 1], [], []>} : vector<16x10xf32>, vector<10x18xf32>, vector<16x18xf32> -> vector<16x18xf32>
    %c0_525 = arith.constant 0 : index
    %c126 = arith.constant 126 : index
    %441 = vector.load %arg37[%c0_525, %c126] : memref<32x324xf32, #tpu.memory_space<vmem>>, vector<16x18xf32>
    tpu.vector_store %arg37[%c0_525, %c126], %440 {strides = array<i32>} : memref<32x324xf32, #tpu.memory_space<vmem>>, vector<16x18xf32>,
    %c0_526 = arith.constant 0 : index
    %c144 = arith.constant 144 : index
    %442 = vector.load %arg37[%c0_526, %c144] : memref<32x324xf32, #tpu.memory_space<vmem>>, vector<16x18xf32>
    tpu.vector_store %arg37[%c0_526, %c144], %440 {strides = array<i32>} : memref<32x324xf32, #tpu.memory_space<vmem>>, vector<16x18xf32>,
    %443 = vector.extract_strided_slice %420 {offsets = [0, 50], sizes = [16, 10], strides = [1, 1]} : vector<16x100xf32> to vector<16x10xf32>
    %c0_527 = arith.constant 0 : index
    %c0_528 = arith.constant 0 : index
    %444 = vector.load %arg34[%c0_527, %c0_528] : memref<10x18xf32, #tpu.memory_space<vmem>>, vector<10x18xf32>
    %cst_529 = arith.constant dense<0.000000e+00> : vector<16x18xf32>
    %445 = tpu.matmul %443, %444, %cst_529 {dimension_numbers = #tpu.dot_dimension_numbers<[1], [0], [0], [1], [0, 0, 1, 1], [], []>} : vector<16x10xf32>, vector<10x18xf32>, vector<16x18xf32> -> vector<16x18xf32>
    %c0_530 = arith.constant 0 : index
    %c162 = arith.constant 162 : index
    %446 = vector.load %arg37[%c0_530, %c162] : memref<32x324xf32, #tpu.memory_space<vmem>>, vector<16x18xf32>
    tpu.vector_store %arg37[%c0_530, %c162], %445 {strides = array<i32>} : memref<32x324xf32, #tpu.memory_space<vmem>>, vector<16x18xf32>,
    %c0_531 = arith.constant 0 : index
    %c180 = arith.constant 180 : index
    %447 = vector.load %arg37[%c0_531, %c180] : memref<32x324xf32, #tpu.memory_space<vmem>>, vector<16x18xf32>
    tpu.vector_store %arg37[%c0_531, %c180], %445 {strides = array<i32>} : memref<32x324xf32, #tpu.memory_space<vmem>>, vector<16x18xf32>,
    %448 = vector.extract_strided_slice %420 {offsets = [0, 60], sizes = [16, 10], strides = [1, 1]} : vector<16x100xf32> to vector<16x10xf32>
    %c0_532 = arith.constant 0 : index
    %c0_533 = arith.constant 0 : index
    %449 = vector.load %arg34[%c0_532, %c0_533] : memref<10x18xf32, #tpu.memory_space<vmem>>, vector<10x18xf32>
    %cst_534 = arith.constant dense<0.000000e+00> : vector<16x18xf32>
    %450 = tpu.matmul %448, %449, %cst_534 {dimension_numbers = #tpu.dot_dimension_numbers<[1], [0], [0], [1], [0, 0, 1, 1], [], []>} : vector<16x10xf32>, vector<10x18xf32>, vector<16x18xf32> -> vector<16x18xf32>
    %c0_535 = arith.constant 0 : index
    %c198 = arith.constant 198 : index
    %451 = vector.load %arg37[%c0_535, %c198] : memref<32x324xf32, #tpu.memory_space<vmem>>, vector<16x18xf32>
    tpu.vector_store %arg37[%c0_535, %c198], %450 {strides = array<i32>} : memref<32x324xf32, #tpu.memory_space<vmem>>, vector<16x18xf32>,
    %c0_536 = arith.constant 0 : index
    %c216 = arith.constant 216 : index
    %452 = vector.load %arg37[%c0_536, %c216] : memref<32x324xf32, #tpu.memory_space<vmem>>, vector<16x18xf32>
    tpu.vector_store %arg37[%c0_536, %c216], %450 {strides = array<i32>} : memref<32x324xf32, #tpu.memory_space<vmem>>, vector<16x18xf32>,
    %453 = vector.extract_strided_slice %420 {offsets = [0, 70], sizes = [16, 10], strides = [1, 1]} : vector<16x100xf32> to vector<16x10xf32>
    %c0_537 = arith.constant 0 : index
    %c0_538 = arith.constant 0 : index
    %454 = vector.load %arg34[%c0_537, %c0_538] : memref<10x18xf32, #tpu.memory_space<vmem>>, vector<10x18xf32>
    %cst_539 = arith.constant dense<0.000000e+00> : vector<16x18xf32>
    %455 = tpu.matmul %453, %454, %cst_539 {dimension_numbers = #tpu.dot_dimension_numbers<[1], [0], [0], [1], [0, 0, 1, 1], [], []>} : vector<16x10xf32>, vector<10x18xf32>, vector<16x18xf32> -> vector<16x18xf32>
    %c0_540 = arith.constant 0 : index
    %c234 = arith.constant 234 : index
    %456 = vector.load %arg37[%c0_540, %c234] : memref<32x324xf32, #tpu.memory_space<vmem>>, vector<16x18xf32>
    tpu.vector_store %arg37[%c0_540, %c234], %455 {strides = array<i32>} : memref<32x324xf32, #tpu.memory_space<vmem>>, vector<16x18xf32>,
    %c0_541 = arith.constant 0 : index
    %c252 = arith.constant 252 : index
    %457 = vector.load %arg37[%c0_541, %c252] : memref<32x324xf32, #tpu.memory_space<vmem>>, vector<16x18xf32>
    tpu.vector_store %arg37[%c0_541, %c252], %455 {strides = array<i32>} : memref<32x324xf32, #tpu.memory_space<vmem>>, vector<16x18xf32>,
    %458 = vector.extract_strided_slice %420 {offsets = [0, 80], sizes = [16, 10], strides = [1, 1]} : vector<16x100xf32> to vector<16x10xf32>
    %c0_542 = arith.constant 0 : index
    %c0_543 = arith.constant 0 : index
    %459 = vector.load %arg34[%c0_542, %c0_543] : memref<10x18xf32, #tpu.memory_space<vmem>>, vector<10x18xf32>
    %cst_544 = arith.constant dense<0.000000e+00> : vector<16x18xf32>
    %460 = tpu.matmul %458, %459, %cst_544 {dimension_numbers = #tpu.dot_dimension_numbers<[1], [0], [0], [1], [0, 0, 1, 1], [], []>} : vector<16x10xf32>, vector<10x18xf32>, vector<16x18xf32> -> vector<16x18xf32>
    %c0_545 = arith.constant 0 : index
    %c270 = arith.constant 270 : index
    %461 = vector.load %arg37[%c0_545, %c270] : memref<32x324xf32, #tpu.memory_space<vmem>>, vector<16x18xf32>
    tpu.vector_store %arg37[%c0_545, %c270], %460 {strides = array<i32>} : memref<32x324xf32, #tpu.memory_space<vmem>>, vector<16x18xf32>,
    %c0_546 = arith.constant 0 : index
    %c288 = arith.constant 288 : index
    %462 = vector.load %arg37[%c0_546, %c288] : memref<32x324xf32, #tpu.memory_space<vmem>>, vector<16x18xf32>
    tpu.vector_store %arg37[%c0_546, %c288], %460 {strides = array<i32>} : memref<32x324xf32, #tpu.memory_space<vmem>>, vector<16x18xf32>,
    %c0_547 = arith.constant 0 : index
    %c0_548 = arith.constant 0 : index
    %463 = vector.load %arg37[%c0_547, %c0_548] : memref<32x324xf32, #tpu.memory_space<vmem>>, vector<16x324xf32>
    %c0_549 = arith.constant 0 : index
    %c147_550 = arith.constant 147 : index
    %464 = vector.load %arg36[%c0_549, %c147_550] : memref<288x580xf32, #tpu.memory_space<vmem>>, vector<16x324xf32>
    tpu.vector_store %arg36[%c0_549, %c147_550], %463 {strides = array<i32>} : memref<288x580xf32, #tpu.memory_space<vmem>>, vector<16x324xf32>,
    %cst_551 = arith.constant 0.000000e+00 : f32
    %465 = vector.broadcast %cst_551 : f32 to vector<16x19xf32>
    %c0_552 = arith.constant 0 : index
    %c128_553 = arith.constant 128 : index
    %466 = vector.load %arg36[%c0_552, %c128_553] : memref<288x580xf32, #tpu.memory_space<vmem>>, vector<16x19xf32>
    tpu.vector_store %arg36[%c0_552, %c128_553], %465 {strides = array<i32>} : memref<288x580xf32, #tpu.memory_space<vmem>>, vector<16x19xf32>,
    %c16_554 = arith.constant 16 : index
    %c146_555 = arith.constant 146 : index
    %467 = vector.load %arg36[%c16_554, %c146_555] : memref<288x580xf32, #tpu.memory_space<vmem>>, vector<16x324xf32>
    tpu.vector_store %arg36[%c16_554, %c146_555], %463 {strides = array<i32>} : memref<288x580xf32, #tpu.memory_space<vmem>>, vector<16x324xf32>,
    %cst_556 = arith.constant 0.000000e+00 : f32
    %468 = vector.broadcast %cst_556 : f32 to vector<16x18xf32>
    %c16_557 = arith.constant 16 : index
    %c128_558 = arith.constant 128 : index
    %469 = vector.load %arg36[%c16_557, %c128_558] : memref<288x580xf32, #tpu.memory_space<vmem>>, vector<16x18xf32>
    tpu.vector_store %arg36[%c16_557, %c128_558], %468 {strides = array<i32>} : memref<288x580xf32, #tpu.memory_space<vmem>>, vector<16x18xf32>,
    %c32_559 = arith.constant 32 : index
    %c145_560 = arith.constant 145 : index
    %470 = vector.load %arg36[%c32_559, %c145_560] : memref<288x580xf32, #tpu.memory_space<vmem>>, vector<16x324xf32>
    tpu.vector_store %arg36[%c32_559, %c145_560], %463 {strides = array<i32>} : memref<288x580xf32, #tpu.memory_space<vmem>>, vector<16x324xf32>,
    %cst_561 = arith.constant 0.000000e+00 : f32
    %471 = vector.broadcast %cst_561 : f32 to vector<16x17xf32>
    %c32_562 = arith.constant 32 : index
    %c128_563 = arith.constant 128 : index
    %472 = vector.load %arg36[%c32_562, %c128_563] : memref<288x580xf32, #tpu.memory_space<vmem>>, vector<16x17xf32>
    tpu.vector_store %arg36[%c32_562, %c128_563], %471 {strides = array<i32>} : memref<288x580xf32, #tpu.memory_space<vmem>>, vector<16x17xf32>,
    %c48_564 = arith.constant 48 : index
    %c129_565 = arith.constant 129 : index
    %473 = vector.load %arg36[%c48_564, %c129_565] : memref<288x580xf32, #tpu.memory_space<vmem>>, vector<16x324xf32>
    tpu.vector_store %arg36[%c48_564, %c129_565], %463 {strides = array<i32>} : memref<288x580xf32, #tpu.memory_space<vmem>>, vector<16x324xf32>,
    %cst_566 = arith.constant 0.000000e+00 : f32
    %474 = vector.broadcast %cst_566 : f32 to vector<16x1xf32>
    %c48_567 = arith.constant 48 : index
    %c128_568 = arith.constant 128 : index
    %475 = vector.load %arg36[%c48_567, %c128_568] : memref<288x580xf32, #tpu.memory_space<vmem>>, vector<16x1xf32>
    tpu.vector_store %arg36[%c48_567, %c128_568], %474 {strides = array<i32>} : memref<288x580xf32, #tpu.memory_space<vmem>>, vector<16x1xf32>,
    %c64_569 = arith.constant 64 : index
    %c128_570 = arith.constant 128 : index
    %476 = vector.load %arg36[%c64_569, %c128_570] : memref<288x580xf32, #tpu.memory_space<vmem>>, vector<16x324xf32>
    tpu.vector_store %arg36[%c64_569, %c128_570], %463 {strides = array<i32>} : memref<288x580xf32, #tpu.memory_space<vmem>>, vector<16x324xf32>,
    %c80_571 = arith.constant 80 : index
    %c127_572 = arith.constant 127 : index
    %477 = vector.load %arg36[%c80_571, %c127_572] : memref<288x580xf32, #tpu.memory_space<vmem>>, vector<16x324xf32>
    tpu.vector_store %arg36[%c80_571, %c127_572], %463 {strides = array<i32>} : memref<288x580xf32, #tpu.memory_space<vmem>>, vector<16x324xf32>,
    %cst_573 = arith.constant 0.000000e+00 : f32
    %478 = vector.broadcast %cst_573 : f32 to vector<16x1xf32>
    %c80_574 = arith.constant 80 : index
    %c451_575 = arith.constant 451 : index
    %479 = vector.load %arg36[%c80_574, %c451_575] : memref<288x580xf32, #tpu.memory_space<vmem>>, vector<16x1xf32>
    tpu.vector_store %arg36[%c80_574, %c451_575], %478 {strides = array<i32>} : memref<288x580xf32, #tpu.memory_space<vmem>>, vector<16x1xf32>,
    %c96_576 = arith.constant 96 : index
    %c111_577 = arith.constant 111 : index
    %480 = vector.load %arg36[%c96_576, %c111_577] : memref<288x580xf32, #tpu.memory_space<vmem>>, vector<16x324xf32>
    tpu.vector_store %arg36[%c96_576, %c111_577], %463 {strides = array<i32>} : memref<288x580xf32, #tpu.memory_space<vmem>>, vector<16x324xf32>,
    %cst_578 = arith.constant 0.000000e+00 : f32
    %481 = vector.broadcast %cst_578 : f32 to vector<16x17xf32>
    %c96_579 = arith.constant 96 : index
    %c435_580 = arith.constant 435 : index
    %482 = vector.load %arg36[%c96_579, %c435_580] : memref<288x580xf32, #tpu.memory_space<vmem>>, vector<16x17xf32>
    tpu.vector_store %arg36[%c96_579, %c435_580], %481 {strides = array<i32>} : memref<288x580xf32, #tpu.memory_space<vmem>>, vector<16x17xf32>,
    %c112_581 = arith.constant 112 : index
    %c110_582 = arith.constant 110 : index
    %483 = vector.load %arg36[%c112_581, %c110_582] : memref<288x580xf32, #tpu.memory_space<vmem>>, vector<16x324xf32>
    tpu.vector_store %arg36[%c112_581, %c110_582], %463 {strides = array<i32>} : memref<288x580xf32, #tpu.memory_space<vmem>>, vector<16x324xf32>,
    %cst_583 = arith.constant 0.000000e+00 : f32
    %484 = vector.broadcast %cst_583 : f32 to vector<16x18xf32>
    %c112_584 = arith.constant 112 : index
    %c434_585 = arith.constant 434 : index
    %485 = vector.load %arg36[%c112_584, %c434_585] : memref<288x580xf32, #tpu.memory_space<vmem>>, vector<16x18xf32>
    tpu.vector_store %arg36[%c112_584, %c434_585], %484 {strides = array<i32>} : memref<288x580xf32, #tpu.memory_space<vmem>>, vector<16x18xf32>,
    %c128_586 = arith.constant 128 : index
    %c109_587 = arith.constant 109 : index
    %486 = vector.load %arg36[%c128_586, %c109_587] : memref<288x580xf32, #tpu.memory_space<vmem>>, vector<16x324xf32>
    tpu.vector_store %arg36[%c128_586, %c109_587], %463 {strides = array<i32>} : memref<288x580xf32, #tpu.memory_space<vmem>>, vector<16x324xf32>,
    %cst_588 = arith.constant 0.000000e+00 : f32
    %487 = vector.broadcast %cst_588 : f32 to vector<16x19xf32>
    %c128_589 = arith.constant 128 : index
    %c433_590 = arith.constant 433 : index
    %488 = vector.load %arg36[%c128_589, %c433_590] : memref<288x580xf32, #tpu.memory_space<vmem>>, vector<16x19xf32>
    tpu.vector_store %arg36[%c128_589, %c433_590], %487 {strides = array<i32>} : memref<288x580xf32, #tpu.memory_space<vmem>>, vector<16x19xf32>,
    %c0_591 = arith.constant 0 : index
    %c128_592 = arith.constant 128 : index
    %489 = vector.load %arg36[%c0_591, %c128_592] : memref<288x580xf32, #tpu.memory_space<vmem>>, vector<144x324xf32>
    %490 = arith.truncf %489 : vector<144x324xf32> to vector<144x324xbf16>
    %c0_593 = arith.constant 0 : index
    %c0_594 = arith.constant 0 : index
    %491 = vector.load %arg20[%c0_593, %c0_594] : memref<8x144xbf16, #tpu.memory_space<vmem>>, vector<8x144xbf16>
    %cst_595 = arith.constant dense<0.000000e+00> : vector<8x324xf32>
    %492 = tpu.matmul %491, %490, %cst_595 {dimension_numbers = #tpu.dot_dimension_numbers<[1], [0], [0], [1], [0, 0, 1, 1], [], []>} : vector<8x144xbf16>, vector<144x324xbf16>, vector<8x324xf32> -> vector<8x324xf32>
    %c0_596 = arith.constant 0 : index
    %c0_597 = arith.constant 0 : index
    %493 = vector.load %arg21[%c0_596, %c0_597] : memref<8x1xf32, #tpu.memory_space<vmem>>, vector<8x1xf32>
    %494 = vector.broadcast %493 : vector<8x1xf32> to vector<8x324xf32>
    %495 = arith.addf %492, %494 : vector<8x324xf32>
    %496 = arith.addf %495, %76 : vector<8x324xf32>
    %cst_598 = arith.constant 0.000000e+00 : f32
    %497 = vector.broadcast %cst_598 : f32 to vector<8x324xf32>
    %498 = arith.maximumf %496, %497 : vector<8x324xf32>
    %499 = vector.broadcast %0 : vector<1x324xf32> to vector<8x324xf32>
    %500 = arith.mulf %498, %499 : vector<8x324xf32>
    %c0_599 = arith.constant 0 : index
    %c147_600 = arith.constant 147 : index
    %501 = vector.load %arg36[%c0_599, %c147_600] : memref<288x580xf32, #tpu.memory_space<vmem>>, vector<8x324xf32>
    tpu.vector_store %arg36[%c0_599, %c147_600], %500 {strides = array<i32>} : memref<288x580xf32, #tpu.memory_space<vmem>>, vector<8x324xf32>,
    %cst_601 = arith.constant 0.000000e+00 : f32
    %502 = vector.broadcast %cst_601 : f32 to vector<8x19xf32>
    %c0_602 = arith.constant 0 : index
    %c128_603 = arith.constant 128 : index
    %503 = vector.load %arg36[%c0_602, %c128_603] : memref<288x580xf32, #tpu.memory_space<vmem>>, vector<8x19xf32>
    tpu.vector_store %arg36[%c0_602, %c128_603], %502 {strides = array<i32>} : memref<288x580xf32, #tpu.memory_space<vmem>>, vector<8x19xf32>,
    %c8_604 = arith.constant 8 : index
    %c146_605 = arith.constant 146 : index
    %504 = vector.load %arg36[%c8_604, %c146_605] : memref<288x580xf32, #tpu.memory_space<vmem>>, vector<8x324xf32>
    tpu.vector_store %arg36[%c8_604, %c146_605], %500 {strides = array<i32>} : memref<288x580xf32, #tpu.memory_space<vmem>>, vector<8x324xf32>,
    %cst_606 = arith.constant 0.000000e+00 : f32
    %505 = vector.broadcast %cst_606 : f32 to vector<8x18xf32>
    %c8_607 = arith.constant 8 : index
    %c128_608 = arith.constant 128 : index
    %506 = vector.load %arg36[%c8_607, %c128_608] : memref<288x580xf32, #tpu.memory_space<vmem>>, vector<8x18xf32>
    tpu.vector_store %arg36[%c8_607, %c128_608], %505 {strides = array<i32>} : memref<288x580xf32, #tpu.memory_space<vmem>>, vector<8x18xf32>,
    %c16_609 = arith.constant 16 : index
    %c145_610 = arith.constant 145 : index
    %507 = vector.load %arg36[%c16_609, %c145_610] : memref<288x580xf32, #tpu.memory_space<vmem>>, vector<8x324xf32>
    tpu.vector_store %arg36[%c16_609, %c145_610], %500 {strides = array<i32>} : memref<288x580xf32, #tpu.memory_space<vmem>>, vector<8x324xf32>,
    %cst_611 = arith.constant 0.000000e+00 : f32
    %508 = vector.broadcast %cst_611 : f32 to vector<8x17xf32>
    %c16_612 = arith.constant 16 : index
    %c128_613 = arith.constant 128 : index
    %509 = vector.load %arg36[%c16_612, %c128_613] : memref<288x580xf32, #tpu.memory_space<vmem>>, vector<8x17xf32>
    tpu.vector_store %arg36[%c16_612, %c128_613], %508 {strides = array<i32>} : memref<288x580xf32, #tpu.memory_space<vmem>>, vector<8x17xf32>,
    %c24_614 = arith.constant 24 : index
    %c129_615 = arith.constant 129 : index
    %510 = vector.load %arg36[%c24_614, %c129_615] : memref<288x580xf32, #tpu.memory_space<vmem>>, vector<8x324xf32>
    tpu.vector_store %arg36[%c24_614, %c129_615], %500 {strides = array<i32>} : memref<288x580xf32, #tpu.memory_space<vmem>>, vector<8x324xf32>,
    %cst_616 = arith.constant 0.000000e+00 : f32
    %511 = vector.broadcast %cst_616 : f32 to vector<8x1xf32>
    %c24_617 = arith.constant 24 : index
    %c128_618 = arith.constant 128 : index
    %512 = vector.load %arg36[%c24_617, %c128_618] : memref<288x580xf32, #tpu.memory_space<vmem>>, vector<8x1xf32>
    tpu.vector_store %arg36[%c24_617, %c128_618], %511 {strides = array<i32>} : memref<288x580xf32, #tpu.memory_space<vmem>>, vector<8x1xf32>,
    %c32_619 = arith.constant 32 : index
    %c128_620 = arith.constant 128 : index
    %513 = vector.load %arg36[%c32_619, %c128_620] : memref<288x580xf32, #tpu.memory_space<vmem>>, vector<8x324xf32>
    tpu.vector_store %arg36[%c32_619, %c128_620], %500 {strides = array<i32>} : memref<288x580xf32, #tpu.memory_space<vmem>>, vector<8x324xf32>,
    %c40_621 = arith.constant 40 : index
    %c127_622 = arith.constant 127 : index
    %514 = vector.load %arg36[%c40_621, %c127_622] : memref<288x580xf32, #tpu.memory_space<vmem>>, vector<8x324xf32>
    tpu.vector_store %arg36[%c40_621, %c127_622], %500 {strides = array<i32>} : memref<288x580xf32, #tpu.memory_space<vmem>>, vector<8x324xf32>,
    %cst_623 = arith.constant 0.000000e+00 : f32
    %515 = vector.broadcast %cst_623 : f32 to vector<8x1xf32>
    %c40_624 = arith.constant 40 : index
    %c451_625 = arith.constant 451 : index
    %516 = vector.load %arg36[%c40_624, %c451_625] : memref<288x580xf32, #tpu.memory_space<vmem>>, vector<8x1xf32>
    tpu.vector_store %arg36[%c40_624, %c451_625], %515 {strides = array<i32>} : memref<288x580xf32, #tpu.memory_space<vmem>>, vector<8x1xf32>,
    %c48_626 = arith.constant 48 : index
    %c111_627 = arith.constant 111 : index
    %517 = vector.load %arg36[%c48_626, %c111_627] : memref<288x580xf32, #tpu.memory_space<vmem>>, vector<8x324xf32>
    tpu.vector_store %arg36[%c48_626, %c111_627], %500 {strides = array<i32>} : memref<288x580xf32, #tpu.memory_space<vmem>>, vector<8x324xf32>,
    %cst_628 = arith.constant 0.000000e+00 : f32
    %518 = vector.broadcast %cst_628 : f32 to vector<8x17xf32>
    %c48_629 = arith.constant 48 : index
    %c435_630 = arith.constant 435 : index
    %519 = vector.load %arg36[%c48_629, %c435_630] : memref<288x580xf32, #tpu.memory_space<vmem>>, vector<8x17xf32>
    tpu.vector_store %arg36[%c48_629, %c435_630], %518 {strides = array<i32>} : memref<288x580xf32, #tpu.memory_space<vmem>>, vector<8x17xf32>,
    %c56_631 = arith.constant 56 : index
    %c110_632 = arith.constant 110 : index
    %520 = vector.load %arg36[%c56_631, %c110_632] : memref<288x580xf32, #tpu.memory_space<vmem>>, vector<8x324xf32>
    tpu.vector_store %arg36[%c56_631, %c110_632], %500 {strides = array<i32>} : memref<288x580xf32, #tpu.memory_space<vmem>>, vector<8x324xf32>,
    %cst_633 = arith.constant 0.000000e+00 : f32
    %521 = vector.broadcast %cst_633 : f32 to vector<8x18xf32>
    %c56_634 = arith.constant 56 : index
    %c434_635 = arith.constant 434 : index
    %522 = vector.load %arg36[%c56_634, %c434_635] : memref<288x580xf32, #tpu.memory_space<vmem>>, vector<8x18xf32>
    tpu.vector_store %arg36[%c56_634, %c434_635], %521 {strides = array<i32>} : memref<288x580xf32, #tpu.memory_space<vmem>>, vector<8x18xf32>,
    %c64_636 = arith.constant 64 : index
    %c109_637 = arith.constant 109 : index
    %523 = vector.load %arg36[%c64_636, %c109_637] : memref<288x580xf32, #tpu.memory_space<vmem>>, vector<8x324xf32>
    tpu.vector_store %arg36[%c64_636, %c109_637], %500 {strides = array<i32>} : memref<288x580xf32, #tpu.memory_space<vmem>>, vector<8x324xf32>,
    %cst_638 = arith.constant 0.000000e+00 : f32
    %524 = vector.broadcast %cst_638 : f32 to vector<8x19xf32>
    %c64_639 = arith.constant 64 : index
    %c433_640 = arith.constant 433 : index
    %525 = vector.load %arg36[%c64_639, %c433_640] : memref<288x580xf32, #tpu.memory_space<vmem>>, vector<8x19xf32>
    tpu.vector_store %arg36[%c64_639, %c433_640], %524 {strides = array<i32>} : memref<288x580xf32, #tpu.memory_space<vmem>>, vector<8x19xf32>,
    %c0_641 = arith.constant 0 : index
    %c128_642 = arith.constant 128 : index
    %526 = vector.load %arg36[%c0_641, %c128_642] : memref<288x580xf32, #tpu.memory_space<vmem>>, vector<72x324xf32>
    %527 = arith.truncf %526 : vector<72x324xf32> to vector<72x324xbf16>
    %c0_643 = arith.constant 0 : index
    %c0_644 = arith.constant 0 : index
    %528 = vector.load %arg22[%c0_643, %c0_644] : memref<8x72xbf16, #tpu.memory_space<vmem>>, vector<8x72xbf16>
    %cst_645 = arith.constant dense<0.000000e+00> : vector<8x324xf32>
    %529 = tpu.matmul %528, %527, %cst_645 {dimension_numbers = #tpu.dot_dimension_numbers<[1], [0], [0], [1], [0, 0, 1, 1], [], []>} : vector<8x72xbf16>, vector<72x324xbf16>, vector<8x324xf32> -> vector<8x324xf32>
    %c0_646 = arith.constant 0 : index
    %c0_647 = arith.constant 0 : index
    %530 = vector.load %arg23[%c0_646, %c0_647] : memref<8x1xf32, #tpu.memory_space<vmem>>, vector<8x1xf32>
    %531 = vector.broadcast %530 : vector<8x1xf32> to vector<8x324xf32>
    %532 = arith.addf %529, %531 : vector<8x324xf32>
    %cst_648 = arith.constant 0.000000e+00 : f32
    %533 = vector.broadcast %cst_648 : f32 to vector<8x324xf32>
    %534 = arith.maximumf %532, %533 : vector<8x324xf32>
    %535 = vector.broadcast %0 : vector<1x324xf32> to vector<8x324xf32>
    %536 = arith.mulf %534, %535 : vector<8x324xf32>
    %c0_649 = arith.constant 0 : index
    %c147_650 = arith.constant 147 : index
    %537 = vector.load %arg36[%c0_649, %c147_650] : memref<288x580xf32, #tpu.memory_space<vmem>>, vector<8x324xf32>
    tpu.vector_store %arg36[%c0_649, %c147_650], %536 {strides = array<i32>} : memref<288x580xf32, #tpu.memory_space<vmem>>, vector<8x324xf32>,
    %cst_651 = arith.constant 0.000000e+00 : f32
    %538 = vector.broadcast %cst_651 : f32 to vector<8x19xf32>
    %c0_652 = arith.constant 0 : index
    %c128_653 = arith.constant 128 : index
    %539 = vector.load %arg36[%c0_652, %c128_653] : memref<288x580xf32, #tpu.memory_space<vmem>>, vector<8x19xf32>
    tpu.vector_store %arg36[%c0_652, %c128_653], %538 {strides = array<i32>} : memref<288x580xf32, #tpu.memory_space<vmem>>, vector<8x19xf32>,
    %c8_654 = arith.constant 8 : index
    %c146_655 = arith.constant 146 : index
    %540 = vector.load %arg36[%c8_654, %c146_655] : memref<288x580xf32, #tpu.memory_space<vmem>>, vector<8x324xf32>
    tpu.vector_store %arg36[%c8_654, %c146_655], %536 {strides = array<i32>} : memref<288x580xf32, #tpu.memory_space<vmem>>, vector<8x324xf32>,
    %cst_656 = arith.constant 0.000000e+00 : f32
    %541 = vector.broadcast %cst_656 : f32 to vector<8x18xf32>
    %c8_657 = arith.constant 8 : index
    %c128_658 = arith.constant 128 : index
    %542 = vector.load %arg36[%c8_657, %c128_658] : memref<288x580xf32, #tpu.memory_space<vmem>>, vector<8x18xf32>
    tpu.vector_store %arg36[%c8_657, %c128_658], %541 {strides = array<i32>} : memref<288x580xf32, #tpu.memory_space<vmem>>, vector<8x18xf32>,
    %c16_659 = arith.constant 16 : index
    %c145_660 = arith.constant 145 : index
    %543 = vector.load %arg36[%c16_659, %c145_660] : memref<288x580xf32, #tpu.memory_space<vmem>>, vector<8x324xf32>
    tpu.vector_store %arg36[%c16_659, %c145_660], %536 {strides = array<i32>} : memref<288x580xf32, #tpu.memory_space<vmem>>, vector<8x324xf32>,
    %cst_661 = arith.constant 0.000000e+00 : f32
    %544 = vector.broadcast %cst_661 : f32 to vector<8x17xf32>
    %c16_662 = arith.constant 16 : index
    %c128_663 = arith.constant 128 : index
    %545 = vector.load %arg36[%c16_662, %c128_663] : memref<288x580xf32, #tpu.memory_space<vmem>>, vector<8x17xf32>
    tpu.vector_store %arg36[%c16_662, %c128_663], %544 {strides = array<i32>} : memref<288x580xf32, #tpu.memory_space<vmem>>, vector<8x17xf32>,
    %c24_664 = arith.constant 24 : index
    %c129_665 = arith.constant 129 : index
    %546 = vector.load %arg36[%c24_664, %c129_665] : memref<288x580xf32, #tpu.memory_space<vmem>>, vector<8x324xf32>
    tpu.vector_store %arg36[%c24_664, %c129_665], %536 {strides = array<i32>} : memref<288x580xf32, #tpu.memory_space<vmem>>, vector<8x324xf32>,
    %cst_666 = arith.constant 0.000000e+00 : f32
    %547 = vector.broadcast %cst_666 : f32 to vector<8x1xf32>
    %c24_667 = arith.constant 24 : index
    %c128_668 = arith.constant 128 : index
    %548 = vector.load %arg36[%c24_667, %c128_668] : memref<288x580xf32, #tpu.memory_space<vmem>>, vector<8x1xf32>
    tpu.vector_store %arg36[%c24_667, %c128_668], %547 {strides = array<i32>} : memref<288x580xf32, #tpu.memory_space<vmem>>, vector<8x1xf32>,
    %c32_669 = arith.constant 32 : index
    %c128_670 = arith.constant 128 : index
    %549 = vector.load %arg36[%c32_669, %c128_670] : memref<288x580xf32, #tpu.memory_space<vmem>>, vector<8x324xf32>
    tpu.vector_store %arg36[%c32_669, %c128_670], %536 {strides = array<i32>} : memref<288x580xf32, #tpu.memory_space<vmem>>, vector<8x324xf32>,
    %c40_671 = arith.constant 40 : index
    %c127_672 = arith.constant 127 : index
    %550 = vector.load %arg36[%c40_671, %c127_672] : memref<288x580xf32, #tpu.memory_space<vmem>>, vector<8x324xf32>
    tpu.vector_store %arg36[%c40_671, %c127_672], %536 {strides = array<i32>} : memref<288x580xf32, #tpu.memory_space<vmem>>, vector<8x324xf32>,
    %cst_673 = arith.constant 0.000000e+00 : f32
    %551 = vector.broadcast %cst_673 : f32 to vector<8x1xf32>
    %c40_674 = arith.constant 40 : index
    %c451_675 = arith.constant 451 : index
    %552 = vector.load %arg36[%c40_674, %c451_675] : memref<288x580xf32, #tpu.memory_space<vmem>>, vector<8x1xf32>
    tpu.vector_store %arg36[%c40_674, %c451_675], %551 {strides = array<i32>} : memref<288x580xf32, #tpu.memory_space<vmem>>, vector<8x1xf32>,
    %c48_676 = arith.constant 48 : index
    %c111_677 = arith.constant 111 : index
    %553 = vector.load %arg36[%c48_676, %c111_677] : memref<288x580xf32, #tpu.memory_space<vmem>>, vector<8x324xf32>
    tpu.vector_store %arg36[%c48_676, %c111_677], %536 {strides = array<i32>} : memref<288x580xf32, #tpu.memory_space<vmem>>, vector<8x324xf32>,
    %cst_678 = arith.constant 0.000000e+00 : f32
    %554 = vector.broadcast %cst_678 : f32 to vector<8x17xf32>
    %c48_679 = arith.constant 48 : index
    %c435_680 = arith.constant 435 : index
    %555 = vector.load %arg36[%c48_679, %c435_680] : memref<288x580xf32, #tpu.memory_space<vmem>>, vector<8x17xf32>
    tpu.vector_store %arg36[%c48_679, %c435_680], %554 {strides = array<i32>} : memref<288x580xf32, #tpu.memory_space<vmem>>, vector<8x17xf32>,
    %c56_681 = arith.constant 56 : index
    %c110_682 = arith.constant 110 : index
    %556 = vector.load %arg36[%c56_681, %c110_682] : memref<288x580xf32, #tpu.memory_space<vmem>>, vector<8x324xf32>
    tpu.vector_store %arg36[%c56_681, %c110_682], %536 {strides = array<i32>} : memref<288x580xf32, #tpu.memory_space<vmem>>, vector<8x324xf32>,
    %cst_683 = arith.constant 0.000000e+00 : f32
    %557 = vector.broadcast %cst_683 : f32 to vector<8x18xf32>
    %c56_684 = arith.constant 56 : index
    %c434_685 = arith.constant 434 : index
    %558 = vector.load %arg36[%c56_684, %c434_685] : memref<288x580xf32, #tpu.memory_space<vmem>>, vector<8x18xf32>
    tpu.vector_store %arg36[%c56_684, %c434_685], %557 {strides = array<i32>} : memref<288x580xf32, #tpu.memory_space<vmem>>, vector<8x18xf32>,
    %c64_686 = arith.constant 64 : index
    %c109_687 = arith.constant 109 : index
    %559 = vector.load %arg36[%c64_686, %c109_687] : memref<288x580xf32, #tpu.memory_space<vmem>>, vector<8x324xf32>
    tpu.vector_store %arg36[%c64_686, %c109_687], %536 {strides = array<i32>} : memref<288x580xf32, #tpu.memory_space<vmem>>, vector<8x324xf32>,
    %cst_688 = arith.constant 0.000000e+00 : f32
    %560 = vector.broadcast %cst_688 : f32 to vector<8x19xf32>
    %c64_689 = arith.constant 64 : index
    %c433_690 = arith.constant 433 : index
    %561 = vector.load %arg36[%c64_689, %c433_690] : memref<288x580xf32, #tpu.memory_space<vmem>>, vector<8x19xf32>
    tpu.vector_store %arg36[%c64_689, %c433_690], %560 {strides = array<i32>} : memref<288x580xf32, #tpu.memory_space<vmem>>, vector<8x19xf32>,
    %c0_691 = arith.constant 0 : index
    %c128_692 = arith.constant 128 : index
    %562 = vector.load %arg36[%c0_691, %c128_692] : memref<288x580xf32, #tpu.memory_space<vmem>>, vector<72x324xf32>
    %563 = arith.truncf %562 : vector<72x324xf32> to vector<72x324xbf16>
    %c0_693 = arith.constant 0 : index
    %c0_694 = arith.constant 0 : index
    %564 = vector.load %arg24[%c0_693, %c0_694] : memref<8x72xbf16, #tpu.memory_space<vmem>>, vector<8x72xbf16>
    %cst_695 = arith.constant dense<0.000000e+00> : vector<8x324xf32>
    %565 = tpu.matmul %564, %563, %cst_695 {dimension_numbers = #tpu.dot_dimension_numbers<[1], [0], [0], [1], [0, 0, 1, 1], [], []>} : vector<8x72xbf16>, vector<72x324xbf16>, vector<8x324xf32> -> vector<8x324xf32>
    %c0_696 = arith.constant 0 : index
    %c0_697 = arith.constant 0 : index
    %566 = vector.load %arg25[%c0_696, %c0_697] : memref<8x1xf32, #tpu.memory_space<vmem>>, vector<8x1xf32>
    %567 = vector.broadcast %566 : vector<8x1xf32> to vector<8x324xf32>
    %568 = arith.addf %565, %567 : vector<8x324xf32>
    %cst_698 = arith.constant 0.000000e+00 : f32
    %569 = vector.broadcast %cst_698 : f32 to vector<8x324xf32>
    %570 = arith.maximumf %568, %569 : vector<8x324xf32>
    %571 = vector.broadcast %0 : vector<1x324xf32> to vector<8x324xf32>
    %572 = arith.mulf %570, %571 : vector<8x324xf32>
    %c0_699 = arith.constant 0 : index
    %c0_700 = arith.constant 0 : index
    %573 = vector.load %arg26[%c0_699, %c0_700] : memref<1x8xbf16, #tpu.memory_space<vmem>>, vector<1x8xbf16>
    %574 = arith.truncf %572 : vector<8x324xf32> to vector<8x324xbf16>
    %cst_701 = arith.constant dense<0.000000e+00> : vector<1x324xf32>
    %575 = tpu.matmul %573, %574, %cst_701 {dimension_numbers = #tpu.dot_dimension_numbers<[1], [0], [0], [1], [0, 0, 1, 1], [], []>} : vector<1x8xbf16>, vector<8x324xbf16>, vector<1x324xf32> -> vector<1x324xf32>
    %c0_702 = arith.constant 0 : index
    %c0_703 = arith.constant 0 : index
    %576 = vector.load %arg27[%c0_702, %c0_703] : memref<1x1xf32, #tpu.memory_space<vmem>>, vector<1x1xf32>
    %577 = vector.broadcast %576 : vector<1x1xf32> to vector<1x324xf32>
    %578 = arith.addf %575, %577 : vector<1x324xf32>
    %c0_704 = arith.constant 0 : index
    %c0_705 = arith.constant 0 : index
    %c0_706 = arith.constant 0 : index
    %579 = vector.load %arg35[%c0_704, %c0_705, %c0_706] : memref<1x1x324xf32, #tpu.memory_space<vmem>>, vector<1x1x324xf32>
    %580 = vector.shape_cast %579 : vector<1x1x324xf32> to vector<1x324xf32>
    %581 = vector.shape_cast %578 : vector<1x324xf32> to vector<1x1x324xf32>
    tpu.vector_store %arg35[%c0_704, %c0_705, %c0_706], %581 {strides = array<i32>} : memref<1x1x324xf32, #tpu.memory_space<vmem>>, vector<1x1x324xf32>,
    return
  }
  func.func @transform_0(%arg0: i32) -> (i32, i32, i32) {
    %c0_i32 = arith.constant 0 : i32
    %c0_i32_0 = arith.constant 0 : i32
    %c0_i32_1 = arith.constant 0 : i32
    return %arg0, %c0_i32, %c0_i32_0 : i32, i32, i32
  }
  func.func @transform_1(%arg0: i32) -> (i32, i32) {
    %c0_i32 = arith.constant 0 : i32
    %c0_i32_0 = arith.constant 0 : i32
    %c0_i32_1 = arith.constant 0 : i32
    return %c0_i32, %c0_i32_0 : i32, i32
  }
  func.func @transform_2(%arg0: i32) -> (i32, i32) {
    %c0_i32 = arith.constant 0 : i32
    %c0_i32_0 = arith.constant 0 : i32
    %c0_i32_1 = arith.constant 0 : i32
    return %c0_i32, %c0_i32_0 : i32, i32
  }
  func.func @transform_3(%arg0: i32) -> (i32, i32) {
    %c0_i32 = arith.constant 0 : i32
    %c0_i32_0 = arith.constant 0 : i32
    %c0_i32_1 = arith.constant 0 : i32
    return %c0_i32, %c0_i32_0 : i32, i32
  }
  func.func @transform_4(%arg0: i32) -> (i32, i32) {
    %c0_i32 = arith.constant 0 : i32
    %c0_i32_0 = arith.constant 0 : i32
    %c0_i32_1 = arith.constant 0 : i32
    return %c0_i32, %c0_i32_0 : i32, i32
  }
  func.func @transform_5(%arg0: i32) -> (i32, i32) {
    %c0_i32 = arith.constant 0 : i32
    %c0_i32_0 = arith.constant 0 : i32
    %c0_i32_1 = arith.constant 0 : i32
    return %c0_i32, %c0_i32_0 : i32, i32
  }
  func.func @transform_6(%arg0: i32) -> (i32, i32) {
    %c0_i32 = arith.constant 0 : i32
    %c0_i32_0 = arith.constant 0 : i32
    %c0_i32_1 = arith.constant 0 : i32
    return %c0_i32, %c0_i32_0 : i32, i32
  }
  func.func @transform_7(%arg0: i32) -> (i32, i32) {
    %c0_i32 = arith.constant 0 : i32
    %c0_i32_0 = arith.constant 0 : i32
    %c0_i32_1 = arith.constant 0 : i32
    return %c0_i32, %c0_i32_0 : i32, i32
  }
  func.func @transform_8(%arg0: i32) -> (i32, i32) {
    %c0_i32 = arith.constant 0 : i32
    %c0_i32_0 = arith.constant 0 : i32
    %c0_i32_1 = arith.constant 0 : i32
    return %c0_i32, %c0_i32_0 : i32, i32
  }
  func.func @transform_9(%arg0: i32) -> (i32, i32) {
    %c0_i32 = arith.constant 0 : i32
    %c0_i32_0 = arith.constant 0 : i32
    %c0_i32_1 = arith.constant 0 : i32
    return %c0_i32, %c0_i32_0 : i32, i32
  }
  func.func @transform_10(%arg0: i32) -> (i32, i32) {
    %c0_i32 = arith.constant 0 : i32
    %c0_i32_0 = arith.constant 0 : i32
    %c0_i32_1 = arith.constant 0 : i32
    return %c0_i32, %c0_i32_0 : i32, i32
  }
  func.func @transform_11(%arg0: i32) -> (i32, i32) {
    %c0_i32 = arith.constant 0 : i32
    %c0_i32_0 = arith.constant 0 : i32
    %c0_i32_1 = arith.constant 0 : i32
    return %c0_i32, %c0_i32_0 : i32, i32
  }
  func.func @transform_12(%arg0: i32) -> (i32, i32) {
    %c0_i32 = arith.constant 0 : i32
    %c0_i32_0 = arith.constant 0 : i32
    %c0_i32_1 = arith.constant 0 : i32
    return %c0_i32, %c0_i32_0 : i32, i32
  }
  func.func @transform_13(%arg0: i32) -> (i32, i32) {
    %c0_i32 = arith.constant 0 : i32
    %c0_i32_0 = arith.constant 0 : i32
    %c0_i32_1 = arith.constant 0 : i32
    return %c0_i32, %c0_i32_0 : i32, i32
  }
  func.func @transform_14(%arg0: i32) -> (i32, i32) {
    %c0_i32 = arith.constant 0 : i32
    %c0_i32_0 = arith.constant 0 : i32
    %c0_i32_1 = arith.constant 0 : i32
    return %c0_i32, %c0_i32_0 : i32, i32
  }
  func.func @transform_15(%arg0: i32) -> (i32, i32) {
    %c0_i32 = arith.constant 0 : i32
    %c0_i32_0 = arith.constant 0 : i32
    %c0_i32_1 = arith.constant 0 : i32
    return %c0_i32, %c0_i32_0 : i32, i32
  }
  func.func @transform_16(%arg0: i32) -> (i32, i32) {
    %c0_i32 = arith.constant 0 : i32
    %c0_i32_0 = arith.constant 0 : i32
    %c0_i32_1 = arith.constant 0 : i32
    return %c0_i32, %c0_i32_0 : i32, i32
  }
  func.func @transform_17(%arg0: i32) -> (i32, i32) {
    %c0_i32 = arith.constant 0 : i32
    %c0_i32_0 = arith.constant 0 : i32
    %c0_i32_1 = arith.constant 0 : i32
    return %c0_i32, %c0_i32_0 : i32, i32
  }
  func.func @transform_18(%arg0: i32) -> (i32, i32) {
    %c0_i32 = arith.constant 0 : i32
    %c0_i32_0 = arith.constant 0 : i32
    %c0_i32_1 = arith.constant 0 : i32
    return %c0_i32, %c0_i32_0 : i32, i32
  }
  func.func @transform_19(%arg0: i32) -> (i32, i32) {
    %c0_i32 = arith.constant 0 : i32
    %c0_i32_0 = arith.constant 0 : i32
    %c0_i32_1 = arith.constant 0 : i32
    return %c0_i32, %c0_i32_0 : i32, i32
  }
  func.func @transform_20(%arg0: i32) -> (i32, i32) {
    %c0_i32 = arith.constant 0 : i32
    %c0_i32_0 = arith.constant 0 : i32
    %c0_i32_1 = arith.constant 0 : i32
    return %c0_i32, %c0_i32_0 : i32, i32
  }
  func.func @transform_21(%arg0: i32) -> (i32, i32) {
    %c0_i32 = arith.constant 0 : i32
    %c0_i32_0 = arith.constant 0 : i32
    %c0_i32_1 = arith.constant 0 : i32
    return %c0_i32, %c0_i32_0 : i32, i32
  }
  func.func @transform_22(%arg0: i32) -> (i32, i32) {
    %c0_i32 = arith.constant 0 : i32
    %c0_i32_0 = arith.constant 0 : i32
    %c0_i32_1 = arith.constant 0 : i32
    return %c0_i32, %c0_i32_0 : i32, i32
  }
  func.func @transform_23(%arg0: i32) -> (i32, i32) {
    %c0_i32 = arith.constant 0 : i32
    %c0_i32_0 = arith.constant 0 : i32
    %c0_i32_1 = arith.constant 0 : i32
    return %c0_i32, %c0_i32_0 : i32, i32
  }
  func.func @transform_24(%arg0: i32) -> (i32, i32) {
    %c0_i32 = arith.constant 0 : i32
    %c0_i32_0 = arith.constant 0 : i32
    %c0_i32_1 = arith.constant 0 : i32
    return %c0_i32, %c0_i32_0 : i32, i32
  }
  func.func @transform_25(%arg0: i32) -> (i32, i32) {
    %c0_i32 = arith.constant 0 : i32
    %c0_i32_0 = arith.constant 0 : i32
    %c0_i32_1 = arith.constant 0 : i32
    return %c0_i32, %c0_i32_0 : i32, i32
  }
  func.func @transform_26(%arg0: i32) -> (i32, i32) {
    %c0_i32 = arith.constant 0 : i32
    %c0_i32_0 = arith.constant 0 : i32
    %c0_i32_1 = arith.constant 0 : i32
    return %c0_i32, %c0_i32_0 : i32, i32
  }
  func.func @transform_27(%arg0: i32) -> (i32, i32) {
    %c0_i32 = arith.constant 0 : i32
    %c0_i32_0 = arith.constant 0 : i32
    %c0_i32_1 = arith.constant 0 : i32
    return %c0_i32, %c0_i32_0 : i32, i32
  }
  func.func @transform_28(%arg0: i32) -> (i32, i32) {
    %c0_i32 = arith.constant 0 : i32
    %c0_i32_0 = arith.constant 0 : i32
    %c0_i32_1 = arith.constant 0 : i32
    return %c0_i32, %c0_i32_0 : i32, i32
  }
  func.func @transform_29(%arg0: i32) -> (i32, i32) {
    %c0_i32 = arith.constant 0 : i32
    %c0_i32_0 = arith.constant 0 : i32
    %c0_i32_1 = arith.constant 0 : i32
    return %c0_i32, %c0_i32_0 : i32, i32
  }
  func.func @transform_30(%arg0: i32) -> (i32, i32) {
    %c0_i32 = arith.constant 0 : i32
    %c0_i32_0 = arith.constant 0 : i32
    %c0_i32_1 = arith.constant 0 : i32
    return %c0_i32, %c0_i32_0 : i32, i32
  }
  func.func @transform_31(%arg0: i32) -> (i32, i32) {
    %c0_i32 = arith.constant 0 : i32
    %c0_i32_0 = arith.constant 0 : i32
    %c0_i32_1 = arith.constant 0 : i32
    return %c0_i32, %c0_i32_0 : i32, i32
  }
  func.func @transform_32(%arg0: i32) -> (i32, i32) {
    %c0_i32 = arith.constant 0 : i32
    %c0_i32_0 = arith.constant 0 : i32
    %c0_i32_1 = arith.constant 0 : i32
    return %c0_i32, %c0_i32_0 : i32, i32
  }
  func.func @transform_33(%arg0: i32) -> (i32, i32) {
    %c0_i32 = arith.constant 0 : i32
    %c0_i32_0 = arith.constant 0 : i32
    %c0_i32_1 = arith.constant 0 : i32
    return %c0_i32, %c0_i32_0 : i32, i32
  }
  func.func @transform_34(%arg0: i32) -> (i32, i32, i32) {
    %c0_i32 = arith.constant 0 : i32
    %c0_i32_0 = arith.constant 0 : i32
    %c0_i32_1 = arith.constant 0 : i32
    return %arg0, %c0_i32, %c0_i32_0 : i32, i32, i32
  }
}

</mosaic_0001>

<bundles_post_ra>
// kernel: pgan_forward_pallas.1
= control target key start
LH: loop header
LB: loop body
LE: loop exit
PB: predicated region body
PF: predicated region fallthrough
CT: control target
= control target key end

     0   :  { %s8119_s6 = smov 1   ;;  %s8120_s10 = smov 2   ;;  %s10242_s0 = inlined_call_operand.smem [shape: u32[35], index: -1, kind: input, shape index: {}] }
   0x1   :  { %s8223_s5 = sld [smem:[%s10242_s0]]   ;;  %s8121_s14 = smov 3  }
   0x2   :  { %s8228_s9 = sld [smem:[%s10242_s0 + %s8119_s6]]   ;;  %s8122_s18 = smov 4  }
   0x3   :  { %s8233_s13 = sld [smem:[%s10242_s0 + %s8120_s10]]   ;;  %s8123_s22 = smov 5  }
   0x4   :  { %s8238_s17 = sld [smem:[%s10242_s0 + %s8121_s14]]   ;;  %s8124_s26 = smov 6  }
   0x5   :  { %s8243_s21 = sld [smem:[%s10242_s0 + %s8122_s18]]   ;;  %s8125_s30 = smov 7  }
   0x6   :  { %s8248_s25 = sld [smem:[%s10242_s0 + %s8123_s22]]   ;;  %s8126_s4 = smov 8  }
   0x7   :  { %10367 = sst [smem:[#allocation5_spill]] %s8223_s5  ;;  %s8127_s10 = smov 9  }
   0x8   :  { %s8253_s29 = sld [smem:[%s10242_s0 + %s8124_s26]]   ;;  %s8128_s15 = smov 10  }
   0x9   :  { %s8258_s3 = sld [smem:[%s10242_s0 + %s8125_s30]]   ;;  %s8129_s20 = smov 11  }
   0xa   :  { %s8263_s8 = sld [smem:[%s10242_s0 + %s8126_s4]]   ;;  %s8130_s26 = smov 12  }
   0xb   :  { %s8268_s14 = sld [smem:[%s10242_s0 + %s8127_s10]]   ;;  %s8131_s1 = smov 13  }
   0xc   :  { %s8273_s19 = sld [smem:[%s10242_s0 + %s8128_s15]]   ;;  %s8132_s7 = smov 14  }
   0xd   :  { %s8278_s24 = sld [smem:[%s10242_s0 + %s8129_s20]]   ;;  %s8133_s15 = smov 15  }
   0xe   :  { %s8283_s30 = sld [smem:[%s10242_s0 + %s8130_s26]]   ;;  %s8134_s22 = smov 16  }
   0xf   :  { %10368 = sst [smem:[#allocation6_spill]] %s8258_s3  ;;  %s8135_s28 = smov 17  }
  0x10   :  { %s8288_s6 = sld [smem:[%s10242_s0 + %s8131_s1]]   ;;  %s8145_s16 = smov 27  }
  0x11   :  { %s8293_s12 = sld [smem:[%s10242_s0 + %s8132_s7]]   ;;  %s8136_s7 = smov 18  }
  0x12   :  { %s8298_s20 = sld [smem:[%s10242_s0 + %s8133_s15]]   ;;  %s8137_s15 = smov 19  }
  0x13   :  { %10369 = sst [smem:[#allocation7_spill]] %s8278_s24  ;;  %s8146_s23 = smov 28  }
  0x14   :  { %10370 = sst [smem:[#allocation8_spill]] %s8283_s30  ;;  %s8147_s1 = smov 29  }
  0x15   :  { %s8303_s27 = sld [smem:[%s10242_s0 + %s8134_s22]]   ;;  %s8138_s22 = smov 20  }
  0x16   :  { %10371 = sst [smem:[#allocation9_spill]] %s8288_s6  ;;  %s8148_s10 = smov 30  }
  0x17   :  { %10372 = sst [smem:[#allocation10_spill]] %s8293_s12 }
  0x18   :  { %10373 = sst [smem:[#allocation11_spill]] %s8298_s20 }
  0x19   :  { %s8308_s4 = sld [smem:[%s10242_s0 + %s8135_s28]]   ;;  %s8139_s28 = smov 21  }
  0x1a   :  { %s8313_s12 = sld [smem:[%s10242_s0 + %s8136_s7]]   ;;  %s8140_s7 = smov 22  }
  0x1b   :  { %10374 = sst [smem:[#allocation12_spill]] %s8303_s27 }
  0x1c   :  { %s8318_s20 = sld [smem:[%s10242_s0 + %s8137_s15]]   ;;  %s8141_s15 = smov 23  }
  0x1d   :  { %s8323_s27 = sld [smem:[%s10242_s0 + %s8138_s22]]   ;;  %s8142_s22 = smov 24  }
  0x1e   :  { %s8371_s6 = sld [smem:[%s10242_s0 + %s8148_s10]]   ;;  %s8152_s10 = smov 34  }
  0x1f   :  { %10375 = sst [smem:[#allocation13_spill]] %s8308_s4 }
  0x20   :  { %10376 = sst [smem:[#allocation14_spill]] %s8313_s12 }
  0x21   :  { %s8328_s4 = sld [smem:[%s10242_s0 + %s8139_s28]]   ;;  %s8143_s28 = smov 25  }
  0x22   :  { %10377 = sst [smem:[#allocation15_spill]] %s8318_s20 }
  0x23   :  { %10378 = sst [smem:[#allocation16_spill]] %s8323_s27 }
  0x24   :  { %s8333_s12 = sld [smem:[%s10242_s0 + %s8140_s7]]   ;;  %s8144_s7 = smov 26  }
  0x25   :  { %s8338_s20 = sld [smem:[%s10242_s0 + %s8141_s15]]   ;;  %s8393_s15 = smov 0  }
  0x26   :  { %s8343_s27 = sld [smem:[%s10242_s0 + %s8142_s22]]  }
  0x27   :  { %10379 = sst [smem:[#allocation17_spill]] %s8328_s4 }
  0x28   :  { %s8348_s4 = sld [smem:[%s10242_s0 + %s8143_s28]]  }
  0x2a   :  { %10380 = sst [smem:[#allocation18_spill]] %s8333_s12 }
  0x2b   :  { %10381 = sst [smem:[#allocation19_spill]] %s8338_s20 }
  0x2c   :  { %10382 = sst [smem:[#allocation20_spill]] %s8343_s27 }
  0x2d   :  { %s7264_s12 = sld [smem:[%s10242_s0 + %s8144_s7]]  }
  0x2e   :  { %10383 = sst [smem:[#allocation21_spill]] %s8348_s4 }
  0x2f   :  { %s8356_s20 = sld [smem:[%s10242_s0 + %s8145_s16]]   ;;  %s8149_s16 = smov 31  }
  0x30   :  { %s8361_s27 = sld [smem:[%s10242_s0 + %s8146_s23]]   ;;  %s8150_s23 = smov 32  }
  0x31   :  { %s8366_s4 = sld [smem:[%s10242_s0 + %s8147_s1]]   ;;  %s8151_s1 = smov 33  }
  0x32   :  { %s8376_s30 = sld [smem:[%s10242_s0 + %s8149_s16]]  }
  0x33   :  { %s8381_s24 = sld [smem:[%s10242_s0 + %s8150_s23]]   ;;  %v74_v0 = vstv %s7264_s12 }
  0x34   :  { %s8386_s7 = sld [smem:[%s10242_s0 + %s8151_s1]]   ;;  %75 = vst [vmem:[#allocation4] sm:$0x1] %v74_v0 }
  0x35   :  { %s8391_s16 = sld [smem:[%s10242_s0 + %s8152_s10]]  }
  0x37   :  { %10384 = sst [smem:[#allocation22_spill]] %s8366_s4 }
  0x38 LB: > { %s10385_s3 = sld [smem:[#allocation6_spill]]  ;;  %s7273_s12 = sadd.s32 4294967295, %s8117_s15   ;;  %s8117_s15 = sphi %s8393_s15, %s81_s15  }
  0x39   : > { %p7277_p0 = scmp.ge.s32.totalorder %s8117_s15, 1  ;;  %p949_p1 = scmp.lt.s32.totalorder %s8117_s15, 3 }
  0x3b   : > { %p950_p2 = pnand %p7277_p0, %p949_p1 }
  0x3c   : > { %p1034_p3 = scmp.lt.s32.totalorder (!%p950_p2), %s7273_s12, 1  ;;  %s10386_s5 = sld [smem:[#allocation5_spill]] (!%p950_p2)  ;;  %v8153_v1 = vmov (!%p950_p2), 0.0   ;;  %vm10297_vm0 = vcmask (!%p950_p2), 556032   ;;  %v8162_v5 = vmov (!%p950_p2), 0   ;;  %vm10306_vm1 = vmmov (!%p950_p2), 0  }
  0x3d   : > { %953 = sbr.rel (%p950_p2) target bundleno = 7452 (0x1d1c), region = 156  ;;  %5145 = vst [vmem:[#allocation3 + $0x8] sm:$0xff] (!%p950_p2), %v8153_v1  ;;  %5148 = vst [vmem:[#allocation3 + $0x20] sm:$0xff] (!%p950_p2), %v8153_v1  ;;  %7592 = vmatprep.subr.bf16.mxu1 (!%p950_p2), %v8153_v1  ;;  %s10328_s18 = smov (!%p950_p2), 18   ;;  %1308 = vmatprep.mubr.bf16.mxu0 (!%p950_p2), %v8162_v5  ;;  %v1256_v6 = vld [vmem:[%s8233_s13] sm:$0xff] (!%p950_p2)  ;;  %vm10261_vm2 = vcmask (!%p950_p2), 1047696  }
  0x3e   : > { %s10276_s23 = smov (!%p950_p2), 19   ;;  %s10272_s22 = smov (!%p950_p2), 17   ;;  %5146 = vst.msk [vmem:[#allocation3 + $0x10] sm:$0xff] (!%p950_p2), %vm10297_vm0, %v8153_v1  ;;  %5149 = vst.msk [vmem:[#allocation3 + $0x28] sm:$0xff] (!%p950_p2), %vm10297_vm0, %v8153_v1  ;;  %7602 = vmatprep.mubr.msk.bf16.mxu1 (!%p950_p2), %vm10306_vm1, %v8153_v1  ;;  %8074 = vset.pattern.permute.xlu0 (!%p950_p2), %v8162_v5  ;;  %vm10269_vm3 = vcmask (!%p950_p2), 1047704   ;;  %vm10260_vm4 = vcmask (!%p950_p2), 146432  }
  0x3f   : > { %s10357_s26 = smov (!%p950_p2), 1   ;;  %s10355_s1 = smov (!%p950_p2), 127   ;;  %8075 = vset.pattern.permute.xlu1 (!%p950_p2), %v8162_v5  ;;  %vm10296_vm5 = vcmask (!%p950_p2), 154624   ;;  %vm10251_vm6 = vcmask (!%p950_p2), 703488   ;;  %vm10257_vm7 = vcmask (!%p950_p2), 711680   ;;  %vm10259_vm8 = vcmask (!%p950_p2), 1047688  }
  0x40   : > { %s10274_s28 = smov (!%p950_p2), 111   ;;  %s10352_s2 = smov (!%p950_p2), 110   ;;  %vm10258_vm9 = vcmask (!%p950_p2), 138240   ;;  %vm10254_vm10 = vcmask (!%p950_p2), 7168   ;;  %vm10256_vm11 = vcmask (!%p950_p2), 1047560   ;;  %vm10252_vm12 = vcmask (!%p950_p2), 564224  }
  0x41   : > { %s10270_s10 = smov (!%p950_p2), 109   ;;  %vm10253_vm13 = vcmask (!%p950_p2), 695296   ;;  %vm10268_vm14 = vcmask (!%p950_p2), 547840   ;;  %vm10255_vm15 = vcmask (!%p950_p2), 1039360   ;;  %s8165_s11 = smov (!%p950_p2), 74  }
  0x44   : > { %s10833_s12 = smov (!%p1034_p3, %s7273_s12), 1 }
  0x45   : > { %s7968_s0 = smul.u32 24, %s10833_s12 }
  0x47   : > { %s1038_s4 = scalar_lea.vmem %s10386_s5, %s7968_s0  ;;  %s8166_s0 = smov 2  }
  0x48   : > { %v8408_v2 = vld [vmem:[%s1038_s4] sm:$0xff]  ;;  %v8410_v3 = vld [vmem:[%s1038_s4 + $0x8] sm:$0xff]  ;;  %v1049_v4 = vld [vmem:[%s1038_s4 + $0x10] sm:$0xff]  ;;  %s8167_s4 = smov 38   ;;  %s10605_s5 = sld [smem:[#allocation13_spill]] }
  0x49   : > { %1071 = vrot.lane.b32.xlu1 %v8408_v2, %s10328_s18  ;;  %1053 = vrot.lane.b32.xlu0 %v8408_v2, %s10276_s23  ;;  %1128 = vst.msk [vmem:[#allocation2 + $0xb8] sm:$0xff] %vm10297_vm0, %v1049_v4 }
  0x4d   : > { %1073 = vrot.lane.b32.xlu1 %v8410_v3, %s10328_s18  ;;  %1055 = vrot.lane.b32.xlu0 %v8410_v3, %s10276_s23 }
  0x50   : > { %v1227_v49 = vld [vmem:[#allocation2 + $0xb8] sm:$0xff] }
  0x51   : > { %1075 = vrot.lane.b32.xlu1 %v1049_v4, %s10328_s18  ;;  %1057 = vrot.lane.b32.xlu0 %v1049_v4, %s10276_s23 }
  0x55   : > { %1091 = vrot.lane.b32.xlu1 %v8410_v3, %s10272_s22  ;;  %1089 = vrot.lane.b32.xlu0 %v8408_v2, %s10272_s22 }
  0x59   : > { %1109 = vrot.lane.b32.xlu1 %v8410_v3, %s10357_s26  ;;  %1107 = vrot.lane.b32.xlu0 %v8408_v2, %s10357_s26 }
  0x5d   : > { %1111 = vrot.lane.b32.xlu1 %v1049_v4, %s10357_s26  ;;  %1093 = vrot.lane.b32.xlu0 %v1049_v4, %s10272_s22 }
  0x61   : > { %1133 = vrot.lane.b32.xlu1 %v1049_v4, %s10355_s1  ;;  %1131 = vrot.lane.b32.xlu0 %v8410_v3, %s10355_s1 }
  0x65   : > { %1152 = vrot.lane.b32.xlu1 %v8410_v3, %s10274_s28  ;;  %1129 = vrot.lane.b32.xlu0 %v8408_v2, %s10355_s1 }
  0x69   : > { %1173 = vrot.lane.b32.xlu1 %v8410_v3, %s10352_s2  ;;  %1154 = vrot.lane.b32.xlu0 %v1049_v4, %s10274_s28 }
  0x6d   : > { %1150 = vrot.lane.b32.xlu1 %v8408_v2, %s10274_s28  ;;  %1175 = vrot.lane.b32.xlu0 %v1049_v4, %s10352_s2 }
  0x71   : > { %1192 = vrot.lane.b32.xlu1 %v8408_v2, %s10270_s10  ;;  %1171 = vrot.lane.b32.xlu0 %v8408_v2, %s10352_s2 }
  0x75   : > { %1196 = vrot.lane.b32.xlu1 %v1049_v4, %s10270_s10  ;;  %1194 = vrot.lane.b32.xlu0 %v8410_v3, %s10270_s10 }
  0x79   : > { %1259 = vperm.xlu0 %8074, %v1256_v6  }
  0xbb   : > { %v1072_v7 = vpop.permute.xlu1 %1071  ;;  %v1054_v8 = vpop.permute.xlu0 %1053 }
  0xbc   : > { %1084 = vst.msk [vmem:[#allocation2 + $0x30] sm:$0xff] %vm10261_vm2, %v1072_v7  ;;  %vm10312_vm2 = vcmask 1043456  }
  0xbd   : > { %1066 = vst.msk [vmem:[#allocation2 + $0x8] sm:$0xff] %vm10269_vm3, %v1054_v8 }
  0xbe   : > { %1088 = vst.msk [vmem:[#allocation2 + $0x30] sm:$0xff] %vm10260_vm4, %v8153_v1 }
  0xbf   : > { %1070 = vst.msk [vmem:[#allocation2 + $0x8] sm:$0xff] %vm10296_vm5, %v8153_v1  ;;  %v1074_v9 = vpop.permute.xlu1 %1073  ;;  %v1056_v10 = vpop.permute.xlu0 %1055 }
  0xc0   : > { %v1078_v11 = vsel %vm10260_vm4, %v1072_v7, %v1074_v9  ;;  %v1060_v12 = vsel %vm10296_vm5, %v1054_v8, %v1056_v10 }
  0xc1   : > { %v1241_v13 = vpack.c.bf16 %v1078_v11, %v1060_v12  ;;  %v1255_v12 = vld [vmem:[%s8228_s9] sm:$0xf] }
  0xc3   : > { %v1076_v14 = vpop.permute.xlu1 %1075  ;;  %v1058_v15 = vpop.permute.xlu0 %1057  ;;  %1276 = vmatprep.subr.bf16.mxu0 %v1241_v13 }
  0xc4   : > { %v1079_v16 = vsel %vm10260_vm4, %v1074_v9, %v1076_v14  ;;  %v1061_v17 = vsel %vm10296_vm5, %v1056_v10, %v1058_v15  ;;  %vm10283_vm4 = vcmask 556424  }
  0xc5   : > { %v1216_v19 = vld [vmem:[#allocation2 + $0x30] sm:$0xff]  ;;  %1087 = vst.msk [vmem:[#allocation2 + $0x40] sm:$0xff] %vm10251_vm6, %v1079_v16  ;;  %vm10265_vm6 = vcmask 556568   ;;  %v1361_v16 = vlaneseq }
  0xc6   : > { %v1213_v18 = vld [vmem:[#allocation2 + $0x8] sm:$0xff]  ;;  %1069 = vst.msk [vmem:[#allocation2 + $0x18] sm:$0xff] %vm10257_vm7, %v1061_v17  ;;  %vm10267_vm7 = vcmask 556432  }
  0xc7   : > { %v1240_v20 = vpack.c.bf16 %v1216_v19, %v1213_v18  ;;  %v1092_v21 = vpop.permute.xlu1 %1091  ;;  %v1090_v22 = vpop.permute.xlu0 %1089  ;;  %v8524_v17 = vshrl.u32 %v1361_v16, 7  ;;  %v1044_v19 = vld [vmem:[%s8356_s20] sm:$0x7] }
  0xc8   : > { %1102 = vst.msk [vmem:[#allocation2 + $0x58] sm:$0xff] %vm10259_vm8, %v1090_v22  ;;  %v1096_v25 = vsel %vm10258_vm9, %v1090_v22, %v1092_v21  ;;  %vm10282_vm8 = vcmask 891904  }
  0xc9   : > { %1277 = vmatpush1.bf16.msra.mxu0 %v1240_v20  ;;  %1106 = vst.msk [vmem:[#allocation2 + $0x58] sm:$0xff] %vm10258_vm9, %v8153_v1  ;;  %v1363_v18 = vsub.s32 0, %v8524_v17 }
  0xcb   : > { %v1110_v23 = vpop.permute.xlu1 %1109  ;;  %v1108_v24 = vpop.permute.xlu0 %1107 }
  0xcc   : > { %v1114_v26 = vsel %vm10254_vm10, %v1108_v24, %v1110_v23  ;;  %1120 = vst.msk [vmem:[#allocation2 + $0x80] sm:$0xff] %vm10256_vm11, %v1108_v24  ;;  %v1218_v28 = vld [vmem:[#allocation2 + $0x40] sm:$0xff]  ;;  %vm10266_vm11 = vcmask 408576  }
  0xcd   : > { %v1215_v27 = vld [vmem:[#allocation2 + $0x18] sm:$0xff]  ;;  %1124 = vst.msk [vmem:[#allocation2 + $0x80] sm:$0xff] %vm10254_vm10, %v8153_v1  ;;  %v1244_v30 = vpack.c.bf16 %v1114_v26, %v1096_v25 }
  0xce   : > { %v1242_v29 = vpack.c.bf16 %v1218_v28, %v1215_v27  ;;  %v1371_v28 = vsub.s32 2, %v8524_v17 }
  0xcf   : > { %v1112_v31 = vpop.permute.xlu1 %1111  ;;  %v1094_v32 = vpop.permute.xlu0 %1093  ;;  %1278 = vmatprep.subr.bf16.mxu0 %v1244_v30 }
  0xd0   : > { %7593 = vmatpush3.bf16.msra.mxu1 %v1242_v29  ;;  %v1115_v33 = vsel %vm10254_vm10, %v1110_v23, %v1112_v31  ;;  %v1097_v34 = vsel %vm10258_vm9, %v1092_v21, %v1094_v32  ;;  %v1219_v35 = vld [vmem:[#allocation2 + $0x58] sm:$0xff]  ;;  %vm10295_vm10 = vcmask 908288   ;;  %vm10262_vm9 = vcmask 400384  }
  0xd1   : > { %7594 = vmatprep.subr.bf16.mxu1 %v8153_v1  ;;  %1123 = vst.msk [vmem:[#allocation2 + $0x90] sm:$0xff] %vm10252_vm12, %v1115_v33  ;;  %vm10263_vm12 = vcmask 416768   ;;  %v8530_v23 = vrot.slane %v1044_v19, %v1363_v18  ;;  %v8537_v31 = vrot.slane %v1044_v19, %v1371_v28 }
  0xd2   : > { %1105 = vst.msk [vmem:[#allocation2 + $0x68] sm:$0xff] %vm10253_vm13, %v1097_v34  ;;  %vm10264_vm13 = vcmask 556440  }
  0xd3   : > { %v1134_v36 = vpop.permute.xlu1 %1133  ;;  %v1132_v37 = vpop.permute.xlu0 %1131 }
  0xd4   : > { %1147 = vst.msk [vmem:[#allocation2 + $0xe0] sm:$0xff] %vm10268_vm14, %v1134_v36  ;;  %v1137_v38 = vsel %vm10255_vm15, %v1132_v37, %v1134_v36  ;;  %v1222_v39 = vld [vmem:[#allocation2 + $0x80] sm:$0xff] }
  0xd5   : > { %1149 = vst.msk [vmem:[#allocation2 + $0xe0] sm:$0xff] %vm10265_vm6, %v8153_v1  ;;  %v1243_v40 = vpack.c.bf16 %v1222_v39, %v1219_v35  ;;  %v1247_v41 = vpack.c.bf16 %v1137_v38, %v8410_v3  ;;  %v1367_v39 = vsub.s32 1, %v8524_v17 }
  0xd7   : > { %v1153_v42 = vpop.permute.xlu1 %1152  ;;  %v1130_v43 = vpop.permute.xlu0 %1129  ;;  %1279 = vmatpush1.bf16.msra.mxu0 %v1243_v40 }
  0xd8   : > { %v1136_v44 = vsel %vm10255_vm15, %v1130_v43, %v1132_v37  ;;  %v1224_v46 = vld [vmem:[#allocation2 + $0x90] sm:$0xff]  ;;  %1280 = vmatprep.subr.bf16.mxu0 %v1247_v41  ;;  %vm10284_vm15 = vcmask 900096   ;;  %v8551_v41 = vrot.slane %v1044_v19, %v1367_v39  ;;  %v1556_v43 = vld [vmem:[%s8243_s21] sm:$0xff] }
  0xd9   : > { %v1221_v45 = vld [vmem:[#allocation2 + $0x68] sm:$0xff]  ;;  %v1246_v48 = vpack.c.bf16 %v1136_v44, %v8408_v2 }
  0xda   : > { %v1245_v47 = vpack.c.bf16 %v1224_v46, %v1221_v45 }
  0xdb   : > { %v1174_v50 = vpop.permute.xlu1 %1173  ;;  %v1155_v51 = vpop.permute.xlu0 %1154  ;;  %1281 = vmatpush1.bf16.msra.mxu0 %v1246_v48 }
  0xdc   : > { %7595 = vmatpush3.bf16.msra.mxu1 %v1245_v47  ;;  %1168 = vst.msk [vmem:[#allocation2 + $0x108] sm:$0xff] %vm10263_vm12, %v1155_v51  ;;  %v1230_v52 = vld [vmem:[#allocation2 + $0xe0] sm:$0xff]  ;;  %v1158_v56 = vsel %vm10295_vm10, %v1153_v42, %v1155_v51 }
  0xdd   : > { %7596 = vmatprep.subr.bf16.mxu1 %v8153_v1  ;;  %1170 = vst.msk [vmem:[#allocation2 + $0x108] sm:$0xff] %vm10264_vm13, %v8153_v1  ;;  %v1248_v53 = vpack.c.bf16 %v1230_v52, %v1227_v49 }
  0xdf   : > { %v1151_v54 = vpop.permute.xlu1 %1150  ;;  %v1176_v55 = vpop.permute.xlu0 %1175 }
  0xe0   : > { %7597 = vmatpush3.bf16.msra.mxu1 %v1248_v53  ;;  %v1179_v57 = vsel %vm10284_vm15, %v1174_v50, %v1176_v55  ;;  %1189 = vst.msk [vmem:[#allocation2 + $0x130] sm:$0xff] %vm10266_vm11, %v1176_v55  ;;  %v1157_v61 = vsel %vm10295_vm10, %v1151_v54, %v1153_v42 }
  0xe1   : > { %7598 = vmatprep.subr.bf16.mxu1 %v8153_v1  ;;  %1191 = vst.msk [vmem:[#allocation2 + $0x130] sm:$0xff] %vm10267_vm7, %v8153_v1  ;;  %v1250_v58 = vpack.c.bf16 %v1179_v57, %v1158_v56 }
  0xe3   : > { %v1193_v59 = vpop.permute.xlu1 %1192  ;;  %v1172_v60 = vpop.permute.xlu0 %1171  ;;  %1282 = vmatprep.subr.bf16.mxu0 %v1250_v58 }
  0xe4   : > { %v1178_v62 = vsel %vm10284_vm15, %v1172_v60, %v1174_v50  ;;  %v1233_v0 = vld [vmem:[#allocation2 + $0x108] sm:$0xff] }
  0xe5   : > { %v1249_v63 = vpack.c.bf16 %v1178_v62, %v1157_v61 }
  0xe7   : > { %v1197_v2 = vpop.permute.xlu1 %1196  ;;  %v1195_v3 = vpop.permute.xlu0 %1194  ;;  %1283 = vmatpush1.bf16.msra.mxu0 %v1249_v63 }
  0xe8   : > { %1210 = vst.msk [vmem:[#allocation2 + $0x158] sm:$0xff] %vm10262_vm9, %v1197_v2  ;;  %v1199_v4 = vsel %vm10282_vm8, %v1193_v59, %v1195_v3  ;;  %v1200_v6 = vsel %vm10282_vm8, %v1195_v3, %v1197_v2  ;;  %v1236_v7 = vld [vmem:[#allocation2 + $0x130] sm:$0xff]  ;;  %vm10311_vm9 = vcmask 588800  }
  0xe9   : > { %1212 = vst.msk [vmem:[#allocation2 + $0x158] sm:$0xff] %vm10283_vm4, %v8153_v1  ;;  %v1251_v8 = vpack.c.bf16 %v1236_v7, %v1233_v0  ;;  %v1253_v9 = vpack.c.bf16 %v1200_v6, %v1200_v6  ;;  %v1252_v10 = vpack.c.bf16 %v1199_v4, %v1199_v4 }
  0xeb   : > { %7599 = vmatpush3.bf16.msra.mxu1 %v1251_v8  ;;  %7279 = vmatprep.subr.msk.bf16.mxu0 %vm10312_vm2, %v1253_v9  ;;  %v1268_v11 = vsel %vm10312_vm2, %v1252_v10, 0 }
  0xec   : > { %7600 = vmatprep.subr.bf16.mxu1 %v8153_v1  ;;  %1285 = vmatpush1.bf16.msra.mxu0 %v1268_v11 }
  0xef   : > { %7280 = vmatmul.mubr.msk.bf16.vlgmr.msra.gmra.mrb[0].mxu0 %vm10311_vm9, %v1255_v12 }
  0xf0   : > { %v1239_v13 = vld [vmem:[#allocation2 + $0x158] sm:$0xff]  ;;  %1606 = vmatprep.mubr.bf16.mxu0 %v8162_v5 }
  0xf1   : > { %v1254_v14 = vpack.c.bf16 %v1239_v13, %v1239_v13 }
  0xf3   : > { %v1274_v15 = vsel %vm10312_vm2, %v1254_v14, 0 }
  0xf4   : > { %7601 = vmatpush3.bf16.msra.mxu1 %v1274_v15 }
  0xf5   : > { %7606 = vmatprep.subr.bf16.mxu1 %v8153_v1 }
  0xf7   : > { %7603 = vmatmul.mubr.msk.bf16.vlgmr.msra.gmra.mrb[0].mxu1 %vm10311_vm9, %v1255_v12 }
  0xf8   : > { %7616 = vmatprep.mubr.msk.bf16.mxu1 %vm10306_vm1, %v8153_v1  ;;  %v1260_v20 = vpop.permute.xlu0 %1259 }
 0x1c2   : > { %v1310_v21 = vpop.f32.mrb[0].mxu0 }
 0x1c3   : > { %v1311_v22 = vadd.f32 %v1310_v21, %v1260_v20  ;;  %v1312_v24 = vpop.f32.mrb[1].mxu0 }
 0x1c4   : > { %v1314_v25 = vpop.f32.mrb[2].mxu0  ;;  %v1313_v38 = vadd.f32 %v1312_v24, %v1260_v20 }
 0x1c5   : > { %v1357_v26 = vmax.f32 %v1311_v22, 0.0  ;;  %v1315_v27 = vpop.f32.mrb[3].mxu0 }
 0x1c6   : > { %v1358_v40 = vmax.f32 %v1313_v38, 0.0 }
 0x1c7   : > { %v8534_v29 = vmul.f32 %v8530_v23, %v1357_v26 }
 0x1c8   : > { %v8558_v42 = vmul.f32 %v8551_v41, %v1358_v40 }
 0x1c9   : > { %1442 = vst [vmem:[#allocation2 + $0xa8] sm:$0xff] %v8534_v29 }
 0x1ca   : > { %v1351_v30 = vpop.f32.mrb[0].mxu1 }
 0x1cb   : > { %v1352_v32 = vadd.f32 %v1351_v30, %v1260_v20  ;;  %v7604_v33 = vpop.f32.mrb[1].mxu1 }
 0x1cc   : > { %v1354_v34 = vpop.f32.mrb[2].mxu1 }
 0x1cd   : > { %v1359_v35 = vmax.f32 %v1352_v32, 0.0  ;;  %v7605_v36 = vpop.f32.mrb[3].mxu1 }
 0x1cf   : > { %v1378_v37 = vmul.f32 %v8537_v31, %v1359_v35 }
 0x1d1   : > { %1444 = vst.msk [vmem:[#allocation2 + $0xb8] sm:$0xff] %vm10297_vm0, %v1378_v37  ;;  %1401 = vrot.lane.b32.xlu1 %v1378_v37, %s10328_s18  ;;  %1386 = vrot.lane.b32.xlu0 %v1378_v37, %s10276_s23  ;;  %vm10340_vm0 = vcmask 80896  }
 0x1d5   : > { %1431 = vrot.lane.b32.xlu1 %v1378_v37, %s10357_s26  ;;  %1416 = vrot.lane.b32.xlu0 %v1378_v37, %s10272_s22 }
 0x1d9   : > { %1449 = vrot.lane.b32.xlu1 %v1378_v37, %s10355_s1  ;;  %1466 = vrot.lane.b32.xlu0 %v1378_v37, %s10274_s28 }
 0x1dd   : > { %1483 = vrot.lane.b32.xlu0 %v1378_v37, %s10352_s2  ;;  %1382 = vrot.lane.b32.xlu1 %v8534_v29, %s10276_s23 }
 0x1e1   : > { %1397 = vrot.lane.b32.xlu0 %v8534_v29, %s10328_s18  ;;  %1462 = vrot.lane.b32.xlu1 %v8534_v29, %s10274_s28 }
 0x1e5   : > { %1412 = vrot.lane.b32.xlu0 %v8534_v29, %s10272_s22  ;;  %1384 = vrot.lane.b32.xlu1 %v8558_v42, %s10276_s23  ;;  %s10289_s23 = smov 60  }
 0x1e9   : > { %1427 = vrot.lane.b32.xlu0 %v8534_v29, %s10357_s26  ;;  %1399 = vrot.lane.b32.xlu1 %v8558_v42, %s10328_s18 }
 0x1ed   : > { %1445 = vrot.lane.b32.xlu0 %v8534_v29, %s10355_s1  ;;  %1414 = vrot.lane.b32.xlu1 %v8558_v42, %s10272_s22  ;;  %s8169_s22 = smov 22  }
 0x1f1   : > { %1447 = vrot.lane.b32.xlu0 %v8558_v42, %s10355_s1  ;;  %1429 = vrot.lane.b32.xlu1 %v8558_v42, %s10357_s26 }
 0x1f5   : > { %1479 = vrot.lane.b32.xlu0 %v8534_v29, %s10352_s2  ;;  %1496 = vrot.lane.b32.xlu1 %v8534_v29, %s10270_s10 }
 0x1f9   : > { %1498 = vrot.lane.b32.xlu0 %v8558_v42, %s10270_s10  ;;  %1464 = vrot.lane.b32.xlu1 %v8558_v42, %s10274_s28  ;;  %s10321_s28 = smov 58  }
 0x1fd   : > { %1559 = vperm.xlu0 %8074, %v1556_v43   ;;  %1481 = vrot.lane.b32.xlu1 %v8558_v42, %s10352_s2  ;;  %v1527_v43 = vld [vmem:[#allocation2 + $0xb8] sm:$0xff] }
 0x201   : > { %1500 = vrot.lane.b32.xlu1 %v1378_v37, %s10270_s10  ;;  %s8168_s10 = smov 94  }
 0x243   : > { %v1402_v44 = vpop.permute.xlu1 %1401  ;;  %v1387_v45 = vpop.permute.xlu0 %1386 }
 0x247   : > { %v1432_v46 = vpop.permute.xlu1 %1431  ;;  %v1417_v47 = vpop.permute.xlu0 %1416 }
 0x24b   : > { %v1450_v48 = vpop.permute.xlu1 %1449  ;;  %v8588_v49 = vpop.permute.xlu0 %1466 }
 0x24c   : > { %1460 = vst.msk [vmem:[#allocation2 + $0xe0] sm:$0xff] %vm10268_vm14, %v1450_v48 }
 0x24d   : > { %1477 = vst.msk [vmem:[#allocation2 + $0x108] sm:$0xff] %vm10263_vm12, %v8588_v49  ;;  %vm10387_vm12 = vcmask 1047696  }
 0x24e   : > { %1461 = vst.msk [vmem:[#allocation2 + $0xe0] sm:$0xff] %vm10265_vm6, %v8153_v1  ;;  %vm10389_vm6 = vcmask 1047688  }
 0x24f   : > { %1478 = vst.msk [vmem:[#allocation2 + $0x108] sm:$0xff] %vm10264_vm13, %v8153_v1  ;;  %v8597_v50 = vpop.permute.xlu0 %1483  ;;  %v1383_v51 = vpop.permute.xlu1 %1382  ;;  %vm10388_vm13 = vcmask 146432  }
 0x250   : > { %1494 = vst.msk [vmem:[#allocation2 + $0x130] sm:$0xff] %vm10266_vm11, %v8597_v50  ;;  %vm10390_vm11 = vcmask 138240   ;;  %vm10393_vm14 = vmmov %vm10388_vm13 }
 0x251   : > { %1393 = vst.msk [vmem:[#allocation2 + $0x8] sm:$0xff] %vm10269_vm3, %v1383_v51  ;;  %vm10395_vm3 = vcmask 703488  }
 0x252   : > { %1495 = vst.msk [vmem:[#allocation2 + $0x130] sm:$0xff] %vm10267_vm7, %v8153_v1  ;;  %vm10391_vm7 = vcmask 711680  }
 0x253   : > { %1396 = vst.msk [vmem:[#allocation2 + $0x8] sm:$0xff] %vm10296_vm5, %v8153_v1  ;;  %v1398_v52 = vpop.permute.xlu0 %1397  ;;  %v1463_v53 = vpop.permute.xlu1 %1462 }
 0x254   : > { %1408 = vst.msk [vmem:[#allocation2 + $0x30] sm:$0xff] %vm10387_vm12, %v1398_v52  ;;  %vm10392_vm12 = vcmask 1047560  }
 0x255   : > { %1411 = vst.msk [vmem:[#allocation2 + $0x30] sm:$0xff] %vm10388_vm13, %v8153_v1  ;;  %v1530_v38 = vld [vmem:[#allocation2 + $0xe0] sm:$0xff] }
 0x257   : > { %v1413_v54 = vpop.permute.xlu0 %1412  ;;  %v1385_v55 = vpop.permute.xlu1 %1384 }
 0x258   : > { %1423 = vst.msk [vmem:[#allocation2 + $0x58] sm:$0xff] %vm10389_vm6, %v1413_v54  ;;  %v1389_v56 = vsel %vm10296_vm5, %v1385_v55, %v1387_v45  ;;  %v1388_v60 = vsel %vm10296_vm5, %v1383_v51, %v1385_v55  ;;  %vm10394_vm6 = vcmask 7168   ;;  %v1555_v55 = vld [vmem:[%s8238_s17] sm:$0xf]  ;;  %vm10315_vm5 = vcmask 908376  }
 0x259   : > { %1426 = vst.msk [vmem:[#allocation2 + $0x58] sm:$0xff] %vm10390_vm11, %v8153_v1  ;;  %v1536_v45 = vld [vmem:[#allocation2 + $0x130] sm:$0xff] }
 0x25a   : > { %1395 = vst.msk [vmem:[#allocation2 + $0x18] sm:$0xff] %vm10391_vm7, %v1389_v56  ;;  %v1513_v57 = vld [vmem:[#allocation2 + $0x8] sm:$0xff]  ;;  %vm10396_vm7 = vmmov %vm10390_vm11  ;;  %vm10397_vm11 = vcmask 695296  }
 0x25b   : > { %v1428_v58 = vpop.permute.xlu0 %1427  ;;  %v1400_v59 = vpop.permute.xlu1 %1399 }
 0x25c   : > { %1438 = vst.msk [vmem:[#allocation2 + $0x80] sm:$0xff] %vm10392_vm12, %v1428_v58  ;;  %v1403_v61 = vsel %vm10393_vm14, %v1398_v52, %v1400_v59  ;;  %v1404_v62 = vsel %vm10388_vm13, %v1400_v59, %v1402_v44  ;;  %v1516_v63 = vld [vmem:[#allocation2 + $0x30] sm:$0xff]  ;;  %vm10398_vm14 = vmmov %vm10396_vm7  ;;  %vm10399_vm12 = vcmask 1039360   ;;  %v1533_v44 = vld [vmem:[#allocation2 + $0x108] sm:$0xff] }
 0x25d   : > { %1441 = vst.msk [vmem:[#allocation2 + $0x80] sm:$0xff] %vm10394_vm6, %v8153_v1  ;;  %v1541_v0 = vpack.c.bf16 %v1403_v61, %v1388_v60  ;;  %v1540_v2 = vpack.c.bf16 %v1516_v63, %v1513_v57  ;;  %vm10400_vm13 = vmmov %vm10399_vm12  ;;  %v1551_v52 = vpack.c.bf16 %v1536_v45, %v1533_v44  ;;  %v1873_v45 = vld [vmem:[%s8371_s6 + $0x10] sm:$0x3] }
 0x25e   : > { %1410 = vst.msk [vmem:[#allocation2 + $0x40] sm:$0xff] %vm10395_vm3, %v1404_v62  ;;  %vm10401_vm3 = vmmov %vm10394_vm6 }
 0x25f   : > { %v1446_v3 = vpop.permute.xlu0 %1445  ;;  %v1415_v4 = vpop.permute.xlu1 %1414  ;;  %1574 = vmatprep.subr.bf16.mxu0 %v1541_v0  ;;  %vm10402_vm6 = vmmov %vm10401_vm3 }
 0x260   : > { %v1419_v6 = vsel %vm10396_vm7, %v1415_v4, %v1417_v47  ;;  %1575 = vmatpush1.bf16.msra.mxu0 %v1540_v2  ;;  %v1519_v7 = vld [vmem:[#allocation2 + $0x58] sm:$0xff]  ;;  %v1418_v8 = vsel %vm10398_vm14, %v1413_v54, %v1415_v4  ;;  %vm10403_vm7 = vcmask 564224   ;;  %vm10405_vm14 = vmmov %vm10399_vm12 }
 0x261   : > { %1425 = vst.msk [vmem:[#allocation2 + $0x68] sm:$0xff] %vm10397_vm11, %v1419_v6  ;;  %v1515_v15 = vld [vmem:[#allocation2 + $0x18] sm:$0xff]  ;;  %vm10404_vm11 = vcmask 400384  }
 0x263   : > { %v1448_v9 = vpop.permute.xlu0 %1447  ;;  %v1430_v10 = vpop.permute.xlu1 %1429 }
 0x264   : > { %v1451_v11 = vsel %vm10399_vm12, %v1446_v3, %v1448_v9  ;;  %v1452_v12 = vsel %vm10400_vm13, %v1448_v9, %v1450_v48  ;;  %v1433_v13 = vsel %vm10401_vm3, %v1428_v58, %v1430_v10  ;;  %v1434_v14 = vsel %vm10402_vm6, %v1430_v10, %v1432_v46  ;;  %v1522_v20 = vld [vmem:[#allocation2 + $0x80] sm:$0xff] }
 0x265   : > { %v1518_v19 = vld [vmem:[#allocation2 + $0x40] sm:$0xff]  ;;  %1458 = vst [vmem:[#allocation2 + $0xd0] sm:$0xff] %v1451_v11  ;;  %1440 = vst.msk [vmem:[#allocation2 + $0x90] sm:$0xff] %vm10403_vm7, %v1434_v14  ;;  %v1544_v22 = vpack.c.bf16 %v1433_v13, %v1418_v8  ;;  %v1543_v24 = vpack.c.bf16 %v1522_v20, %v1519_v7  ;;  %v1547_v27 = vpack.c.bf16 %v1452_v12, %v8558_v42  ;;  %vm10308_vm13 = vcmask 1041408  }
 0x266   : > { %v1542_v21 = vpack.c.bf16 %v1518_v19, %v1515_v15  ;;  %v1546_v28 = vpack.c.bf16 %v1451_v11, %v8534_v29  ;;  %v1548_v46 = vpack.c.bf16 %v1530_v38, %v1527_v43  ;;  %vm10406_vm3 = vcmask 146432  }
 0x267   : > { %v1480_v25 = vpop.permute.xlu0 %1479  ;;  %v1497_v26 = vpop.permute.xlu1 %1496  ;;  %1576 = vmatprep.subr.bf16.mxu0 %v1544_v22  ;;  %vm10407_vm6 = vmmov %vm10406_vm3  ;;  %vm1965_vm7 = vcmask 15360  }
 0x268   : > { %7607 = vmatpush3.bf16.msra.mxu1 %v1542_v21  ;;  %1577 = vmatpush1.bf16.msra.mxu0 %v1543_v24  ;;  %v1521_v35 = vld [vmem:[#allocation2 + $0x68] sm:$0xff] }
 0x269   : > { %7608 = vmatprep.subr.bf16.mxu1 %v8153_v1  ;;  %1578 = vmatprep.subr.bf16.mxu0 %v1547_v27  ;;  %v1697_v27 = vld [vmem:[%s8371_s6] sm:$0xff] }
 0x26b   : > { %v1499_v30 = vpop.permute.xlu0 %1498  ;;  %v1465_v32 = vpop.permute.xlu1 %1464 }
 0x26c   : > { %v1502_v33 = vsel %vm10282_vm8, %v1497_v26, %v1499_v30  ;;  %v1468_v34 = vsel %vm10295_vm10, %v1463_v53, %v1465_v32  ;;  %v1524_v36 = vld [vmem:[#allocation2 + $0x90] sm:$0xff]  ;;  %1579 = vmatpush1.bf16.msra.mxu0 %v1546_v28  ;;  %v1469_v40 = vsel %vm10295_vm10, %v1465_v32, %v8588_v49  ;;  %v1698_v28 = vld [vmem:[%s8371_s6 + $0x8] sm:$0xff]  ;;  %vm10314_vm10 = vcmask 900176  }
 0x26d   : > { %1509 = vst [vmem:[#allocation2 + $0x148] sm:$0xff] %v1502_v33  ;;  %1475 = vst [vmem:[#allocation2 + $0xf8] sm:$0xff] %v1468_v34  ;;  %v1545_v37 = vpack.c.bf16 %v1524_v36, %v1521_v35  ;;  %v1552_v49 = vpack.c.bf16 %v1502_v33, %v1502_v33  ;;  %v8682_v32 = vpack.c.bf16 %v1698_v28, %v1697_v27  ;;  %v1699_v33 = vld [vmem:[%s8371_s6 + $0x10] sm:$0x3] }
 0x26f   : > { %7609 = vmatpush3.bf16.msra.mxu1 %v1545_v37  ;;  %v1482_v39 = vpop.permute.xlu1 %1481  ;;  %v1566_v54 = vsel %vm10312_vm2, %v1552_v49, 0  ;;  %v2050_v49 = vld [vmem:[%s8371_s6 + $0x10] sm:$0x3] }
 0x270   : > { %v1485_v29 = vsel %vm10284_vm15, %v1480_v25, %v1482_v39  ;;  %v1486_v42 = vsel %vm10284_vm15, %v1482_v39, %v8597_v50  ;;  %7610 = vmatprep.subr.bf16.mxu1 %v8153_v1 }
 0x271   : > { %1492 = vst [vmem:[#allocation2 + $0x120] sm:$0xff] %v1485_v29  ;;  %v1550_v47 = vpack.c.bf16 %v1486_v42, %v1469_v40  ;;  %v1549_v48 = vpack.c.bf16 %v1485_v29, %v1468_v34  ;;  %v1787_v34 = vld [vmem:[%s8371_s6 + $0x10] sm:$0x3] }
 0x273   : > { %7611 = vmatpush3.bf16.msra.mxu1 %v1548_v46  ;;  %v1501_v51 = vpop.permute.xlu1 %1500  ;;  %1580 = vmatprep.subr.bf16.mxu0 %v1550_v47  ;;  %v1959_v46 = vld [vmem:[%s8371_s6 + $0x10] sm:$0x3] }
 0x274   : > { %v1503_v53 = vsel %vm10282_vm8, %v1499_v30, %v1501_v51  ;;  %1511 = vst.msk [vmem:[#allocation2 + $0x158] sm:$0xff] %vm10404_vm11, %v1501_v51  ;;  %7612 = vmatprep.subr.bf16.mxu1 %v8153_v1  ;;  %1581 = vmatpush1.bf16.msra.mxu0 %v1549_v48  ;;  %v8164_v30 = vmov 0.0|0.0   ;;  %vm10408_vm11 = vmmov %vm10406_vm3  ;;  %vm10300_vm8 = vcmask 572896  }
 0x275   : > { %1512 = vst.msk [vmem:[#allocation2 + $0x158] sm:$0xff] %vm10283_vm4, %v8153_v1  ;;  %v1553_v50 = vpack.c.bf16 %v1503_v53, %v1503_v53  ;;  %vm10299_vm4 = vcmask 654896  }
 0x277   : > { %7613 = vmatpush3.bf16.msra.mxu1 %v1551_v52  ;;  %7282 = vmatprep.subr.msk.bf16.mxu0 %vm10312_vm2, %v1553_v50  ;;  %v2136_v50 = vld [vmem:[%s8371_s6 + $0x10] sm:$0x3] }
 0x278   : > { %7614 = vmatprep.subr.bf16.mxu1 %v8153_v1  ;;  %1583 = vmatpush1.bf16.msra.mxu0 %v1566_v54  ;;  %v8731_v54 = vld [vmem:[#allocation3 + $0x8] sm:$0xff] }
 0x279   : > { %7872 = vmatprep.subr.bf16.mxu0 %v8164_v30 }
 0x27b   : > { %7283 = vmatmul.mubr.msk.bf16.vlgmr.msra.gmra.mrb[4].mxu0 %vm10311_vm9, %v1555_v55 }
 0x27c   : > { %v1539_v56 = vld [vmem:[#allocation2 + $0x158] sm:$0xff]  ;;  %7626 = vmatprep.mubr.msk.f32.mxu0 %vm10306_vm1, %v8153_v1  ;;  %v1560_v59 = vpop.permute.xlu0 %1559  ;;  %7874 = vmatpush3.bf16.msra.mxu0 %v8682_v32 }
 0x27d   : > { %v1554_v57 = vpack.c.bf16 %v1539_v56, %v1539_v56  ;;  %7624 = vmatprep.subr.mxu0 %v8153_v1  ;;  %v2222_v56 = vld [vmem:[%s8371_s6 + $0x10] sm:$0x3] }
 0x27f   : > { %v1572_v58 = vsel %vm10312_vm2, %v1554_v57, 0  ;;  %v2308_v57 = vld [vmem:[%s8371_s6 + $0x10] sm:$0x3] }
 0x280   : > { %7615 = vmatpush3.bf16.msra.mxu1 %v1572_v58  ;;  %7625 = vmatpush3.msk.msra.mxu0 %vm10308_vm13, %v1699_v33 }
 0x281   : > { %7875 = vmatprep.subr.bf16.mxu1 %v8164_v30  ;;  %7878 = vmatprep.subr.bf16.mxu0 %v8164_v30 }
 0x283   : > { %7617 = vmatmul.mubr.msk.bf16.vlgmr.msra.gmra.mrb[4].mxu1 %vm10311_vm9, %v1555_v55 }
 0x284   : > { %7635 = vmatprep.mubr.msk.f32.mxu1 %vm10306_vm1, %v8153_v1  ;;  %7877 = vmatpush3.bf16.msra.mxu1 %v8682_v32 }
 0x285   : > { %7633 = vmatprep.subr.mxu1 %v8153_v1 }
 0x288   : > { %7634 = vmatpush3.msk.msra.mxu1 %vm10308_vm13, %v1787_v34 }
 0x289   : > { %7881 = vmatprep.subr.bf16.mxu1 %v8164_v30 }
 0x34e   : > { %v1608_v60 = vpop.f32.mrb[4].mxu0 }
 0x34f   : > { %v1609_v61 = vadd.f32 %v1608_v60, %v1560_v59  ;;  %v1610_v62 = vpop.f32.mrb[5].mxu0 }
 0x350   : > { %v1611_v63 = vadd.f32 %v1610_v62, %v1560_v59  ;;  %v1612_v0 = vpop.f32.mrb[6].mxu0 }
 0x351   : > { %v1655_v2 = vmax.f32 %v1609_v61, 0.0  ;;  %v1613_v3 = vpop.f32.mrb[7].mxu0 }
 0x352   : > { %v1656_v4 = vmax.f32 %v1611_v63, 0.0 }
 0x353   : > { %v8657_v6 = vmul.f32 %v1655_v2, %v8530_v23 }
 0x354   : > { %v8660_v7 = vmul.f32 %v1656_v4, %v8551_v41 }
 0x355   : > { %1664 = vrot.lane.b32.xlu1 %v8657_v6, %s10355_s1 }
 0x356   : > { %v1649_v8 = vpop.f32.mrb[4].mxu1  ;;  %1666 = vrot.lane.b32.xlu0 %v8660_v7, %s10355_s1 }
 0x357   : > { %v1650_v9 = vadd.f32 %v1649_v8, %v1560_v59  ;;  %v7618_v10 = vpop.f32.mrb[5].mxu1 }
 0x358   : > { %v1652_v11 = vpop.f32.mrb[6].mxu1 }
 0x359   : > { %v1657_v12 = vmax.f32 %v1650_v9, 0.0  ;;  %v7619_v13 = vpop.f32.mrb[7].mxu1 }
 0x35b   : > { %v8667_v14 = vmul.f32 %v1657_v12, %v8537_v31 }
 0x35d   : > { %1668 = vrot.lane.b32.xlu1 %v8667_v14, %s10355_s1 }
 0x3c7   : > { %v1665_v15 = vpop.permute.xlu1 %1664 }
 0x3c8   : > { %v1667_v19 = vpop.permute.xlu0 %1666 }
 0x3c9   : > { %v1670_v20 = vsel %vm10405_vm14, %v1665_v15, %v1667_v19  ;;  %vm10409_vm14 = vmmov %vm10406_vm3 }
 0x3ca   : > { %v1675_v21 = vmax.f32 %v8657_v6, %v1670_v20 }
 0x3cc   : > { %1681 = vrot.lane.b32.xlu0 %v1675_v21, %s10352_s2 }
 0x3cf   : > { %v1669_v22 = vpop.permute.xlu1 %1668 }
 0x3d0   : > { %v1671_v24 = vsel %vm10399_vm12, %v1667_v19, %v1669_v22  ;;  %v1677_v25 = vmax.f32 %v8667_v14, %v1669_v22  ;;  %vm10410_vm12 = vmmov %vm10406_vm3 }
 0x3d1   : > { %v1676_v26 = vmax.f32 %v8660_v7, %v1671_v24 }
 0x3d2   : > { %1685 = vrot.lane.b32.xlu0 %v1677_v25, %s10352_s2 }
 0x3d3   : > { %1683 = vrot.lane.b32.xlu1 %v1676_v26, %s10352_s2 }
 0x43e   : > { %v1682_v35 = vpop.permute.xlu0 %1681 }
 0x444   : > { %v1686_v39 = vpop.permute.xlu0 %1685 }
 0x445   : > { %v1684_v36 = vpop.permute.xlu1 %1683  ;;  %v1694_v42 = vmax.f32 %v1677_v25, %v1686_v39 }
 0x446   : > { %v1687_v37 = vsel %vm10284_vm15, %v1682_v35, %v1684_v36  ;;  %v1688_v40 = vsel %vm10284_vm15, %v1684_v36, %v1686_v39  ;;  %vm10298_vm15 = vcmask 736896  }
 0x447   : > { %v1692_v38 = vmax.f32 %v1675_v21, %v1687_v37  ;;  %v1693_v29 = vmax.f32 %v1676_v26, %v1688_v40 }
 0x449   : > { %1788 = vrot.lane.b32.xlu0 %v1692_v38, %s8165_s11  ;;  %1701 = vrot.lane.b32.xlu1 %v1692_v38, %s10352_s2  ;;  %s8171_s11 = smov 114  }
 0x44d   : > { %1961 = vrot.lane.b32.xlu0 %v1692_v38, %s8166_s0  ;;  %1874 = vrot.lane.b32.xlu1 %v1692_v38, %s8167_s4  ;;  %s10293_s4 = smov 40  }
 0x451   : > { %2051 = vrot.lane.b32.xlu0 %v1693_v29, %s8168_s10  ;;  %1963 = vrot.lane.b32.xlu1 %v1693_v29, %s8166_s0  ;;  %s10348_s10 = smov 10   ;;  %s10280_s0 = smov 30  }
 0x455   : > { %2223 = vrot.lane.b32.xlu0 %v1693_v29, %s8169_s22  ;;  %2137 = vrot.lane.b32.xlu1 %v1693_v29, %s10321_s28  ;;  %s10278_s22 = smov 20  }
 0x459   : > { %2310 = vrot.lane.b32.xlu1 %v1694_v42, %s8171_s11  ;;  %s10291_s11 = smov 50  }
 0x4bb   : > { %v1789_v43 = vpop.permute.xlu0 %1788  ;;  %v1702_v44 = vpop.permute.xlu1 %1701 }
 0x4bc   : > { %7627 = vmatmul.mubr.msk.f32.vlgmr.msra.gmra.mrb[8].mxu0 %vm10406_vm3, %v1702_v44  ;;  %7636 = vmatmul.mubr.msk.f32.vlgmr.msra.gmra.mrb[8].mxu1 %vm10407_vm6, %v1789_v43  ;;  %vm10411_vm6 = vmmov %vm10406_vm3 }
 0x4bd   : > { %7880 = vmatpush3.bf16.msra.mxu0 %v8682_v32  ;;  %7883 = vmatpush3.bf16.msra.mxu1 %v8682_v32 }
 0x4be   : > { %7642 = vmatprep.subr.mxu0 %v8153_v1  ;;  %7644 = vmatprep.mubr.msk.f32.mxu0 %vm10306_vm1, %v8153_v1 }
 0x4bf   : > { %v1875_v47 = vpop.permute.xlu1 %1874  ;;  %7651 = vmatprep.subr.mxu1 %v8153_v1  ;;  %7653 = vmatprep.mubr.msk.f32.mxu1 %vm10306_vm1, %v8153_v1  ;;  %v1962_v48 = vpop.permute.xlu0 %1961 }
 0x4c1   : > { %7643 = vmatpush3.msk.msra.mxu0 %vm10308_vm13, %v1873_v45  ;;  %7652 = vmatpush3.msk.msra.mxu1 %vm10308_vm13, %v1959_v46 }
 0x4c2   : > { %7645 = vmatmul.mubr.msk.f32.vlgmr.msra.gmra.mrb[10].mxu0 %vm10408_vm11, %v1875_v47  ;;  %7884 = vmatprep.subr.bf16.mxu0 %v8164_v30  ;;  %vm10343_vm11 = vcmask 818176  }
 0x4c3   : > { %7886 = vmatpush3.bf16.msra.mxu0 %v8682_v32  ;;  %v1964_v51 = vpop.permute.xlu1 %1963  ;;  %7887 = vmatprep.subr.bf16.mxu1 %v8164_v30  ;;  %v2052_v53 = vpop.permute.xlu0 %2051  ;;  %1696 = vst.msk [vmem:[#allocation3] sm:$0xff] %vm10343_vm11, %v8731_v54  ;;  %3829 = vst.msk [vmem:[#allocation3 + $0x30] sm:$0xff] %vm10343_vm11, %v8731_v54 }
 0x4c4   : > { %v1966_v52 = vsel %vm1965_vm7, %v1962_v48, %v1964_v51  ;;  %7660 = vmatprep.subr.mxu0 %v8153_v1  ;;  %7662 = vmatprep.mubr.msk.f32.mxu0 %vm10306_vm1, %v8153_v1  ;;  %vm10412_vm7 = vmmov %vm10406_vm3  ;;  %3830 = vst.msk [vmem:[#allocation3 + $0x48] sm:$0xff] %vm10343_vm11, %v8731_v54 }
 0x4c5   : > { %7654 = vmatmul.mubr.msk.f32.vlgmr.msra.gmra.mrb[10].mxu1 %vm10409_vm14, %v1966_v52  ;;  %vm10305_vm14 = vcmask 162896  }
 0x4c6   : > { %7889 = vmatpush3.bf16.msra.mxu1 %v8682_v32  ;;  %7671 = vmatprep.mubr.msk.f32.mxu1 %vm10306_vm1, %v8153_v1 }
 0x4c7   : > { %7661 = vmatpush3.msk.msra.mxu0 %vm10308_vm13, %v2050_v49  ;;  %7669 = vmatprep.subr.mxu1 %v8153_v1  ;;  %v2138_v55 = vpop.permute.xlu1 %2137  ;;  %v2224_v1 = vpop.permute.xlu0 %2223 }
 0x4c8   : > { %7663 = vmatmul.mubr.msk.f32.vlgmr.msra.gmra.mrb[12].mxu0 %vm10410_vm12, %v2052_v53  ;;  %7890 = vmatprep.subr.bf16.mxu0 %v8164_v30  ;;  %vm10304_vm12 = vcmask 244896  }
 0x4c9   : > { %7892 = vmatpush3.bf16.msra.mxu0 %v8682_v32  ;;  %7680 = vmatprep.mubr.msk.f32.mxu0 %vm10306_vm1, %v8731_v54 }
 0x4ca   : > { %7670 = vmatpush3.msk.msra.mxu1 %vm10308_vm13, %v2136_v50  ;;  %7678 = vmatprep.subr.mxu0 %v8731_v54 }
 0x4cb   : > { %7672 = vmatmul.mubr.msk.f32.vlgmr.msra.gmra.mrb[12].mxu1 %vm10406_vm3, %v2138_v55  ;;  %7893 = vmatprep.subr.bf16.mxu1 %v8164_v30  ;;  %v2311_v58 = vpop.permute.xlu1 %2310  ;;  %vm10303_vm3 = vcmask 326896   ;;  %v2474_v30 = vld [vmem:[%s8253_s29] sm:$0xff] }
 0x4cc   : > { %7895 = vmatpush3.bf16.msra.mxu1 %v8682_v32  ;;  %7689 = vmatprep.mubr.msk.f32.mxu1 %vm10306_vm1, %v8731_v54  ;;  %v2475_v32 = vld [vmem:[%s8253_s29 + $0x8] sm:$0xff] }
 0x4cd   : > { %7679 = vmatpush3.msk.msra.mxu0 %vm10308_vm13, %v2222_v56  ;;  %7687 = vmatprep.subr.mxu1 %v8731_v54 }
 0x4ce   : > { %7681 = vmatmul.mubr.msk.f32.vlgmr.msra.gmra.mrb[14].mxu0 %vm10411_vm6, %v2224_v1  ;;  %7692 = vmatprep.subr.bf16.mxu0 %v8731_v54  ;;  %vm10302_vm6 = vcmask 408896   ;;  %v8076_v1 = vld [vmem:[%s8248_s25] sm:$0xff]  }
 0x4cf   : > { %7702 = vmatprep.mubr.msk.bf16.mxu0 %vm10306_vm1, %v8731_v54  ;;  %vm10341_vm1 = vcmask 818968  }
 0x4d0   : > { %7688 = vmatpush3.msk.msra.mxu1 %vm10308_vm13, %v2308_v57  ;;  %vm10336_vm13 = vcmask 736256  }
 0x4d1   : > { %7690 = vmatmul.mubr.msk.f32.vlgmr.msra.gmra.mrb[14].mxu1 %vm10412_vm7, %v2311_v58  ;;  %2694 = vmatprep.subr.bf16.mxu1 %v8162_v5  ;;  %vm10301_vm7 = vcmask 490896  }
 0x58f   : > { %v1775_v59 = vpop.f32.mrb[8].mxu0  ;;  %v1861_v60 = vpop.f32.mrb[8].mxu1 }
 0x590   : > { %v7637_v61 = vpop.f32.mrb[9].mxu1  ;;  %1866 = vrot.lane.b32.xlu1 %v1861_v60, %s10278_s22  ;;  %1780 = vrot.lane.b32.xlu0 %v1775_v59, %s10348_s10  ;;  %v7628_v62 = vpop.f32.mrb[9].mxu0  ;;  %s10287_s22 = smov 70  }
 0x591   : > { %v8818_v62 = vld [vmem:[%s8361_s27] ss:$0 sm:$0xff] }
 0x595   : > { %v1947_v63 = vpop.f32.mrb[10].mxu0 }
 0x596   : > { %1952 = vrot.lane.b32.xlu0 %v1947_v63, %s10280_s0  ;;  %v7646_v0 = vpop.f32.mrb[11].mxu0  ;;  %s10285_s0 = smov 80  }
 0x598   : > { %v2038_v2 = vpop.f32.mrb[10].mxu1 }
 0x599   : > { %2043 = vrot.lane.b32.xlu1 %v2038_v2, %s10293_s4  ;;  %v7655_v3 = vpop.f32.mrb[11].mxu1  ;;  %s10330_s4 = smov 118  }
 0x59b   : > { %v2124_v4 = vpop.f32.mrb[12].mxu0 }
 0x59c   : > { %2129 = vrot.lane.b32.xlu0 %v2124_v4, %s10291_s11  ;;  %v7664_v8 = vpop.f32.mrb[13].mxu0  ;;  %s10317_s11 = smov 117  }
 0x59e   : > { %v2210_v9 = vpop.f32.mrb[12].mxu1 }
 0x59f   : > { %2215 = vrot.lane.b32.xlu1 %v2210_v9, %s10289_s23  ;;  %v7673_v10 = vpop.f32.mrb[13].mxu1  ;;  %s10332_s23 = smov 119  }
 0x5a0   : > { %v2669_v10 = vld [vmem:[%s8263_s8] sm:$0xff] }
 0x5a1   : > { %v2296_v11 = vpop.f32.mrb[14].mxu0 }
 0x5a2   : > { %2301 = vrot.lane.b32.xlu0 %v2296_v11, %s10287_s22  ;;  %v7682_v12 = vpop.f32.mrb[15].mxu0  ;;  %s10319_s22 = smov 9   ;;  %v2670_v11 = vld [vmem:[%s8263_s8 + $0x8] sm:$0xff] }
 0x5a3   : > { %v8077_v12 = vld [vmem:[%s10385_s3 + $0x4] ss:$8 sps:$4 sm:$0xff]  }
 0x5a4   : > { %v2383_v13 = vpop.f32.mrb[14].mxu1 }
 0x5a5   : > { %2388 = vrot.lane.b32.xlu1 %v2383_v13, %s10285_s0  ;;  %v7691_v15 = vpop.f32.mrb[15].mxu1  ;;  %s10345_s0 = smov 11  }
 0x602   : > { %v1781_v19 = vpop.permute.xlu0 %1780  ;;  %v1867_v20 = vpop.permute.xlu1 %1866 }
 0x603   : > { %1784 = vst.msk [vmem:[#allocation3] sm:$0xff] %vm10305_vm14, %v1781_v19  ;;  %vm10338_vm14 = vcmask 818904  }
 0x604   : > { %1870 = vst.msk [vmem:[#allocation3] sm:$0xff] %vm10304_vm12, %v1867_v20  ;;  %vm10342_vm12 = vcmask 809984  }
 0x608   : > { %v1953_v21 = vpop.permute.xlu0 %1952 }
 0x609   : > { %1956 = vst.msk [vmem:[#allocation3] sm:$0xff] %vm10303_vm3, %v1953_v21  ;;  %vm10339_vm3 = vcmask 744448  }
 0x60b   : > { %v2044_v22 = vpop.permute.xlu1 %2043 }
 0x60c   : > { %2047 = vst.msk [vmem:[#allocation3] sm:$0xff] %vm10302_vm6, %v2044_v22  ;;  %vm10413_vm6 = vcmask 7168  }
 0x60e   : > { %v2130_v24 = vpop.permute.xlu0 %2129 }
 0x60f   : > { %2133 = vst.msk [vmem:[#allocation3] sm:$0xff] %vm10301_vm7, %v2130_v24  ;;  %vm10310_vm7 = vcmask 72704  }
 0x611   : > { %v2216_v25 = vpop.permute.xlu1 %2215 }
 0x612   : > { %2219 = vst.msk [vmem:[#allocation3] sm:$0xff] %vm10300_vm8, %v2216_v25  ;;  %vm10337_vm8 = vcmask 891976  }
 0x614   : > { %v2302_v26 = vpop.permute.xlu0 %2301 }
 0x615   : > { %2305 = vst.msk [vmem:[#allocation3] sm:$0xff] %vm10299_vm4, %v2302_v26  ;;  %vm10309_vm4 = vcmask 826376  }
 0x617   : > { %v2389_v27 = vpop.permute.xlu1 %2388 }
 0x618   : > { %2392 = vst.msk [vmem:[#allocation3] sm:$0xff] %vm10298_vm15, %v2389_v27  ;;  %vm10313_vm15 = vcmask 89088  }
 0x61f   : > { %v2393_v28 = vld [vmem:[#allocation3] sm:$0xff] }
 0x620   : > { %2402 = vrot.lane.b32.xlu1 %v2393_v28, %s10348_s10  ;;  %2422 = vst.msk [vmem:[#allocation2 + $0xa8] sm:$0xff] %vm10343_vm11, %v2393_v28  ;;  %2395 = vrot.lane.b32.xlu0 %v2393_v28, %s10345_s0 }
 0x624   : > { %2416 = vrot.lane.b32.xlu1 %v2393_v28, %s10357_s26  ;;  %2409 = vrot.lane.b32.xlu0 %v2393_v28, %s10319_s22 }
 0x627   : > { %v2462_v47 = vld [vmem:[#allocation2 + $0xa8] sm:$0xff] }
 0x628   : > { %2431 = vrot.lane.b32.xlu1 %v2393_v28, %s10332_s23  ;;  %2423 = vrot.lane.b32.xlu0 %v2393_v28, %s10355_s1 }
 0x62c   : > { %2449 = vrot.lane.b32.xlu1 %v2393_v28, %s10317_s11  ;;  %2440 = vrot.lane.b32.xlu0 %v2393_v28, %s10330_s4 }
 0x630   : > { %2478 = vperm.xlu0 %8074, %v2474_v30   ;;  %2483 = vperm.xlu1 %8075, %v2475_v32  }
 0x692   : > { %v2403_v33 = vpop.permute.xlu1 %2402  ;;  %v2396_v34 = vpop.permute.xlu0 %2395 }
 0x693   : > { %2406 = vst.msk [vmem:[#allocation2 + $0x30] sm:$0xff] %vm10314_vm10, %v2403_v33 }
 0x694   : > { %2399 = vst.msk [vmem:[#allocation2 + $0x8] sm:$0xff] %vm10315_vm5, %v2396_v34 }
 0x695   : > { %2408 = vst.msk [vmem:[#allocation2 + $0x30] sm:$0xff] %vm10340_vm0, %v8731_v54 }
 0x696   : > { %2401 = vst.msk [vmem:[#allocation2 + $0x8] sm:$0xff] %vm10313_vm15, %v8731_v54  ;;  %v2417_v35 = vpop.permute.xlu1 %2416  ;;  %v2410_v36 = vpop.permute.xlu0 %2409 }
 0x697   : > { %2420 = vst.msk [vmem:[#allocation2 + $0x80] sm:$0xff] %vm10309_vm4, %v2417_v35  ;;  %vm10327_vm4 = vcmask 818888  }
 0x698   : > { %2413 = vst.msk [vmem:[#allocation2 + $0x58] sm:$0xff] %vm10337_vm8, %v2410_v36 }
 0x699   : > { %2421 = vst.msk [vmem:[#allocation2 + $0x80] sm:$0xff] %vm10413_vm6, %v8731_v54  ;;  %vm10334_vm6 = vcmask 728064  }
 0x69a   : > { %2415 = vst.msk [vmem:[#allocation2 + $0x58] sm:$0xff] %vm10310_vm7, %v8731_v54  ;;  %v2432_v37 = vpop.permute.xlu1 %2431  ;;  %v2424_v38 = vpop.permute.xlu0 %2423  ;;  %vm10335_vm7 = vcmask 818896  }
 0x69b   : > { %2437 = vst.msk [vmem:[#allocation2 + $0xf8] sm:$0xff] %vm10339_vm3, %v2432_v37 }
 0x69c   : > { %2428 = vst.msk [vmem:[#allocation2 + $0xd0] sm:$0xff] %vm10342_vm12, %v2424_v38  ;;  %v2459_v40 = vld [vmem:[#allocation2 + $0x30] sm:$0xff] }
 0x69d   : > { %v2458_v39 = vld [vmem:[#allocation2 + $0x8] sm:$0xff]  ;;  %2439 = vst.msk [vmem:[#allocation2 + $0xf8] sm:$0xff] %vm10338_vm14, %v8731_v54 }
 0x69e   : > { %2430 = vst.msk [vmem:[#allocation2 + $0xd0] sm:$0xff] %vm10341_vm1, %v8731_v54  ;;  %v2467_v29 = vpack.c.bf16 %v2459_v40, %v2458_v39  ;;  %v2450_v42 = vpop.permute.xlu1 %2449  ;;  %v2441_v43 = vpop.permute.xlu0 %2440 }
 0x69f   : > { %2455 = vst.msk [vmem:[#allocation2 + $0x148] sm:$0xff] %vm10334_vm6, %v2450_v42 }
 0x6a0   : > { %7693 = vmatpush3.bf16.msra.mxu0 %v2467_v29  ;;  %2446 = vst.msk [vmem:[#allocation2 + $0x120] sm:$0xff] %vm10336_vm13, %v2441_v43  ;;  %v2461_v45 = vld [vmem:[#allocation2 + $0x80] sm:$0xff] }
 0x6a1   : > { %7694 = vmatprep.subr.bf16.mxu0 %v8731_v54  ;;  %v2460_v44 = vld [vmem:[#allocation2 + $0x58] sm:$0xff]  ;;  %2457 = vst.msk [vmem:[#allocation2 + $0x148] sm:$0xff] %vm10327_vm4, %v8731_v54 }
 0x6a2   : > { %2448 = vst.msk [vmem:[#allocation2 + $0x120] sm:$0xff] %vm10335_vm7, %v8731_v54  ;;  %v2468_v46 = vpack.c.bf16 %v2461_v45, %v2460_v44 }
 0x6a4   : > { %7695 = vmatpush3.bf16.msra.mxu0 %v2468_v46  ;;  %v2464_v52 = vld [vmem:[#allocation2 + $0xf8] sm:$0xff] }
 0x6a5   : > { %7696 = vmatprep.subr.bf16.mxu0 %v8731_v54  ;;  %v2463_v48 = vld [vmem:[#allocation2 + $0xd0] sm:$0xff] }
 0x6a6   : > { %v2469_v51 = vpack.c.bf16 %v2463_v48, %v2462_v47 }
 0x6a8   : > { %7697 = vmatpush3.bf16.msra.mxu0 %v2469_v51  ;;  %v2466_v53 = vld [vmem:[#allocation2 + $0x148] sm:$0xff] }
 0x6a9   : > { %7698 = vmatprep.subr.bf16.mxu0 %v8731_v54  ;;  %v2465_v49 = vld [vmem:[#allocation2 + $0x120] sm:$0xff]  ;;  %v2471_v55 = vpack.c.bf16 %v2466_v53, %v2466_v53 }
 0x6aa   : > { %v2470_v50 = vpack.c.bf16 %v2465_v49, %v2464_v52 }
 0x6ab   : > { %v2495_v56 = vsel %vm10312_vm2, %v2471_v55, 0  ;;  %vm10414_vm2 = vcmask 72704  }
 0x6ac   : > { %7699 = vmatpush3.bf16.msra.mxu0 %v2470_v50 }
 0x6ad   : > { %7700 = vmatprep.subr.bf16.mxu0 %v8731_v54 }
 0x6af   : > { %v2479_v57 = vpop.permute.xlu0 %2478  ;;  %v2484_v59 = vpop.permute.xlu1 %2483 }
 0x6b0   : > { %7701 = vmatpush3.bf16.msra.mxu0 %v2495_v56 }
 0x6b3   : > { %7703 = vmatmul.mubr.msk.bf16.vlgmr.msra.gmra.mrb[16].mxu0 %vm10311_vm9, %v8076_v1  ;;  %vm10316_vm9 = vcmask 130048  }
 0x6b4   : > { %7306 = vmatprep.mubr.msk.bf16.mxu1 %vm10316_vm9, %v8077_v12 }
 0x786   : > { %v2531_v58 = vpop.f32.mrb[16].mxu0 }
 0x787   : > { %v2532_v60 = vadd.f32 %v2531_v58, %v2479_v57  ;;  %v7704_v61 = vpop.f32.mrb[17].mxu0 }
 0x788   : > { %v2534_v63 = vpop.f32.mrb[18].mxu0 }
 0x789   : > { %v2538_v0 = vmax.f32 %v2532_v60, 0.0  ;;  %v2535_v2 = vadd.f32 %v2534_v63, %v2484_v59  ;;  %v7705_v3 = vpop.f32.mrb[19].mxu0 }
 0x78b   : > { %v2546_v4 = vmul.f32 %v8818_v62, %v2538_v0  ;;  %v2539_v8 = vmax.f32 %v2535_v2, 0.0  ;;  %v8079_v0 = vld [vmem:[%s10385_s3] ss:$8 sps:$4 sm:$0xff]   ;;  %s10567_s3 = smov 1  }
 0x78d   : > { %2590 = vst.msk [vmem:[#allocation2 + $0x148] sm:$0xff] %vm10343_vm11, %v2546_v4  ;;  %v2547_v9 = vmul.f32 %v8818_v62, %v2539_v8  ;;  %2550 = vrot.lane.b32.xlu0 %v2546_v4, %s10345_s0 }
 0x78f   : > { %2591 = vst.msk [vmem:[#allocation2 + $0x170] sm:$0xff] %vm10343_vm11, %v2547_v9  ;;  %2552 = vrot.lane.b32.xlu1 %v2547_v9, %s10345_s0  ;;  %s10426_s0 = sld [smem:[#allocation22_spill]] }
 0x791   : > { %2560 = vrot.lane.b32.xlu0 %v2546_v4, %s10348_s10 }
 0x793   : > { %2562 = vrot.lane.b32.xlu1 %v2547_v9, %s10348_s10  ;;  %s10429_s10 = sld [smem:[#allocation8_spill]] }
 0x794   : > { %v2648_v47 = vld [vmem:[#allocation2 + $0x148] sm:$0xff] }
 0x795   : > { %2570 = vrot.lane.b32.xlu0 %v2546_v4, %s10319_s22 }
 0x796   : > { %v2649_v45 = vld [vmem:[#allocation2 + $0x170] sm:$0xff] }
 0x797   : > { %2572 = vrot.lane.b32.xlu1 %v2547_v9, %s10319_s22  ;;  %v2662_v49 = vpack.c.bf16 %v2649_v45, %v2648_v47  ;;  %s10323_s22 = smov 78  }
 0x799   : > { %2580 = vrot.lane.b32.xlu0 %v2546_v4, %s10357_s26 }
 0x79b   : > { %2582 = vrot.lane.b32.xlu1 %v2547_v9, %s10357_s26 }
 0x79d   : > { %2592 = vrot.lane.b32.xlu0 %v2546_v4, %s10355_s1 }
 0x79f   : > { %2594 = vrot.lane.b32.xlu1 %v2547_v9, %s10355_s1 }
 0x7a1   : > { %2604 = vrot.lane.b32.xlu0 %v2546_v4, %s10332_s23 }
 0x7a3   : > { %2606 = vrot.lane.b32.xlu1 %v2547_v9, %s10332_s23  ;;  %s8195_s23 = smov 121  }
 0x7a5   : > { %2616 = vrot.lane.b32.xlu0 %v2546_v4, %s10330_s4 }
 0x7a7   : > { %2618 = vrot.lane.b32.xlu1 %v2547_v9, %s10330_s4 }
 0x7a9   : > { %2628 = vrot.lane.b32.xlu0 %v2546_v4, %s10317_s11 }
 0x7ab   : > { %2630 = vrot.lane.b32.xlu1 %v2547_v9, %s10317_s11  ;;  %s10325_s11 = smov 98  }
 0x7ad   : > { %2673 = vperm.xlu0 %8074, %v2669_v10  }
 0x7af   : > { %2678 = vperm.xlu1 %8075, %v2670_v11  }
 0x7ff   : > { %v2551_v13 = vpop.permute.xlu0 %2550 }
 0x800   : > { %2556 = vst.msk [vmem:[#allocation2 + $0x8] sm:$0xff] %vm10315_vm5, %v2551_v13 }
 0x801   : > { %2558 = vst.msk [vmem:[#allocation2 + $0x8] sm:$0xff] %vm10313_vm15, %v8731_v54  ;;  %v2553_v15 = vpop.permute.xlu1 %2552 }
 0x802   : > { %2557 = vst.msk [vmem:[#allocation2 + $0x30] sm:$0xff] %vm10315_vm5, %v2553_v15  ;;  %vm10417_vm5 = vcmask 7168  }
 0x803   : > { %2559 = vst.msk [vmem:[#allocation2 + $0x30] sm:$0xff] %vm10313_vm15, %v8731_v54  ;;  %v2561_v19 = vpop.permute.xlu0 %2560  ;;  %vm10415_vm15 = vmmov %vm10414_vm2 }
 0x804   : > { %2566 = vst.msk [vmem:[#allocation2 + $0x58] sm:$0xff] %vm10314_vm10, %v2561_v19 }
 0x805   : > { %2568 = vst.msk [vmem:[#allocation2 + $0x58] sm:$0xff] %vm10340_vm0, %v8731_v54  ;;  %v2563_v20 = vpop.permute.xlu1 %2562 }
 0x806   : > { %2567 = vst.msk [vmem:[#allocation2 + $0x80] sm:$0xff] %vm10314_vm10, %v2563_v20  ;;  %vm10416_vm10 = vcmask 826376  }
 0x807   : > { %2569 = vst.msk [vmem:[#allocation2 + $0x80] sm:$0xff] %vm10340_vm0, %v8731_v54  ;;  %v2571_v21 = vpop.permute.xlu0 %2570  ;;  %vm10418_vm9 = vmmov %vm10416_vm10 }
 0x808   : > { %2576 = vst.msk [vmem:[#allocation2 + $0xa8] sm:$0xff] %vm10337_vm8, %v2571_v21  ;;  %v2640_v22 = vld [vmem:[#allocation2 + $0x8] sm:$0xff] }
 0x809   : > { %2578 = vst.msk [vmem:[#allocation2 + $0xa8] sm:$0xff] %vm10414_vm2, %v8731_v54  ;;  %v2573_v24 = vpop.permute.xlu1 %2572  ;;  %vm10419_vm2 = vmmov %vm10417_vm5 }
 0x80a   : > { %2577 = vst.msk [vmem:[#allocation2 + $0xd0] sm:$0xff] %vm10337_vm8, %v2573_v24  ;;  %v2641_v25 = vld [vmem:[#allocation2 + $0x30] sm:$0xff]  ;;  %vm10424_vm8 = vcmask 7168  }
 0x80b   : > { %2579 = vst.msk [vmem:[#allocation2 + $0xd0] sm:$0xff] %vm10415_vm15, %v8731_v54  ;;  %v2581_v26 = vpop.permute.xlu0 %2580  ;;  %v2658_v27 = vpack.c.bf16 %v2641_v25, %v2640_v22  ;;  %vm2759_vm15 = vcmask 293888  }
 0x80c   : > { %2586 = vst.msk [vmem:[#allocation2 + $0xf8] sm:$0xff] %vm10416_vm10, %v2581_v26  ;;  %v2642_v28 = vld [vmem:[#allocation2 + $0x58] sm:$0xff]  ;;  %v2762_v26 = vld [vmem:[%s8376_s30] sm:$0xff] }
 0x80d   : > { %2588 = vst.msk [vmem:[#allocation2 + $0xf8] sm:$0xff] %vm10417_vm5, %v8731_v54  ;;  %2695 = vmatpush1.bf16.msra.mxu1 %v2658_v27  ;;  %v2583_v30 = vpop.permute.xlu1 %2582  ;;  %vm8185_vm5 = vmmov 1   ;;  %v2763_v27 = vld [vmem:[%s8376_s30 + $0x8] sm:$0x3] }
 0x80e   : > { %2587 = vst.msk [vmem:[#allocation2 + $0x120] sm:$0xff] %vm10418_vm9, %v2583_v30  ;;  %2696 = vmatprep.subr.bf16.mxu1 %v8162_v5  ;;  %v2643_v32 = vld [vmem:[#allocation2 + $0x80] sm:$0xff]  ;;  %vm10420_vm9 = vcmask 1041408   ;;  %v2864_v30 = vld [vmem:[%s8376_s30 + $0x8] sm:$0x3] }
 0x80f   : > { %2589 = vst.msk [vmem:[#allocation2 + $0x120] sm:$0xff] %vm10419_vm2, %v8731_v54  ;;  %v2593_v33 = vpop.permute.xlu0 %2592  ;;  %v2659_v34 = vpack.c.bf16 %v2643_v32, %v2642_v28  ;;  %vm8917_vm10 = vmpackc.low %vm10420_vm9, %vm8185_vm5  ;;  %v7896_v28 = vpack.c.bf16 %v2763_v27, %v2762_v26  ;;  %v7902_v32 = vpack.c.bf16 %v2864_v30, %v2762_v26  ;;  %vm2860_vm2 = vcmask 97328  }
 0x810   : > { %2599 = vst.msk [vmem:[#allocation2 + $0x198] sm:$0xff] %vm10342_vm12, %v2593_v33  ;;  %v2644_v35 = vld [vmem:[#allocation2 + $0xa8] sm:$0xff]  ;;  %vm2959_vm5 = vcmask 146528   ;;  %vm3058_vm9 = vcmask 195728  }
 0x811   : > { %2602 = vst.msk [vmem:[#allocation2 + $0x198] sm:$0xff] %vm10341_vm1, %v8731_v54  ;;  %2697 = vmatpush1.bf16.msra.mxu1 %v2659_v34  ;;  %v2595_v36 = vpop.permute.xlu1 %2594  ;;  %7898 = vmatprep.subr.msk.bf16.mxu0 %vm8917_vm10, %v7896_v28 }
 0x812   : > { %2601 = vst.msk [vmem:[#allocation2 + $0x1c0] sm:$0xff] %vm10342_vm12, %v2595_v36  ;;  %2698 = vmatprep.subr.bf16.mxu1 %v8162_v5  ;;  %v2645_v37 = vld [vmem:[#allocation2 + $0xd0] sm:$0xff]  ;;  %7901 = vmatpush3.bf16.msk.msra.mxu0 %vm8917_vm10, %v7896_v28  ;;  %vm3254_vm12 = vcmask 294128  }
 0x813   : > { %2603 = vst.msk [vmem:[#allocation2 + $0x1c0] sm:$0xff] %vm10341_vm1, %v8731_v54  ;;  %v2605_v38 = vpop.permute.xlu0 %2604  ;;  %v2660_v39 = vpack.c.bf16 %v2645_v37, %v2644_v35  ;;  %7904 = vmatprep.subr.msk.bf16.mxu0 %vm8917_vm10, %v7902_v32  ;;  %v2963_v37 = vld [vmem:[%s8376_s30 + $0x8] sm:$0x3]  ;;  %vm3250_vm1 = vcmask 244736  }
 0x814   : > { %2611 = vst.msk [vmem:[#allocation2 + $0x1e8] sm:$0xff] %vm10339_vm3, %v2605_v38  ;;  %v2646_v40 = vld [vmem:[#allocation2 + $0xf8] sm:$0xff] }
 0x815   : > { %2614 = vst.msk [vmem:[#allocation2 + $0x1e8] sm:$0xff] %vm10338_vm14, %v8731_v54  ;;  %2699 = vmatpush1.bf16.msra.mxu1 %v2660_v39  ;;  %v2607_v29 = vpop.permute.xlu1 %2606  ;;  %v7908_v39 = vpack.c.bf16 %v2963_v37, %v2762_v26 }
 0x816   : > { %2613 = vst.msk [vmem:[#allocation2 + $0x210] sm:$0xff] %vm10339_vm3, %v2607_v29  ;;  %2700 = vmatprep.subr.bf16.mxu1 %v8162_v5  ;;  %v2647_v42 = vld [vmem:[#allocation2 + $0x120] sm:$0xff]  ;;  %v3062_v29 = vld [vmem:[%s8376_s30 + $0x8] sm:$0x3]  ;;  %vm10425_vm3 = vmmov %vm10424_vm8 }
 0x817   : > { %2615 = vst.msk [vmem:[#allocation2 + $0x210] sm:$0xff] %vm10338_vm14, %v8731_v54  ;;  %v2617_v43 = vpop.permute.xlu0 %2616  ;;  %v2661_v44 = vpack.c.bf16 %v2647_v42, %v2646_v40  ;;  %vm3220_vm14 = vcmask 285696  }
 0x818   : > { %2623 = vst.msk [vmem:[#allocation2 + $0x238] sm:$0xff] %vm10336_vm13, %v2617_v43  ;;  %v2650_v48 = vld [vmem:[#allocation2 + $0x198] sm:$0xff]  ;;  %v7914_v43 = vpack.c.bf16 %v3062_v29, %v2762_v26 }
 0x819   : > { %2626 = vst.msk [vmem:[#allocation2 + $0x238] sm:$0xff] %vm10335_vm7, %v8731_v54  ;;  %2701 = vmatpush1.bf16.msra.mxu1 %v2661_v44  ;;  %v2619_v46 = vpop.permute.xlu1 %2618 }
 0x81a   : > { %2625 = vst.msk [vmem:[#allocation2 + $0x260] sm:$0xff] %vm10336_vm13, %v2619_v46  ;;  %2702 = vmatprep.subr.bf16.mxu1 %v8162_v5  ;;  %v2651_v51 = vld [vmem:[#allocation2 + $0x1c0] sm:$0xff]  ;;  %vm10344_vm13 = vcmask 302088  }
 0x81b   : > { %2627 = vst.msk [vmem:[#allocation2 + $0x260] sm:$0xff] %vm10335_vm7, %v8731_v54  ;;  %v2629_v52 = vpop.permute.xlu0 %2628  ;;  %v2663_v50 = vpack.c.bf16 %v2651_v51, %v2650_v48  ;;  %vm10351_vm7 = vcmask 39936  }
 0x81c   : > { %2635 = vst.msk [vmem:[#allocation2 + $0x288] sm:$0xff] %vm10334_vm6, %v2629_v52  ;;  %v2652_v55 = vld [vmem:[#allocation2 + $0x1e8] sm:$0xff] }
 0x81d   : > { %2638 = vst.msk [vmem:[#allocation2 + $0x288] sm:$0xff] %vm10327_vm4, %v8731_v54  ;;  %v2631_v53 = vpop.permute.xlu1 %2630  ;;  %2703 = vmatpush1.bf16.msra.mxu1 %v2662_v49 }
 0x81e   : > { %2637 = vst.msk [vmem:[#allocation2 + $0x2b0] sm:$0xff] %vm10334_vm6, %v2631_v53  ;;  %2704 = vmatprep.subr.bf16.mxu1 %v8162_v5  ;;  %v2653_v56 = vld [vmem:[#allocation2 + $0x210] sm:$0xff]  ;;  %vm3185_vm6 = vcmask 48128  }
 0x81f   : > { %2639 = vst.msk [vmem:[#allocation2 + $0x2b0] sm:$0xff] %vm10327_vm4, %v8731_v54  ;;  %v2664_v1 = vpack.c.bf16 %v2653_v56, %v2652_v55  ;;  %vm3157_vm4 = vcmask 244928  }
 0x820   : > { %v2654_v57 = vld [vmem:[#allocation2 + $0x238] sm:$0xff]  ;;  %2761 = vst.msk [vmem:[#allocation3 + $0x18] sm:$0xff] %vm2759_vm15, %v8731_v54  ;;  %2760 = vst.msk [vmem:[#allocation3] sm:$0xff] %vm2759_vm15, %v8731_v54 }
 0x821   : > { %2705 = vmatpush1.bf16.msra.mxu1 %v2663_v50 }
 0x822   : > { %2706 = vmatprep.subr.bf16.mxu1 %v8162_v5  ;;  %v2655_v58 = vld [vmem:[#allocation2 + $0x260] sm:$0xff] }
 0x823   : > { %v2665_v59 = vpack.c.bf16 %v2655_v58, %v2654_v57 }
 0x824   : > { %v2656_v60 = vld [vmem:[#allocation2 + $0x288] sm:$0xff] }
 0x825   : > { %2707 = vmatpush1.bf16.msra.mxu1 %v2664_v1 }
 0x826   : > { %2708 = vmatprep.subr.bf16.mxu1 %v8162_v5  ;;  %v2657_v61 = vld [vmem:[#allocation2 + $0x2b0] sm:$0xff] }
 0x827   : > { %v2666_v63 = vpack.c.bf16 %v2657_v61, %v2656_v60 }
 0x829   : > { %2709 = vmatpush1.bf16.msra.mxu1 %v2665_v59 }
 0x82a   : > { %2710 = vmatprep.subr.bf16.mxu1 %v8162_v5 }
 0x82c   : > { %v2674_v2 = vpop.permute.xlu0 %2673 }
 0x82d   : > { %2711 = vmatpush1.bf16.msra.mxu1 %v2666_v63 }
 0x82e   : > { %3351 = vmatprep.subr.bf16.mxu1 %v8162_v5  ;;  %v2679_v9 = vpop.permute.xlu1 %2678 }
 0x830   : > { %2727 = vmatmul.mubr.bf16.vlgmr.msra.gmra.mrb[16].mxu1 %v8079_v0 }
 0x903   : > { %v2728_v3 = vpop.f32.mrb[16].mxu1 }
 0x904   : > { %v2729_v4 = vadd.f32 %v2728_v3, %v2674_v2  ;;  %v2730_v8 = vpop.f32.mrb[17].mxu1 }
 0x905   : > { %v2731_v10 = vpop.f32.mrb[18].mxu1  ;;  %v3304_v8 = vld [vmem:[%s8273_s19 + $0x8] sm:$0xff] }
 0x906   : > { %v2735_v11 = vmax.f32 %v2729_v4, 0.0  ;;  %v2732_v12 = vadd.f32 %v2731_v10, %v2679_v9  ;;  %v2733_v13 = vpop.f32.mrb[19].mxu1  ;;  %v3303_v9 = vld [vmem:[%s8273_s19] sm:$0xff] }
 0x907   : > { %v8080_v10 = vld [vmem:[%s8268_s14 + $0x4] ss:$8 sps:$4 sm:$0xff]  }
 0x908   : > { %v8903_v15 = vmul.f32 %v8818_v62, %v2735_v11  ;;  %v2736_v19 = vmax.f32 %v2732_v12, 0.0  ;;  %v3306_v11 = vld [vmem:[%s8273_s19 + $0x18] sm:$0xff]  ;;  %v3305_v12 = vld [vmem:[%s8273_s19 + $0x10] sm:$0xff] }
 0x90a   : > { %v8906_v20 = vmul.f32 %v8818_v62, %v2736_v19  ;;  %2741 = vrot.lane.b32.xlu0 %v8903_v15, %s10355_s1 }
 0x90c   : > { %2743 = vrot.lane.b32.xlu1 %v8906_v20, %s10355_s1 }
 0x97c   : > { %v2742_v21 = vpop.permute.xlu0 %2741 }
 0x97d   : > { %v2747_v22 = vmax.f32 %v8903_v15, %v2742_v21 }
 0x97e   : > { %v2744_v24 = vpop.permute.xlu1 %2743 }
 0x97f   : > { %v2748_v25 = vmax.f32 %v8906_v20, %v2744_v24  ;;  %2751 = vrot.lane.b32.xlu0 %v2747_v22, %s10330_s4 }
 0x981   : > { %2753 = vrot.lane.b32.xlu1 %v2748_v25, %s10330_s4 }
 0x9f1   : > { %v2752_v33 = vpop.permute.xlu0 %2751 }
 0x9f2   : > { %v2757_v34 = vmax.f32 %v2747_v22, %v2752_v33 }
 0x9f3   : > { %v2754_v35 = vpop.permute.xlu1 %2753 }
 0x9f4   : > { %v2758_v36 = vmax.f32 %v2748_v25, %v2754_v35  ;;  %2766 = vrot.lane.b32.xlu0 %v2757_v34, %s10330_s4 }
 0x9f6   : > { %2768 = vrot.lane.b32.xlu1 %v2758_v36, %s10330_s4  ;;  %s8194_s4 = smov 122  }
 0x9f8   : > { %2865 = vrot.lane.b32.xlu0 %v2757_v34, %s10325_s11 }
 0x9fa   : > { %2867 = vrot.lane.b32.xlu1 %v2758_v36, %s10325_s11  ;;  %s8190_s11 = smov 24  }
 0x9fc   : > { %2964 = vrot.lane.b32.xlu0 %v2757_v34, %s10323_s22 }
 0x9fe   : > { %2966 = vrot.lane.b32.xlu1 %v2758_v36, %s10323_s22  ;;  %s8189_s22 = smov 12  }
 0xa00   : > { %3063 = vrot.lane.b32.xlu0 %v2757_v34, %s10321_s28 }
 0xa02   : > { %3065 = vrot.lane.b32.xlu1 %v2758_v36, %s10321_s28  ;;  %s8188_s28 = smov 6  }
 0xa66   : > { %v2767_v38 = vpop.permute.xlu0 %2766 }
 0xa67   : > { %7710 = vmatprep.mubr.msk.f32.mxu0 %vm10340_vm0, %v2767_v38 }
 0xa68   : > { %v2769_v40 = vpop.permute.xlu1 %2768 }
 0xa69   : > { %7711 = vmatmul.mubr.msk.f32.vlgmr.msra.gmra.mrb[20].mxu0 %vm10340_vm0, %v2769_v40  ;;  %v9024_v40 = vld [vmem:[#allocation3 + $0x8] sm:$0xff] }
 0xa6a   : > { %7907 = vmatpush3.bf16.msk.msra.mxu0 %vm8917_vm10, %v7902_v32  ;;  %v2866_v42 = vpop.permute.xlu0 %2865 }
 0xa6b   : > { %7717 = vmatprep.mubr.msk.f32.mxu0 %vm10340_vm0, %v2866_v42  ;;  %7910 = vmatprep.subr.msk.bf16.mxu0 %vm8917_vm10, %v7908_v39 }
 0xa6c   : > { %v2868_v44 = vpop.permute.xlu1 %2867 }
 0xa6d   : > { %7718 = vmatmul.mubr.msk.f32.vlgmr.msra.gmra.mrb[22].mxu0 %vm10340_vm0, %v2868_v44 }
 0xa6e   : > { %7913 = vmatpush3.bf16.msk.msra.mxu0 %vm8917_vm10, %v7908_v39  ;;  %v2965_v45 = vpop.permute.xlu0 %2964 }
 0xa6f   : > { %7724 = vmatprep.mubr.msk.f32.mxu0 %vm10340_vm0, %v2965_v45  ;;  %7916 = vmatprep.subr.msk.bf16.mxu0 %vm8917_vm10, %v7914_v43 }
 0xa70   : > { %v2967_v46 = vpop.permute.xlu1 %2966 }
 0xa71   : > { %7725 = vmatmul.mubr.msk.f32.vlgmr.msra.gmra.mrb[24].mxu0 %vm10340_vm0, %v2967_v46 }
 0xa72   : > { %7919 = vmatpush3.bf16.msk.msra.mxu0 %vm8917_vm10, %v7914_v43  ;;  %v3064_v47 = vpop.permute.xlu0 %3063 }
 0xa73   : > { %7731 = vmatprep.mubr.msk.f32.mxu0 %vm10340_vm0, %v3064_v47 }
 0xa74   : > { %v3066_v48 = vpop.permute.xlu1 %3065 }
 0xa75   : > { %7732 = vmatmul.mubr.msk.f32.vlgmr.msra.gmra.mrb[26].mxu0 %vm10340_vm0, %v3066_v48  ;;  %vm3224_vm0 = vcmask 294168  }
 0xb3c   : > { %v7712_v51 = vpop.f32.mrb[20].mxu0 }
 0xb3d   : > { %2856 = vrot.lane.b32.xlu1 %v7712_v51, %s8188_s28  ;;  %v2843_v52 = vpop.f32.mrb[21].mxu0 }
 0xb3e   : > { %2854 = vrot.lane.b32.xlu0 %v2843_v52, %s8188_s28 }
 0xb40   : > { %v7719_v49 = vpop.f32.mrb[22].mxu0 }
 0xb41   : > { %2955 = vrot.lane.b32.xlu1 %v7719_v49, %s8189_s22  ;;  %v2942_v53 = vpop.f32.mrb[23].mxu0 }
 0xb42   : > { %2953 = vrot.lane.b32.xlu0 %v2942_v53, %s8189_s22  ;;  %s8191_s22 = smov 7  }
 0xb44   : > { %v7726_v50 = vpop.f32.mrb[24].mxu0 }
 0xb45   : > { %3054 = vrot.lane.b32.xlu1 %v7726_v50, %s10328_s18  ;;  %v3041_v55 = vpop.f32.mrb[25].mxu0 }
 0xb46   : > { %3052 = vrot.lane.b32.xlu0 %v3041_v55, %s10328_s18  ;;  %s8193_s18 = smov 123  }
 0xb48   : > { %v7733_v56 = vpop.f32.mrb[26].mxu0 }
 0xb49   : > { %3153 = vrot.lane.b32.xlu1 %v7733_v56, %s8190_s11  ;;  %v3140_v1 = vpop.f32.mrb[27].mxu0 }
 0xb4a   : > { %3151 = vrot.lane.b32.xlu0 %v3140_v1, %s8190_s11  ;;  %s8192_s11 = smov 5  }
 0xbaf   : > { %v2857_v57 = vpop.permute.xlu1 %2856 }
 0xbb0   : > { %2862 = vst.msk [vmem:[#allocation3 + $0x18] sm:$0xff] %vm2860_vm2, %v2857_v57  ;;  %v2855_v58 = vpop.permute.xlu0 %2854 }
 0xbb1   : > { %2861 = vst.msk [vmem:[#allocation3] sm:$0xff] %vm2860_vm2, %v2855_v58  ;;  %vm3170_vm2 = vcmask 351288  }
 0xbb3   : > { %v2956_v59 = vpop.permute.xlu1 %2955 }
 0xbb4   : > { %2961 = vst.msk [vmem:[#allocation3 + $0x18] sm:$0xff] %vm2959_vm5, %v2956_v59  ;;  %v2954_v60 = vpop.permute.xlu0 %2953 }
 0xbb5   : > { %2960 = vst.msk [vmem:[#allocation3] sm:$0xff] %vm2959_vm5, %v2954_v60  ;;  %vm3173_vm5 = vcmask 56320  }
 0xbb7   : > { %v3055_v61 = vpop.permute.xlu1 %3054 }
 0xbb8   : > { %3060 = vst.msk [vmem:[#allocation3 + $0x18] sm:$0xff] %vm3058_vm9, %v3055_v61  ;;  %v3053_v63 = vpop.permute.xlu0 %3052 }
 0xbb9   : > { %3059 = vst.msk [vmem:[#allocation3] sm:$0xff] %vm3058_vm9, %v3053_v63  ;;  %vm3182_vm9 = vcmask 343088  }
 0xbbb   : > { %v3154_v0 = vpop.permute.xlu1 %3153 }
 0xbbc   : > { %3159 = vst.msk [vmem:[#allocation3 + $0x18] sm:$0xff] %vm3157_vm4, %v3154_v0  ;;  %v3152_v2 = vpop.permute.xlu0 %3151 }
 0xbbd   : > { %3158 = vst.msk [vmem:[#allocation3] sm:$0xff] %vm3157_vm4, %v3152_v2  ;;  %vm10423_vm4 = vcmask 130048  }
 0xbbe   : > { %7323 = vmatprep.mubr.msk.bf16.mxu1 %vm10423_vm4, %v8080_v10  ;;  %vm3194_vm4 = vcmask 334888  }
 0xbc3   : > { %v3161_v3 = vld [vmem:[#allocation3 + $0x18] sm:$0xff] }
 0xbc4   : > { %3166 = vrot.lane.b32.xlu1 %v3161_v3, %s8191_s22  ;;  %3212 = vst.msk [vmem:[#allocation2 + $0x170] sm:$0xff] %vm2759_vm15, %v3161_v3  ;;  %v3160_v4 = vld [vmem:[#allocation3] sm:$0xff] }
 0xbc5   : > { %3828 = vst.msk [vmem:[#allocation3 + $0x18] sm:$0xff] %vm10343_vm11, %v8731_v54  ;;  %3164 = vrot.lane.b32.xlu0 %v3160_v4, %s8191_s22  ;;  %3827 = vst.msk [vmem:[#allocation3] sm:$0xff] %vm10343_vm11, %v8731_v54  ;;  %vm10350_vm11 = vcmask 236544  }
 0xbc6   : > { %3211 = vst.msk [vmem:[#allocation2 + $0x148] sm:$0xff] %vm2759_vm15, %v3160_v4 }
 0xbc8   : > { %3178 = vrot.lane.b32.xlu1 %v3161_v3, %s8188_s28 }
 0xbc9   : > { %3176 = vrot.lane.b32.xlu0 %v3160_v4, %s8188_s28 }
 0xbcb   : > { %v3281_v48 = vld [vmem:[#allocation2 + $0x170] sm:$0xff] }
 0xbcc   : > { %3190 = vrot.lane.b32.xlu1 %v3161_v3, %s8192_s11 }
 0xbcd   : > { %3188 = vrot.lane.b32.xlu0 %v3160_v4, %s8192_s11  ;;  %v3280_v47 = vld [vmem:[#allocation2 + $0x148] sm:$0xff] }
 0xbce   : > { %v3294_v53 = vpack.c.bf16 %v3281_v48, %v3280_v47  ;;  %v3660_v47 = vld [vmem:[%s10429_s10] sm:$0xff]  ;;  %v3661_v48 = vld [vmem:[%s10429_s10 + $0x8] sm:$0xff] }
 0xbd0   : > { %3202 = vrot.lane.b32.xlu1 %v3161_v3, %s10357_s26 }
 0xbd1   : > { %3200 = vrot.lane.b32.xlu0 %v3160_v4, %s10357_s26 }
 0xbd4   : > { %3215 = vrot.lane.b32.xlu1 %v3161_v3, %s10355_s1 }
 0xbd5   : > { %3213 = vrot.lane.b32.xlu0 %v3160_v4, %s10355_s1 }
 0xbd8   : > { %3229 = vrot.lane.b32.xlu1 %v3161_v3, %s8193_s18 }
 0xbd9   : > { %3227 = vrot.lane.b32.xlu0 %v3160_v4, %s8193_s18 }
 0xbdc   : > { %3244 = vrot.lane.b32.xlu1 %v3161_v3, %s8194_s4 }
 0xbdd   : > { %3242 = vrot.lane.b32.xlu0 %v3160_v4, %s8194_s4 }
 0xbe0   : > { %3259 = vrot.lane.b32.xlu1 %v3161_v3, %s8195_s23  ;;  %v8082_v3 = vld [vmem:[%s8268_s14] ss:$8 sps:$4 sm:$0xff]  }
 0xbe1   : > { %3257 = vrot.lane.b32.xlu0 %v3160_v4, %s8195_s23  ;;  %v8083_v4 = vld [vmem:[%s8268_s14 + $0x14] ss:$8 sps:$4 sm:$0xff]  }
 0xbe4   : > { %3314 = vperm.xlu1 %8075, %v3304_v8   ;;  %v8085_v8 = vld [vmem:[%s8268_s14 + $0x10] ss:$8 sps:$4 sm:$0xff]  }
 0xbe5   : > { %3309 = vperm.xlu0 %8074, %v3303_v9  }
 0xbe8   : > { %3324 = vperm.xlu1 %8075, %v3306_v11  }
 0xbe9   : > { %3319 = vperm.xlu0 %8074, %v3305_v12  }
 0xc36   : > { %v3167_v13 = vpop.permute.xlu1 %3166 }
 0xc37   : > { %3172 = vst.msk [vmem:[#allocation2 + $0x30] sm:$0xff] %vm3170_vm2, %v3167_v13  ;;  %v3165_v19 = vpop.permute.xlu0 %3164 }
 0xc38   : > { %3175 = vst.msk [vmem:[#allocation2 + $0x30] sm:$0xff] %vm3173_vm5, %v8731_v54 }
 0xc39   : > { %3171 = vst.msk [vmem:[#allocation2 + $0x8] sm:$0xff] %vm3170_vm2, %v3165_v19  ;;  %v9057_v19 = vld [vmem:[%s10426_s0] ss:$0 sm:$0xff]  ;;  %s10428_s0 = sld [smem:[#allocation7_spill]] }
 0xc3a   : > { %3174 = vst.msk [vmem:[#allocation2 + $0x8] sm:$0xff] %vm3173_vm5, %v8731_v54  ;;  %v3179_v21 = vpop.permute.xlu1 %3178 }
 0xc3b   : > { %3184 = vst.msk [vmem:[#allocation2 + $0x80] sm:$0xff] %vm3182_vm9, %v3179_v21  ;;  %v3177_v22 = vpop.permute.xlu0 %3176 }
 0xc3c   : > { %3187 = vst.msk [vmem:[#allocation2 + $0x80] sm:$0xff] %vm3185_vm6, %v8731_v54 }
 0xc3d   : > { %3183 = vst.msk [vmem:[#allocation2 + $0x58] sm:$0xff] %vm3182_vm9, %v3177_v22 }
 0xc3e   : > { %3186 = vst.msk [vmem:[#allocation2 + $0x58] sm:$0xff] %vm3185_vm6, %v8731_v54  ;;  %v3191_v24 = vpop.permute.xlu1 %3190 }
 0xc3f   : > { %3196 = vst.msk [vmem:[#allocation2 + $0xd0] sm:$0xff] %vm3194_vm4, %v3191_v24  ;;  %v3189_v25 = vpop.permute.xlu0 %3188  ;;  %v3273_v26 = vld [vmem:[#allocation2 + $0x30] sm:$0xff] }
 0xc40   : > { %3199 = vst.msk [vmem:[#allocation2 + $0xd0] sm:$0xff] %vm10351_vm7, %v8731_v54 }
 0xc41   : > { %3195 = vst.msk [vmem:[#allocation2 + $0xa8] sm:$0xff] %vm3194_vm4, %v3189_v25  ;;  %v3272_v27 = vld [vmem:[#allocation2 + $0x8] sm:$0xff] }
 0xc42   : > { %3198 = vst.msk [vmem:[#allocation2 + $0xa8] sm:$0xff] %vm10351_vm7, %v8731_v54  ;;  %v3290_v28 = vpack.c.bf16 %v3273_v26, %v3272_v27  ;;  %v3203_v30 = vpop.permute.xlu1 %3202 }
 0xc43   : > { %3208 = vst.msk [vmem:[#allocation2 + $0x120] sm:$0xff] %vm10344_vm13, %v3203_v30  ;;  %v3201_v32 = vpop.permute.xlu0 %3200  ;;  %v3275_v33 = vld [vmem:[#allocation2 + $0x80] sm:$0xff] }
 0xc44   : > { %3352 = vmatpush1.bf16.msra.mxu1 %v3290_v28  ;;  %3210 = vst.msk [vmem:[#allocation2 + $0x120] sm:$0xff] %vm10424_vm8, %v8731_v54  ;;  %vm3235_vm8 = vcmask 252928  }
 0xc45   : > { %3207 = vst.msk [vmem:[#allocation2 + $0xf8] sm:$0xff] %vm10344_vm13, %v3201_v32  ;;  %3353 = vmatprep.subr.bf16.mxu1 %v8162_v5  ;;  %v3274_v34 = vld [vmem:[#allocation2 + $0x58] sm:$0xff]  ;;  %vm10347_vm13 = vcmask 294120  }
 0xc46   : > { %3209 = vst.msk [vmem:[#allocation2 + $0xf8] sm:$0xff] %vm10425_vm3, %v8731_v54  ;;  %v3291_v35 = vpack.c.bf16 %v3275_v33, %v3274_v34  ;;  %v3216_v36 = vpop.permute.xlu1 %3215  ;;  %vm3239_vm3 = vcmask 294136  }
 0xc47   : > { %3223 = vst.msk [vmem:[#allocation2 + $0x1c0] sm:$0xff] %vm3220_vm14, %v3216_v36  ;;  %v3214_v37 = vpop.permute.xlu0 %3213  ;;  %v3277_v38 = vld [vmem:[#allocation2 + $0xd0] sm:$0xff] }
 0xc48   : > { %3354 = vmatpush1.bf16.msra.mxu1 %v3291_v35  ;;  %3226 = vst.msk [vmem:[#allocation2 + $0x1c0] sm:$0xff] %vm3224_vm0, %v8731_v54 }
 0xc49   : > { %3221 = vst.msk [vmem:[#allocation2 + $0x198] sm:$0xff] %vm3220_vm14, %v3214_v37  ;;  %3355 = vmatprep.subr.bf16.mxu1 %v8162_v5  ;;  %v3276_v39 = vld [vmem:[#allocation2 + $0xa8] sm:$0xff] }
 0xc4a   : > { %3225 = vst.msk [vmem:[#allocation2 + $0x198] sm:$0xff] %vm3224_vm0, %v9024_v40  ;;  %v3292_v29 = vpack.c.bf16 %v3277_v38, %v3276_v39  ;;  %v3230_v42 = vpop.permute.xlu1 %3229 }
 0xc4b   : > { %3238 = vst.msk [vmem:[#allocation2 + $0x210] sm:$0xff] %vm3235_vm8, %v3230_v42  ;;  %v3228_v43 = vpop.permute.xlu0 %3227  ;;  %v3279_v44 = vld [vmem:[#allocation2 + $0x120] sm:$0xff] }
 0xc4c   : > { %3356 = vmatpush1.bf16.msra.mxu1 %v3292_v29  ;;  %3241 = vst.msk [vmem:[#allocation2 + $0x210] sm:$0xff] %vm3239_vm3, %v9024_v40 }
 0xc4d   : > { %3236 = vst.msk [vmem:[#allocation2 + $0x1e8] sm:$0xff] %vm3235_vm8, %v3228_v43  ;;  %3357 = vmatprep.subr.bf16.mxu1 %v8162_v5  ;;  %v3278_v54 = vld [vmem:[#allocation2 + $0xf8] sm:$0xff] }
 0xc4e   : > { %3240 = vst.msk [vmem:[#allocation2 + $0x1e8] sm:$0xff] %vm3239_vm3, %v9024_v40  ;;  %v3293_v45 = vpack.c.bf16 %v3279_v44, %v3278_v54  ;;  %v3245_v46 = vpop.permute.xlu1 %3244 }
 0xc4f   : > { %3253 = vst.msk [vmem:[#allocation2 + $0x260] sm:$0xff] %vm3250_vm1, %v3245_v46  ;;  %v3243_v51 = vpop.permute.xlu0 %3242  ;;  %v3283_v49 = vld [vmem:[#allocation2 + $0x1c0] sm:$0xff] }
 0xc50   : > { %3358 = vmatpush1.bf16.msra.mxu1 %v3293_v45  ;;  %3256 = vst.msk [vmem:[#allocation2 + $0x260] sm:$0xff] %vm3254_vm12, %v9024_v40  ;;  %v8088_v46 = vld [vmem:[%s10428_s0 + $0x4] ss:$12 sps:$4 sm:$0xff]  }
 0xc51   : > { %3251 = vst.msk [vmem:[#allocation2 + $0x238] sm:$0xff] %vm3250_vm1, %v3243_v51  ;;  %3359 = vmatprep.subr.bf16.mxu1 %v8162_v5  ;;  %v3282_v52 = vld [vmem:[#allocation2 + $0x198] sm:$0xff]  ;;  %3753 = vmatprep.mubr.bf16.mxu0 %v8088_v46  ;;  %v3662_v51 = vld [vmem:[%s10429_s10 + $0x10] sm:$0xff] }
 0xc52   : > { %3255 = vst.msk [vmem:[#allocation2 + $0x238] sm:$0xff] %vm3254_vm12, %v9024_v40  ;;  %v3260_v50 = vpop.permute.xlu1 %3259  ;;  %v3295_v56 = vpack.c.bf16 %v3283_v49, %v3282_v52  ;;  %v3663_v52 = vld [vmem:[%s10429_s10 + $0x18] sm:$0xff] }
 0xc53   : > { %3268 = vst.msk [vmem:[#allocation2 + $0x2b0] sm:$0xff] %vm10350_vm11, %v3260_v50  ;;  %v3258_v55 = vpop.permute.xlu0 %3257  ;;  %v3285_v57 = vld [vmem:[#allocation2 + $0x210] sm:$0xff] }
 0xc54   : > { %3360 = vmatpush1.bf16.msra.mxu1 %v3294_v53  ;;  %3271 = vst.msk [vmem:[#allocation2 + $0x2b0] sm:$0xff] %vm10347_vm13, %v9024_v40 }
 0xc55   : > { %3266 = vst.msk [vmem:[#allocation2 + $0x288] sm:$0xff] %vm10350_vm11, %v3258_v55  ;;  %3361 = vmatprep.subr.bf16.mxu1 %v8162_v5  ;;  %v3284_v1 = vld [vmem:[#allocation2 + $0x1e8] sm:$0xff] }
 0xc56   : > { %3270 = vst.msk [vmem:[#allocation2 + $0x288] sm:$0xff] %vm10347_vm13, %v9024_v40  ;;  %v3296_v58 = vpack.c.bf16 %v3285_v57, %v3284_v1  ;;  %vm10427_vm13 = vcmask 130048  }
 0xc57   : > { %v3287_v60 = vld [vmem:[#allocation2 + $0x260] sm:$0xff] }
 0xc58   : > { %3362 = vmatpush1.bf16.msra.mxu1 %v3295_v56 }
 0xc59   : > { %3363 = vmatprep.subr.bf16.mxu1 %v8162_v5  ;;  %v3286_v59 = vld [vmem:[#allocation2 + $0x238] sm:$0xff] }
 0xc5a   : > { %v3297_v61 = vpack.c.bf16 %v3287_v60, %v3286_v59 }
 0xc5b   : > { %v3289_v0 = vld [vmem:[#allocation2 + $0x2b0] sm:$0xff] }
 0xc5c   : > { %3364 = vmatpush1.bf16.msra.mxu1 %v3296_v58 }
 0xc5d   : > { %3365 = vmatprep.subr.bf16.mxu1 %v8162_v5  ;;  %v3288_v63 = vld [vmem:[#allocation2 + $0x288] sm:$0xff] }
 0xc5e   : > { %v3298_v2 = vpack.c.bf16 %v3289_v0, %v3288_v63 }
 0xc60   : > { %3366 = vmatpush1.bf16.msra.mxu1 %v3297_v61 }
 0xc61   : > { %3367 = vmatprep.subr.bf16.mxu1 %v8162_v5 }
 0xc63   : > { %v3315_v13 = vpop.permute.xlu1 %3314 }
 0xc64   : > { %3368 = vmatpush1.bf16.msra.mxu1 %v3298_v2  ;;  %v3310_v9 = vpop.permute.xlu0 %3309 }
 0xc67   : > { %3384 = vmatmul.mubr.bf16.vlgmr.msra.gmra.mrb[20].mxu1 %v8082_v3  ;;  %v3325_v35 = vpop.permute.xlu1 %3324 }
 0xc68   : > { %7324 = vmatprep.mubr.msk.bf16.mxu1 %vm10427_vm13, %v8083_v4  ;;  %v3320_v30 = vpop.permute.xlu0 %3319  ;;  %vm10430_vm13 = vcmask 302088  }
 0xc69   : > { %vm10432_vm11 = vmmov %vm10430_vm13 }
 0xc6f   : > { %3392 = vmatmul.mubr.bf16.gmra.mrb[24].mxu1 %v8085_v8 }
 0xd3a   : > { %v3385_v10 = vpop.f32.mrb[20].mxu1 }
 0xd3b   : > { %v3386_v11 = vadd.f32 %v3385_v10, %v3310_v9  ;;  %v3387_v12 = vpop.f32.mrb[21].mxu1 }
 0xd3c   : > { %v3388_v21 = vpop.f32.mrb[22].mxu1 }
 0xd3d   : > { %v3400_v22 = vmax.f32 %v3386_v11, 0.0  ;;  %v3389_v24 = vadd.f32 %v3388_v21, %v3315_v13  ;;  %v3390_v25 = vpop.f32.mrb[23].mxu1 }
 0xd3f   : > { %v3410_v26 = vmul.f32 %v9057_v19, %v3400_v22  ;;  %v3401_v27 = vmax.f32 %v3389_v24, 0.0 }
 0xd41   : > { %3498 = vst.msk [vmem:[#allocation2 + $0x288] sm:$0xff] %vm2759_vm15, %v3410_v26  ;;  %v3411_v28 = vmul.f32 %v9057_v19, %v3401_v27  ;;  %3418 = vrot.lane.b32.xlu0 %v3410_v26, %s8191_s22 }
 0xd42   : > { %v3393_v32 = vpop.f32.mrb[24].mxu1 }
 0xd43   : > { %3499 = vst.msk [vmem:[#allocation2 + $0x2b0] sm:$0xff] %vm2759_vm15, %v3411_v28  ;;  %v3394_v33 = vadd.f32 %v3393_v32, %v3320_v30  ;;  %v3395_v34 = vpop.f32.mrb[25].mxu1  ;;  %3420 = vrot.lane.b32.xlu1 %v3411_v28, %s8191_s22 }
 0xd44   : > { %v3396_v36 = vpop.f32.mrb[26].mxu1 }
 0xd45   : > { %v3402_v37 = vmax.f32 %v3394_v33, 0.0  ;;  %v3397_v38 = vadd.f32 %v3396_v36, %v3325_v35  ;;  %3502 = vrot.lane.b32.xlu0 %v3410_v26, %s10355_s1  ;;  %v3398_v39 = vpop.f32.mrb[27].mxu1 }
 0xd47   : > { %v3412_v29 = vmul.f32 %v9057_v19, %v3402_v37  ;;  %v3403_v42 = vmax.f32 %v3397_v38, 0.0  ;;  %3504 = vrot.lane.b32.xlu1 %v3411_v28, %s10355_s1 }
 0xd48   : > { %v3614_v44 = vld [vmem:[#allocation2 + $0x288] sm:$0xff] }
 0xd49   : > { %3500 = vst.msk [vmem:[#allocation2 + $0x2d8] sm:$0xff] %vm2759_vm15, %v3412_v29  ;;  %v3413_v43 = vmul.f32 %v9057_v19, %v3403_v42  ;;  %3438 = vrot.lane.b32.xlu0 %v3410_v26, %s8188_s28 }
 0xd4a   : > { %v3615_v54 = vld [vmem:[#allocation2 + $0x2b0] sm:$0xff] }
 0xd4b   : > { %3501 = vst.msk [vmem:[#allocation2 + $0x300] sm:$0xff] %vm2759_vm15, %v3413_v43  ;;  %3440 = vrot.lane.b32.xlu1 %v3411_v28, %s8188_s28  ;;  %v3642_v45 = vpack.c.bf16 %v3615_v54, %v3614_v44  ;;  %vm10431_vm15 = vcmask 7168  }
 0xd4d   : > { %3526 = vrot.lane.b32.xlu0 %v3410_v26, %s8193_s18  ;;  %7469 = vmatprep.subr.bf16.mxu0 %v3642_v45 }
 0xd4f   : > { %3528 = vrot.lane.b32.xlu1 %v3411_v28, %s8193_s18 }
 0xd50   : > { %v3616_v63 = vld [vmem:[#allocation2 + $0x2d8] sm:$0xff] }
 0xd51   : > { %3458 = vrot.lane.b32.xlu0 %v3410_v26, %s8192_s11 }
 0xd52   : > { %v3617_v58 = vld [vmem:[#allocation2 + $0x300] sm:$0xff] }
 0xd53   : > { %3460 = vrot.lane.b32.xlu1 %v3411_v28, %s8192_s11  ;;  %v3643_v0 = vpack.c.bf16 %v3617_v58, %v3616_v63 }
 0xd55   : > { %3550 = vrot.lane.b32.xlu0 %v3410_v26, %s8194_s4 }
 0xd57   : > { %3552 = vrot.lane.b32.xlu1 %v3411_v28, %s8194_s4 }
 0xd59   : > { %3478 = vrot.lane.b32.xlu0 %v3410_v26, %s10357_s26 }
 0xd5b   : > { %3480 = vrot.lane.b32.xlu1 %v3411_v28, %s10357_s26 }
 0xd5d   : > { %3422 = vrot.lane.b32.xlu0 %v3412_v29, %s8191_s22 }
 0xd5f   : > { %3424 = vrot.lane.b32.xlu1 %v3413_v43, %s8191_s22  ;;  %s10450_s22 = smov 30  }
 0xd61   : > { %3506 = vrot.lane.b32.xlu0 %v3412_v29, %s10355_s1 }
 0xd63   : > { %3508 = vrot.lane.b32.xlu1 %v3413_v43, %s10355_s1 }
 0xd65   : > { %3442 = vrot.lane.b32.xlu0 %v3412_v29, %s8188_s28 }
 0xd67   : > { %3444 = vrot.lane.b32.xlu1 %v3413_v43, %s8188_s28  ;;  %s10448_s28 = smov 10  }
 0xd69   : > { %3530 = vrot.lane.b32.xlu0 %v3412_v29, %s8193_s18 }
 0xd6b   : > { %3532 = vrot.lane.b32.xlu1 %v3413_v43, %s8193_s18  ;;  %s8196_s18 = smov 116  }
 0xd6d   : > { %3462 = vrot.lane.b32.xlu0 %v3412_v29, %s8192_s11 }
 0xd6f   : > { %3464 = vrot.lane.b32.xlu1 %v3413_v43, %s8192_s11  ;;  %s10451_s11 = smov 40  }
 0xd71   : > { %3554 = vrot.lane.b32.xlu0 %v3412_v29, %s8194_s4 }
 0xd73   : > { %3556 = vrot.lane.b32.xlu1 %v3413_v43, %s8194_s4 }
 0xd75   : > { %3482 = vrot.lane.b32.xlu0 %v3412_v29, %s10357_s26 }
 0xd77   : > { %3484 = vrot.lane.b32.xlu1 %v3413_v43, %s10357_s26 }
 0xd79   : > { %3574 = vrot.lane.b32.xlu0 %v3410_v26, %s8195_s23 }
 0xd7b   : > { %3576 = vrot.lane.b32.xlu1 %v3411_v28, %s8195_s23 }
 0xd7d   : > { %3578 = vrot.lane.b32.xlu0 %v3412_v29, %s8195_s23 }
 0xd7f   : > { %3580 = vrot.lane.b32.xlu1 %v3413_v43, %s8195_s23  ;;  %s8197_s23 = smov 104  }
 0xd81   : > { %3666 = vperm.xlu0 %8074, %v3660_v47  }
 0xd83   : > { %3671 = vperm.xlu1 %8075, %v3661_v48  }
 0xd85   : > { %3676 = vperm.xlu0 %8074, %v3662_v51  }
 0xd87   : > { %3681 = vperm.xlu1 %8075, %v3663_v52  }
 0xdb3   : > { %v3419_v49 = vpop.permute.xlu0 %3418 }
 0xdb4   : > { %3430 = vst.msk [vmem:[#allocation2 + $0x8] sm:$0xff] %vm3170_vm2, %v3419_v49 }
 0xdb5   : > { %3434 = vst.msk [vmem:[#allocation2 + $0x8] sm:$0xff] %vm3173_vm5, %v9024_v40  ;;  %v3421_v53 = vpop.permute.xlu1 %3420 }
 0xdb6   : > { %3431 = vst.msk [vmem:[#allocation2 + $0x30] sm:$0xff] %vm3170_vm2, %v3421_v53 }
 0xdb7   : > { %3435 = vst.msk [vmem:[#allocation2 + $0x30] sm:$0xff] %vm3173_vm5, %v9024_v40  ;;  %v3503_v50 = vpop.permute.xlu0 %3502 }
 0xdb8   : > { %3515 = vst.msk [vmem:[#allocation2 + $0x328] sm:$0xff] %vm3220_vm14, %v3503_v50 }
 0xdb9   : > { %3522 = vst.msk [vmem:[#allocation2 + $0x328] sm:$0xff] %vm3224_vm0, %v9024_v40  ;;  %v3505_v55 = vpop.permute.xlu1 %3504 }
 0xdba   : > { %3517 = vst.msk [vmem:[#allocation2 + $0x350] sm:$0xff] %vm3220_vm14, %v3505_v55 }
 0xdbb   : > { %3523 = vst.msk [vmem:[#allocation2 + $0x350] sm:$0xff] %vm3224_vm0, %v9024_v40  ;;  %v3439_v56 = vpop.permute.xlu0 %3438 }
 0xdbc   : > { %3450 = vst.msk [vmem:[#allocation2 + $0xa8] sm:$0xff] %vm3182_vm9, %v3439_v56  ;;  %v3598_v1 = vld [vmem:[#allocation2 + $0x8] sm:$0xff] }
 0xdbd   : > { %3454 = vst.msk [vmem:[#allocation2 + $0xa8] sm:$0xff] %vm3185_vm6, %v9024_v40  ;;  %v3441_v57 = vpop.permute.xlu1 %3440 }
 0xdbe   : > { %3451 = vst.msk [vmem:[#allocation2 + $0xd0] sm:$0xff] %vm3182_vm9, %v3441_v57  ;;  %v3599_v59 = vld [vmem:[#allocation2 + $0x30] sm:$0xff] }
 0xdbf   : > { %3455 = vst.msk [vmem:[#allocation2 + $0xd0] sm:$0xff] %vm3185_vm6, %v9024_v40  ;;  %v3527_v60 = vpop.permute.xlu0 %3526  ;;  %v3634_v61 = vpack.c.bf16 %v3599_v59, %v3598_v1 }
 0xdc0   : > { %3539 = vst.msk [vmem:[#allocation2 + $0x3c8] sm:$0xff] %vm3235_vm8, %v3527_v60  ;;  %v3618_v25 = vld [vmem:[#allocation2 + $0x328] sm:$0xff] }
 0xdc1   : > { %3546 = vst.msk [vmem:[#allocation2 + $0x3c8] sm:$0xff] %vm3239_vm3, %v9024_v40  ;;  %v3529_v2 = vpop.permute.xlu1 %3528  ;;  %7470 = vmatpush3.bf16.msra.mxu0 %v3634_v61 }
 0xdc2   : > { %3541 = vst.msk [vmem:[#allocation2 + $0x3f0] sm:$0xff] %vm3235_vm8, %v3529_v2  ;;  %7471 = vmatprep.subr.bf16.mxu0 %v3643_v0  ;;  %v3619_v26 = vld [vmem:[#allocation2 + $0x350] sm:$0xff] }
 0xdc3   : > { %3547 = vst.msk [vmem:[#allocation2 + $0x3f0] sm:$0xff] %vm3239_vm3, %v9024_v40  ;;  %v3459_v3 = vpop.permute.xlu0 %3458  ;;  %v3644_v32 = vpack.c.bf16 %v3619_v26, %v3618_v25 }
 0xdc4   : > { %3470 = vst.msk [vmem:[#allocation2 + $0x148] sm:$0xff] %vm3194_vm4, %v3459_v3  ;;  %v3602_v33 = vld [vmem:[#allocation2 + $0xa8] sm:$0xff] }
 0xdc5   : > { %3474 = vst.msk [vmem:[#allocation2 + $0x148] sm:$0xff] %vm10351_vm7, %v9024_v40  ;;  %v3461_v4 = vpop.permute.xlu1 %3460 }
 0xdc6   : > { %3471 = vst.msk [vmem:[#allocation2 + $0x170] sm:$0xff] %vm3194_vm4, %v3461_v4  ;;  %v3603_v34 = vld [vmem:[#allocation2 + $0xd0] sm:$0xff] }
 0xdc7   : > { %3475 = vst.msk [vmem:[#allocation2 + $0x170] sm:$0xff] %vm10351_vm7, %v9024_v40  ;;  %v3551_v8 = vpop.permute.xlu0 %3550  ;;  %vm10433_vm7 = vmmov %vm10431_vm15  ;;  %v3636_v39 = vpack.c.bf16 %v3603_v34, %v3602_v33 }
 0xdc8   : > { %3563 = vst.msk [vmem:[#allocation2 + $0x468] sm:$0xff] %vm3250_vm1, %v3551_v8  ;;  %v3622_v44 = vld [vmem:[#allocation2 + $0x3c8] sm:$0xff] }
 0xdc9   : > { %3570 = vst.msk [vmem:[#allocation2 + $0x468] sm:$0xff] %vm3254_vm12, %v9024_v40  ;;  %v3553_v9 = vpop.permute.xlu1 %3552 }
 0xdca   : > { %3565 = vst.msk [vmem:[#allocation2 + $0x490] sm:$0xff] %vm3250_vm1, %v3553_v9  ;;  %v3623_v54 = vld [vmem:[#allocation2 + $0x3f0] sm:$0xff] }
 0xdcb   : > { %3571 = vst.msk [vmem:[#allocation2 + $0x490] sm:$0xff] %vm3254_vm12, %v9024_v40  ;;  %v3479_v10 = vpop.permute.xlu0 %3478  ;;  %v3646_v48 = vpack.c.bf16 %v3623_v54, %v3622_v44 }
 0xdcc   : > { %3490 = vst.msk [vmem:[#allocation2 + $0x1e8] sm:$0xff] %vm10430_vm13, %v3479_v10  ;;  %v3606_v51 = vld [vmem:[#allocation2 + $0x148] sm:$0xff] }
 0xdcd   : > { %3494 = vst.msk [vmem:[#allocation2 + $0x1e8] sm:$0xff] %vm10431_vm15, %v9024_v40  ;;  %v3481_v11 = vpop.permute.xlu1 %3480 }
 0xdce   : > { %3491 = vst.msk [vmem:[#allocation2 + $0x210] sm:$0xff] %vm10432_vm11, %v3481_v11  ;;  %v3607_v52 = vld [vmem:[#allocation2 + $0x170] sm:$0xff] }
 0xdcf   : > { %3495 = vst.msk [vmem:[#allocation2 + $0x210] sm:$0xff] %vm10433_vm7, %v9024_v40  ;;  %v3423_v12 = vpop.permute.xlu0 %3422  ;;  %v3638_v56 = vpack.c.bf16 %v3607_v52, %v3606_v51 }
 0xdd0   : > { %3432 = vst.msk [vmem:[#allocation2 + $0x58] sm:$0xff] %vm3170_vm2, %v3423_v12  ;;  %v3626_v59 = vld [vmem:[#allocation2 + $0x468] sm:$0xff] }
 0xdd1   : > { %3436 = vst.msk [vmem:[#allocation2 + $0x58] sm:$0xff] %vm3173_vm5, %v9024_v40  ;;  %v3425_v13 = vpop.permute.xlu1 %3424 }
 0xdd2   : > { %3433 = vst.msk [vmem:[#allocation2 + $0x80] sm:$0xff] %vm3170_vm2, %v3425_v13  ;;  %v3627_v60 = vld [vmem:[#allocation2 + $0x490] sm:$0xff]  ;;  %vm10437_vm2 = vmmov %vm10430_vm13 }
 0xdd3   : > { %3437 = vst.msk [vmem:[#allocation2 + $0x80] sm:$0xff] %vm3173_vm5, %v9024_v40  ;;  %v3507_v21 = vpop.permute.xlu0 %3506  ;;  %v3648_v2 = vpack.c.bf16 %v3627_v60, %v3626_v59  ;;  %vm10440_vm5 = vcmask 294120  }
 0xdd4   : > { %3519 = vst.msk [vmem:[#allocation2 + $0x378] sm:$0xff] %vm3220_vm14, %v3507_v21  ;;  %v3610_v3 = vld [vmem:[#allocation2 + $0x1e8] sm:$0xff] }
 0xdd5   : > { %3524 = vst.msk [vmem:[#allocation2 + $0x378] sm:$0xff] %vm3224_vm0, %v9024_v40  ;;  %v3509_v22 = vpop.permute.xlu1 %3508 }
 0xdd6   : > { %3521 = vst.msk [vmem:[#allocation2 + $0x3a0] sm:$0xff] %vm3220_vm14, %v3509_v22  ;;  %vm10436_vm14 = vmmov %vm10430_vm13  ;;  %v3611_v4 = vld [vmem:[#allocation2 + $0x210] sm:$0xff] }
 0xdd7   : > { %3525 = vst.msk [vmem:[#allocation2 + $0x3a0] sm:$0xff] %vm3224_vm0, %v9024_v40  ;;  %v3443_v24 = vpop.permute.xlu0 %3442  ;;  %vm10434_vm0 = vcmask 39936   ;;  %v3640_v12 = vpack.c.bf16 %v3611_v4, %v3610_v3 }
 0xdd8   : > { %3452 = vst.msk [vmem:[#allocation2 + $0xf8] sm:$0xff] %vm3182_vm9, %v3443_v24  ;;  %v3600_v27 = vld [vmem:[#allocation2 + $0x58] sm:$0xff]  ;;  %vm10435_vm11 = vmmov %vm10434_vm0 }
 0xdd9   : > { %3456 = vst.msk [vmem:[#allocation2 + $0xf8] sm:$0xff] %vm3185_vm6, %v9024_v40  ;;  %v3445_v28 = vpop.permute.xlu1 %3444 }
 0xdda   : > { %3453 = vst.msk [vmem:[#allocation2 + $0x120] sm:$0xff] %vm3182_vm9, %v3445_v28  ;;  %v3601_v30 = vld [vmem:[#allocation2 + $0x80] sm:$0xff] }
 0xddb   : > { %3457 = vst.msk [vmem:[#allocation2 + $0x120] sm:$0xff] %vm3185_vm6, %v9024_v40  ;;  %v3531_v35 = vpop.permute.xlu0 %3530  ;;  %v3635_v36 = vpack.c.bf16 %v3601_v30, %v3600_v27  ;;  %v8086_v28 = vld [vmem:[%s10428_s0] ss:$12 sps:$4 sm:$0xff]  }
 0xddc   : > { %3543 = vst.msk [vmem:[#allocation2 + $0x418] sm:$0xff] %vm3235_vm8, %v3531_v35  ;;  %v3620_v37 = vld [vmem:[#allocation2 + $0x378] sm:$0xff] }
 0xddd   : > { %3548 = vst.msk [vmem:[#allocation2 + $0x418] sm:$0xff] %vm3239_vm3, %v9024_v40  ;;  %v3533_v38 = vpop.permute.xlu1 %3532  ;;  %7472 = vmatpush3.bf16.msra.mxu0 %v3635_v36 }
 0xdde   : > { %3545 = vst.msk [vmem:[#allocation2 + $0x440] sm:$0xff] %vm3235_vm8, %v3533_v38  ;;  %7473 = vmatprep.subr.bf16.mxu0 %v3644_v32  ;;  %v3621_v29 = vld [vmem:[#allocation2 + $0x3a0] sm:$0xff]  ;;  %v8089_v32 = vld [vmem:[%s10428_s0 + $0x1c] ss:$12 sps:$4 sm:$0xff]  }
 0xddf   : > { %3549 = vst.msk [vmem:[#allocation2 + $0x440] sm:$0xff] %vm3239_vm3, %v9024_v40  ;;  %v3463_v42 = vpop.permute.xlu0 %3462  ;;  %v3645_v43 = vpack.c.bf16 %v3621_v29, %v3620_v37  ;;  %v8091_v38 = vld [vmem:[%s10428_s0 + $0x18] ss:$12 sps:$4 sm:$0xff]   ;;  %v8093_v29 = vld [vmem:[%s10428_s0 + $0x20] ss:$12 sps:$4 sm:$0xff]  }
 0xde0   : > { %3472 = vst.msk [vmem:[#allocation2 + $0x198] sm:$0xff] %vm3194_vm4, %v3463_v42  ;;  %v3604_v45 = vld [vmem:[#allocation2 + $0xf8] sm:$0xff] }
 0xde1   : > { %3476 = vst.msk [vmem:[#allocation2 + $0x198] sm:$0xff] %vm10434_vm0, %v9024_v40  ;;  %v3465_v46 = vpop.permute.xlu1 %3464  ;;  %7474 = vmatpush3.bf16.msra.mxu0 %v3636_v39  ;;  %v8092_v39 = vld [vmem:[%s10428_s0 + $0x8] ss:$12 sps:$4 sm:$0xff]   ;;  %vm3714_vm0 = vcmask 261120   ;;  %s10497_s0 = sld [smem:[#allocation10_spill]] }
 0xde2   : > { %3473 = vst.msk [vmem:[#allocation2 + $0x1c0] sm:$0xff] %vm3194_vm4, %v3465_v46  ;;  %7475 = vmatprep.subr.bf16.mxu0 %v3645_v43  ;;  %v3605_v47 = vld [vmem:[#allocation2 + $0x120] sm:$0xff]  ;;  %vm10442_vm4 = vmmov %vm10440_vm5 }
 0xde3   : > { %3477 = vst.msk [vmem:[#allocation2 + $0x1c0] sm:$0xff] %vm10435_vm11, %v9024_v40  ;;  %v3555_v49 = vpop.permute.xlu0 %3554  ;;  %v3637_v53 = vpack.c.bf16 %v3605_v47, %v3604_v45  ;;  %vm10444_vm3 = vmmov %vm10442_vm4  ;;  %vm3852_vm11 = vcmask 1045504  }
 0xde4   : > { %3567 = vst.msk [vmem:[#allocation2 + $0x4b8] sm:$0xff] %vm3250_vm1, %v3555_v49  ;;  %v3624_v50 = vld [vmem:[#allocation2 + $0x418] sm:$0xff]  ;;  %vm10446_vm15 = vmmov %vm10444_vm3 }
 0xde5   : > { %3572 = vst.msk [vmem:[#allocation2 + $0x4b8] sm:$0xff] %vm3254_vm12, %v9024_v40  ;;  %v3557_v55 = vpop.permute.xlu1 %3556  ;;  %7476 = vmatpush3.bf16.msra.mxu0 %v3637_v53 }
 0xde6   : > { %3569 = vst.msk [vmem:[#allocation2 + $0x4e0] sm:$0xff] %vm3250_vm1, %v3557_v55  ;;  %7477 = vmatprep.subr.bf16.mxu0 %v3646_v48  ;;  %v3625_v1 = vld [vmem:[#allocation2 + $0x440] sm:$0xff]  ;;  %vm10438_vm1 = vmmov %vm10433_vm7 }
 0xde7   : > { %3573 = vst.msk [vmem:[#allocation2 + $0x4e0] sm:$0xff] %vm3254_vm12, %v9024_v40  ;;  %v3483_v57 = vpop.permute.xlu0 %3482  ;;  %v3647_v58 = vpack.c.bf16 %v3625_v1, %v3624_v50  ;;  %vm10439_vm12 = vcmask 236544   ;;  %v3831_v55 = vld [vmem:[%s8381_s24] sm:$0x3f] }
 0xde8   : > { %3492 = vst.msk [vmem:[#allocation2 + $0x238] sm:$0xff] %vm10436_vm14, %v3483_v57  ;;  %v3608_v61 = vld [vmem:[#allocation2 + $0x198] sm:$0xff]  ;;  %vm10441_vm9 = vmmov %vm10439_vm12  ;;  %7742 = vmatprep.subr.msk.mxu1 %vm3852_vm11, %v3831_v55  ;;  %vm10447_vm14 = vmmov 0  }
 0xde9   : > { %3496 = vst.msk [vmem:[#allocation2 + $0x238] sm:$0xff] %vm10433_vm7, %v9024_v40  ;;  %v3485_v63 = vpop.permute.xlu1 %3484  ;;  %7478 = vmatpush3.bf16.msra.mxu0 %v3638_v56  ;;  %vm10443_vm8 = vmmov %vm10441_vm9  ;;  %7743 = vmatpush3.msk.msra.mxu1 %vm3852_vm11, %v3831_v55 }
 0xdea   : > { %3493 = vst.msk [vmem:[#allocation2 + $0x260] sm:$0xff] %vm10437_vm2, %v3485_v63  ;;  %7479 = vmatprep.subr.bf16.mxu0 %v3647_v58  ;;  %v3609_v0 = vld [vmem:[#allocation2 + $0x1c0] sm:$0xff]  ;;  %vm10445_vm13 = vmmov %vm10443_vm8  ;;  %vm10458_vm2 = vcmask 244896  }
 0xdeb   : > { %3497 = vst.msk [vmem:[#allocation2 + $0x260] sm:$0xff] %vm10438_vm1, %v9024_v40  ;;  %v3575_v8 = vpop.permute.xlu0 %3574  ;;  %v3639_v9 = vpack.c.bf16 %v3609_v0, %v3608_v61  ;;  %vm10459_vm1 = vmmov %vm10458_vm2 }
 0xdec   : > { %3587 = vst.msk [vmem:[#allocation2 + $0x508] sm:$0xff] %vm10439_vm12, %v3575_v8  ;;  %v3628_v10 = vld [vmem:[#allocation2 + $0x4b8] sm:$0xff]  ;;  %vm10460_vm12 = vcmask 326896  }
 0xded   : > { %3594 = vst.msk [vmem:[#allocation2 + $0x508] sm:$0xff] %vm10440_vm5, %v9024_v40  ;;  %v3577_v11 = vpop.permute.xlu1 %3576  ;;  %7480 = vmatpush3.bf16.msra.mxu0 %v3639_v9  ;;  %vm10461_vm5 = vmmov %vm10460_vm12 }
 0xdee   : > { %3589 = vst.msk [vmem:[#allocation2 + $0x530] sm:$0xff] %vm10441_vm9, %v3577_v11  ;;  %7481 = vmatprep.subr.bf16.mxu0 %v3648_v2  ;;  %v3629_v13 = vld [vmem:[#allocation2 + $0x4e0] sm:$0xff]  ;;  %vm10462_vm9 = vcmask 408896  }
 0xdef   : > { %3595 = vst.msk [vmem:[#allocation2 + $0x530] sm:$0xff] %vm10442_vm4, %v9024_v40  ;;  %v3579_v21 = vpop.permute.xlu0 %3578  ;;  %v3649_v22 = vpack.c.bf16 %v3629_v13, %v3628_v10  ;;  %vm10463_vm4 = vmmov %vm10462_vm9 }
 0xdf0   : > { %3591 = vst.msk [vmem:[#allocation2 + $0x558] sm:$0xff] %vm10443_vm8, %v3579_v21  ;;  %v3612_v24 = vld [vmem:[#allocation2 + $0x238] sm:$0xff] }
 0xdf1   : > { %3596 = vst.msk [vmem:[#allocation2 + $0x558] sm:$0xff] %vm10444_vm3, %v9024_v40  ;;  %v3581_v25 = vpop.permute.xlu1 %3580  ;;  %7482 = vmatpush3.bf16.msra.mxu0 %v3640_v12 }
 0xdf2   : > { %3593 = vst.msk [vmem:[#allocation2 + $0x580] sm:$0xff] %vm10445_vm13, %v3581_v25  ;;  %7483 = vmatprep.subr.bf16.mxu0 %v3649_v22  ;;  %v3613_v26 = vld [vmem:[#allocation2 + $0x260] sm:$0xff]  ;;  %vm10466_vm13 = vmmov %vm10459_vm1 }
 0xdf3   : > { %3597 = vst.msk [vmem:[#allocation2 + $0x580] sm:$0xff] %vm10446_vm15, %v9024_v40  ;;  %v3641_v27 = vpack.c.bf16 %v3613_v26, %v3612_v24  ;;  %v3977_v22 = vld [vmem:[%s8381_s24] sm:$0x3f]  ;;  %vm10467_vm15 = vmmov %vm10459_vm1 }
 0xdf4   : > { %v3630_v30 = vld [vmem:[#allocation2 + $0x508] sm:$0xff]  ;;  %v4118_v25 = vld [vmem:[%s8381_s24] sm:$0x3f] }
 0xdf5   : > { %7484 = vmatpush3.bf16.msra.mxu0 %v3641_v27  ;;  %7758 = vmatprep.subr.msk.mxu1 %vm3852_vm11, %v4118_v25 }
 0xdf6   : > { %v3631_v33 = vld [vmem:[#allocation2 + $0x530] sm:$0xff] }
 0xdf7   : > { %v3650_v34 = vpack.c.bf16 %v3631_v33, %v3630_v30 }
 0xdf8   : > { %3754 = vmatmul.mubr.bf16.vlgmr.msra.gmra.mrb[28].mxu0 %v8086_v28  ;;  %v3632_v35 = vld [vmem:[#allocation2 + $0x558] sm:$0xff]  ;;  %v4259_v28 = vld [vmem:[%s8381_s24] sm:$0x3f] }
 0xdf9   : > { %7734 = vmatprep.subr.bf16.mxu0 %v3650_v34  ;;  %3761 = vmatprep.mubr.bf16.mxu0 %v8089_v32 }
 0xdfa   : > { %7735 = vmatpush3.bf16.msra.mxu0 %v3650_v34  ;;  %v3633_v36 = vld [vmem:[#allocation2 + $0x580] sm:$0xff] }
 0xdfb   : > { %v3651_v37 = vpack.c.bf16 %v3633_v36, %v3632_v35 }
 0xdfd   : > { %7736 = vmatprep.subr.bf16.mxu0 %v3651_v37 }
 0xdfe   : > { %7737 = vmatpush3.bf16.msra.mxu0 %v3651_v37 }
 0xdff   : > { %7750 = vmatprep.subr.msk.mxu0 %vm3852_vm11, %v3977_v22 }
 0xe00   : > { %3762 = vmatmul.mubr.bf16.gmra.mrb[32].mxu0 %v8091_v38  ;;  %v3667_v47 = vpop.permute.xlu0 %3666 }
 0xe01   : > { %7738 = vmatprep.mubr.msk.bf16.mxu0 %vm3714_vm0, %v8092_v39 }
 0xe02   : > { %v3672_v52 = vpop.permute.xlu1 %3671 }
 0xe04   : > { %v3677_v1 = vpop.permute.xlu0 %3676 }
 0xe06   : > { %v3682_v58 = vpop.permute.xlu1 %3681 }
 0xe08   : > { %7739 = vmatmul.mubr.msk.bf16.vlgmr.msra.gmra.mrb[36].mxu0 %vm3714_vm0, %v8093_v29 }
 0xe09   : > { %7751 = vmatpush3.msk.msra.mxu0 %vm3852_vm11, %v3977_v22 }
 0xe0a   : > { %7766 = vmatprep.subr.msk.mxu0 %vm3852_vm11, %v4259_v28 }
 0xecb   : > { %v7485_v42 = vpop.f32.mrb[28].mxu0 }
 0xecc   : > { %v7486_v43 = vpop.f32.mrb[29].mxu0 }
 0xecd   : > { %v7487_v44 = vadd.f32 %v7486_v43, %v7485_v42  ;;  %v7488_v54 = vpop.f32.mrb[30].mxu0 }
 0xece   : > { %v7489_v45 = vpop.f32.mrb[31].mxu0 }
 0xecf   : > { %v7490_v46 = vadd.f32 %v7489_v45, %v7488_v54  ;;  %v3756_v60 = vadd.f32 %v7487_v44, %v3667_v47 }
 0xed1   : > { %v3759_v4 = vadd.f32 %v7490_v46, %v3672_v52 }
 0xed3   : > { %v7491_v48 = vpop.f32.mrb[32].mxu0 }
 0xed4   : > { %v7492_v51 = vpop.f32.mrb[33].mxu0 }
 0xed5   : > { %v7493_v49 = vadd.f32 %v7492_v51, %v7491_v48  ;;  %v7494_v53 = vpop.f32.mrb[34].mxu0 }
 0xed6   : > { %v7495_v50 = vpop.f32.mrb[35].mxu0 }
 0xed7   : > { %v7496_v56 = vadd.f32 %v7495_v50, %v7494_v53  ;;  %v3764_v57 = vadd.f32 %v7493_v49, %v3677_v1 }
 0xed9   : > { %v3767_v0 = vadd.f32 %v7496_v56, %v3682_v58 }
 0xedb   : > { %v7740_v59 = vpop.f32.mrb[36].mxu0 }
 0xedc   : > { %v3813_v61 = vadd.f32 %v7740_v59, %v3764_v57  ;;  %v3804_v63 = vpop.f32.mrb[37].mxu0 }
 0xedd   : > { %v3805_v2 = vadd.f32 %v3804_v63, %v3756_v60  ;;  %v7741_v3 = vpop.f32.mrb[38].mxu0 }
 0xede   : > { %v3821_v8 = vmax.f32 %v3813_v61, 0.0  ;;  %v3816_v9 = vadd.f32 %v7741_v3, %v3767_v0  ;;  %v3807_v10 = vpop.f32.mrb[39].mxu0 }
 0xedf   : > { %v3808_v11 = vadd.f32 %v3807_v10, %v3759_v4  ;;  %v3819_v24 = vmax.f32 %v3805_v2, 0.0 }
 0xee0   : > { %v3825_v12 = vmul.f32 %v9057_v19, %v3821_v8  ;;  %v3822_v13 = vmax.f32 %v3816_v9, 0.0 }
 0xee1   : > { %v3820_v26 = vmax.f32 %v3808_v11, 0.0  ;;  %v3823_v27 = vmul.f32 %v9057_v19, %v3819_v24 }
 0xee2   : > { %v3826_v21 = vmul.f32 %v9057_v19, %v3822_v13  ;;  %3840 = vrot.lane.b32.xlu0 %v3825_v12, %s8194_s4 }
 0xee3   : > { %v3824_v30 = vmul.f32 %v9057_v19, %v3820_v26 }
 0xee4   : > { %3842 = vrot.lane.b32.xlu1 %v3826_v21, %s8194_s4 }
 0xee6   : > { %3982 = vrot.lane.b32.xlu0 %v3825_v12, %s8196_s18 }
 0xee8   : > { %3984 = vrot.lane.b32.xlu1 %v3826_v21, %s8196_s18 }
 0xeea   : > { %4123 = vrot.lane.b32.xlu0 %v3825_v12, %s10352_s2 }
 0xeec   : > { %4125 = vrot.lane.b32.xlu1 %v3826_v21, %s10352_s2 }
 0xeee   : > { %3836 = vrot.lane.b32.xlu0 %v3823_v27, %s8194_s4 }
 0xef0   : > { %3838 = vrot.lane.b32.xlu1 %v3824_v30, %s8194_s4  ;;  %s10449_s4 = smov 20  }
 0xef2   : > { %3978 = vrot.lane.b32.xlu0 %v3823_v27, %s8196_s18 }
 0xef4   : > { %3980 = vrot.lane.b32.xlu1 %v3824_v30, %s8196_s18  ;;  %s10452_s18 = smov 50  }
 0xef6   : > { %4119 = vrot.lane.b32.xlu0 %v3823_v27, %s10352_s2 }
 0xef8   : > { %4121 = vrot.lane.b32.xlu1 %v3824_v30, %s10352_s2  ;;  %s10454_s2 = smov 70  }
 0xefa   : > { %4260 = vrot.lane.b32.xlu0 %v3823_v27, %s8197_s23 }
 0xefc   : > { %4262 = vrot.lane.b32.xlu1 %v3824_v30, %s8197_s23 }
 0xefe   : > { %4264 = vrot.lane.b32.xlu0 %v3825_v12, %s8197_s23 }
 0xf00   : > { %4266 = vrot.lane.b32.xlu1 %v3826_v21, %s8197_s23  ;;  %s10453_s23 = smov 60  }
 0xf54   : > { %v3841_v32 = vpop.permute.xlu0 %3840 }
 0xf56   : > { %v3843_v33 = vpop.permute.xlu1 %3842 }
 0xf58   : > { %v3983_v34 = vpop.permute.xlu0 %3982 }
 0xf5a   : > { %v3985_v35 = vpop.permute.xlu1 %3984 }
 0xf5c   : > { %v4124_v19 = vpop.permute.xlu0 %4123 }
 0xf5e   : > { %v4126_v36 = vpop.permute.xlu1 %4125 }
 0xf60   : > { %v3837_v37 = vpop.permute.xlu0 %3836 }
 0xf61   : > { %7744 = vmatprep.mubr.msk.f32.mxu1 %vm3185_vm6, %v3837_v37 }
 0xf62   : > { %v3839_v38 = vpop.permute.xlu1 %3838 }
 0xf63   : > { %7745 = vmatmul.mubr.msk.f32.vlgmr.msra.gmra.mrb[28].mxu1 %vm3185_vm6, %v3839_v38 }
 0xf64   : > { %7747 = vmatprep.mubr.msk.f32.mxu1 %vm3185_vm6, %v3841_v32  ;;  %v3979_v39 = vpop.permute.xlu0 %3978  ;;  %7759 = vmatpush3.msk.msra.mxu1 %vm3852_vm11, %v4118_v25 }
 0xf65   : > { %7752 = vmatprep.mubr.msk.f32.mxu0 %vm3185_vm6, %v3979_v39 }
 0xf66   : > { %v3981_v29 = vpop.permute.xlu1 %3980 }
 0xf67   : > { %7748 = vmatmul.mubr.msk.f32.gmra.mrb[30].mxu1 %vm3185_vm6, %v3843_v33  ;;  %7753 = vmatmul.mubr.msk.f32.vlgmr.msra.gmra.mrb[40].mxu0 %vm3185_vm6, %v3981_v29  ;;  %v9311_v29 = vld [vmem:[#allocation3 + $0x8] sm:$0xff] }
 0xf68   : > { %7755 = vmatprep.mubr.msk.f32.mxu0 %vm3185_vm6, %v3983_v34  ;;  %v4120_v42 = vpop.permute.xlu0 %4119  ;;  %7767 = vmatpush3.msk.msra.mxu0 %vm3852_vm11, %v4259_v28  ;;  %vm10468_vm11 = vmmov %vm10461_vm5 }
 0xf69   : > { %7760 = vmatprep.mubr.msk.f32.mxu1 %vm3185_vm6, %v4120_v42  ;;  %7774 = vmatprep.subr.bf16.mxu0 %v9024_v40 }
 0xf6a   : > { %v4122_v43 = vpop.permute.xlu1 %4121 }
 0xf6b   : > { %7756 = vmatmul.mubr.msk.f32.gmra.mrb[42].mxu0 %vm3185_vm6, %v3985_v35  ;;  %7761 = vmatmul.mubr.msk.f32.vlgmr.msra.gmra.mrb[32].mxu1 %vm3185_vm6, %v4122_v43 }
 0xf6c   : > { %7763 = vmatprep.mubr.msk.f32.mxu1 %vm3185_vm6, %v4124_v19  ;;  %v4261_v44 = vpop.permute.xlu0 %4260 }
 0xf6d   : > { %7768 = vmatprep.mubr.msk.f32.mxu0 %vm3185_vm6, %v4261_v44 }
 0xf6e   : > { %v4263_v54 = vpop.permute.xlu1 %4262 }
 0xf6f   : > { %7764 = vmatmul.mubr.msk.f32.gmra.mrb[34].mxu1 %vm3185_vm6, %v4126_v36  ;;  %7769 = vmatmul.mubr.msk.f32.vlgmr.msra.gmra.mrb[44].mxu0 %vm3185_vm6, %v4263_v54 }
 0xf70   : > { %v4265_v45 = vpop.permute.xlu0 %4264 }
 0xf71   : > { %7771 = vmatprep.mubr.msk.f32.mxu0 %vm3185_vm6, %v4265_v45 }
 0xf72   : > { %v4267_v46 = vpop.permute.xlu1 %4266 }
 0xf73   : > { %7772 = vmatmul.mubr.msk.f32.gmra.mrb[46].mxu0 %vm3185_vm6, %v4267_v46  ;;  %vm10456_vm6 = vcmask 162896  }
 0xf74   : > { %7778 = vmatprep.mubr.msk.bf16.mxu0 %vm10447_vm14, %v9024_v40  ;;  %vm10457_vm7 = vmmov %vm10456_vm6 }
 0xf75   : > { %vm10464_vm8 = vmmov %vm10456_vm6 }
 0xf76   : > { %vm10465_vm3 = vmmov %vm10456_vm6 }
0x1036   : > { %v7746_v47 = vpop.f32.mrb[28].mxu1 }
0x1037   : > { %3947 = vrot.lane.b32.xlu1 %v7746_v47, %s10448_s28  ;;  %v3922_v48 = vpop.f32.mrb[29].mxu1 }
0x1038   : > { %3945 = vrot.lane.b32.xlu0 %v3922_v48, %s10448_s28 }
0x103a   : > { %v7749_v51 = vpop.f32.mrb[30].mxu1  ;;  %v7754_v52 = vpop.f32.mrb[40].mxu0 }
0x103b   : > { %3963 = vrot.lane.b32.xlu1 %v7746_v47, %s10449_s4  ;;  %v3932_v49 = vpop.f32.mrb[31].mxu1  ;;  %v4063_v53 = vpop.f32.mrb[41].mxu0 }
0x103c   : > { %3961 = vrot.lane.b32.xlu0 %v3922_v48, %s10449_s4 }
0x103e   : > { %v7757_v50 = vpop.f32.mrb[42].mxu0  ;;  %v7762_v55 = vpop.f32.mrb[32].mxu1 }
0x103f   : > { %4088 = vrot.lane.b32.xlu1 %v7754_v52, %s10450_s22  ;;  %v4073_v56 = vpop.f32.mrb[43].mxu0  ;;  %v4204_v40 = vpop.f32.mrb[33].mxu1 }
0x1040   : > { %4086 = vrot.lane.b32.xlu0 %v4063_v53, %s10450_s22 }
0x1042   : > { %v7765_v1 = vpop.f32.mrb[34].mxu1  ;;  %v7770_v57 = vpop.f32.mrb[44].mxu0 }
0x1043   : > { %4104 = vrot.lane.b32.xlu1 %v7754_v52, %s10451_s11  ;;  %v4214_v58 = vpop.f32.mrb[35].mxu1  ;;  %v4345_v59 = vpop.f32.mrb[45].mxu0 }
0x1044   : > { %4102 = vrot.lane.b32.xlu0 %v4063_v53, %s10451_s11 }
0x1046   : > { %v7773_v60 = vpop.f32.mrb[46].mxu0 }
0x1047   : > { %3951 = vrot.lane.b32.xlu1 %v7749_v51, %s10448_s28  ;;  %v4355_v61 = vpop.f32.mrb[47].mxu0 }
0x1048   : > { %3949 = vrot.lane.b32.xlu0 %v3932_v49, %s10448_s28 }
0x104b   : > { %3967 = vrot.lane.b32.xlu1 %v7749_v51, %s10449_s4 }
0x104c   : > { %3965 = vrot.lane.b32.xlu0 %v3932_v49, %s10449_s4  ;;  %s10455_s4 = smov 80  }
0x104f   : > { %4092 = vrot.lane.b32.xlu1 %v7757_v50, %s10450_s22 }
0x1050   : > { %4090 = vrot.lane.b32.xlu0 %v4073_v56, %s10450_s22  ;;  %s10483_s22 = smov 11  }
0x1053   : > { %4108 = vrot.lane.b32.xlu1 %v7757_v50, %s10451_s11  ;;  %v4647_v50 = vld [vmem:[%s10497_s0 + $0x8] sm:$0xff] }
0x1054   : > { %4106 = vrot.lane.b32.xlu0 %v4073_v56, %s10451_s11  ;;  %s10491_s11 = smov 119  }
0x1057   : > { %4229 = vrot.lane.b32.xlu1 %v7762_v55, %s10452_s18 }
0x1058   : > { %4227 = vrot.lane.b32.xlu0 %v4204_v40, %s10452_s18 }
0x105b   : > { %4245 = vrot.lane.b32.xlu1 %v7762_v55, %s10453_s23  ;;  %v4646_v55 = vld [vmem:[%s10497_s0] sm:$0xff]  ;;  %s10566_s0 = sld [smem:[#allocation11_spill]] }
0x105c   : > { %4243 = vrot.lane.b32.xlu0 %v4204_v40, %s10453_s23 }
0x105f   : > { %4370 = vrot.lane.b32.xlu1 %v7770_v57, %s10454_s2 }
0x1060   : > { %4368 = vrot.lane.b32.xlu0 %v4345_v59, %s10454_s2 }
0x1063   : > { %4386 = vrot.lane.b32.xlu1 %v7770_v57, %s10455_s4 }
0x1064   : > { %4384 = vrot.lane.b32.xlu0 %v4345_v59, %s10455_s4 }
0x1067   : > { %4233 = vrot.lane.b32.xlu1 %v7765_v1, %s10452_s18 }
0x1068   : > { %4231 = vrot.lane.b32.xlu0 %v4214_v58, %s10452_s18  ;;  %s10492_s18 = smov 9  }
0x106b   : > { %4249 = vrot.lane.b32.xlu1 %v7765_v1, %s10453_s23 }
0x106c   : > { %4247 = vrot.lane.b32.xlu0 %v4214_v58, %s10453_s23  ;;  %s10495_s23 = smov 118  }
0x106f   : > { %4374 = vrot.lane.b32.xlu1 %v7773_v60, %s10454_s2 }
0x1070   : > { %4372 = vrot.lane.b32.xlu0 %v4355_v61, %s10454_s2 }
0x1073   : > { %4390 = vrot.lane.b32.xlu1 %v7773_v60, %s10455_s4 }
0x1074   : > { %4388 = vrot.lane.b32.xlu0 %v4355_v61, %s10455_s4  ;;  %s10496_s4 = sld [smem:[#allocation9_spill]] }
0x107a   : > { %v8096_v53 = vld [vmem:[%s10496_s4 + $0x4] ss:$12 sps:$4 sm:$0xff]  }
0x107b   : > { %4708 = vmatprep.mubr.bf16.mxu1 %v8096_v53 }
0x10a9   : > { %v3948_v63 = vpop.permute.xlu1 %3947 }
0x10aa   : > { %3958 = vst.msk [vmem:[#allocation3 + $0x18] sm:$0xff] %vm10456_vm6, %v3948_v63  ;;  %v3946_v0 = vpop.permute.xlu0 %3945  ;;  %vm10469_vm6 = vmmov %vm10461_vm5 }
0x10ab   : > { %3957 = vst.msk [vmem:[#allocation3] sm:$0xff] %vm10457_vm7, %v3946_v0  ;;  %vm10470_vm7 = vmmov %vm10463_vm4 }
0x10ad   : > { %v3964_v2 = vpop.permute.xlu1 %3963 }
0x10ae   : > { %3974 = vst.msk [vmem:[#allocation3 + $0x18] sm:$0xff] %vm10458_vm2, %v3964_v2  ;;  %v3962_v3 = vpop.permute.xlu0 %3961  ;;  %vm10471_vm2 = vmmov %vm10463_vm4 }
0x10af   : > { %3973 = vst.msk [vmem:[#allocation3] sm:$0xff] %vm10459_vm1, %v3962_v3  ;;  %vm10472_vm1 = vcmask 490896  }
0x10b1   : > { %v4089_v4 = vpop.permute.xlu1 %4088 }
0x10b2   : > { %4099 = vst.msk [vmem:[#allocation3 + $0x18] sm:$0xff] %vm10460_vm12, %v4089_v4  ;;  %v4087_v8 = vpop.permute.xlu0 %4086  ;;  %vm10473_vm12 = vmmov %vm10472_vm1 }
0x10b3   : > { %4098 = vst.msk [vmem:[#allocation3] sm:$0xff] %vm10461_vm5, %v4087_v8  ;;  %vm10474_vm5 = vcmask 572896  }
0x10b5   : > { %v4105_v9 = vpop.permute.xlu1 %4104 }
0x10b6   : > { %4115 = vst.msk [vmem:[#allocation3 + $0x18] sm:$0xff] %vm10462_vm9, %v4105_v9  ;;  %v4103_v10 = vpop.permute.xlu0 %4102  ;;  %vm10475_vm9 = vmmov %vm10474_vm5 }
0x10b7   : > { %4114 = vst.msk [vmem:[#allocation3] sm:$0xff] %vm10463_vm4, %v4103_v10  ;;  %vm10476_vm4 = vcmask 654896  }
0x10b9   : > { %v3952_v11 = vpop.permute.xlu1 %3951 }
0x10ba   : > { %3960 = vst.msk [vmem:[#allocation3 + $0x48] sm:$0xff] %vm10464_vm8, %v3952_v11  ;;  %v3950_v12 = vpop.permute.xlu0 %3949  ;;  %vm10477_vm8 = vmmov %vm10476_vm4 }
0x10bb   : > { %3959 = vst.msk [vmem:[#allocation3 + $0x30] sm:$0xff] %vm10465_vm3, %v3950_v12  ;;  %vm10478_vm3 = vcmask 736896  }
0x10bd   : > { %v3968_v13 = vpop.permute.xlu1 %3967 }
0x10be   : > { %3976 = vst.msk [vmem:[#allocation3 + $0x48] sm:$0xff] %vm10466_vm13, %v3968_v13  ;;  %v3966_v21 = vpop.permute.xlu0 %3965  ;;  %vm10479_vm13 = vmmov %vm10478_vm3 }
0x10bf   : > { %3975 = vst.msk [vmem:[#allocation3 + $0x30] sm:$0xff] %vm10467_vm15, %v3966_v21  ;;  %vm10480_vm15 = vmmov %vm10472_vm1 }
0x10c1   : > { %v4093_v22 = vpop.permute.xlu1 %4092 }
0x10c2   : > { %4101 = vst.msk [vmem:[#allocation3 + $0x48] sm:$0xff] %vm10468_vm11, %v4093_v22  ;;  %v4091_v24 = vpop.permute.xlu0 %4090  ;;  %vm10481_vm11 = vmmov %vm10472_vm1 }
0x10c3   : > { %4100 = vst.msk [vmem:[#allocation3 + $0x30] sm:$0xff] %vm10469_vm6, %v4091_v24  ;;  %vm10482_vm6 = vmmov %vm10474_vm5 }
0x10c5   : > { %v4109_v25 = vpop.permute.xlu1 %4108 }
0x10c6   : > { %4117 = vst.msk [vmem:[#allocation3 + $0x48] sm:$0xff] %vm10470_vm7, %v4109_v25  ;;  %v4107_v26 = vpop.permute.xlu0 %4106  ;;  %vm10484_vm7 = vcmask 818176  }
0x10c7   : > { %4116 = vst.msk [vmem:[#allocation3 + $0x30] sm:$0xff] %vm10471_vm2, %v4107_v26  ;;  %vm10485_vm2 = vmmov %vm10474_vm5 }
0x10c9   : > { %v4230_v27 = vpop.permute.xlu1 %4229 }
0x10ca   : > { %4240 = vst.msk [vmem:[#allocation3 + $0x18] sm:$0xff] %vm10472_vm1, %v4230_v27  ;;  %v4228_v28 = vpop.permute.xlu0 %4227  ;;  %vm10486_vm1 = vmmov %vm10484_vm7 }
0x10cb   : > { %4239 = vst.msk [vmem:[#allocation3] sm:$0xff] %vm10473_vm12, %v4228_v28  ;;  %vm10487_vm12 = vmmov %vm10476_vm4 }
0x10cd   : > { %v4246_v30 = vpop.permute.xlu1 %4245 }
0x10ce   : > { %4256 = vst.msk [vmem:[#allocation3 + $0x18] sm:$0xff] %vm10474_vm5, %v4246_v30  ;;  %v4244_v32 = vpop.permute.xlu0 %4243  ;;  %vm10488_vm5 = vmmov %vm10476_vm4 }
0x10cf   : > { %4255 = vst.msk [vmem:[#allocation3] sm:$0xff] %vm10475_vm9, %v4244_v32  ;;  %vm10489_vm9 = vmmov %vm10478_vm3 }
0x10d1   : > { %v4371_v33 = vpop.permute.xlu1 %4370 }
0x10d2   : > { %4381 = vst.msk [vmem:[#allocation3 + $0x18] sm:$0xff] %vm10476_vm4, %v4371_v33  ;;  %v4369_v34 = vpop.permute.xlu0 %4368  ;;  %vm10490_vm4 = vmmov %vm10478_vm3 }
0x10d3   : > { %4380 = vst.msk [vmem:[#allocation3] sm:$0xff] %vm10477_vm8, %v4369_v34  ;;  %vm10493_vm8 = vmmov %vm10486_vm1 }
0x10d5   : > { %v4387_v35 = vpop.permute.xlu1 %4386 }
0x10d6   : > { %4397 = vst.msk [vmem:[#allocation3 + $0x18] sm:$0xff] %vm10478_vm3, %v4387_v35  ;;  %v4385_v19 = vpop.permute.xlu0 %4384  ;;  %vm10494_vm3 = vmmov %vm10486_vm1 }
0x10d7   : > { %4396 = vst.msk [vmem:[#allocation3] sm:$0xff] %vm10479_vm13, %v4385_v19  ;;  %vm10499_vm13 = vcmask 908376  }
0x10d9   : > { %v4234_v36 = vpop.permute.xlu1 %4233 }
0x10da   : > { %4242 = vst.msk [vmem:[#allocation3 + $0x48] sm:$0xff] %vm10480_vm15, %v4234_v36  ;;  %v4232_v37 = vpop.permute.xlu0 %4231  ;;  %vm10500_vm15 = vcmask 89088  }
0x10db   : > { %4241 = vst.msk [vmem:[#allocation3 + $0x30] sm:$0xff] %vm10481_vm11, %v4232_v37  ;;  %vm10501_vm11 = vmmov %vm10499_vm13 }
0x10dd   : > { %v4250_v38 = vpop.permute.xlu1 %4249  ;;  %v4401_v39 = vld [vmem:[#allocation3 + $0x18] sm:$0xff] }
0x10de   : > { %4258 = vst.msk [vmem:[#allocation3 + $0x48] sm:$0xff] %vm10482_vm6, %v4250_v38  ;;  %4410 = vrot.lane.b32.xlu1 %v4401_v39, %s10483_s22  ;;  %5147 = vst [vmem:[#allocation3 + $0x18] sm:$0xff] %v9311_v29  ;;  %v4248_v42 = vpop.permute.xlu0 %4247  ;;  %v4400_v43 = vld [vmem:[#allocation3] sm:$0xff] }
0x10df   : > { %4489 = vst.msk [vmem:[#allocation2 + $0x2b0] sm:$0xff] %vm10484_vm7, %v4401_v39  ;;  %4408 = vrot.lane.b32.xlu0 %v4400_v43, %s10483_s22  ;;  %5144 = vst [vmem:[#allocation3] sm:$0xff] %v9311_v29  ;;  %vm10503_vm7 = vcmask 809984  }
0x10e0   : > { %4257 = vst.msk [vmem:[#allocation3 + $0x30] sm:$0xff] %vm10485_vm2, %v4248_v42  ;;  %vm10502_vm6 = vmmov %vm10500_vm15  ;;  %vm10504_vm2 = vcmask 818968  }
0x10e1   : > { %4488 = vst.msk [vmem:[#allocation2 + $0x288] sm:$0xff] %vm10486_vm1, %v4400_v43  ;;  %v4375_v44 = vpop.permute.xlu1 %4374  ;;  %vm10505_vm1 = vmmov %vm10503_vm7 }
0x10e2   : > { %4383 = vst.msk [vmem:[#allocation3 + $0x48] sm:$0xff] %vm10487_vm12, %v4375_v44  ;;  %4494 = vrot.lane.b32.xlu1 %v4401_v39, %s10355_s1  ;;  %v4373_v54 = vpop.permute.xlu0 %4372  ;;  %vm10506_vm12 = vmmov %vm10504_vm2 }
0x10e3   : > { %4382 = vst.msk [vmem:[#allocation3 + $0x30] sm:$0xff] %vm10488_vm5, %v4373_v54  ;;  %4492 = vrot.lane.b32.xlu0 %v4400_v43, %s10355_s1  ;;  %vm10507_vm5 = vcmask 900176  }
0x10e5   : > { %v4391_v45 = vpop.permute.xlu1 %4390 }
0x10e6   : > { %v4605_v46 = vld [vmem:[#allocation2 + $0x2b0] sm:$0xff]  ;;  %4399 = vst.msk [vmem:[#allocation3 + $0x48] sm:$0xff] %vm10489_vm9, %v4391_v45  ;;  %4430 = vrot.lane.b32.xlu1 %v4401_v39, %s10448_s28  ;;  %v4389_v47 = vpop.permute.xlu0 %4388  ;;  %vm10508_vm9 = vcmask 80896  }
0x10e7   : > { %4398 = vst.msk [vmem:[#allocation3 + $0x30] sm:$0xff] %vm10490_vm4, %v4389_v47  ;;  %4428 = vrot.lane.b32.xlu0 %v4400_v43, %s10448_s28  ;;  %vm10509_vm4 = vmmov %vm10507_vm5 }
0x10e8   : > { %v4604_v48 = vld [vmem:[#allocation2 + $0x288] sm:$0xff] }
0x10e9   : > { %v4632_v51 = vpack.c.bf16 %v4605_v46, %v4604_v48 }
0x10ea   : > { %4518 = vrot.lane.b32.xlu1 %v4401_v39, %s10491_s11 }
0x10eb   : > { %7521 = vmatprep.subr.bf16.mxu1 %v4632_v51  ;;  %4516 = vrot.lane.b32.xlu0 %v4400_v43, %s10491_s11 }
0x10ed   : > { %v4403_v52 = vld [vmem:[#allocation3 + $0x48] sm:$0xff] }
0x10ee   : > { %4450 = vrot.lane.b32.xlu1 %v4401_v39, %s10492_s18  ;;  %4491 = vst.msk [vmem:[#allocation2 + $0x300] sm:$0xff] %vm10493_vm8, %v4403_v52  ;;  %v4402_v49 = vld [vmem:[#allocation3 + $0x30] sm:$0xff]  ;;  %vm10510_vm8 = vmmov %vm10508_vm9 }
0x10ef   : > { %4448 = vrot.lane.b32.xlu0 %v4400_v43, %s10492_s18  ;;  %4490 = vst.msk [vmem:[#allocation2 + $0x2d8] sm:$0xff] %vm10494_vm3, %v4402_v49  ;;  %vm10511_vm3 = vcmask 744448  }
0x10f2   : > { %4542 = vrot.lane.b32.xlu1 %v4401_v39, %s10495_s23 }
0x10f3   : > { %4540 = vrot.lane.b32.xlu0 %v4400_v43, %s10495_s23 }
0x10f5   : > { %v4607_v63 = vld [vmem:[#allocation2 + $0x300] sm:$0xff] }
0x10f6   : > { %4470 = vrot.lane.b32.xlu1 %v4401_v39, %s10357_s26  ;;  %v4606_v61 = vld [vmem:[#allocation2 + $0x2d8] sm:$0xff] }
0x10f7   : > { %4468 = vrot.lane.b32.xlu0 %v4400_v43, %s10357_s26  ;;  %v4633_v4 = vpack.c.bf16 %v4607_v63, %v4606_v61 }
0x10fa   : > { %4414 = vrot.lane.b32.xlu1 %v4403_v52, %s10483_s22 }
0x10fb   : > { %4412 = vrot.lane.b32.xlu0 %v4402_v49, %s10483_s22 }
0x10fe   : > { %4498 = vrot.lane.b32.xlu1 %v4403_v52, %s10355_s1 }
0x10ff   : > { %4496 = vrot.lane.b32.xlu0 %v4402_v49, %s10355_s1  ;;  %s10498_s1 = smov 117  }
0x1102   : > { %4434 = vrot.lane.b32.xlu1 %v4403_v52, %s10448_s28 }
0x1103   : > { %4432 = vrot.lane.b32.xlu0 %v4402_v49, %s10448_s28 }
0x1106   : > { %4522 = vrot.lane.b32.xlu1 %v4403_v52, %s10491_s11 }
0x1107   : > { %4520 = vrot.lane.b32.xlu0 %v4402_v49, %s10491_s11 }
0x110a   : > { %4454 = vrot.lane.b32.xlu1 %v4403_v52, %s10492_s18 }
0x110b   : > { %4452 = vrot.lane.b32.xlu0 %v4402_v49, %s10492_s18 }
0x110e   : > { %4546 = vrot.lane.b32.xlu1 %v4403_v52, %s10495_s23 }
0x110f   : > { %4544 = vrot.lane.b32.xlu0 %v4402_v49, %s10495_s23 }
0x1112   : > { %4474 = vrot.lane.b32.xlu1 %v4403_v52, %s10357_s26 }
0x1113   : > { %4472 = vrot.lane.b32.xlu0 %v4402_v49, %s10357_s26  ;;  %s10565_s26 = sld [smem:[#allocation12_spill]] }
0x1116   : > { %4566 = vrot.lane.b32.xlu1 %v4401_v39, %s10498_s1 }
0x1117   : > { %4564 = vrot.lane.b32.xlu0 %v4400_v43, %s10498_s1 }
0x111a   : > { %4570 = vrot.lane.b32.xlu1 %v4403_v52, %s10498_s1 }
0x111b   : > { %4568 = vrot.lane.b32.xlu0 %v4402_v49, %s10498_s1 }
0x111e   : > { %4655 = vperm.xlu1 %8075, %v4647_v50  }
0x111f   : > { %4650 = vperm.xlu0 %8074, %v4646_v55  }
0x1150   : > { %v4411_v56 = vpop.permute.xlu1 %4410 }
0x1151   : > { %4421 = vst.msk [vmem:[#allocation2 + $0x30] sm:$0xff] %vm10499_vm13, %v4411_v56  ;;  %v4409_v40 = vpop.permute.xlu0 %4408  ;;  %vm10512_vm13 = vcmask 818904  }
0x1152   : > { %4425 = vst.msk [vmem:[#allocation2 + $0x30] sm:$0xff] %vm10500_vm15, %v9311_v29  ;;  %vm10513_vm15 = vmmov %vm10511_vm3 }
0x1153   : > { %4420 = vst.msk [vmem:[#allocation2 + $0x8] sm:$0xff] %vm10501_vm11, %v4409_v40  ;;  %vm10514_vm11 = vmmov %vm10512_vm13 }
0x1154   : > { %4424 = vst.msk [vmem:[#allocation2 + $0x8] sm:$0xff] %vm10502_vm6, %v9311_v29  ;;  %v4495_v1 = vpop.permute.xlu1 %4494  ;;  %vm10515_vm6 = vcmask 891976  }
0x1155   : > { %4507 = vst.msk [vmem:[#allocation2 + $0x350] sm:$0xff] %vm10503_vm7, %v4495_v1  ;;  %v4493_v57 = vpop.permute.xlu0 %4492  ;;  %vm10516_vm7 = vcmask 72704  }
0x1156   : > { %4513 = vst.msk [vmem:[#allocation2 + $0x350] sm:$0xff] %vm10504_vm2, %v9311_v29  ;;  %vm10517_vm2 = vmmov %vm10515_vm6 }
0x1157   : > { %4505 = vst.msk [vmem:[#allocation2 + $0x328] sm:$0xff] %vm10505_vm1, %v4493_v57  ;;  %vm10518_vm1 = vmmov %vm10516_vm7 }
0x1158   : > { %4512 = vst.msk [vmem:[#allocation2 + $0x328] sm:$0xff] %vm10506_vm12, %v9311_v29  ;;  %v4431_v58 = vpop.permute.xlu1 %4430  ;;  %vm10519_vm12 = vcmask 736256  }
0x1159   : > { %4441 = vst.msk [vmem:[#allocation2 + $0xd0] sm:$0xff] %vm10507_vm5, %v4431_v58  ;;  %v4429_v59 = vpop.permute.xlu0 %4428  ;;  %v4589_v60 = vld [vmem:[#allocation2 + $0x30] sm:$0xff]  ;;  %vm10520_vm5 = vcmask 818896  }
0x115a   : > { %4445 = vst.msk [vmem:[#allocation2 + $0xd0] sm:$0xff] %vm10508_vm9, %v9311_v29  ;;  %vm10521_vm9 = vmmov %vm10519_vm12 }
0x115b   : > { %4440 = vst.msk [vmem:[#allocation2 + $0xa8] sm:$0xff] %vm10509_vm4, %v4429_v59  ;;  %v4588_v0 = vld [vmem:[#allocation2 + $0x8] sm:$0xff]  ;;  %vm10522_vm4 = vmmov %vm10520_vm5 }
0x115c   : > { %4444 = vst.msk [vmem:[#allocation2 + $0xa8] sm:$0xff] %vm10510_vm8, %v9311_v29  ;;  %v4624_v2 = vpack.c.bf16 %v4589_v60, %v4588_v0  ;;  %v4519_v3 = vpop.permute.xlu1 %4518  ;;  %vm10523_vm8 = vcmask 826376  }
0x115d   : > { %4531 = vst.msk [vmem:[#allocation2 + $0x3f0] sm:$0xff] %vm10511_vm3, %v4519_v3  ;;  %v4517_v8 = vpop.permute.xlu0 %4516  ;;  %vm10524_vm3 = vcmask 7168   ;;  %v4609_v28 = vld [vmem:[#allocation2 + $0x350] sm:$0xff] }
0x115e   : > { %7522 = vmatpush3.bf16.msra.mxu1 %v4624_v2  ;;  %4537 = vst.msk [vmem:[#allocation2 + $0x3f0] sm:$0xff] %vm10512_vm13, %v9311_v29  ;;  %vm10525_vm13 = vmmov %vm10523_vm8 }
0x115f   : > { %4529 = vst.msk [vmem:[#allocation2 + $0x3c8] sm:$0xff] %vm10513_vm15, %v4517_v8  ;;  %7523 = vmatprep.subr.bf16.mxu1 %v4633_v4  ;;  %vm10526_vm15 = vmmov %vm10524_vm3  ;;  %v4608_v27 = vld [vmem:[#allocation2 + $0x328] sm:$0xff] }
0x1160   : > { %4536 = vst.msk [vmem:[#allocation2 + $0x3c8] sm:$0xff] %vm10514_vm11, %v9311_v29  ;;  %v4451_v9 = vpop.permute.xlu1 %4450  ;;  %vm10527_vm11 = vcmask 908376   ;;  %v4634_v35 = vpack.c.bf16 %v4609_v28, %v4608_v27 }
0x1161   : > { %4461 = vst.msk [vmem:[#allocation2 + $0x170] sm:$0xff] %vm10515_vm6, %v4451_v9  ;;  %v4449_v10 = vpop.permute.xlu0 %4448  ;;  %vm10528_vm6 = vcmask 89088   ;;  %v4593_v36 = vld [vmem:[#allocation2 + $0xd0] sm:$0xff] }
0x1162   : > { %4465 = vst.msk [vmem:[#allocation2 + $0x170] sm:$0xff] %vm10516_vm7, %v9311_v29  ;;  %vm10529_vm7 = vmmov %vm10527_vm11 }
0x1163   : > { %4460 = vst.msk [vmem:[#allocation2 + $0x148] sm:$0xff] %vm10517_vm2, %v4449_v10  ;;  %vm10530_vm2 = vmmov %vm10528_vm6  ;;  %v4592_v19 = vld [vmem:[#allocation2 + $0xa8] sm:$0xff] }
0x1164   : > { %4464 = vst.msk [vmem:[#allocation2 + $0x148] sm:$0xff] %vm10518_vm1, %v9311_v29  ;;  %v4543_v11 = vpop.permute.xlu1 %4542  ;;  %vm10531_vm1 = vcmask 809984   ;;  %v4626_v42 = vpack.c.bf16 %v4593_v36, %v4592_v19 }
0x1165   : > { %4555 = vst.msk [vmem:[#allocation2 + $0x490] sm:$0xff] %vm10519_vm12, %v4543_v11  ;;  %v4541_v12 = vpop.permute.xlu0 %4540  ;;  %vm10532_vm12 = vcmask 818968   ;;  %v4613_v46 = vld [vmem:[#allocation2 + $0x3f0] sm:$0xff] }
0x1166   : > { %4561 = vst.msk [vmem:[#allocation2 + $0x490] sm:$0xff] %vm10520_vm5, %v9311_v29  ;;  %vm10533_vm5 = vmmov %vm10531_vm1 }
0x1167   : > { %4553 = vst.msk [vmem:[#allocation2 + $0x468] sm:$0xff] %vm10521_vm9, %v4541_v12  ;;  %vm10534_vm9 = vmmov %vm10532_vm12  ;;  %v4612_v45 = vld [vmem:[#allocation2 + $0x3c8] sm:$0xff] }
0x1168   : > { %4560 = vst.msk [vmem:[#allocation2 + $0x468] sm:$0xff] %vm10522_vm4, %v9311_v29  ;;  %v4471_v13 = vpop.permute.xlu1 %4470  ;;  %vm10535_vm4 = vcmask 900176   ;;  %v4636_v49 = vpack.c.bf16 %v4613_v46, %v4612_v45 }
0x1169   : > { %4481 = vst.msk [vmem:[#allocation2 + $0x210] sm:$0xff] %vm10523_vm8, %v4471_v13  ;;  %v4469_v21 = vpop.permute.xlu0 %4468  ;;  %vm10536_vm8 = vcmask 80896   ;;  %v4597_v50 = vld [vmem:[#allocation2 + $0x170] sm:$0xff] }
0x116a   : > { %4485 = vst.msk [vmem:[#allocation2 + $0x210] sm:$0xff] %vm10524_vm3, %v9311_v29  ;;  %vm10537_vm3 = vmmov %vm10535_vm4 }
0x116b   : > { %4480 = vst.msk [vmem:[#allocation2 + $0x1e8] sm:$0xff] %vm10525_vm13, %v4469_v21  ;;  %vm10538_vm13 = vmmov %vm10536_vm8  ;;  %v4596_v53 = vld [vmem:[#allocation2 + $0x148] sm:$0xff] }
0x116c   : > { %4484 = vst.msk [vmem:[#allocation2 + $0x1e8] sm:$0xff] %vm10526_vm15, %v9311_v29  ;;  %v4415_v22 = vpop.permute.xlu1 %4414  ;;  %vm10539_vm15 = vcmask 744448   ;;  %v4628_v1 = vpack.c.bf16 %v4597_v50, %v4596_v53 }
0x116d   : > { %4423 = vst.msk [vmem:[#allocation2 + $0x80] sm:$0xff] %vm10527_vm11, %v4415_v22  ;;  %v4413_v24 = vpop.permute.xlu0 %4412  ;;  %vm10540_vm11 = vcmask 818904   ;;  %v4617_v61 = vld [vmem:[#allocation2 + $0x490] sm:$0xff] }
0x116e   : > { %4427 = vst.msk [vmem:[#allocation2 + $0x80] sm:$0xff] %vm10528_vm6, %v9311_v29  ;;  %vm10541_vm6 = vmmov %vm10539_vm15 }
0x116f   : > { %4422 = vst.msk [vmem:[#allocation2 + $0x58] sm:$0xff] %vm10529_vm7, %v4413_v24  ;;  %vm10542_vm7 = vmmov %vm10540_vm11  ;;  %v4616_v60 = vld [vmem:[#allocation2 + $0x468] sm:$0xff] }
0x1170   : > { %4426 = vst.msk [vmem:[#allocation2 + $0x58] sm:$0xff] %vm10530_vm2, %v9311_v29  ;;  %v4499_v25 = vpop.permute.xlu1 %4498  ;;  %vm10543_vm2 = vcmask 891976   ;;  %v4638_v4 = vpack.c.bf16 %v4617_v61, %v4616_v60 }
0x1171   : > { %4511 = vst.msk [vmem:[#allocation2 + $0x3a0] sm:$0xff] %vm10531_vm1, %v4499_v25  ;;  %v4497_v26 = vpop.permute.xlu0 %4496  ;;  %vm10544_vm1 = vcmask 72704   ;;  %v4601_v9 = vld [vmem:[#allocation2 + $0x210] sm:$0xff] }
0x1172   : > { %4515 = vst.msk [vmem:[#allocation2 + $0x3a0] sm:$0xff] %vm10532_vm12, %v9311_v29  ;;  %vm10545_vm12 = vmmov %vm10543_vm2 }
0x1173   : > { %4509 = vst.msk [vmem:[#allocation2 + $0x378] sm:$0xff] %vm10533_vm5, %v4497_v26  ;;  %vm10546_vm5 = vmmov %vm10544_vm1  ;;  %v4600_v8 = vld [vmem:[#allocation2 + $0x1e8] sm:$0xff] }
0x1174   : > { %4514 = vst.msk [vmem:[#allocation2 + $0x378] sm:$0xff] %vm10534_vm9, %v9311_v29  ;;  %v4435_v30 = vpop.permute.xlu1 %4434  ;;  %vm10547_vm9 = vcmask 736256   ;;  %v4630_v13 = vpack.c.bf16 %v4601_v9, %v4600_v8 }
0x1175   : > { %4443 = vst.msk [vmem:[#allocation2 + $0x120] sm:$0xff] %vm10535_vm4, %v4435_v30  ;;  %v4433_v32 = vpop.permute.xlu0 %4432  ;;  %v4591_v33 = vld [vmem:[#allocation2 + $0x80] sm:$0xff]  ;;  %vm10548_vm4 = vcmask 818896  }
0x1176   : > { %4447 = vst.msk [vmem:[#allocation2 + $0x120] sm:$0xff] %vm10536_vm8, %v9311_v29  ;;  %vm10549_vm8 = vmmov %vm10547_vm9 }
0x1177   : > { %4442 = vst.msk [vmem:[#allocation2 + $0xf8] sm:$0xff] %vm10537_vm3, %v4433_v32  ;;  %v4590_v34 = vld [vmem:[#allocation2 + $0x58] sm:$0xff]  ;;  %vm10550_vm3 = vmmov %vm10548_vm4  ;;  %v8094_v32 = vld [vmem:[%s10496_s4] ss:$12 sps:$4 sm:$0xff]  }
0x1178   : > { %4446 = vst.msk [vmem:[#allocation2 + $0xf8] sm:$0xff] %vm10538_vm13, %v9311_v29  ;;  %v4625_v37 = vpack.c.bf16 %v4591_v33, %v4590_v34  ;;  %v4523_v38 = vpop.permute.xlu1 %4522  ;;  %vm10551_vm13 = vcmask 826376  }
0x1179   : > { %4535 = vst.msk [vmem:[#allocation2 + $0x440] sm:$0xff] %vm10539_vm15, %v4523_v38  ;;  %v4521_v39 = vpop.permute.xlu0 %4520  ;;  %v4611_v43 = vld [vmem:[#allocation2 + $0x3a0] sm:$0xff]  ;;  %vm10552_vm15 = vcmask 7168   ;;  %v8097_v38 = vld [vmem:[%s10496_s4 + $0x8] ss:$12 sps:$4 sm:$0xff]   ;;  %s10568_s4 = smov 127  }
0x117a   : > { %7524 = vmatpush3.bf16.msra.mxu1 %v4625_v37  ;;  %4539 = vst.msk [vmem:[#allocation2 + $0x440] sm:$0xff] %vm10540_vm11, %v9311_v29  ;;  %vm10553_vm11 = vmmov %vm10551_vm13 }
0x117b   : > { %4533 = vst.msk [vmem:[#allocation2 + $0x418] sm:$0xff] %vm10541_vm6, %v4521_v39  ;;  %7525 = vmatprep.subr.bf16.mxu1 %v4634_v35  ;;  %v4610_v44 = vld [vmem:[#allocation2 + $0x378] sm:$0xff]  ;;  %vm10554_vm6 = vmmov %vm10552_vm15 }
0x117c   : > { %4538 = vst.msk [vmem:[#allocation2 + $0x418] sm:$0xff] %vm10542_vm7, %v9311_v29  ;;  %v4635_v54 = vpack.c.bf16 %v4611_v43, %v4610_v44  ;;  %v4455_v47 = vpop.permute.xlu1 %4454  ;;  %vm10555_vm7 = vcmask 728064  }
0x117d   : > { %4463 = vst.msk [vmem:[#allocation2 + $0x1c0] sm:$0xff] %vm10543_vm2, %v4455_v47  ;;  %v4453_v48 = vpop.permute.xlu0 %4452  ;;  %v4595_v51 = vld [vmem:[#allocation2 + $0x120] sm:$0xff]  ;;  %vm10556_vm2 = vcmask 818888  }
0x117e   : > { %7526 = vmatpush3.bf16.msra.mxu1 %v4626_v42  ;;  %4467 = vst.msk [vmem:[#allocation2 + $0x1c0] sm:$0xff] %vm10544_vm1, %v9311_v29  ;;  %vm10557_vm1 = vmmov %vm10555_vm7 }
0x117f   : > { %4462 = vst.msk [vmem:[#allocation2 + $0x198] sm:$0xff] %vm10545_vm12, %v4453_v48  ;;  %7527 = vmatprep.subr.bf16.mxu1 %v4635_v54  ;;  %v4594_v52 = vld [vmem:[#allocation2 + $0xf8] sm:$0xff]  ;;  %vm10558_vm12 = vmmov %vm10556_vm2 }
0x1180   : > { %4466 = vst.msk [vmem:[#allocation2 + $0x198] sm:$0xff] %vm10546_vm5, %v9311_v29  ;;  %v4627_v55 = vpack.c.bf16 %v4595_v51, %v4594_v52  ;;  %v4547_v56 = vpop.permute.xlu1 %4546  ;;  %vm10559_vm5 = vmmov %vm10557_vm1 }
0x1181   : > { %4559 = vst.msk [vmem:[#allocation2 + $0x4e0] sm:$0xff] %vm10547_vm9, %v4547_v56  ;;  %v4545_v40 = vpop.permute.xlu0 %4544  ;;  %v4615_v57 = vld [vmem:[#allocation2 + $0x440] sm:$0xff]  ;;  %vm10560_vm9 = vmmov %vm10556_vm2 }
0x1182   : > { %7528 = vmatpush3.bf16.msra.mxu1 %v4627_v55  ;;  %4563 = vst.msk [vmem:[#allocation2 + $0x4e0] sm:$0xff] %vm10548_vm4, %v9311_v29  ;;  %vm10561_vm4 = vmmov %vm10557_vm1 }
0x1183   : > { %4557 = vst.msk [vmem:[#allocation2 + $0x4b8] sm:$0xff] %vm10549_vm8, %v4545_v40  ;;  %7529 = vmatprep.subr.bf16.mxu1 %v4636_v49  ;;  %v4614_v58 = vld [vmem:[#allocation2 + $0x418] sm:$0xff]  ;;  %vm10562_vm8 = vmmov %vm10556_vm2 }
0x1184   : > { %4562 = vst.msk [vmem:[#allocation2 + $0x4b8] sm:$0xff] %vm10550_vm3, %v9311_v29  ;;  %v4637_v59 = vpack.c.bf16 %v4615_v57, %v4614_v58  ;;  %v4475_v63 = vpop.permute.xlu1 %4474  ;;  %v9462_v58 = vld [vmem:[%s8361_s27] ss:$0 sm:$0xff] }
0x1185   : > { %4483 = vst.msk [vmem:[#allocation2 + $0x260] sm:$0xff] %vm10551_vm13, %v4475_v63  ;;  %v4473_v0 = vpop.permute.xlu0 %4472  ;;  %v4599_v2 = vld [vmem:[#allocation2 + $0x1c0] sm:$0xff]  ;;  %vm10569_vm13 = vcmask 130048  }
0x1186   : > { %7530 = vmatpush3.bf16.msra.mxu1 %v4628_v1  ;;  %4487 = vst.msk [vmem:[#allocation2 + $0x260] sm:$0xff] %vm10552_vm15, %v9311_v29  ;;  %v8098_v63 = vld [vmem:[%s10566_s0 + $0x4] ss:$8 sps:$4 sm:$0xff]   ;;  %vm10570_vm15 = vcmask 908376  }
0x1187   : > { %4482 = vst.msk [vmem:[#allocation2 + $0x238] sm:$0xff] %vm10553_vm11, %v4473_v0  ;;  %7531 = vmatprep.subr.bf16.mxu1 %v4637_v59  ;;  %v4598_v3 = vld [vmem:[#allocation2 + $0x198] sm:$0xff]  ;;  %vm10571_vm11 = vcmask 89088  }
0x1188   : > { %4486 = vst.msk [vmem:[#allocation2 + $0x238] sm:$0xff] %vm10554_vm6, %v9311_v29  ;;  %v4629_v10 = vpack.c.bf16 %v4599_v2, %v4598_v3  ;;  %v4567_v11 = vpop.permute.xlu1 %4566  ;;  %vm10572_vm6 = vmmov %vm10570_vm15 }
0x1189   : > { %4579 = vst.msk [vmem:[#allocation2 + $0x530] sm:$0xff] %vm10555_vm7, %v4567_v11  ;;  %v4565_v12 = vpop.permute.xlu0 %4564  ;;  %v4619_v21 = vld [vmem:[#allocation2 + $0x4e0] sm:$0xff]  ;;  %vm10573_vm7 = vmmov %vm10571_vm11 }
0x118a   : > { %7532 = vmatpush3.bf16.msra.mxu1 %v4629_v10  ;;  %4585 = vst.msk [vmem:[#allocation2 + $0x530] sm:$0xff] %vm10556_vm2, %v9311_v29  ;;  %vm10574_vm2 = vcmask 900176  }
0x118b   : > { %4577 = vst.msk [vmem:[#allocation2 + $0x508] sm:$0xff] %vm10557_vm1, %v4565_v12  ;;  %7533 = vmatprep.subr.bf16.mxu1 %v4638_v4  ;;  %v4618_v22 = vld [vmem:[#allocation2 + $0x4b8] sm:$0xff]  ;;  %vm10575_vm1 = vcmask 80896  }
0x118c   : > { %4584 = vst.msk [vmem:[#allocation2 + $0x508] sm:$0xff] %vm10558_vm12, %v9311_v29  ;;  %v4639_v24 = vpack.c.bf16 %v4619_v21, %v4618_v22  ;;  %v4571_v25 = vpop.permute.xlu1 %4570  ;;  %vm10576_vm12 = vmmov %vm10574_vm2 }
0x118d   : > { %4583 = vst.msk [vmem:[#allocation2 + $0x580] sm:$0xff] %vm10559_vm5, %v4571_v25  ;;  %v4569_v26 = vpop.permute.xlu0 %4568  ;;  %v4603_v27 = vld [vmem:[#allocation2 + $0x260] sm:$0xff]  ;;  %vm10577_vm5 = vmmov %vm10575_vm1 }
0x118e   : > { %7534 = vmatpush3.bf16.msra.mxu1 %v4630_v13  ;;  %4587 = vst.msk [vmem:[#allocation2 + $0x580] sm:$0xff] %vm10560_vm9, %v9311_v29  ;;  %vm10578_vm9 = vcmask 891976  }
0x118f   : > { %4581 = vst.msk [vmem:[#allocation2 + $0x558] sm:$0xff] %vm10561_vm4, %v4569_v26  ;;  %7535 = vmatprep.subr.bf16.mxu1 %v4639_v24  ;;  %v4602_v28 = vld [vmem:[#allocation2 + $0x238] sm:$0xff]  ;;  %vm10579_vm4 = vcmask 72704  }
0x1190   : > { %4586 = vst.msk [vmem:[#allocation2 + $0x558] sm:$0xff] %vm10562_vm8, %v9311_v29  ;;  %v4631_v30 = vpack.c.bf16 %v4603_v27, %v4602_v28  ;;  %vm10580_vm8 = vmmov %vm10578_vm9 }
0x1191   : > { %v4621_v33 = vld [vmem:[#allocation2 + $0x530] sm:$0xff] }
0x1192   : > { %7536 = vmatpush3.bf16.msra.mxu1 %v4631_v30 }
0x1193   : > { %v4620_v34 = vld [vmem:[#allocation2 + $0x508] sm:$0xff]  ;;  %5099 = vmatprep.subr.bf16.mxu1 %v8162_v5 }
0x1194   : > { %v4640_v35 = vpack.c.bf16 %v4621_v33, %v4620_v34 }
0x1195   : > { %4709 = vmatmul.mubr.bf16.vlgmr.msra.gmra.mrb[36].mxu1 %v8094_v32  ;;  %v4623_v19 = vld [vmem:[#allocation2 + $0x580] sm:$0xff] }
0x1196   : > { %7775 = vmatpush3.bf16.msra.mxu0 %v4640_v35 }
0x1197   : > { %7776 = vmatprep.subr.bf16.mxu0 %v9311_v29  ;;  %v4622_v36 = vld [vmem:[#allocation2 + $0x558] sm:$0xff] }
0x1198   : > { %v4641_v37 = vpack.c.bf16 %v4623_v19, %v4622_v36 }
0x119a   : > { %7777 = vmatpush3.bf16.msra.mxu0 %v4641_v37 }
0x119b   : > { %4909 = vmatprep.subr.bf16.mxu0 %v8162_v5 }
0x119d   : > { %7779 = vmatmul.mubr.msk.bf16.vlgmr.msra.gmra.mrb[48].mxu0 %vm3714_vm0, %v8097_v38  ;;  %v4656_v48 = vpop.permute.xlu1 %4655  ;;  %vm10563_vm0 = vcmask 818176  }
0x119e   : > { %v4651_v46 = vpop.permute.xlu0 %4650  ;;  %vm10564_vm3 = vmmov %vm10563_vm0  ;;  %7360 = vmatprep.mubr.msk.bf16.mxu0 %vm10569_vm13, %v8098_v63  ;;  %vm10583_vm13 = vcmask 7168  }
0x1268   : > { %v7537_v39 = vpop.f32.mrb[36].mxu1 }
0x1269   : > { %v7538_v42 = vpop.f32.mrb[37].mxu1 }
0x126a   : > { %v7539_v43 = vadd.f32 %v7538_v42, %v7537_v39  ;;  %v7540_v44 = vpop.f32.mrb[38].mxu1 }
0x126b   : > { %v7541_v54 = vpop.f32.mrb[39].mxu1 }
0x126c   : > { %v7542_v45 = vadd.f32 %v7541_v54, %v7540_v44  ;;  %v4711_v47 = vadd.f32 %v7539_v43, %v4651_v46 }
0x126e   : > { %v4714_v53 = vadd.f32 %v7542_v45, %v4656_v48 }
0x1270   : > { %v4751_v51 = vpop.f32.mrb[48].mxu0 }
0x1271   : > { %v4752_v52 = vadd.f32 %v4751_v51, %v4711_v47  ;;  %v7780_v49 = vpop.f32.mrb[49].mxu0 }
0x1272   : > { %v4754_v50 = vpop.f32.mrb[50].mxu0 }
0x1273   : > { %v4758_v55 = vadd.f32 %v4752_v52, %v8903_v15  ;;  %v4755_v56 = vadd.f32 %v4754_v50, %v4714_v53  ;;  %v7781_v40 = vpop.f32.mrb[51].mxu0  ;;  %v4885_v15 = vld [vmem:[%s10565_s26] sm:$0xff] }
0x1275   : > { %v4760_v1 = vmax.f32 %v4758_v55, 0.0  ;;  %v4759_v57 = vadd.f32 %v4755_v56, %v8906_v20  ;;  %v4886_v20 = vld [vmem:[%s10565_s26 + $0x8] sm:$0xff] }
0x1277   : > { %v4762_v59 = vmul.f32 %v9462_v58, %v4760_v1  ;;  %v4761_v60 = vmax.f32 %v4759_v57, 0.0  ;;  %v8100_v1 = vld [vmem:[%s10566_s0] ss:$8 sps:$4 sm:$0xff]   ;;  %s10604_s0 = sld [smem:[#allocation14_spill]] }
0x1279   : > { %4806 = vst.msk [vmem:[#allocation2 + $0x148] sm:$0xff] %vm10563_vm0, %v4762_v59  ;;  %v4763_v61 = vmul.f32 %v9462_v58, %v4761_v60  ;;  %4766 = vrot.lane.b32.xlu0 %v4762_v59, %s10483_s22  ;;  %vm10581_vm0 = vmmov %vm10579_vm4 }
0x127b   : > { %4807 = vst.msk [vmem:[#allocation2 + $0x170] sm:$0xff] %vm10564_vm3, %v4763_v61  ;;  %4768 = vrot.lane.b32.xlu1 %v4763_v61, %s10483_s22  ;;  %vm10582_vm3 = vcmask 826376  }
0x127d   : > { %4776 = vrot.lane.b32.xlu0 %v4762_v59, %s10448_s28 }
0x127f   : > { %4778 = vrot.lane.b32.xlu1 %v4763_v61, %s10448_s28 }
0x1280   : > { %v4864_v42 = vld [vmem:[#allocation2 + $0x148] sm:$0xff] }
0x1281   : > { %4786 = vrot.lane.b32.xlu0 %v4762_v59, %s10492_s18 }
0x1282   : > { %v4865_v38 = vld [vmem:[#allocation2 + $0x170] sm:$0xff] }
0x1283   : > { %4788 = vrot.lane.b32.xlu1 %v4763_v61, %s10492_s18  ;;  %v4878_v45 = vpack.c.bf16 %v4865_v38, %v4864_v42 }
0x1285   : > { %4796 = vrot.lane.b32.xlu0 %v4762_v59, %s10567_s3 }
0x1287   : > { %4798 = vrot.lane.b32.xlu1 %v4763_v61, %s10567_s3 }
0x1289   : > { %4808 = vrot.lane.b32.xlu0 %v4762_v59, %s10568_s4 }
0x128b   : > { %4810 = vrot.lane.b32.xlu1 %v4763_v61, %s10568_s4 }
0x128d   : > { %4820 = vrot.lane.b32.xlu0 %v4762_v59, %s10491_s11 }
0x128f   : > { %4822 = vrot.lane.b32.xlu1 %v4763_v61, %s10491_s11 }
0x1291   : > { %4832 = vrot.lane.b32.xlu0 %v4762_v59, %s10495_s23 }
0x1293   : > { %4834 = vrot.lane.b32.xlu1 %v4763_v61, %s10495_s23 }
0x1295   : > { %4844 = vrot.lane.b32.xlu0 %v4762_v59, %s10498_s1 }
0x1297   : > { %4846 = vrot.lane.b32.xlu1 %v4763_v61, %s10498_s1 }
0x1299   : > { %4889 = vperm.xlu0 %8074, %v4885_v15  }
0x129b   : > { %4894 = vperm.xlu1 %8075, %v4886_v20  }
0x12eb   : > { %v4767_v0 = vpop.permute.xlu0 %4766 }
0x12ec   : > { %4772 = vst.msk [vmem:[#allocation2 + $0x8] sm:$0xff] %vm10570_vm15, %v4767_v0  ;;  %vm10584_vm15 = vmmov %vm10582_vm3 }
0x12ed   : > { %4774 = vst.msk [vmem:[#allocation2 + $0x8] sm:$0xff] %vm10571_vm11, %v9311_v29  ;;  %v4769_v2 = vpop.permute.xlu1 %4768  ;;  %vm10585_vm11 = vmmov %vm10583_vm13 }
0x12ee   : > { %4773 = vst.msk [vmem:[#allocation2 + $0x30] sm:$0xff] %vm10572_vm6, %v4769_v2  ;;  %vm10586_vm6 = vcmask 809984  }
0x12ef   : > { %4775 = vst.msk [vmem:[#allocation2 + $0x30] sm:$0xff] %vm10573_vm7, %v9311_v29  ;;  %v4777_v3 = vpop.permute.xlu0 %4776  ;;  %vm10587_vm7 = vcmask 818968  }
0x12f0   : > { %4782 = vst.msk [vmem:[#allocation2 + $0x58] sm:$0xff] %vm10574_vm2, %v4777_v3  ;;  %vm10588_vm2 = vmmov %vm10586_vm6 }
0x12f1   : > { %4784 = vst.msk [vmem:[#allocation2 + $0x58] sm:$0xff] %vm10575_vm1, %v9311_v29  ;;  %v4779_v4 = vpop.permute.xlu1 %4778  ;;  %vm10589_vm1 = vmmov %vm10587_vm7 }
0x12f2   : > { %4783 = vst.msk [vmem:[#allocation2 + $0x80] sm:$0xff] %vm10576_vm12, %v4779_v4  ;;  %vm10590_vm12 = vcmask 744448  }
0x12f3   : > { %4785 = vst.msk [vmem:[#allocation2 + $0x80] sm:$0xff] %vm10577_vm5, %v9311_v29  ;;  %v4787_v8 = vpop.permute.xlu0 %4786  ;;  %vm10591_vm5 = vcmask 818904  }
0x12f4   : > { %4792 = vst.msk [vmem:[#allocation2 + $0xa8] sm:$0xff] %vm10578_vm9, %v4787_v8  ;;  %v4856_v9 = vld [vmem:[#allocation2 + $0x8] sm:$0xff]  ;;  %vm10592_vm9 = vmmov %vm10590_vm12 }
0x12f5   : > { %4794 = vst.msk [vmem:[#allocation2 + $0xa8] sm:$0xff] %vm10579_vm4, %v9311_v29  ;;  %v4789_v10 = vpop.permute.xlu1 %4788  ;;  %vm10593_vm4 = vmmov %vm10591_vm5 }
0x12f6   : > { %4793 = vst.msk [vmem:[#allocation2 + $0xd0] sm:$0xff] %vm10580_vm8, %v4789_v10  ;;  %v4857_v11 = vld [vmem:[#allocation2 + $0x30] sm:$0xff]  ;;  %vm10594_vm8 = vcmask 736256   ;;  %v5076_v10 = vld [vmem:[%s10604_s0 + $0x8] sm:$0xff] }
0x12f7   : > { %4795 = vst.msk [vmem:[#allocation2 + $0xd0] sm:$0xff] %vm10581_vm0, %v9311_v29  ;;  %v4797_v12 = vpop.permute.xlu0 %4796  ;;  %v4874_v13 = vpack.c.bf16 %v4857_v11, %v4856_v9  ;;  %vm10595_vm0 = vcmask 818896   ;;  %v5075_v9 = vld [vmem:[%s10604_s0] sm:$0xff]  ;;  %s8207_s0 = smov 126  }
0x12f8   : > { %4802 = vst.msk [vmem:[#allocation2 + $0xf8] sm:$0xff] %vm10582_vm3, %v4797_v12  ;;  %v4858_v21 = vld [vmem:[#allocation2 + $0x58] sm:$0xff]  ;;  %vm10596_vm3 = vmmov %vm10594_vm8  ;;  %v8101_v11 = vld [vmem:[%s10605_s5 + $0x4] ss:$8 sps:$4 sm:$0xff]  }
0x12f9   : > { %4804 = vst.msk [vmem:[#allocation2 + $0xf8] sm:$0xff] %vm10583_vm13, %v9311_v29  ;;  %v4799_v22 = vpop.permute.xlu1 %4798  ;;  %4910 = vmatpush1.bf16.msra.mxu0 %v4874_v13  ;;  %vm10597_vm13 = vmmov %vm10595_vm0 }
0x12fa   : > { %4803 = vst.msk [vmem:[#allocation2 + $0x120] sm:$0xff] %vm10584_vm15, %v4799_v22  ;;  %4911 = vmatprep.subr.bf16.mxu0 %v8162_v5  ;;  %v4859_v24 = vld [vmem:[#allocation2 + $0x80] sm:$0xff]  ;;  %vm10598_vm15 = vcmask 728064  }
0x12fb   : > { %4805 = vst.msk [vmem:[#allocation2 + $0x120] sm:$0xff] %vm10585_vm11, %v9311_v29  ;;  %v4809_v25 = vpop.permute.xlu0 %4808  ;;  %v4875_v26 = vpack.c.bf16 %v4859_v24, %v4858_v21  ;;  %vm10599_vm11 = vcmask 818888  }
0x12fc   : > { %4815 = vst.msk [vmem:[#allocation2 + $0x198] sm:$0xff] %vm10586_vm6, %v4809_v25  ;;  %v4860_v27 = vld [vmem:[#allocation2 + $0xa8] sm:$0xff]  ;;  %vm10600_vm6 = vmmov %vm10598_vm15 }
0x12fd   : > { %4818 = vst.msk [vmem:[#allocation2 + $0x198] sm:$0xff] %vm10587_vm7, %v9311_v29  ;;  %v4811_v28 = vpop.permute.xlu1 %4810  ;;  %4912 = vmatpush1.bf16.msra.mxu0 %v4875_v26  ;;  %vm10601_vm7 = vmmov %vm10599_vm11 }
0x12fe   : > { %4817 = vst.msk [vmem:[#allocation2 + $0x1c0] sm:$0xff] %vm10588_vm2, %v4811_v28  ;;  %4913 = vmatprep.subr.bf16.mxu0 %v8162_v5  ;;  %v4861_v30 = vld [vmem:[#allocation2 + $0xd0] sm:$0xff]  ;;  %vm10602_vm2 = vcmask 818176  }
0x12ff   : > { %4819 = vst.msk [vmem:[#allocation2 + $0x1c0] sm:$0xff] %vm10589_vm1, %v9311_v29  ;;  %v4821_v32 = vpop.permute.xlu0 %4820  ;;  %v4876_v33 = vpack.c.bf16 %v4861_v30, %v4860_v27  ;;  %vm10603_vm1 = vmmov %vm10602_vm2 }
0x1300   : > { %4827 = vst.msk [vmem:[#allocation2 + $0x1e8] sm:$0xff] %vm10590_vm12, %v4821_v32  ;;  %v4862_v34 = vld [vmem:[#allocation2 + $0xf8] sm:$0xff]  ;;  %vm10606_vm12 = vcmask 130048  }
0x1301   : > { %4830 = vst.msk [vmem:[#allocation2 + $0x1e8] sm:$0xff] %vm10591_vm5, %v9311_v29  ;;  %v4823_v35 = vpop.permute.xlu1 %4822  ;;  %4914 = vmatpush1.bf16.msra.mxu0 %v4876_v33  ;;  %7363 = vmatprep.mubr.msk.bf16.mxu1 %vm10606_vm12, %v8101_v11  ;;  %vm10607_vm5 = vcmask 908376   ;;  %vm10620_vm12 = vcmask 7168  }
0x1302   : > { %4829 = vst.msk [vmem:[#allocation2 + $0x210] sm:$0xff] %vm10592_vm9, %v4823_v35  ;;  %4915 = vmatprep.subr.bf16.mxu0 %v8162_v5  ;;  %v4863_v19 = vld [vmem:[#allocation2 + $0x120] sm:$0xff]  ;;  %vm10608_vm9 = vcmask 89088  }
0x1303   : > { %4831 = vst.msk [vmem:[#allocation2 + $0x210] sm:$0xff] %vm10593_vm4, %v9311_v29  ;;  %v4833_v36 = vpop.permute.xlu0 %4832  ;;  %v4877_v37 = vpack.c.bf16 %v4863_v19, %v4862_v34  ;;  %vm10609_vm4 = vmmov %vm10607_vm5 }
0x1304   : > { %4839 = vst.msk [vmem:[#allocation2 + $0x238] sm:$0xff] %vm10594_vm8, %v4833_v36  ;;  %v4866_v43 = vld [vmem:[#allocation2 + $0x198] sm:$0xff]  ;;  %vm10610_vm8 = vmmov %vm10608_vm9 }
0x1305   : > { %4842 = vst.msk [vmem:[#allocation2 + $0x238] sm:$0xff] %vm10595_vm0, %v9311_v29  ;;  %v4835_v39 = vpop.permute.xlu1 %4834  ;;  %4916 = vmatpush1.bf16.msra.mxu0 %v4877_v37  ;;  %vm10611_vm0 = vcmask 900176  }
0x1306   : > { %4841 = vst.msk [vmem:[#allocation2 + $0x260] sm:$0xff] %vm10596_vm3, %v4835_v39  ;;  %4917 = vmatprep.subr.bf16.mxu0 %v8162_v5  ;;  %v4867_v44 = vld [vmem:[#allocation2 + $0x1c0] sm:$0xff]  ;;  %vm10612_vm3 = vcmask 80896  }
0x1307   : > { %4843 = vst.msk [vmem:[#allocation2 + $0x260] sm:$0xff] %vm10597_vm13, %v9311_v29  ;;  %v4845_v54 = vpop.permute.xlu0 %4844  ;;  %v4879_v47 = vpack.c.bf16 %v4867_v44, %v4866_v43  ;;  %vm10613_vm13 = vmmov %vm10611_vm0 }
0x1308   : > { %4851 = vst.msk [vmem:[#allocation2 + $0x288] sm:$0xff] %vm10598_vm15, %v4845_v54  ;;  %v4868_v48 = vld [vmem:[#allocation2 + $0x1e8] sm:$0xff]  ;;  %vm10614_vm15 = vmmov %vm10612_vm3 }
0x1309   : > { %4854 = vst.msk [vmem:[#allocation2 + $0x288] sm:$0xff] %vm10599_vm11, %v9311_v29  ;;  %v4847_v46 = vpop.permute.xlu1 %4846  ;;  %4918 = vmatpush1.bf16.msra.mxu0 %v4878_v45  ;;  %vm10615_vm11 = vcmask 891976  }
0x130a   : > { %4853 = vst.msk [vmem:[#allocation2 + $0x2b0] sm:$0xff] %vm10600_vm6, %v4847_v46  ;;  %4919 = vmatprep.subr.bf16.mxu0 %v8162_v5  ;;  %v4869_v51 = vld [vmem:[#allocation2 + $0x210] sm:$0xff]  ;;  %vm10616_vm6 = vcmask 72704  }
0x130b   : > { %4855 = vst.msk [vmem:[#allocation2 + $0x2b0] sm:$0xff] %vm10601_vm7, %v9311_v29  ;;  %v4880_v52 = vpack.c.bf16 %v4869_v51, %v4868_v48  ;;  %vm10617_vm7 = vmmov %vm10615_vm11 }
0x130c   : > { %v4870_v49 = vld [vmem:[#allocation2 + $0x238] sm:$0xff] }
0x130d   : > { %4920 = vmatpush1.bf16.msra.mxu0 %v4879_v47 }
0x130e   : > { %4921 = vmatprep.subr.bf16.mxu0 %v8162_v5  ;;  %v4871_v53 = vld [vmem:[#allocation2 + $0x260] sm:$0xff] }
0x130f   : > { %v4881_v50 = vpack.c.bf16 %v4871_v53, %v4870_v49 }
0x1310   : > { %v4872_v55 = vld [vmem:[#allocation2 + $0x288] sm:$0xff] }
0x1311   : > { %4922 = vmatpush1.bf16.msra.mxu0 %v4880_v52 }
0x1312   : > { %4923 = vmatprep.subr.bf16.mxu0 %v8162_v5  ;;  %v4873_v56 = vld [vmem:[#allocation2 + $0x2b0] sm:$0xff] }
0x1313   : > { %v4882_v40 = vpack.c.bf16 %v4873_v56, %v4872_v55 }
0x1315   : > { %4924 = vmatpush1.bf16.msra.mxu0 %v4881_v50 }
0x1316   : > { %4925 = vmatprep.subr.bf16.mxu0 %v8162_v5 }
0x1318   : > { %v4890_v57 = vpop.permute.xlu0 %4889 }
0x1319   : > { %4926 = vmatpush1.bf16.msra.mxu0 %v4882_v40 }
0x131a   : > { %v4895_v15 = vpop.permute.xlu1 %4894 }
0x131c   : > { %4942 = vmatmul.mubr.bf16.vlgmr.msra.gmra.mrb[52].mxu0 %v8100_v1 }
0x13ef   : > { %v4943_v59 = vpop.f32.mrb[52].mxu0 }
0x13f0   : > { %v4944_v60 = vadd.f32 %v4943_v59, %v4890_v57  ;;  %v4945_v61 = vpop.f32.mrb[53].mxu0  ;;  %v9620_v57 = vld [vmem:[#allocation3 + $0x8] sm:$0xff] }
0x13f1   : > { %v4946_v20 = vpop.f32.mrb[54].mxu0 }
0x13f2   : > { %v4950_v63 = vmax.f32 %v4944_v60, 0.0  ;;  %v4947_v0 = vadd.f32 %v4946_v20, %v4895_v15  ;;  %v4948_v2 = vpop.f32.mrb[55].mxu0 }
0x13f3   : > { %v9629_v2 = vld [vmem:[%s8386_s7] sm:$0xff] }
0x13f4   : > { %v4952_v3 = vmul.f32 %v9462_v58, %v4950_v63  ;;  %v4951_v4 = vmax.f32 %v4947_v0, 0.0  ;;  %v8103_v0 = vld [vmem:[%s10605_s5] ss:$8 sps:$4 sm:$0xff]   ;;  %s8213_s5 = smov 32  }
0x13f6   : > { %4996 = vst.msk [vmem:[#allocation2 + $0x148] sm:$0xff] %vm10602_vm2, %v4952_v3  ;;  %v4953_v8 = vmul.f32 %v9462_v58, %v4951_v4  ;;  %4956 = vrot.lane.b32.xlu0 %v4952_v3, %s10483_s22  ;;  %vm10618_vm2 = vmmov %vm10616_vm6 }
0x13f8   : > { %4997 = vst.msk [vmem:[#allocation2 + $0x170] sm:$0xff] %vm10603_vm1, %v4953_v8  ;;  %4958 = vrot.lane.b32.xlu1 %v4953_v8, %s10483_s22  ;;  %vm10619_vm1 = vcmask 826376   ;;  %s8199_s22 = smov 88  }
0x13fa   : > { %4966 = vrot.lane.b32.xlu0 %v4952_v3, %s10448_s28 }
0x13fc   : > { %4968 = vrot.lane.b32.xlu1 %v4953_v8, %s10448_s28  ;;  %s10639_s28 = smov 98  }
0x13fd   : > { %v5054_v51 = vld [vmem:[#allocation2 + $0x148] sm:$0xff] }
0x13fe   : > { %4976 = vrot.lane.b32.xlu0 %v4952_v3, %s10492_s18 }
0x13ff   : > { %v5055_v47 = vld [vmem:[#allocation2 + $0x170] sm:$0xff] }
0x1400   : > { %4978 = vrot.lane.b32.xlu1 %v4953_v8, %s10492_s18  ;;  %v5068_v50 = vpack.c.bf16 %v5055_v47, %v5054_v51  ;;  %s8200_s18 = smov 68   ;;  %v5803_v47 = vld [vmem:[%s8386_s7 + $0x8] sm:$0x3] }
0x1401   : > { %v7956_v51 = vpack.c.bf16 %v5803_v47, %v9629_v2 }
0x1402   : > { %4986 = vrot.lane.b32.xlu0 %v4952_v3, %s10567_s3 }
0x1404   : > { %4988 = vrot.lane.b32.xlu1 %v4953_v8, %s10567_s3 }
0x1406   : > { %4998 = vrot.lane.b32.xlu0 %v4952_v3, %s10568_s4 }
0x1408   : > { %5000 = vrot.lane.b32.xlu1 %v4953_v8, %s10568_s4 }
0x140a   : > { %5010 = vrot.lane.b32.xlu0 %v4952_v3, %s10491_s11 }
0x140c   : > { %5012 = vrot.lane.b32.xlu1 %v4953_v8, %s10491_s11  ;;  %s10640_s11 = smov 78  }
0x140e   : > { %5022 = vrot.lane.b32.xlu0 %v4952_v3, %s10495_s23 }
0x1410   : > { %5024 = vrot.lane.b32.xlu1 %v4953_v8, %s10495_s23 }
0x1412   : > { %5034 = vrot.lane.b32.xlu0 %v4952_v3, %s10498_s1  ;;  %v5151_v3 = vld [vmem:[%s8386_s7 + $0x8] sm:$0x3] }
0x1413   : > { %v7920_v4 = vpack.c.bf16 %v5151_v3, %v9629_v2 }
0x1414   : > { %5036 = vrot.lane.b32.xlu1 %v4953_v8, %s10498_s1  ;;  %v5261_v8 = vld [vmem:[%s8386_s7 + $0x8] sm:$0x3]  ;;  %s10363_s1 = smov 108  }
0x1415   : > { %7922 = vmatprep.subr.msk.bf16.mxu0 %vm8917_vm10, %v7920_v4 }
0x1416   : > { %5079 = vperm.xlu0 %8074, %v5075_v9   ;;  %7925 = vmatpush3.bf16.msk.msra.mxu0 %vm8917_vm10, %v7920_v4  ;;  %v7926_v9 = vpack.c.bf16 %v5261_v8, %v9629_v2 }
0x1418   : > { %5084 = vperm.xlu1 %8075, %v5076_v10   ;;  %7928 = vmatprep.subr.msk.bf16.mxu0 %vm8917_vm10, %v7926_v9 }
0x1468   : > { %v4957_v12 = vpop.permute.xlu0 %4956 }
0x1469   : > { %4962 = vst.msk [vmem:[#allocation2 + $0x8] sm:$0xff] %vm10607_vm5, %v4957_v12  ;;  %vm10621_vm5 = vmmov %vm10619_vm1 }
0x146a   : > { %4964 = vst.msk [vmem:[#allocation2 + $0x8] sm:$0xff] %vm10608_vm9, %v9311_v29  ;;  %v4959_v13 = vpop.permute.xlu1 %4958  ;;  %vm10622_vm9 = vmmov %vm10620_vm12 }
0x146b   : > { %4963 = vst.msk [vmem:[#allocation2 + $0x30] sm:$0xff] %vm10609_vm4, %v4959_v13  ;;  %vm10623_vm4 = vcmask 809984  }
0x146c   : > { %4965 = vst.msk [vmem:[#allocation2 + $0x30] sm:$0xff] %vm10610_vm8, %v9311_v29  ;;  %v4967_v21 = vpop.permute.xlu0 %4966  ;;  %vm10624_vm8 = vcmask 818968  }
0x146d   : > { %4972 = vst.msk [vmem:[#allocation2 + $0x58] sm:$0xff] %vm10611_vm0, %v4967_v21  ;;  %vm10625_vm0 = vmmov %vm10623_vm4 }
0x146e   : > { %4974 = vst.msk [vmem:[#allocation2 + $0x58] sm:$0xff] %vm10612_vm3, %v9311_v29  ;;  %v4969_v22 = vpop.permute.xlu1 %4968  ;;  %vm10626_vm3 = vmmov %vm10624_vm8 }
0x146f   : > { %4973 = vst.msk [vmem:[#allocation2 + $0x80] sm:$0xff] %vm10613_vm13, %v4969_v22  ;;  %vm10627_vm13 = vcmask 744448  }
0x1470   : > { %4975 = vst.msk [vmem:[#allocation2 + $0x80] sm:$0xff] %vm10614_vm15, %v9311_v29  ;;  %v4977_v24 = vpop.permute.xlu0 %4976  ;;  %vm10628_vm15 = vcmask 818904  }
0x1471   : > { %4982 = vst.msk [vmem:[#allocation2 + $0xa8] sm:$0xff] %vm10615_vm11, %v4977_v24  ;;  %v5046_v25 = vld [vmem:[#allocation2 + $0x8] sm:$0xff]  ;;  %vm10629_vm11 = vmmov %vm10627_vm13 }
0x1472   : > { %4984 = vst.msk [vmem:[#allocation2 + $0xa8] sm:$0xff] %vm10616_vm6, %v9311_v29  ;;  %v4979_v26 = vpop.permute.xlu1 %4978  ;;  %vm10630_vm6 = vmmov %vm10628_vm15 }
0x1473   : > { %4983 = vst.msk [vmem:[#allocation2 + $0xd0] sm:$0xff] %vm10617_vm7, %v4979_v26  ;;  %v5047_v27 = vld [vmem:[#allocation2 + $0x30] sm:$0xff]  ;;  %vm10631_vm7 = vcmask 736256  }
0x1474   : > { %4985 = vst.msk [vmem:[#allocation2 + $0xd0] sm:$0xff] %vm10618_vm2, %v9311_v29  ;;  %v4987_v28 = vpop.permute.xlu0 %4986  ;;  %v5064_v30 = vpack.c.bf16 %v5047_v27, %v5046_v25  ;;  %vm10632_vm2 = vcmask 818896  }
0x1475   : > { %4992 = vst.msk [vmem:[#allocation2 + $0xf8] sm:$0xff] %vm10619_vm1, %v4987_v28  ;;  %v5048_v32 = vld [vmem:[#allocation2 + $0x58] sm:$0xff]  ;;  %vm10633_vm1 = vmmov %vm10631_vm7 }
0x1476   : > { %4994 = vst.msk [vmem:[#allocation2 + $0xf8] sm:$0xff] %vm10620_vm12, %v9311_v29  ;;  %v4989_v33 = vpop.permute.xlu1 %4988  ;;  %5100 = vmatpush1.bf16.msra.mxu1 %v5064_v30  ;;  %vm10634_vm12 = vmmov %vm10632_vm2 }
0x1477   : > { %4993 = vst.msk [vmem:[#allocation2 + $0x120] sm:$0xff] %vm10621_vm5, %v4989_v33  ;;  %5101 = vmatprep.subr.bf16.mxu1 %v8162_v5  ;;  %v5049_v34 = vld [vmem:[#allocation2 + $0x80] sm:$0xff]  ;;  %vm10635_vm5 = vcmask 728064  }
0x1478   : > { %4995 = vst.msk [vmem:[#allocation2 + $0x120] sm:$0xff] %vm10622_vm9, %v9311_v29  ;;  %v4999_v35 = vpop.permute.xlu0 %4998  ;;  %v5065_v19 = vpack.c.bf16 %v5049_v34, %v5048_v32  ;;  %vm10636_vm9 = vcmask 818888   ;;  %v5695_v32 = vld [vmem:[%s8386_s7 + $0x8] sm:$0x3] }
0x1479   : > { %5005 = vst.msk [vmem:[#allocation2 + $0x198] sm:$0xff] %vm10623_vm4, %v4999_v35  ;;  %v5050_v36 = vld [vmem:[#allocation2 + $0xa8] sm:$0xff]  ;;  %vm10637_vm4 = vmmov %vm10635_vm5  ;;  %v7950_v33 = vpack.c.bf16 %v5695_v32, %v9629_v2 }
0x147a   : > { %5008 = vst.msk [vmem:[#allocation2 + $0x198] sm:$0xff] %vm10624_vm8, %v9311_v29  ;;  %v5001_v37 = vpop.permute.xlu1 %5000  ;;  %5102 = vmatpush1.bf16.msra.mxu1 %v5065_v19  ;;  %vm10638_vm8 = vmmov %vm10636_vm9  ;;  %v5369_v35 = vld [vmem:[%s8386_s7 + $0x8] sm:$0x3] }
0x147b   : > { %5007 = vst.msk [vmem:[#allocation2 + $0x1c0] sm:$0xff] %vm10625_vm0, %v5001_v37  ;;  %5103 = vmatprep.subr.bf16.mxu1 %v8162_v5  ;;  %v5051_v38 = vld [vmem:[#allocation2 + $0xd0] sm:$0xff]  ;;  %vm10642_vm0 = vcmask 80896  }
0x147c   : > { %5009 = vst.msk [vmem:[#allocation2 + $0x1c0] sm:$0xff] %vm10626_vm3, %v9311_v29  ;;  %v5011_v39 = vpop.permute.xlu0 %5010  ;;  %v5066_v42 = vpack.c.bf16 %v5051_v38, %v5050_v36  ;;  %v7932_v36 = vpack.c.bf16 %v5369_v35, %v9629_v2  ;;  %v5477_v38 = vld [vmem:[%s8386_s7 + $0x8] sm:$0x3]  ;;  %vm10643_vm3 = vmmov %vm10642_vm0 }
0x147d   : > { %5017 = vst.msk [vmem:[#allocation2 + $0x1e8] sm:$0xff] %vm10627_vm13, %v5011_v39  ;;  %v5052_v43 = vld [vmem:[#allocation2 + $0xf8] sm:$0xff]  ;;  %vm10644_vm13 = vmmov %vm10642_vm0 }
0x147e   : > { %5020 = vst.msk [vmem:[#allocation2 + $0x1e8] sm:$0xff] %vm10628_vm15, %v9311_v29  ;;  %v5013_v44 = vpop.permute.xlu1 %5012  ;;  %5104 = vmatpush1.bf16.msra.mxu1 %v5066_v42  ;;  %v7938_v42 = vpack.c.bf16 %v5477_v38, %v9629_v2  ;;  %vm10645_vm15 = vmmov %vm10642_vm0 }
0x147f   : > { %5019 = vst.msk [vmem:[#allocation2 + $0x210] sm:$0xff] %vm10629_vm11, %v5013_v44  ;;  %5105 = vmatprep.subr.bf16.mxu1 %v8162_v5  ;;  %v5053_v54 = vld [vmem:[#allocation2 + $0x120] sm:$0xff]  ;;  %v5587_v44 = vld [vmem:[%s8386_s7 + $0x8] sm:$0x3]  ;;  %vm10646_vm11 = vmmov %vm10642_vm0 }
0x1480   : > { %5021 = vst.msk [vmem:[#allocation2 + $0x210] sm:$0xff] %vm10630_vm6, %v9311_v29  ;;  %v5023_v45 = vpop.permute.xlu0 %5022  ;;  %v5067_v46 = vpack.c.bf16 %v5053_v54, %v5052_v43  ;;  %vm10647_vm6 = vmmov %vm10642_vm0 }
0x1481   : > { %5029 = vst.msk [vmem:[#allocation2 + $0x238] sm:$0xff] %vm10631_vm7, %v5023_v45  ;;  %v5056_v52 = vld [vmem:[#allocation2 + $0x198] sm:$0xff]  ;;  %v7944_v45 = vpack.c.bf16 %v5587_v44, %v9629_v2  ;;  %vm10648_vm7 = vmmov %vm10642_vm0 }
0x1482   : > { %5032 = vst.msk [vmem:[#allocation2 + $0x238] sm:$0xff] %vm10632_vm2, %v9311_v29  ;;  %v5025_v48 = vpop.permute.xlu1 %5024  ;;  %5106 = vmatpush1.bf16.msra.mxu1 %v5067_v46  ;;  %vm10649_vm2 = vmmov %vm10642_vm0 }
0x1483   : > { %5031 = vst.msk [vmem:[#allocation2 + $0x260] sm:$0xff] %vm10633_vm1, %v5025_v48  ;;  %5107 = vmatprep.subr.bf16.mxu1 %v8162_v5  ;;  %v5057_v49 = vld [vmem:[#allocation2 + $0x1c0] sm:$0xff]  ;;  %vm10650_vm1 = vmmov %vm10642_vm0 }
0x1484   : > { %5033 = vst.msk [vmem:[#allocation2 + $0x260] sm:$0xff] %vm10634_vm12, %v9311_v29  ;;  %v5035_v53 = vpop.permute.xlu0 %5034  ;;  %v5069_v56 = vpack.c.bf16 %v5057_v49, %v5056_v52  ;;  %vm10651_vm12 = vmmov %vm10642_vm0 }
0x1485   : > { %5041 = vst.msk [vmem:[#allocation2 + $0x288] sm:$0xff] %vm10635_vm5, %v5035_v53  ;;  %v5058_v40 = vld [vmem:[#allocation2 + $0x1e8] sm:$0xff]  ;;  %vm10652_vm5 = vmmov %vm10642_vm0 }
0x1486   : > { %5044 = vst.msk [vmem:[#allocation2 + $0x288] sm:$0xff] %vm10636_vm9, %v9311_v29  ;;  %v5037_v55 = vpop.permute.xlu1 %5036  ;;  %5108 = vmatpush1.bf16.msra.mxu1 %v5068_v50  ;;  %vm10653_vm9 = vmmov %vm10642_vm0 }
0x1487   : > { %5043 = vst.msk [vmem:[#allocation2 + $0x2b0] sm:$0xff] %vm10637_vm4, %v5037_v55  ;;  %5109 = vmatprep.subr.bf16.mxu1 %v8162_v5  ;;  %v5059_v1 = vld [vmem:[#allocation2 + $0x210] sm:$0xff]  ;;  %vm10654_vm4 = vmmov %vm10642_vm0 }
0x1488   : > { %5045 = vst.msk [vmem:[#allocation2 + $0x2b0] sm:$0xff] %vm10638_vm8, %v9620_v57  ;;  %v5070_v59 = vpack.c.bf16 %v5059_v1, %v5058_v40  ;;  %vm10655_vm8 = vmmov %vm10642_vm0 }
0x1489   : > { %v5060_v29 = vld [vmem:[#allocation2 + $0x238] sm:$0xff] }
0x148a   : > { %5110 = vmatpush1.bf16.msra.mxu1 %v5069_v56 }
0x148b   : > { %5111 = vmatprep.subr.bf16.mxu1 %v8162_v5  ;;  %v5061_v60 = vld [vmem:[#allocation2 + $0x260] sm:$0xff] }
0x148c   : > { %v5071_v61 = vpack.c.bf16 %v5061_v60, %v5060_v29 }
0x148d   : > { %v5062_v15 = vld [vmem:[#allocation2 + $0x288] sm:$0xff] }
0x148e   : > { %5112 = vmatpush1.bf16.msra.mxu1 %v5070_v59 }
0x148f   : > { %5113 = vmatprep.subr.bf16.mxu1 %v8162_v5  ;;  %v5063_v20 = vld [vmem:[#allocation2 + $0x2b0] sm:$0xff] }
0x1490   : > { %v5072_v63 = vpack.c.bf16 %v5063_v20, %v5062_v15 }
0x1492   : > { %5114 = vmatpush1.bf16.msra.mxu1 %v5071_v61 }
0x1493   : > { %5115 = vmatprep.subr.bf16.mxu1 %v8162_v5 }
0x1495   : > { %v5080_v10 = vpop.permute.xlu0 %5079 }
0x1496   : > { %5116 = vmatpush1.bf16.msra.mxu1 %v5072_v63 }
0x1497   : > { %v5085_v21 = vpop.permute.xlu1 %5084  ;;  %7952 = vmatprep.subr.msk.bf16.mxu1 %vm8917_vm10, %v7950_v33 }
0x1499   : > { %5132 = vmatmul.mubr.bf16.vlgmr.msra.gmra.mrb[40].mxu1 %v8103_v0 }
0x149a   : > { %7955 = vmatpush3.bf16.msk.msra.mxu1 %vm8917_vm10, %v7950_v33 }
0x156c   : > { %v5133_v11 = vpop.f32.mrb[40].mxu1 }
0x156d   : > { %v5134_v12 = vadd.f32 %v5133_v11, %v5080_v10  ;;  %v5135_v13 = vpop.f32.mrb[41].mxu1 }
0x156e   : > { %v5136_v22 = vpop.f32.mrb[42].mxu1 }
0x156f   : > { %v5140_v24 = vmax.f32 %v5134_v12, 0.0  ;;  %v5137_v25 = vadd.f32 %v5136_v22, %v5085_v21  ;;  %v5138_v26 = vpop.f32.mrb[43].mxu1 }
0x1571   : > { %v5142_v27 = vmul.f32 %v9462_v58, %v5140_v24  ;;  %v5141_v28 = vmax.f32 %v5137_v25, 0.0 }
0x1573   : > { %v5143_v30 = vmul.f32 %v9462_v58, %v5141_v28  ;;  %5154 = vrot.lane.b32.xlu0 %v5142_v27, %s10495_s23  ;;  %v5914_v58 = vld [vmem:[%s8386_s7 + $0x8] sm:$0x3] }
0x1574   : > { %v7962_v34 = vpack.c.bf16 %v5914_v58, %v9629_v2 }
0x1575   : > { %5156 = vrot.lane.b32.xlu1 %v5143_v30, %s10495_s23  ;;  %s10641_s23 = smov 58  }
0x1576   : > { %7964 = vmatprep.subr.msk.bf16.mxu1 %vm8917_vm10, %v7962_v34 }
0x1577   : > { %5262 = vrot.lane.b32.xlu0 %v5142_v27, %s10363_s1 }
0x1579   : > { %5264 = vrot.lane.b32.xlu1 %v5143_v30, %s10363_s1  ;;  %s8206_s1 = smov 90  }
0x157b   : > { %5370 = vrot.lane.b32.xlu0 %v5142_v27, %s10639_s28 }
0x157d   : > { %5372 = vrot.lane.b32.xlu1 %v5143_v30, %s10639_s28  ;;  %s8201_s28 = smov 48  }
0x157f   : > { %5478 = vrot.lane.b32.xlu0 %v5142_v27, %s8199_s22 }
0x1581   : > { %5480 = vrot.lane.b32.xlu1 %v5143_v30, %s8199_s22 }
0x1583   : > { %5588 = vrot.lane.b32.xlu0 %v5142_v27, %s10640_s11 }
0x1585   : > { %5590 = vrot.lane.b32.xlu1 %v5143_v30, %s10640_s11  ;;  %s10657_s11 = smov 18  }
0x1587   : > { %5696 = vrot.lane.b32.xlu0 %v5142_v27, %s8200_s18 }
0x1589   : > { %5698 = vrot.lane.b32.xlu1 %v5143_v30, %s8200_s18  ;;  %s8202_s18 = smov 36  }
0x158b   : > { %5804 = vrot.lane.b32.xlu0 %v5142_v27, %s10641_s23 }
0x158d   : > { %5806 = vrot.lane.b32.xlu1 %v5143_v30, %s10641_s23  ;;  %s8203_s23 = smov 54  }
0x158f   : > { %5915 = vrot.lane.b32.xlu0 %v5142_v27, %s8201_s28 }
0x1591   : > { %5917 = vrot.lane.b32.xlu1 %v5143_v30, %s8201_s28  ;;  %s8204_s28 = smov 72  }
0x15e5   : > { %v5155_v19 = vpop.permute.xlu0 %5154 }
0x15e6   : > { %7786 = vmatprep.mubr.msk.f32.mxu0 %vm10642_vm0, %v5155_v19 }
0x15e7   : > { %v5157_v37 = vpop.permute.xlu1 %5156 }
0x15e8   : > { %7787 = vmatmul.mubr.msk.f32.vlgmr.msra.gmra.mrb[56].mxu0 %vm10643_vm3, %v5157_v37  ;;  %vm10656_vm3 = vmmov %vm10642_vm0 }
0x15e9   : > { %7931 = vmatpush3.bf16.msk.msra.mxu0 %vm8917_vm10, %v7926_v9  ;;  %v5263_v39 = vpop.permute.xlu0 %5262 }
0x15ea   : > { %7793 = vmatprep.mubr.msk.f32.mxu0 %vm10644_vm13, %v5263_v39  ;;  %7934 = vmatprep.subr.msk.bf16.mxu0 %vm8917_vm10, %v7932_v36  ;;  %vm5257_vm13 = vcmask 441632  }
0x15eb   : > { %v5265_v43 = vpop.permute.xlu1 %5264 }
0x15ec   : > { %7794 = vmatmul.mubr.msk.f32.vlgmr.msra.gmra.mrb[58].mxu0 %vm10645_vm15, %v5265_v43  ;;  %vm5356_vm15 = vcmask 589232  }
0x15ed   : > { %7937 = vmatpush3.bf16.msk.msra.mxu0 %vm8917_vm10, %v7932_v36  ;;  %v5371_v54 = vpop.permute.xlu0 %5370 }
0x15ee   : > { %7800 = vmatprep.mubr.msk.f32.mxu0 %vm10646_vm11, %v5371_v54  ;;  %7940 = vmatprep.subr.msk.bf16.mxu0 %vm8917_vm10, %v7938_v42  ;;  %vm5365_vm11 = vcmask 736832  }
0x15ef   : > { %v5373_v46 = vpop.permute.xlu1 %5372 }
0x15f0   : > { %7801 = vmatmul.mubr.msk.f32.vlgmr.msra.gmra.mrb[60].mxu0 %vm10647_vm6, %v5373_v46  ;;  %vm5464_vm6 = vcmask 884432  }
0x15f1   : > { %7943 = vmatpush3.bf16.msk.msra.mxu0 %vm8917_vm10, %v7938_v42  ;;  %v5479_v48 = vpop.permute.xlu0 %5478 }
0x15f2   : > { %7807 = vmatprep.mubr.msk.f32.mxu0 %vm10648_vm7, %v5479_v48  ;;  %7946 = vmatprep.subr.msk.bf16.mxu0 %vm8917_vm10, %v7944_v45  ;;  %vm5473_vm7 = vcmask 1032032  }
0x15f3   : > { %v5481_v52 = vpop.permute.xlu1 %5480 }
0x15f4   : > { %7808 = vmatmul.mubr.msk.f32.vlgmr.msra.gmra.mrb[62].mxu0 %vm10649_vm2, %v5481_v52  ;;  %vm5572_vm2 = vcmask 1048560  }
0x15f5   : > { %7949 = vmatpush3.bf16.msk.msra.mxu0 %vm8917_vm10, %v7944_v45  ;;  %v5589_v49 = vpop.permute.xlu0 %5588 }
0x15f6   : > { %7814 = vmatprep.mubr.msk.f32.mxu0 %vm10650_vm1, %v5589_v49  ;;  %7958 = vmatprep.subr.msk.bf16.mxu0 %vm8917_vm10, %v7956_v51  ;;  %vm10659_vm1 = vcmask 130048  }
0x15f7   : > { %v5591_v53 = vpop.permute.xlu1 %5590 }
0x15f8   : > { %7815 = vmatmul.mubr.msk.f32.vlgmr.msra.gmra.mrb[64].mxu0 %vm10651_vm12, %v5591_v53  ;;  %vm10660_vm12 = vmmov %vm10659_vm1 }
0x15f9   : > { %v5697_v50 = vpop.permute.xlu0 %5696  ;;  %7961 = vmatpush3.bf16.msk.msra.mxu0 %vm8917_vm10, %v7956_v51 }
0x15fa   : > { %7821 = vmatprep.mubr.msk.f32.mxu1 %vm10652_vm5, %v5697_v50  ;;  %vm5583_vm5 = vcmask 277632  }
0x15fb   : > { %v5699_v55 = vpop.permute.xlu1 %5698 }
0x15fc   : > { %7822 = vmatmul.mubr.msk.f32.vlgmr.msra.gmra.mrb[44].mxu1 %vm10653_vm9, %v5699_v55  ;;  %vm5682_vm9 = vcmask 425232  }
0x15fd   : > { %v5805_v56 = vpop.permute.xlu0 %5804  ;;  %7967 = vmatpush3.bf16.msk.msra.mxu1 %vm8917_vm10, %v7962_v34  ;;  %vm5248_vm10 = vcmask 294032  }
0x15fe   : > { %7828 = vmatprep.mubr.msk.f32.mxu0 %vm10654_vm4, %v5805_v56  ;;  %6433 = vmatprep.subr.bf16.mxu1 %v8162_v5  ;;  %vm5691_vm4 = vcmask 572832  }
0x15ff   : > { %v5807_v40 = vpop.permute.xlu1 %5806 }
0x1600   : > { %7829 = vmatmul.mubr.msk.f32.vlgmr.msra.gmra.mrb[66].mxu0 %vm10655_vm8, %v5807_v40  ;;  %vm5790_vm8 = vcmask 720432  }
0x1601   : > { %v5916_v1 = vpop.permute.xlu0 %5915 }
0x1602   : > { %7835 = vmatprep.mubr.msk.f32.mxu1 %vm10642_vm0, %v5916_v1  ;;  %vm5799_vm0 = vcmask 868032  }
0x1603   : > { %v5918_v59 = vpop.permute.xlu1 %5917 }
0x1604   : > { %7836 = vmatmul.mubr.msk.f32.vlgmr.msra.gmra.mrb[46].mxu1 %vm10656_vm3, %v5918_v59  ;;  %vm5898_vm3 = vcmask 1015632  }
0x16bb   : > { %v7788_v29 = vpop.f32.mrb[56].mxu0 }
0x16bc   : > { %5244 = vrot.lane.b32.xlu1 %v7788_v29, %s10657_s11  ;;  %v5231_v60 = vpop.f32.mrb[57].mxu0 }
0x16bd   : > { %5242 = vrot.lane.b32.xlu0 %v5231_v60, %s10657_s11 }
0x16bf   : > { %v7795_v62 = vpop.f32.mrb[58].mxu0 }
0x16c0   : > { %5253 = vrot.lane.b32.xlu1 %v7788_v29, %s8202_s18  ;;  %v5339_v61 = vpop.f32.mrb[59].mxu0 }
0x16c1   : > { %5251 = vrot.lane.b32.xlu0 %v5231_v60, %s8202_s18  ;;  %s8205_s18 = smov 14  }
0x16c3   : > { %v7802_v15 = vpop.f32.mrb[60].mxu0 }
0x16c4   : > { %v5447_v20 = vpop.f32.mrb[61].mxu0 }
0x16c7   : > { %v7809_v63 = vpop.f32.mrb[62].mxu0 }
0x16c8   : > { %v5555_v0 = vpop.f32.mrb[63].mxu0 }
0x16cb   : > { %v7816_v2 = vpop.f32.mrb[64].mxu0 }
0x16cc   : > { %v5665_v3 = vpop.f32.mrb[65].mxu0 }
0x16cf   : > { %v7823_v4 = vpop.f32.mrb[44].mxu1 }
0x16d0   : > { %5786 = vrot.lane.b32.xlu1 %v7823_v4, %s10454_s2  ;;  %v5773_v8 = vpop.f32.mrb[45].mxu1 }
0x16d1   : > { %5784 = vrot.lane.b32.xlu0 %v5773_v8, %s10454_s2  ;;  %s10658_s2 = smov 108  }
0x16d3   : > { %v7830_v9 = vpop.f32.mrb[66].mxu0 }
0x16d4   : > { %5795 = vrot.lane.b32.xlu1 %v7823_v4, %s8199_s22  ;;  %v5881_v10 = vpop.f32.mrb[67].mxu0 }
0x16d5   : > { %5793 = vrot.lane.b32.xlu0 %v5773_v8, %s8199_s22  ;;  %s8208_s22 = smov 16  }
0x16d7   : > { %v7837_v11 = vpop.f32.mrb[46].mxu1 }
0x16d8   : > { %5352 = vrot.lane.b32.xlu1 %v7795_v62, %s8203_s23  ;;  %v5992_v12 = vpop.f32.mrb[47].mxu1 }
0x16d9   : > { %5350 = vrot.lane.b32.xlu0 %v5339_v61, %s8203_s23  ;;  %s8209_s23 = smov 34  }
0x16dc   : > { %5361 = vrot.lane.b32.xlu1 %v7795_v62, %s8204_s28 }
0x16dd   : > { %5359 = vrot.lane.b32.xlu0 %v5339_v61, %s8204_s28  ;;  %s8210_s28 = smov 52  }
0x16e0   : > { %6005 = vrot.lane.b32.xlu1 %v7837_v11, %s8205_s18 }
0x16e1   : > { %6003 = vrot.lane.b32.xlu0 %v5992_v12, %s8205_s18  ;;  %s8211_s18 = smov 106  }
0x16e4   : > { %5460 = vrot.lane.b32.xlu1 %v7802_v15, %s8206_s1 }
0x16e5   : > { %5458 = vrot.lane.b32.xlu0 %v5447_v20, %s8206_s1  ;;  %s8212_s1 = smov 124  }
0x16e8   : > { %5469 = vrot.lane.b32.xlu1 %v7802_v15, %s10658_s2 }
0x16e9   : > { %5467 = vrot.lane.b32.xlu0 %v5447_v20, %s10658_s2  ;;  %s10663_s2 = smov 110  }
0x16ec   : > { %5568 = vrot.lane.b32.xlu1 %v7809_v63, %s8207_s0 }
0x16ed   : > { %5566 = vrot.lane.b32.xlu0 %v5555_v0, %s8207_s0  ;;  %s10662_s0 = smov 111  }
0x16f0   : > { %5579 = vrot.lane.b32.xlu1 %v7809_v63, %s8208_s22 }
0x16f1   : > { %5577 = vrot.lane.b32.xlu0 %v5555_v0, %s8208_s22  ;;  %s10664_s22 = smov 17  }
0x16f4   : > { %5678 = vrot.lane.b32.xlu1 %v7816_v2, %s8209_s23 }
0x16f5   : > { %5676 = vrot.lane.b32.xlu0 %v5665_v3, %s8209_s23  ;;  %s10667_s23 = sld [smem:[#allocation15_spill]] }
0x16f8   : > { %5687 = vrot.lane.b32.xlu1 %v7816_v2, %s8210_s28 }
0x16f9   : > { %5685 = vrot.lane.b32.xlu0 %v5665_v3, %s8210_s28  ;;  %s10668_s28 = sld [smem:[#allocation16_spill]] }
0x16fb   : > { %v9812_v60 = vld [vmem:[%s10667_s23] sm:$0xff]  ;;  %s10775_s23 = sld [smem:[#allocation17_spill]] }
0x16fc   : > { %5894 = vrot.lane.b32.xlu1 %v7830_v9, %s8211_s18  ;;  %v7389_v62 = vcombine.high %v9812_v60, %v9812_v60 }
0x16fd   : > { %5892 = vrot.lane.b32.xlu0 %v5881_v10, %s8211_s18  ;;  %s10669_s18 = smov 109  }
0x16fe   : > { %7391 = vmatprep.mubr.msk.bf16.mxu1 %vm10659_vm1, %v7389_v62 }
0x16ff   : > { %v6377_v61 = vld [vmem:[%s10668_s28] sm:$0xff]  ;;  %s10785_s28 = sld [smem:[#allocation20_spill]] }
0x1700   : > { %5903 = vrot.lane.b32.xlu1 %v7830_v9, %s8212_s1 }
0x1701   : > { %5901 = vrot.lane.b32.xlu0 %v5881_v10, %s8212_s1  ;;  %s10741_s1 = sld [smem:[#allocation18_spill]] }
0x1704   : > { %6014 = vrot.lane.b32.xlu1 %v7837_v11, %s8213_s5 }
0x1705   : > { %6012 = vrot.lane.b32.xlu0 %v5992_v12, %s8213_s5  ;;  %s10661_s5 = smov 19  }
0x172e   : > { %v5245_v13 = vpop.permute.xlu1 %5244 }
0x172f   : > { %5250 = vst.msk [vmem:[#allocation3 + $0x18] sm:$0xff] %vm5248_vm10, %v5245_v13  ;;  %v5243_v21 = vpop.permute.xlu0 %5242 }
0x1730   : > { %5249 = vst.msk [vmem:[#allocation3] sm:$0xff] %vm5248_vm10, %v5243_v21  ;;  %vm5907_vm10 = vcmask 1048544  }
0x1732   : > { %v5254_v22 = vpop.permute.xlu1 %5253 }
0x1733   : > { %5259 = vst.msk [vmem:[#allocation3 + $0x18] sm:$0xff] %vm5257_vm13, %v5254_v22  ;;  %v5252_v24 = vpop.permute.xlu0 %5251 }
0x1734   : > { %5258 = vst.msk [vmem:[#allocation3] sm:$0xff] %vm5257_vm13, %v5252_v24  ;;  %vm5909_vm13 = vcmask 113664  }
0x1742   : > { %v5787_v25 = vpop.permute.xlu1 %5786 }
0x1743   : > { %v5785_v26 = vpop.permute.xlu0 %5784 }
0x1746   : > { %v5796_v27 = vpop.permute.xlu1 %5795 }
0x1747   : > { %v5794_v28 = vpop.permute.xlu0 %5793 }
0x174a   : > { %v5353_v30 = vpop.permute.xlu1 %5352 }
0x174b   : > { %5358 = vst.msk [vmem:[#allocation3 + $0x18] sm:$0xff] %vm5356_vm15, %v5353_v30  ;;  %v5351_v32 = vpop.permute.xlu0 %5350 }
0x174c   : > { %5357 = vst.msk [vmem:[#allocation3] sm:$0xff] %vm5356_vm15, %v5351_v32  ;;  %vm6009_vm15 = vcmask 261232  }
0x174e   : > { %v5362_v33 = vpop.permute.xlu1 %5361 }
0x174f   : > { %5367 = vst.msk [vmem:[#allocation3 + $0x18] sm:$0xff] %vm5365_vm11, %v5362_v33  ;;  %v5360_v58 = vpop.permute.xlu0 %5359 }
0x1750   : > { %5366 = vst.msk [vmem:[#allocation3] sm:$0xff] %vm5365_vm11, %v5360_v58  ;;  %vm6018_vm11 = vcmask 408832  }
0x1752   : > { %v9718_v34 = vpop.permute.xlu1 %6005 }
0x1753   : > { %v9720_v35 = vpop.permute.xlu0 %6003 }
0x1756   : > { %v5461_v19 = vpop.permute.xlu1 %5460 }
0x1757   : > { %5466 = vst.msk [vmem:[#allocation3 + $0x18] sm:$0xff] %vm5464_vm6, %v5461_v19  ;;  %v5459_v36 = vpop.permute.xlu0 %5458 }
0x1758   : > { %5465 = vst.msk [vmem:[#allocation3] sm:$0xff] %vm5464_vm6, %v5459_v36  ;;  %vm10665_vm6 = vcmask 556032  }
0x175a   : > { %v5470_v37 = vpop.permute.xlu1 %5469 }
0x175b   : > { %5475 = vst.msk [vmem:[#allocation3 + $0x18] sm:$0xff] %vm5473_vm7, %v5470_v37  ;;  %v5468_v38 = vpop.permute.xlu0 %5467 }
0x175c   : > { %5474 = vst.msk [vmem:[#allocation3] sm:$0xff] %vm5473_vm7, %v5468_v38  ;;  %vm10666_vm7 = vmmov %vm10665_vm6 }
0x175e   : > { %v5569_v39 = vpop.permute.xlu1 %5568 }
0x175f   : > { %5575 = vst.msk [vmem:[#allocation3 + $0x18] sm:$0xff] %vm5572_vm2, %v5569_v39  ;;  %v5567_v42 = vpop.permute.xlu0 %5566 }
0x1760   : > { %5576 = vst.msk [vmem:[#allocation3 + $0x20] sm:$0xff] %vm10659_vm1, %v5569_v39 }
0x1761   : > { %5573 = vst.msk [vmem:[#allocation3] sm:$0xff] %vm5572_vm2, %v5567_v42  ;;  %vm10670_vm2 = vmmov %vm10659_vm1 }
0x1762   : > { %5574 = vst.msk [vmem:[#allocation3 + $0x8] sm:$0xff] %vm10660_vm12, %v5567_v42  ;;  %v5580_v43 = vpop.permute.xlu1 %5579  ;;  %7390 = vmatprep.mubr.msk.bf16.mxu0 %vm10670_vm2, %v7389_v62  ;;  %vm10671_vm12 = vcmask 1047704  }
0x1763   : > { %5585 = vst.msk [vmem:[#allocation3 + $0x20] sm:$0xff] %vm5583_vm5, %v5580_v43  ;;  %v5578_v44 = vpop.permute.xlu0 %5577 }
0x1764   : > { %5584 = vst.msk [vmem:[#allocation3 + $0x8] sm:$0xff] %vm5583_vm5, %v5578_v44  ;;  %vm10672_vm5 = vcmask 154624  }
0x1766   : > { %v5679_v54 = vpop.permute.xlu1 %5678  ;;  %v9724_v45 = vld [vmem:[#allocation3 + $0x18] sm:$0xff] }
0x1767   : > { %5684 = vst.msk [vmem:[#allocation3 + $0x20] sm:$0xff] %vm5682_vm9, %v5679_v54  ;;  %6165 = vrot.lane.b32.xlu1 %v9724_v45, %s10568_s4  ;;  %6156 = vst [vmem:[#allocation2 + $0x170] sm:$0xff] %v9724_v45  ;;  %6039 = vrot.lane.b32.xlu0 %v9724_v45, %s10661_s5  ;;  %v5677_v46 = vpop.permute.xlu0 %5676 }
0x1768   : > { %5683 = vst.msk [vmem:[#allocation3 + $0x8] sm:$0xff] %vm5682_vm9, %v5677_v46  ;;  %v9743_v55 = vld [vmem:[#allocation3] sm:$0xff]  ;;  %vm10673_vm9 = vcmask 1047696  }
0x176a   : > { %v5688_v47 = vpop.permute.xlu1 %5687 }
0x176b   : > { %5693 = vst.msk [vmem:[#allocation3 + $0x20] sm:$0xff] %vm5691_vm4, %v5688_v47  ;;  %6199 = vrot.lane.b32.xlu1 %v9724_v45, %s10662_s0  ;;  %6069 = vrot.lane.b32.xlu0 %v9724_v45, %s10657_s11  ;;  %v5686_v48 = vpop.permute.xlu0 %5685 }
0x176c   : > { %5792 = vst.msk [vmem:[#allocation3 + $0x20] sm:$0xff] %vm5790_vm8, %v5787_v25 }
0x176d   : > { %5692 = vst.msk [vmem:[#allocation3 + $0x8] sm:$0xff] %vm5691_vm4, %v5686_v48  ;;  %vm10674_vm4 = vcmask 146432  }
0x176e   : > { %5791 = vst.msk [vmem:[#allocation3 + $0x8] sm:$0xff] %vm5790_vm8, %v5785_v26  ;;  %v5895_v51 = vpop.permute.xlu1 %5894  ;;  %vm10675_vm8 = vcmask 1047688  }
0x176f   : > { %5801 = vst.msk [vmem:[#allocation3 + $0x20] sm:$0xff] %vm5799_vm0, %v5796_v27  ;;  %5800 = vst.msk [vmem:[#allocation3 + $0x8] sm:$0xff] %vm5799_vm0, %v5794_v28  ;;  %6233 = vrot.lane.b32.xlu1 %v9724_v45, %s10663_s2  ;;  %6099 = vrot.lane.b32.xlu0 %v9724_v45, %s10664_s22  ;;  %v5893_v52 = vpop.permute.xlu0 %5892  ;;  %vm10676_vm0 = vcmask 138240  }
0x1770   : > { %5900 = vst.msk [vmem:[#allocation3 + $0x20] sm:$0xff] %vm5898_vm3, %v5895_v51  ;;  %5899 = vst.msk [vmem:[#allocation3 + $0x8] sm:$0xff] %vm5898_vm3, %v5893_v52  ;;  %vm10677_vm3 = vcmask 1047560  }
0x1771   : > { %vm10684_vm2 = vmmov %vm10676_vm0 }
0x1772   : > { %v5904_v49 = vpop.permute.xlu1 %5903  ;;  %vm10685_vm1 = vmmov %vm10677_vm3 }
0x1773   : > { %5911 = vst.msk [vmem:[#allocation3 + $0x20] sm:$0xff] %vm5907_vm10, %v5904_v49  ;;  %6129 = vrot.lane.b32.xlu0 %v9724_v45, %s10567_s3  ;;  %v5902_v53 = vpop.permute.xlu0 %5901 }
0x1774   : > { %5912 = vst.msk [vmem:[#allocation3 + $0x28] sm:$0xff] %vm5909_vm13, %v5904_v49  ;;  %5910 = vst.msk [vmem:[#allocation3 + $0x10] sm:$0xff] %vm5909_vm13, %v5902_v53 }
0x1775   : > { %5908 = vst.msk [vmem:[#allocation3 + $0x8] sm:$0xff] %vm5907_vm10, %v5902_v53  ;;  %vm10678_vm10 = vcmask 7168   ;;  %vm10679_vm13 = vmmov %vm10671_vm12 }
0x1776   : > { %6011 = vst.msk [vmem:[#allocation3 + $0x28] sm:$0xff] %vm6009_vm15, %v9718_v34  ;;  %6010 = vst.msk [vmem:[#allocation3 + $0x10] sm:$0xff] %vm6009_vm15, %v9720_v35  ;;  %v6015_v50 = vpop.permute.xlu1 %6014 }
0x1777   : > { %6020 = vst.msk [vmem:[#allocation3 + $0x28] sm:$0xff] %vm6018_vm11, %v6015_v50  ;;  %6033 = vrot.lane.b32.xlu0 %v9743_v55, %s10661_s5  ;;  %v6013_v56 = vpop.permute.xlu0 %6012  ;;  %vm10680_vm15 = vmmov %vm10672_vm5 }
0x1778   : > { %6019 = vst.msk [vmem:[#allocation3 + $0x10] sm:$0xff] %vm6018_vm11, %v6013_v56  ;;  %vm10681_vm11 = vmmov %vm10673_vm9 }
0x177a   : > { %v9747_v40 = vld [vmem:[#allocation3 + $0x20] sm:$0xff] }
0x177b   : > { %6041 = vrot.lane.b32.xlu1 %v9747_v40, %s10661_s5  ;;  %6063 = vrot.lane.b32.xlu0 %v9743_v55, %s10657_s11 }
0x177c   : > { %v9767_v29 = vld [vmem:[#allocation3 + $0x8] sm:$0xff] }
0x177e   : > { %v6026_v1 = vld [vmem:[#allocation3 + $0x28] sm:$0xff] }
0x177f   : > { %6071 = vrot.lane.b32.xlu1 %v9747_v40, %s10657_s11  ;;  %6093 = vrot.lane.b32.xlu0 %v9743_v55, %s10664_s22  ;;  %6158 = vst.msk [vmem:[#allocation2 + $0x180] sm:$0xff] %vm10665_vm6, %v6026_v1  ;;  %v6023_v59 = vld [vmem:[#allocation3 + $0x10] sm:$0xff]  ;;  %vm10682_vm6 = vmmov %vm10674_vm4 }
0x1780   : > { %6155 = vst.msk [vmem:[#allocation2 + $0x158] sm:$0xff] %vm10666_vm7, %v6023_v59  ;;  %vm10683_vm7 = vmmov %vm10675_vm8 }
0x1783   : > { %6101 = vrot.lane.b32.xlu1 %v9747_v40, %s10664_s22  ;;  %6123 = vrot.lane.b32.xlu0 %v9743_v55, %s10567_s3 }
0x1787   : > { %6131 = vrot.lane.b32.xlu1 %v9747_v40, %s10567_s3  ;;  %6159 = vrot.lane.b32.xlu0 %v9743_v55, %s10568_s4 }
0x178b   : > { %6193 = vrot.lane.b32.xlu0 %v9743_v55, %s10662_s0  ;;  %6035 = vrot.lane.b32.xlu1 %v9767_v29, %s10661_s5 }
0x178f   : > { %6227 = vrot.lane.b32.xlu0 %v9743_v55, %s10663_s2  ;;  %6065 = vrot.lane.b32.xlu1 %v9767_v29, %s10657_s11 }
0x1793   : > { %6167 = vrot.lane.b32.xlu0 %v9747_v40, %s10568_s4  ;;  %6095 = vrot.lane.b32.xlu1 %v9767_v29, %s10664_s22 }
0x1797   : > { %6201 = vrot.lane.b32.xlu0 %v9747_v40, %s10662_s0  ;;  %6043 = vrot.lane.b32.xlu1 %v6026_v1, %s10661_s5 }
0x179b   : > { %6235 = vrot.lane.b32.xlu0 %v9747_v40, %s10663_s2  ;;  %6125 = vrot.lane.b32.xlu1 %v9767_v29, %s10567_s3 }
0x179f   : > { %6161 = vrot.lane.b32.xlu0 %v9767_v29, %s10568_s4  ;;  %6073 = vrot.lane.b32.xlu1 %v6026_v1, %s10657_s11 }
0x17a3   : > { %6195 = vrot.lane.b32.xlu0 %v9767_v29, %s10662_s0  ;;  %6103 = vrot.lane.b32.xlu1 %v6026_v1, %s10664_s22 }
0x17a7   : > { %6229 = vrot.lane.b32.xlu0 %v9767_v29, %s10663_s2  ;;  %6169 = vrot.lane.b32.xlu1 %v6026_v1, %s10568_s4 }
0x17ab   : > { %6133 = vrot.lane.b32.xlu1 %v6026_v1, %s10567_s3  ;;  %6037 = vrot.lane.b32.xlu0 %v6023_v59, %s10661_s5 }
0x17af   : > { %6203 = vrot.lane.b32.xlu1 %v6026_v1, %s10662_s0  ;;  %6067 = vrot.lane.b32.xlu0 %v6023_v59, %s10657_s11 }
0x17b3   : > { %6237 = vrot.lane.b32.xlu1 %v6026_v1, %s10663_s2  ;;  %6097 = vrot.lane.b32.xlu0 %v6023_v59, %s10664_s22 }
0x17b7   : > { %6163 = vrot.lane.b32.xlu1 %v6023_v59, %s10568_s4  ;;  %6127 = vrot.lane.b32.xlu0 %v6023_v59, %s10567_s3 }
0x17bb   : > { %6271 = vrot.lane.b32.xlu1 %v6026_v1, %s10669_s18  ;;  %6263 = vrot.lane.b32.xlu0 %v9767_v29, %s10669_s18 }
0x17bf   : > { %6197 = vrot.lane.b32.xlu1 %v6023_v59, %s10662_s0  ;;  %6269 = vrot.lane.b32.xlu0 %v9747_v40, %s10669_s18 }
0x17c3   : > { %6231 = vrot.lane.b32.xlu1 %v6023_v59, %s10663_s2  ;;  %6261 = vrot.lane.b32.xlu0 %v9743_v55, %s10669_s18 }
0x17c7   : > { %6265 = vrot.lane.b32.xlu1 %v6023_v59, %s10669_s18  ;;  %6380 = vperm.xlu0 %8074, %v6377_v61  }
0x17cb   : > { %6267 = vrot.lane.b32.xlu1 %v9724_v45, %s10669_s18 }
0x17d9   : > { %v6166_v15 = vpop.permute.xlu1 %6165  ;;  %v6040_v20 = vpop.permute.xlu0 %6039 }
0x17da   : > { %6058 = vst.msk [vmem:[#allocation2 + $0x30] sm:$0xff] %vm10671_vm12, %v6040_v20  ;;  %vm10686_vm12 = vmmov %vm10678_vm10 }
0x17db   : > { %6062 = vst.msk [vmem:[#allocation2 + $0x30] sm:$0xff] %vm10672_vm5, %v9620_v57 }
0x17dd   : > { %v9828_v63 = vpop.permute.xlu1 %6199  ;;  %v6070_v0 = vpop.permute.xlu0 %6069 }
0x17de   : > { %6088 = vst.msk [vmem:[#allocation2 + $0x80] sm:$0xff] %vm10673_vm9, %v6070_v0  ;;  %vm10687_vm9 = vmmov %vm10672_vm5 }
0x17df   : > { %6092 = vst.msk [vmem:[#allocation2 + $0x80] sm:$0xff] %vm10674_vm4, %v9620_v57 }
0x17e1   : > { %v9833_v2 = vpop.permute.xlu1 %6233  ;;  %v6100_v3 = vpop.permute.xlu0 %6099 }
0x17e2   : > { %6118 = vst.msk [vmem:[#allocation2 + $0xd0] sm:$0xff] %vm10675_vm8, %v6100_v3  ;;  %v6298_v26 = vld [vmem:[#allocation2 + $0x30] sm:$0xff]  ;;  %vm10688_vm8 = vmmov %vm10674_vm4 }
0x17e3   : > { %6122 = vst.msk [vmem:[#allocation2 + $0xd0] sm:$0xff] %vm10676_vm0, %v9620_v57 }
0x17e5   : > { %v9838_v4 = vpop.permute.xlu0 %6129 }
0x17e6   : > { %6148 = vst.msk [vmem:[#allocation2 + $0x120] sm:$0xff] %vm10677_vm3, %v9838_v4  ;;  %v6304_v35 = vld [vmem:[#allocation2 + $0x80] sm:$0xff]  ;;  %vm10689_vm3 = vmmov %vm10676_vm0 }
0x17e7   : > { %6152 = vst.msk [vmem:[#allocation2 + $0x120] sm:$0xff] %vm10678_vm10, %v9620_v57  ;;  %vm10690_vm10 = vcmask 1039360  }
0x17e9   : > { %v6034_v8 = vpop.permute.xlu0 %6033 }
0x17ea   : > { %6055 = vst.msk [vmem:[#allocation2 + $0x8] sm:$0xff] %vm10679_vm13, %v6034_v8  ;;  %v6310_v44 = vld [vmem:[#allocation2 + $0xd0] sm:$0xff]  ;;  %vm10691_vm13 = vmmov %vm10672_vm5 }
0x17eb   : > { %6061 = vst.msk [vmem:[#allocation2 + $0x8] sm:$0xff] %vm10680_vm15, %v9620_v57  ;;  %vm10692_vm15 = vcmask 908288  }
0x17ed   : > { %v6042_v9 = vpop.permute.xlu1 %6041  ;;  %v6064_v10 = vpop.permute.xlu0 %6063 }
0x17ee   : > { %6085 = vst.msk [vmem:[#allocation2 + $0x58] sm:$0xff] %vm10681_vm11, %v6064_v10  ;;  %v6047_v30 = vsel %vm10672_vm5, %v6040_v20, %v6042_v9  ;;  %vm10693_vm11 = vcmask 711680   ;;  %v6316_v62 = vld [vmem:[#allocation2 + $0x120] sm:$0xff]  ;;  %vm10699_vm5 = vcmask 703488  }
0x17ef   : > { %6091 = vst.msk [vmem:[#allocation2 + $0x58] sm:$0xff] %vm10682_vm6, %v9620_v57  ;;  %vm10694_vm6 = vmmov %vm10686_vm12 }
0x17f1   : > { %v9850_v11 = vpop.permute.xlu1 %6071  ;;  %v6094_v12 = vpop.permute.xlu0 %6093 }
0x17f2   : > { %6115 = vst.msk [vmem:[#allocation2 + $0xa8] sm:$0xff] %vm10683_vm7, %v6094_v12  ;;  %v6295_v25 = vld [vmem:[#allocation2 + $0x8] sm:$0xff]  ;;  %v6077_v37 = vsel %vm10674_vm4, %v6070_v0, %v9850_v11  ;;  %vm10695_vm7 = vmmov %vm10694_vm6 }
0x17f3   : > { %6121 = vst.msk [vmem:[#allocation2 + $0xa8] sm:$0xff] %vm10684_vm2, %v9620_v57  ;;  %v6349_v33 = vpack.c.bf16 %v6298_v26, %v6295_v25  ;;  %vm10696_vm2 = vcmask 900096  }
0x17f5   : > { %v9855_v13 = vpop.permute.xlu1 %6101  ;;  %v6124_v21 = vpop.permute.xlu0 %6123 }
0x17f6   : > { %6145 = vst.msk [vmem:[#allocation2 + $0xf8] sm:$0xff] %vm10685_vm1, %v6124_v21  ;;  %v6301_v34 = vld [vmem:[#allocation2 + $0x58] sm:$0xff]  ;;  %v6107_v47 = vsel %vm10676_vm0, %v6100_v3, %v9855_v13  ;;  %vm10697_vm1 = vmmov %vm10674_vm4 }
0x17f7   : > { %6151 = vst.msk [vmem:[#allocation2 + $0xf8] sm:$0xff] %vm10686_vm12, %v9620_v57  ;;  %v6352_v39 = vpack.c.bf16 %v6304_v35, %v6301_v34  ;;  %vm10698_vm12 = vmmov %vm10690_vm10 }
0x17f8   : > { %vm10701_vm4 = vmmov %vm10692_vm15 }
0x17f9   : > { %v9860_v22 = vpop.permute.xlu1 %6131  ;;  %v6160_v24 = vpop.permute.xlu0 %6159 }
0x17fa   : > { %v6307_v43 = vld [vmem:[#allocation2 + $0xa8] sm:$0xff]  ;;  %v6137_v20 = vsel %vm10694_vm6, %v9838_v4, %v9860_v22 }
0x17fb   : > { %v6355_v52 = vpack.c.bf16 %v6310_v44, %v6307_v43 }
0x17fd   : > { %v9862_v27 = vpop.permute.xlu1 %6035  ;;  %v6194_v28 = vpop.permute.xlu0 %6193 }
0x17fe   : > { %v6045_v32 = vsel %vm10687_vm9, %v6034_v8, %v9862_v27  ;;  %v6313_v59 = vld [vmem:[#allocation2 + $0xf8] sm:$0xff]  ;;  %vm10700_vm9 = vmmov %vm10676_vm0 }
0x17ff   : > { %v6350_v58 = vpack.c.bf16 %v6047_v30, %v6045_v32  ;;  %vm10703_vm0 = vmmov %vm10690_vm10 }
0x1801   : > { %v9867_v19 = vpop.permute.xlu1 %6065  ;;  %v6228_v36 = vpop.permute.xlu0 %6227  ;;  %6392 = vmatprep.subr.bf16.mxu0 %v6350_v58 }
0x1802   : > { %v6075_v38 = vsel %vm10688_vm8, %v6064_v10, %v9867_v19  ;;  %6393 = vmatpush1.bf16.msra.mxu0 %v6349_v33  ;;  %vm10702_vm8 = vcmask 695296  }
0x1803   : > { %v6353_v42 = vpack.c.bf16 %v6077_v37, %v6075_v38 }
0x1805   : > { %v9873_v54 = vpop.permute.xlu1 %6095  ;;  %v6168_v46 = vpop.permute.xlu0 %6167  ;;  %6394 = vmatprep.subr.bf16.mxu0 %v6353_v42 }
0x1806   : > { %v6105_v48 = vsel %vm10689_vm3, %v6094_v12, %v9873_v54  ;;  %v9880_v51 = vsel %vm10690_vm10, %v6166_v15, %v6168_v46  ;;  %6395 = vmatpush1.bf16.msra.mxu0 %v6352_v39  ;;  %v6362_v12 = vpack.c.bf16 %v9747_v40, %v9767_v29  ;;  %vm10704_vm3 = vcmask 547840   ;;  %vm10705_vm10 = vmmov %vm10696_vm2 }
0x1807   : > { %6188 = vst [vmem:[#allocation2 + $0x1c0] sm:$0xff] %v9880_v51  ;;  %v6356_v49 = vpack.c.bf16 %v6107_v47, %v6105_v48 }
0x1809   : > { %v6044_v53 = vpop.permute.xlu1 %6043  ;;  %v6202_v50 = vpop.permute.xlu0 %6201  ;;  %6396 = vmatprep.subr.bf16.mxu0 %v6356_v49 }
0x180a   : > { %v6048_v56 = vsel %vm10691_vm13, %v6042_v9, %v6044_v53  ;;  %v9886_v1 = vsel %vm10692_vm15, %v9828_v63, %v6202_v50  ;;  %6397 = vmatpush1.bf16.msra.mxu0 %v6355_v52  ;;  %v6358_v63 = vpack.c.bf16 %v6316_v62, %v6313_v59  ;;  %vm10706_vm13 = vcmask 556568   ;;  %vm10707_vm15 = vmmov %vm10694_vm6 }
0x180b   : > { %6060 = vst.msk [vmem:[#allocation2 + $0x40] sm:$0xff] %vm10693_vm11, %v6048_v56  ;;  %6222 = vst [vmem:[#allocation2 + $0x210] sm:$0xff] %v9886_v1  ;;  %vm10708_vm11 = vcmask 154624   ;;  %vm10709_vm6 = vcmask 564224  }
0x180d   : > { %v6126_v61 = vpop.permute.xlu1 %6125  ;;  %v6236_v15 = vpop.permute.xlu0 %6235 }
0x180e   : > { %v6135_v0 = vsel %vm10695_vm7, %v6124_v21, %v6126_v61  ;;  %v9896_v3 = vsel %vm10696_vm2, %v9833_v2, %v6236_v15  ;;  %v6361_v2 = vpack.c.bf16 %v9724_v45, %v9743_v55  ;;  %vm10710_vm7 = vcmask 711680   ;;  %vm10711_vm2 = vmmov %vm10701_vm4 }
0x180f   : > { %6256 = vst [vmem:[#allocation2 + $0x260] sm:$0xff] %v9896_v3  ;;  %v6359_v8 = vpack.c.bf16 %v6137_v20, %v6135_v0 }
0x1811   : > { %v6074_v9 = vpop.permute.xlu1 %6073  ;;  %v6162_v10 = vpop.permute.xlu0 %6161  ;;  %6398 = vmatprep.subr.bf16.mxu0 %v6359_v8 }
0x1812   : > { %v6078_v25 = vsel %vm10697_vm1, %v9850_v11, %v6074_v9  ;;  %v9904_v4 = vsel %vm10698_vm12, %v6160_v24, %v6162_v10  ;;  %6399 = vmatpush1.bf16.msra.mxu0 %v6358_v63  ;;  %vm10712_vm1 = vcmask 416768   ;;  %vm10713_vm12 = vcmask 146432   ;;  %v6300_v39 = vld [vmem:[#allocation2 + $0x40] sm:$0xff] }
0x1813   : > { %6090 = vst.msk [vmem:[#allocation2 + $0x90] sm:$0xff] %vm10699_vm5, %v6078_v25  ;;  %6184 = vst [vmem:[#allocation2 + $0x198] sm:$0xff] %v9904_v4  ;;  %6400 = vmatprep.subr.bf16.mxu0 %v6362_v12  ;;  %vm10714_vm5 = vcmask 556440   ;;  %v6364_v49 = vpack.c.bf16 %v9880_v51, %v9904_v4  ;;  %v6324_v12 = vld [vmem:[#allocation2 + $0x180] sm:$0xff] }
0x1815   : > { %v6104_v21 = vpop.permute.xlu1 %6103  ;;  %v9910_v26 = vpop.permute.xlu0 %6195 }
0x1816   : > { %v6108_v40 = vsel %vm10700_vm9, %v9855_v13, %v6104_v21  ;;  %v9916_v29 = vsel %vm10701_vm4, %v6194_v28, %v9910_v26  ;;  %6401 = vmatpush1.bf16.msra.mxu0 %v6361_v2  ;;  %vm10715_vm9 = vcmask 703488   ;;  %vm10716_vm4 = vmmov %vm10705_vm10 }
0x1817   : > { %6120 = vst.msk [vmem:[#allocation2 + $0xe0] sm:$0xff] %vm10702_vm8, %v6108_v40  ;;  %6218 = vst [vmem:[#allocation2 + $0x1e8] sm:$0xff] %v9916_v29  ;;  %vm10717_vm8 = vcmask 408576   ;;  %v6367_v25 = vpack.c.bf16 %v9886_v1, %v9916_v29 }
0x1819   : > { %v6170_v11 = vpop.permute.xlu1 %6169  ;;  %v9920_v24 = vpop.permute.xlu0 %6229 }
0x181a   : > { %v6174_v45 = vsel %vm10703_vm0, %v6168_v46, %v6170_v11  ;;  %6190 = vst.msk [vmem:[#allocation2 + $0x1d0] sm:$0xff] %vm10704_vm3, %v6170_v11  ;;  %v9926_v55 = vsel %vm10705_vm10, %v6228_v36, %v9920_v24  ;;  %vm10718_vm0 = vcmask 138240   ;;  %vm10719_vm3 = vcmask 556432   ;;  %v6306_v47 = vld [vmem:[#allocation2 + $0x90] sm:$0xff] }
0x181b   : > { %6192 = vst.msk [vmem:[#allocation2 + $0x1d0] sm:$0xff] %vm10706_vm13, %v9620_v57  ;;  %6252 = vst [vmem:[#allocation2 + $0x238] sm:$0xff] %v9926_v55  ;;  %vm10720_vm10 = vcmask 695296   ;;  %vm10721_vm13 = vcmask 1039360  }
0x181d   : > { %v6134_v13 = vpop.permute.xlu1 %6133  ;;  %v6038_v28 = vpop.permute.xlu0 %6037 }
0x181e   : > { %v6138_v30 = vsel %vm10707_vm15, %v9860_v22, %v6134_v13  ;;  %v6046_v32 = vsel %vm10708_vm11, %v9862_v27, %v6038_v28  ;;  %vm10722_vm15 = vcmask 547840   ;;  %vm10723_vm11 = vcmask 7168   ;;  %v6312_v59 = vld [vmem:[#allocation2 + $0xe0] sm:$0xff] }
0x181f   : > { %6150 = vst.msk [vmem:[#allocation2 + $0x130] sm:$0xff] %vm10709_vm6, %v6138_v30  ;;  %vm10724_vm6 = vcmask 556568  }
0x1820   : > { %6057 = vst.msk [vmem:[#allocation2 + $0x18] sm:$0xff] %vm10710_vm7, %v6046_v32  ;;  %vm10725_vm7 = vcmask 564224  }
0x1821   : > { %v6204_v33 = vpop.permute.xlu1 %6203  ;;  %v6068_v58 = vpop.permute.xlu0 %6067 }
0x1822   : > { %v6208_v34 = vsel %vm10711_vm2, %v6202_v50, %v6204_v33  ;;  %6224 = vst.msk [vmem:[#allocation2 + $0x220] sm:$0xff] %vm10712_vm1, %v6204_v33  ;;  %v6076_v35 = vsel %vm10713_vm12, %v9867_v19, %v6068_v58  ;;  %vm10726_vm2 = vcmask 400384   ;;  %vm10727_vm1 = vcmask 556424   ;;  %v6330_v11 = vld [vmem:[#allocation2 + $0x1d0] sm:$0xff] }
0x1823   : > { %6226 = vst.msk [vmem:[#allocation2 + $0x220] sm:$0xff] %vm10714_vm5, %v9620_v57  ;;  %vm10728_vm12 = vcmask 908288   ;;  %vm10729_vm5 = vcmask 416768  }
0x1824   : > { %6087 = vst.msk [vmem:[#allocation2 + $0x68] sm:$0xff] %vm10715_vm9, %v6076_v35  ;;  %vm10730_vm9 = vcmask 891904  }
0x1825   : > { %v6238_v22 = vpop.permute.xlu1 %6237  ;;  %v6098_v27 = vpop.permute.xlu0 %6097 }
0x1826   : > { %v9945_v36 = vsel %vm10716_vm4, %v6236_v15, %v6238_v22  ;;  %6258 = vst.msk [vmem:[#allocation2 + $0x270] sm:$0xff] %vm10717_vm8, %v6238_v22  ;;  %v6106_v37 = vsel %vm10718_vm0, %v9873_v54, %v6098_v27  ;;  %v6318_v63 = vld [vmem:[#allocation2 + $0x130] sm:$0xff]  ;;  %vm10731_vm4 = vcmask 556440   ;;  %vm10732_vm8 = vcmask 900096  }
0x1827   : > { %v6297_v38 = vld [vmem:[#allocation2 + $0x18] sm:$0xff]  ;;  %6260 = vst.msk [vmem:[#allocation2 + $0x270] sm:$0xff] %vm10719_vm3, %v9620_v57  ;;  %vm10733_vm0 = vcmask 408576   ;;  %vm10734_vm3 = vmmov %vm10730_vm9  ;;  %v7388_v27 = vcombine.low %v9812_v60, %v9812_v60 }
0x1828   : > { %6117 = vst.msk [vmem:[#allocation2 + $0xb8] sm:$0xff] %vm10720_vm10, %v6106_v37  ;;  %v6351_v19 = vpack.c.bf16 %v6300_v39, %v6297_v38  ;;  %vm10735_vm10 = vcmask 556432  }
0x1829   : > { %v6164_v42 = vpop.permute.xlu1 %6163  ;;  %v6128_v43 = vpop.permute.xlu0 %6127 }
0x182a   : > { %6434 = vmatpush1.bf16.msra.mxu1 %v6351_v19  ;;  %v6172_v44 = vsel %vm10721_vm13, %v6162_v10, %v6164_v42  ;;  %6186 = vst.msk [vmem:[#allocation2 + $0x1a8] sm:$0xff] %vm10722_vm15, %v6164_v42  ;;  %v6136_v46 = vsel %vm10723_vm11, %v6126_v61, %v6128_v43  ;;  %v6321_v10 = vld [vmem:[#allocation2 + $0x158] sm:$0xff]  ;;  %vm10736_vm13 = vmmov %vm10734_vm3  ;;  %v6336_v32 = vld [vmem:[#allocation2 + $0x220] sm:$0xff] }
0x182b   : > { %6435 = vmatprep.subr.bf16.mxu1 %v8162_v5  ;;  %v6303_v54 = vld [vmem:[#allocation2 + $0x68] sm:$0xff]  ;;  %6191 = vst.msk [vmem:[#allocation2 + $0x1a8] sm:$0xff] %vm10724_vm6, %v9620_v57  ;;  %v6365_v52 = vpack.c.bf16 %v6174_v45, %v6172_v44  ;;  %v6363_v1 = vpack.c.bf16 %v6324_v12, %v6321_v10  ;;  %v6370_v45 = vpack.c.bf16 %v9896_v3, %v9926_v55  ;;  %vm10737_vm15 = vmmov %vm10726_vm2 }
0x182c   : > { %6147 = vst.msk [vmem:[#allocation2 + $0x108] sm:$0xff] %vm10725_vm7, %v6136_v46  ;;  %v6354_v48 = vpack.c.bf16 %v6306_v47, %v6303_v54  ;;  %vm10738_vm11 = vmmov %vm10727_vm1  ;;  %vm10740_vm7 = vcmask 556032  }
0x182d   : > { %v6272_v53 = vpop.permute.xlu1 %6271  ;;  %v6264_v50 = vpop.permute.xlu0 %6263  ;;  %6402 = vmatprep.subr.bf16.mxu0 %v6365_v52  ;;  %vm10739_vm6 = vmmov %vm10734_vm3 }
0x182e   : > { %6436 = vmatpush1.bf16.msra.mxu1 %v6354_v48  ;;  %6292 = vst.msk [vmem:[#allocation2 + $0x2c0] sm:$0xff] %vm10726_vm2, %v6272_v53  ;;  %6403 = vmatpush1.bf16.msra.mxu0 %v6364_v49  ;;  %v6342_v35 = vld [vmem:[#allocation2 + $0x270] sm:$0xff]  ;;  %vm10742_vm2 = vcmask 1047704  }
0x182f   : > { %6437 = vmatprep.subr.bf16.mxu1 %v8162_v5  ;;  %v6309_v56 = vld [vmem:[#allocation2 + $0xb8] sm:$0xff]  ;;  %6294 = vst.msk [vmem:[#allocation2 + $0x2c0] sm:$0xff] %vm10727_vm1, %v9620_v57  ;;  %vm10743_vm1 = vcmask 154624  }
0x1830   : > { %v6357_v62 = vpack.c.bf16 %v6312_v59, %v6309_v56 }
0x1831   : > { %v6198_v61 = vpop.permute.xlu1 %6197  ;;  %v6270_v15 = vpop.permute.xlu0 %6269 }
0x1832   : > { %6438 = vmatpush1.bf16.msra.mxu1 %v6357_v62  ;;  %v6206_v51 = vsel %vm10728_vm12, %v9910_v26, %v6198_v61  ;;  %6220 = vst.msk [vmem:[#allocation2 + $0x1f8] sm:$0xff] %vm10729_vm5, %v6198_v61  ;;  %v6276_v20 = vsel %vm10730_vm9, %v6270_v15, %v6272_v53  ;;  %v6327_v40 = vld [vmem:[#allocation2 + $0x1a8] sm:$0xff]  ;;  %vm10744_vm12 = vcmask 1047696   ;;  %vm10745_vm5 = vcmask 146432  }
0x1833   : > { %6439 = vmatprep.subr.bf16.mxu1 %v8162_v5  ;;  %v6315_v0 = vld [vmem:[#allocation2 + $0x108] sm:$0xff]  ;;  %6225 = vst.msk [vmem:[#allocation2 + $0x1f8] sm:$0xff] %vm10731_vm4, %v9620_v57  ;;  %v6368_v9 = vpack.c.bf16 %v6208_v34, %v6206_v51  ;;  %v6366_v13 = vpack.c.bf16 %v6330_v11, %v6327_v40  ;;  %vm10746_vm9 = vcmask 1047688   ;;  %vm10747_vm4 = vcmask 138240  }
0x1834   : > { %v6360_v8 = vpack.c.bf16 %v6318_v63, %v6315_v0 }
0x1835   : > { %v6232_v4 = vpop.permute.xlu1 %6231  ;;  %v6262_v2 = vpop.permute.xlu0 %6261  ;;  %6404 = vmatprep.subr.bf16.mxu0 %v6368_v9 }
0x1836   : > { %6440 = vmatpush1.bf16.msra.mxu1 %v6360_v8  ;;  %v6240_v21 = vsel %vm10732_vm8, %v9920_v24, %v6232_v4  ;;  %6254 = vst.msk [vmem:[#allocation2 + $0x248] sm:$0xff] %vm10733_vm0, %v6232_v4  ;;  %v6273_v26 = vsel %vm10734_vm3, %v6262_v2, %v6264_v50  ;;  %6405 = vmatpush1.bf16.msra.mxu0 %v6367_v25  ;;  %v6348_v38 = vld [vmem:[#allocation2 + $0x2c0] sm:$0xff]  ;;  %vm10748_vm8 = vcmask 547840   ;;  %vm10749_vm0 = vcmask 1047560  }
0x1837   : > { %6441 = vmatprep.subr.bf16.mxu1 %v8162_v5  ;;  %6259 = vst.msk [vmem:[#allocation2 + $0x248] sm:$0xff] %vm10735_vm10, %v9620_v57  ;;  %6286 = vst [vmem:[#allocation2 + $0x288] sm:$0xff] %v6273_v26  ;;  %v6371_v29 = vpack.c.bf16 %v9945_v36, %v6240_v21  ;;  %vm10750_vm3 = vcmask 556568   ;;  %vm10751_vm10 = vcmask 7168  }
0x1839   : > { %v6266_v24 = vpop.permute.xlu1 %6265  ;;  %6406 = vmatprep.subr.bf16.mxu0 %v6371_v29 }
0x183a   : > { %6442 = vmatpush1.bf16.msra.mxu1 %v6363_v1  ;;  %v6274_v28 = vsel %vm10736_vm13, %v6264_v50, %v6266_v24  ;;  %6288 = vst.msk [vmem:[#allocation2 + $0x298] sm:$0xff] %vm10737_vm15, %v6266_v24  ;;  %v6333_v30 = vld [vmem:[#allocation2 + $0x1f8] sm:$0xff]  ;;  %6407 = vmatpush1.bf16.msra.mxu0 %v6370_v45  ;;  %vm10752_vm13 = vmmov %vm10743_vm1  ;;  %vm10753_vm15 = vcmask 711680  }
0x183b   : > { %6443 = vmatprep.subr.bf16.mxu1 %v8162_v5  ;;  %6293 = vst.msk [vmem:[#allocation2 + $0x298] sm:$0xff] %vm10738_vm11, %v9620_v57  ;;  %v6374_v33 = vpack.c.bf16 %v6276_v20, %v6274_v28  ;;  %v6369_v3 = vpack.c.bf16 %v6336_v32, %v6333_v30  ;;  %vm10754_vm11 = vmmov %vm10743_vm1 }
0x183d   : > { %v6268_v58 = vpop.permute.xlu1 %6267  ;;  %6408 = vmatprep.subr.bf16.mxu0 %v6374_v33 }
0x183e   : > { %6444 = vmatpush1.bf16.msra.mxu1 %v6366_v13  ;;  %v6275_v55 = vsel %vm10739_vm6, %v6268_v58, %v6270_v15  ;;  %v6339_v34 = vld [vmem:[#allocation2 + $0x248] sm:$0xff]  ;;  %vm10755_vm6 = vmmov %vm10745_vm5 }
0x183f   : > { %6445 = vmatprep.subr.bf16.mxu1 %v8162_v5  ;;  %6290 = vst [vmem:[#allocation2 + $0x2b0] sm:$0xff] %v6275_v55  ;;  %v6373_v22 = vpack.c.bf16 %v6275_v55, %v6273_v26  ;;  %v6372_v36 = vpack.c.bf16 %v6342_v35, %v6339_v34 }
0x1841   : > { %6409 = vmatpush1.bf16.msra.mxu0 %v6373_v22 }
0x1842   : > { %6446 = vmatpush1.bf16.msra.mxu1 %v6369_v3  ;;  %v6345_v37 = vld [vmem:[#allocation2 + $0x298] sm:$0xff] }
0x1843   : > { %6447 = vmatprep.subr.bf16.mxu1 %v8162_v5  ;;  %v6375_v39 = vpack.c.bf16 %v6348_v38, %v6345_v37 }
0x1844   : > { %6425 = vmatmul.mubr.bf16.vlgmr.msra.gmra.mrb[68].mxu0 %v7388_v27 }
0x1845   : > { %6709 = vmatprep.mubr.bf16.mxu0 %v8162_v5 }
0x1846   : > { %6448 = vmatpush1.bf16.msra.mxu1 %v6372_v36  ;;  %v6381_v60 = vpop.permute.xlu0 %6380 }
0x1847   : > { %6449 = vmatprep.subr.bf16.mxu1 %v8162_v5 }
0x184a   : > { %6450 = vmatpush1.bf16.msra.mxu1 %v6375_v39 }
0x184b   : > { %7838 = vmatprep.subr.bf16.mxu1 %v9620_v57 }
0x184d   : > { %6466 = vmatmul.mubr.bf16.vlgmr.msra.gmra.mrb[48].mxu1 %v7388_v27 }
0x184e   : > { %7848 = vmatprep.mubr.msk.bf16.mxu1 %vm10447_vm14, %v9620_v57 }
0x1917   : > { %v6426_v19 = vpop.f32.mrb[68].mxu0 }
0x1918   : > { %v6427_v42 = vadd.f32 %v6426_v19, %v6381_v60  ;;  %v6428_v43 = vpop.f32.mrb[69].mxu0 }
0x1919   : > { %v6430_v44 = vpop.f32.mrb[70].mxu0  ;;  %v6429_v61 = vadd.f32 %v6428_v43, %v6381_v60 }
0x191a   : > { %v6473_v46 = vadd.f32 %v6427_v42, %v8657_v6  ;;  %v6431_v54 = vpop.f32.mrb[71].mxu0 }
0x191c   : > { %v6476_v47 = vmax.f32 %v6473_v46, 0.0 }
0x191e   : > { %v10002_v48 = vmul.f32 %v6476_v47, %v8530_v23 }
0x1920   : > { %v6467_v52 = vpop.f32.mrb[48].mxu1  ;;  %6485 = vrot.lane.b32.xlu1 %v10002_v48, %s10661_s5 }
0x1921   : > { %v6468_v49 = vadd.f32 %v6467_v52, %v6381_v60  ;;  %v6469_v53 = vpop.f32.mrb[49].mxu1 }
0x1922   : > { %v6470_v50 = vpop.f32.mrb[50].mxu1 }
0x1923   : > { %v6475_v56 = vadd.f32 %v6468_v49, %v8667_v14  ;;  %v6471_v59 = vpop.f32.mrb[51].mxu1  ;;  %v6474_v14 = vadd.f32 %v6429_v61, %v8660_v7  ;;  %v6659_v7 = vld [vmem:[%s10741_s1] sm:$0xff] }
0x1924   : > { %6500 = vrot.lane.b32.xlu1 %v10002_v48, %s10657_s11 }
0x1925   : > { %v6478_v62 = vmax.f32 %v6475_v56, 0.0  ;;  %v6477_v15 = vmax.f32 %v6474_v14, 0.0 }
0x1927   : > { %v6481_v6 = vmul.f32 %v6478_v62, %v8537_v31  ;;  %v10025_v51 = vmul.f32 %v6477_v15, %v8551_v41 }
0x1928   : > { %6515 = vrot.lane.b32.xlu1 %v10002_v48, %s10664_s22 }
0x1929   : > { %6547 = vst.msk [vmem:[#allocation2 + $0xb8] sm:$0xff] %vm10740_vm7, %v6481_v6  ;;  %6504 = vrot.lane.b32.xlu0 %v6481_v6, %s10657_s11  ;;  %vm10756_vm7 = vmmov %vm10745_vm5 }
0x192c   : > { %6530 = vrot.lane.b32.xlu1 %v10002_v48, %s10567_s3 }
0x192d   : > { %6552 = vrot.lane.b32.xlu0 %v6481_v6, %s10568_s4 }
0x1930   : > { %6489 = vrot.lane.b32.xlu1 %v6481_v6, %s10661_s5 }
0x1931   : > { %6519 = vrot.lane.b32.xlu0 %v6481_v6, %s10664_s22 }
0x1934   : > { %6548 = vrot.lane.b32.xlu1 %v10002_v48, %s10568_s4 }
0x1935   : > { %6565 = vrot.lane.b32.xlu0 %v10002_v48, %s10662_s0 }
0x1938   : > { %6534 = vrot.lane.b32.xlu1 %v6481_v6, %s10567_s3 }
0x1939   : > { %6487 = vrot.lane.b32.xlu0 %v10025_v51, %s10661_s5 }
0x193c   : > { %6569 = vrot.lane.b32.xlu1 %v6481_v6, %s10662_s0 }
0x193d   : > { %6502 = vrot.lane.b32.xlu0 %v10025_v51, %s10657_s11 }
0x1940   : > { %6586 = vrot.lane.b32.xlu1 %v6481_v6, %s10663_s2 }
0x1941   : > { %6517 = vrot.lane.b32.xlu0 %v10025_v51, %s10664_s22 }
0x1944   : > { %6550 = vrot.lane.b32.xlu1 %v10025_v51, %s10568_s4 }
0x1945   : > { %6532 = vrot.lane.b32.xlu0 %v10025_v51, %s10567_s3 }
0x1948   : > { %6582 = vrot.lane.b32.xlu1 %v10002_v48, %s10663_s2 }
0x1949   : > { %6599 = vrot.lane.b32.xlu0 %v10002_v48, %s10669_s18 }
0x194c   : > { %6601 = vrot.lane.b32.xlu1 %v10025_v51, %s10669_s18 }
0x194d   : > { %6567 = vrot.lane.b32.xlu0 %v10025_v51, %s10662_s0 }
0x1950   : > { %6662 = vperm.xlu1 %8075, %v6659_v7  }
0x1951   : > { %6584 = vrot.lane.b32.xlu0 %v10025_v51, %s10663_s2 }
0x1955   : > { %6603 = vrot.lane.b32.xlu0 %v6481_v6, %s10669_s18 }
0x1992   : > { %v6486_v20 = vpop.permute.xlu1 %6485 }
0x1993   : > { %6496 = vst.msk [vmem:[#allocation2 + $0x8] sm:$0xff] %vm10742_vm2, %v6486_v20  ;;  %vm10757_vm2 = vcmask 416768  }
0x1994   : > { %6499 = vst.msk [vmem:[#allocation2 + $0x8] sm:$0xff] %vm10743_vm1, %v9620_v57  ;;  %vm10758_vm1 = vcmask 703488  }
0x1996   : > { %v6501_v0 = vpop.permute.xlu1 %6500 }
0x1997   : > { %6511 = vst.msk [vmem:[#allocation2 + $0x30] sm:$0xff] %vm10744_vm12, %v6501_v0  ;;  %vm10759_vm12 = vcmask 556440  }
0x1998   : > { %6514 = vst.msk [vmem:[#allocation2 + $0x30] sm:$0xff] %vm10745_vm5, %v9620_v57  ;;  %vm10760_vm5 = vmmov %vm10747_vm4 }
0x199a   : > { %v6516_v8 = vpop.permute.xlu1 %6515 }
0x199b   : > { %v6505_v63 = vpop.permute.xlu0 %6504  ;;  %6526 = vst.msk [vmem:[#allocation2 + $0x58] sm:$0xff] %vm10746_vm9, %v6516_v8  ;;  %v6616_v11 = vld [vmem:[#allocation2 + $0x8] sm:$0xff]  ;;  %vm10761_vm9 = vcmask 408576  }
0x199c   : > { %6529 = vst.msk [vmem:[#allocation2 + $0x58] sm:$0xff] %vm10747_vm4, %v9620_v57  ;;  %vm10762_vm4 = vcmask 695296  }
0x199e   : > { %v6531_v10 = vpop.permute.xlu1 %6530 }
0x199f   : > { %v6553_v9 = vpop.permute.xlu0 %6552  ;;  %6541 = vst.msk [vmem:[#allocation2 + $0x80] sm:$0xff] %vm10749_vm0, %v6531_v10  ;;  %v6619_v1 = vld [vmem:[#allocation2 + $0x30] sm:$0xff]  ;;  %vm10764_vm0 = vmmov %vm10760_vm5 }
0x19a0   : > { %6563 = vst.msk [vmem:[#allocation2 + $0xe0] sm:$0xff] %vm10748_vm8, %v6553_v9  ;;  %v6643_v30 = vpack.c.bf16 %v6619_v1, %v6616_v11  ;;  %vm10763_vm8 = vcmask 556432  }
0x19a1   : > { %6564 = vst.msk [vmem:[#allocation2 + $0xe0] sm:$0xff] %vm10750_vm3, %v9620_v57  ;;  %vm10765_vm3 = vmmov %vm10751_vm10 }
0x19a2   : > { %6544 = vst.msk [vmem:[#allocation2 + $0x80] sm:$0xff] %vm10751_vm10, %v9620_v57  ;;  %v6490_v25 = vpop.permute.xlu1 %6489  ;;  %vm10766_vm10 = vmmov %vm10765_vm3 }
0x19a3   : > { %v6520_v12 = vpop.permute.xlu0 %6519  ;;  %v6622_v55 = vld [vmem:[#allocation2 + $0x58] sm:$0xff] }
0x19a6   : > { %v6549_v2 = vpop.permute.xlu1 %6548 }
0x19a7   : > { %v6566_v4 = vpop.permute.xlu0 %6565 }
0x19a8   : > { %v6633_v62 = vld [vmem:[#allocation2 + $0xe0] sm:$0xff] }
0x19a9   : > { %v6625_v34 = vld [vmem:[#allocation2 + $0x80] sm:$0xff] }
0x19aa   : > { %v6535_v26 = vpop.permute.xlu1 %6534  ;;  %v6646_v27 = vpack.c.bf16 %v6625_v34, %v6622_v55 }
0x19ab   : > { %v6488_v21 = vpop.permute.xlu0 %6487 }
0x19ac   : > { %v6492_v40 = vsel %vm10752_vm13, %v6488_v21, %v6490_v25  ;;  %v6491_v24 = vsel %vm10754_vm11, %v6486_v20, %v6488_v21  ;;  %vm10767_vm13 = vcmask 1039360  }
0x19ad   : > { %6498 = vst.msk [vmem:[#allocation2 + $0x18] sm:$0xff] %vm10753_vm15, %v6492_v40  ;;  %vm10768_vm15 = vcmask 564224   ;;  %vm10769_vm11 = vmmov %vm10767_vm13 }
0x19ae   : > { %v6570_v45 = vpop.permute.xlu1 %6569 }
0x19af   : > { %v6503_v29 = vpop.permute.xlu0 %6502  ;;  %6580 = vst.msk [vmem:[#allocation2 + $0x108] sm:$0xff] %vm10757_vm2, %v6570_v45  ;;  %vm10772_vm2 = vcmask 900096  }
0x19b0   : > { %v6506_v13 = vsel %vm10755_vm6, %v6501_v0, %v6503_v29  ;;  %v6507_v28 = vsel %vm10756_vm7, %v6503_v29, %v6505_v63  ;;  %6581 = vst.msk [vmem:[#allocation2 + $0x108] sm:$0xff] %vm10759_vm12, %v9620_v57  ;;  %vm10770_vm6 = vcmask 908288   ;;  %vm10774_vm12 = vcmask 891904  }
0x19b1   : > { %6513 = vst.msk [vmem:[#allocation2 + $0x40] sm:$0xff] %vm10758_vm1, %v6507_v28  ;;  %v6644_v32 = vpack.c.bf16 %v6506_v13, %v6491_v24  ;;  %vm10771_vm7 = vmmov %vm10770_vm6 }
0x19b2   : > { %v6587_v58 = vpop.permute.xlu1 %6586  ;;  %vm10773_vm1 = vmmov %vm10772_vm2 }
0x19b3   : > { %v6518_v33 = vpop.permute.xlu0 %6517  ;;  %6677 = vmatprep.subr.bf16.mxu0 %v6644_v32  ;;  %6597 = vst.msk [vmem:[#allocation2 + $0x130] sm:$0xff] %vm10761_vm9, %v6587_v58  ;;  %vm10777_vm9 = vmmov %vm10774_vm12 }
0x19b4   : > { %v6522_v3 = vsel %vm10760_vm5, %v6518_v33, %v6520_v12  ;;  %6678 = vmatpush1.bf16.msra.mxu0 %v6643_v30  ;;  %6598 = vst.msk [vmem:[#allocation2 + $0x130] sm:$0xff] %vm10763_vm8, %v9620_v57  ;;  %v6521_v36 = vsel %vm10764_vm0, %v6516_v8, %v6518_v33  ;;  %v6618_v39 = vld [vmem:[#allocation2 + $0x18] sm:$0xff]  ;;  %vm10776_vm5 = vcmask 400384   ;;  %vm10779_vm8 = vcmask 1043456  }
0x19b5   : > { %6528 = vst.msk [vmem:[#allocation2 + $0x68] sm:$0xff] %vm10762_vm4, %v6522_v3  ;;  %vm10778_vm4 = vcmask 556424   ;;  %vm10780_vm0 = vmmov %vm10779_vm8 }
0x19b6   : > { %v6551_v22 = vpop.permute.xlu1 %6550 }
0x19b7   : > { %v6533_v35 = vpop.permute.xlu0 %6532  ;;  %v6555_v19 = vsel %vm10767_vm13, %v6551_v22, %v6553_v9  ;;  %v6554_v46 = vsel %vm10769_vm11, %v6549_v2, %v6551_v22  ;;  %v6636_v20 = vld [vmem:[#allocation2 + $0x108] sm:$0xff]  ;;  %vm10786_vm11 = vcmask 547840  }
0x19b8   : > { %v6536_v37 = vsel %vm10765_vm3, %v6531_v10, %v6533_v35  ;;  %v6537_v38 = vsel %vm10766_vm10, %v6533_v35, %v6535_v26  ;;  %v6621_v60 = vld [vmem:[#allocation2 + $0x40] sm:$0xff]  ;;  %v6650_v47 = vpack.c.bf16 %v6555_v19, %v10025_v51  ;;  %v6649_v52 = vpack.c.bf16 %v6554_v46, %v10002_v48  ;;  %v6630_v48 = vld [vmem:[#allocation2 + $0xb8] sm:$0xff]  ;;  %vm10782_vm10 = vmmov %vm10780_vm0 }
0x19b9   : > { %6543 = vst.msk [vmem:[#allocation2 + $0x90] sm:$0xff] %vm10768_vm15, %v6537_v38  ;;  %v6645_v42 = vpack.c.bf16 %v6621_v60, %v6618_v39  ;;  %v6647_v43 = vpack.c.bf16 %v6536_v37, %v6521_v36  ;;  %v6651_v63 = vpack.c.bf16 %v6633_v62, %v6630_v48  ;;  %v6658_v26 = vld [vmem:[%s10775_s23] sm:$0xf]  ;;  %vm10781_vm3 = vcmask 588800  }
0x19ba   : > { %v6583_v54 = vpop.permute.xlu1 %6582  ;;  %vm10783_vm13 = vmmov %vm10781_vm3  ;;  %vm10784_vm15 = vcmask 556032   ;;  %v7050_v39 = vld [vmem:[#allocation4] sm:$0x1] }
0x19bb   : > { %v6600_v44 = vpop.permute.xlu0 %6599  ;;  %7839 = vmatpush3.bf16.msra.mxu1 %v6645_v42  ;;  %6679 = vmatprep.subr.bf16.mxu0 %v6647_v43  ;;  %v6639_v0 = vld [vmem:[#allocation2 + $0x130] sm:$0xff]  ;;  %v6941_v60 = vld [vmem:[%s10785_s28] sm:$0xff] }
0x19bc   : > { %7840 = vmatprep.subr.bf16.mxu1 %v9620_v57  ;;  %6680 = vmatpush1.bf16.msra.mxu0 %v6646_v27  ;;  %v6624_v53 = vld [vmem:[#allocation2 + $0x68] sm:$0xff]  ;;  %v6654_v12 = vpack.c.bf16 %v6639_v0, %v6636_v20 }
0x19bd   : > { %6681 = vmatprep.subr.bf16.mxu0 %v6650_v47 }
0x19be   : > { %v6602_v59 = vpop.permute.xlu1 %6601 }
0x19bf   : > { %v6568_v49 = vpop.permute.xlu0 %6567  ;;  %v6605_v7 = vsel %vm10774_vm12, %v6600_v44, %v6602_v59  ;;  %vm10791_vm12 = vcmask 556432  }
0x19c0   : > { %v6627_v50 = vld [vmem:[#allocation2 + $0x90] sm:$0xff]  ;;  %6682 = vmatpush1.bf16.msra.mxu0 %v6649_v52  ;;  %v6571_v6 = vsel %vm10770_vm6, %v6566_v4, %v6568_v49  ;;  %v6572_v14 = vsel %vm10771_vm7, %v6568_v49, %v6570_v45  ;;  %v6655_v25 = vpack.c.bf16 %v6605_v7, %v6605_v7  ;;  %vm10787_vm6 = vcmask 556568  }
0x19c1   : > { %v6648_v56 = vpack.c.bf16 %v6627_v50, %v6624_v53  ;;  %vm10788_vm7 = vcmask 416768  }
0x19c2   : > { %v6669_v21 = vsel %vm10780_vm0, %v6655_v25, 0 }
0x19c3   : > { %v6585_v61 = vpop.permute.xlu0 %6584  ;;  %7841 = vmatpush3.bf16.msra.mxu1 %v6648_v56 }
0x19c4   : > { %v6589_v15 = vsel %vm10772_vm2, %v6585_v61, %v6587_v58  ;;  %v6588_v51 = vsel %vm10773_vm1, %v6583_v54, %v6585_v61  ;;  %7842 = vmatprep.subr.bf16.mxu1 %v9620_v57  ;;  %vm10789_vm2 = vcmask 556440   ;;  %vm10790_vm1 = vcmask 408576  }
0x19c5   : > { %v6653_v8 = vpack.c.bf16 %v6589_v15, %v6572_v14  ;;  %v6652_v9 = vpack.c.bf16 %v6588_v51, %v6571_v6 }
0x19c7   : > { %v6604_v10 = vpop.permute.xlu0 %6603  ;;  %7843 = vmatpush3.bf16.msra.mxu1 %v6651_v63  ;;  %6683 = vmatprep.subr.bf16.mxu0 %v6653_v8 }
0x19c8   : > { %6614 = vst.msk [vmem:[#allocation2 + $0x158] sm:$0xff] %vm10776_vm5, %v6604_v10  ;;  %v6606_v4 = vsel %vm10777_vm9, %v6602_v59, %v6604_v10  ;;  %7844 = vmatprep.subr.bf16.mxu1 %v9620_v57  ;;  %6684 = vmatpush1.bf16.msra.mxu0 %v6652_v9  ;;  %vm10792_vm5 = vcmask 154624  }
0x19c9   : > { %6615 = vst.msk [vmem:[#allocation2 + $0x158] sm:$0xff] %vm10778_vm4, %v9620_v57  ;;  %v6656_v2 = vpack.c.bf16 %v6606_v4, %v6606_v4  ;;  %vm10793_vm9 = vmmov %vm10792_vm5  ;;  %vm10794_vm4 = vcmask 1047704  }
0x19ca   : > { %vm10796_vm0 = vmmov %vm10792_vm5 }
0x19cb   : > { %7845 = vmatpush3.bf16.msra.mxu1 %v6654_v12  ;;  %7392 = vmatprep.subr.msk.bf16.mxu0 %vm10779_vm8, %v6656_v2  ;;  %vm10795_vm8 = vcmask 711680  }
0x19cc   : > { %7846 = vmatprep.subr.bf16.mxu1 %v9620_v57  ;;  %6686 = vmatpush1.bf16.msra.mxu0 %v6669_v21 }
0x19cf   : > { %7393 = vmatmul.mubr.msk.bf16.vlgmr.msra.gmra.mrb[72].mxu0 %vm10781_vm3, %v6658_v26  ;;  %v6663_v29 = vpop.permute.xlu1 %6662  ;;  %vm10797_vm3 = vcmask 146432  }
0x19d0   : > { %v6642_v40 = vld [vmem:[#allocation2 + $0x158] sm:$0xff]  ;;  %6991 = vmatprep.mubr.bf16.mxu0 %v8162_v5 }
0x19d1   : > { %v6657_v11 = vpack.c.bf16 %v6642_v40, %v6642_v40 }
0x19d3   : > { %v6675_v1 = vsel %vm10782_vm10, %v6657_v11, 0  ;;  %vm10798_vm10 = vmmov %vm10797_vm3 }
0x19d4   : > { %7847 = vmatpush3.bf16.msra.mxu1 %v6675_v1 }
0x19d5   : > { %7852 = vmatprep.subr.bf16.mxu1 %v9620_v57 }
0x19d7   : > { %7849 = vmatmul.mubr.msk.bf16.vlgmr.msra.gmra.mrb[52].mxu1 %vm10783_vm13, %v6658_v26  ;;  %vm10799_vm13 = vcmask 1047696  }
0x19d8   : > { %7862 = vmatprep.mubr.msk.bf16.mxu1 %vm10447_vm14, %v9620_v57 }
0x1aa2   : > { %v6711_v45 = vpop.f32.mrb[72].mxu0 }
0x1aa3   : > { %v6712_v24 = vadd.f32 %v6711_v45, %v6663_v29  ;;  %v6713_v13 = vpop.f32.mrb[73].mxu0 }
0x1aa4   : > { %v6714_v28 = vadd.f32 %v6713_v13, %v6663_v29  ;;  %v6715_v30 = vpop.f32.mrb[74].mxu0 }
0x1aa5   : > { %v6758_v32 = vmax.f32 %v6712_v24, 0.0  ;;  %v6716_v33 = vpop.f32.mrb[75].mxu0 }
0x1aa6   : > { %v6759_v58 = vmax.f32 %v6714_v28, 0.0 }
0x1aa7   : > { %v10113_v3 = vmul.f32 %v6758_v32, %v8530_v23 }
0x1aa8   : > { %v10116_v55 = vmul.f32 %v6759_v58, %v8551_v41 }
0x1aa9   : > { %6827 = vst [vmem:[#allocation2 + $0xa8] sm:$0xff] %v10113_v3 }
0x1aaa   : > { %v6752_v34 = vpop.f32.mrb[52].mxu1 }
0x1aab   : > { %v6753_v35 = vadd.f32 %v6752_v34, %v6663_v29  ;;  %v7850_v22 = vpop.f32.mrb[53].mxu1 }
0x1aac   : > { %v6755_v27 = vpop.f32.mrb[54].mxu1 }
0x1aad   : > { %v6760_v36 = vmax.f32 %v6753_v35, 0.0  ;;  %v7851_v37 = vpop.f32.mrb[55].mxu1 }
0x1aaf   : > { %v6763_v38 = vmul.f32 %v6760_v36, %v8537_v31 }
0x1ab1   : > { %6829 = vst.msk [vmem:[#allocation2 + $0xb8] sm:$0xff] %vm10784_vm15, %v6763_v38  ;;  %6786 = vrot.lane.b32.xlu1 %v6763_v38, %s10657_s11  ;;  %6771 = vrot.lane.b32.xlu0 %v6763_v38, %s10661_s5  ;;  %vm10800_vm15 = vcmask 703488  }
0x1ab5   : > { %6834 = vrot.lane.b32.xlu1 %v6763_v38, %s10568_s4  ;;  %6801 = vrot.lane.b32.xlu0 %v6763_v38, %s10664_s22 }
0x1ab9   : > { %6816 = vrot.lane.b32.xlu1 %v6763_v38, %s10567_s3  ;;  %6851 = vrot.lane.b32.xlu0 %v6763_v38, %s10662_s0 }
0x1abd   : > { %6868 = vrot.lane.b32.xlu0 %v6763_v38, %s10663_s2  ;;  %6847 = vrot.lane.b32.xlu1 %v10113_v3, %s10662_s0 }
0x1ac1   : > { %6769 = vrot.lane.b32.xlu1 %v10116_v55, %s10661_s5  ;;  %6767 = vrot.lane.b32.xlu0 %v10113_v3, %s10661_s5 }
0x1ac5   : > { %6784 = vrot.lane.b32.xlu1 %v10116_v55, %s10657_s11  ;;  %6782 = vrot.lane.b32.xlu0 %v10113_v3, %s10657_s11  ;;  %s7969_s11 = smul.u32 3, %s10833_s12 }
0x1ac7   : > { %s1042_s5 = scalar_lea.vmem %s8391_s16, %s7969_s11 }
0x1ac9   : > { %6799 = vrot.lane.b32.xlu1 %v10116_v55, %s10664_s22  ;;  %6797 = vrot.lane.b32.xlu0 %v10113_v3, %s10664_s22 }
0x1acd   : > { %6814 = vrot.lane.b32.xlu1 %v10116_v55, %s10567_s3  ;;  %6812 = vrot.lane.b32.xlu0 %v10113_v3, %s10567_s3  ;;  %s10820_s3 = sld [smem:[#allocation19_spill]] }
0x1ad1   : > { %6881 = vrot.lane.b32.xlu1 %v10113_v3, %s10669_s18  ;;  %6830 = vrot.lane.b32.xlu0 %v10113_v3, %s10568_s4 }
0x1ad5   : > { %6849 = vrot.lane.b32.xlu1 %v10116_v55, %s10662_s0  ;;  %6832 = vrot.lane.b32.xlu0 %v10116_v55, %s10568_s4  ;;  %s10828_s4 = sld [smem:[#allocation21_spill]] }
0x1ad9   : > { %6866 = vrot.lane.b32.xlu1 %v10116_v55, %s10663_s2  ;;  %6864 = vrot.lane.b32.xlu0 %v10113_v3, %s10663_s2 }
0x1add   : > { %6885 = vrot.lane.b32.xlu1 %v6763_v38, %s10669_s18  ;;  %6883 = vrot.lane.b32.xlu0 %v10116_v55, %s10669_s18 }
0x1ae1   : > { %7053 = vperm.xlu1 %8075, %v7050_v39   ;;  %6944 = vperm.xlu0 %8074, %v6941_v60   ;;  %v6912_v39 = vld [vmem:[#allocation2 + $0xb8] sm:$0xff] }
0x1b23   : > { %v6787_v19 = vpop.permute.xlu1 %6786  ;;  %v6772_v42 = vpop.permute.xlu0 %6771 }
0x1b27   : > { %v6835_v43 = vpop.permute.xlu1 %6834  ;;  %v6802_v44 = vpop.permute.xlu0 %6801 }
0x1b28   : > { %6845 = vst.msk [vmem:[#allocation2 + $0xe0] sm:$0xff] %vm10786_vm11, %v6835_v43  ;;  %vm10801_vm11 = vmmov %vm10797_vm3 }
0x1b29   : > { %6846 = vst.msk [vmem:[#allocation2 + $0xe0] sm:$0xff] %vm10787_vm6, %v9620_v57  ;;  %vm10802_vm6 = vcmask 138240  }
0x1b2b   : > { %v6817_v46 = vpop.permute.xlu1 %6816  ;;  %v6852_v54 = vpop.permute.xlu0 %6851 }
0x1b2c   : > { %6862 = vst.msk [vmem:[#allocation2 + $0x108] sm:$0xff] %vm10788_vm7, %v6852_v54  ;;  %vm10803_vm7 = vmmov %vm10802_vm6 }
0x1b2d   : > { %6863 = vst.msk [vmem:[#allocation2 + $0x108] sm:$0xff] %vm10789_vm2, %v9620_v57  ;;  %vm10804_vm2 = vcmask 1047688  }
0x1b2f   : > { %v10168_v47 = vpop.permute.xlu0 %6868  ;;  %v6848_v52 = vpop.permute.xlu1 %6847 }
0x1b30   : > { %6879 = vst.msk [vmem:[#allocation2 + $0x130] sm:$0xff] %vm10790_vm1, %v10168_v47  ;;  %vm10805_vm1 = vcmask 695296   ;;  %v6915_v22 = vld [vmem:[#allocation2 + $0xe0] sm:$0xff] }
0x1b31   : > { %6880 = vst.msk [vmem:[#allocation2 + $0x130] sm:$0xff] %vm10791_vm12, %v9620_v57  ;;  %vm10806_vm12 = vmmov %vm10802_vm6 }
0x1b33   : > { %v6770_v49 = vpop.permute.xlu1 %6769  ;;  %v6768_v53 = vpop.permute.xlu0 %6767 }
0x1b34   : > { %v6774_v50 = vsel %vm10792_vm5, %v6770_v49, %v6772_v42  ;;  %v6773_v56 = vsel %vm10793_vm9, %v6768_v53, %v6770_v49  ;;  %6778 = vst.msk [vmem:[#allocation2 + $0x8] sm:$0xff] %vm10794_vm4, %v6768_v53  ;;  %vm10807_vm5 = vcmask 7168   ;;  %vm10809_vm4 = vcmask 1047560   ;;  %v6918_v60 = vld [vmem:[#allocation2 + $0x108] sm:$0xff] }
0x1b35   : > { %6780 = vst.msk [vmem:[#allocation2 + $0x18] sm:$0xff] %vm10795_vm8, %v6774_v50  ;;  %vm10808_vm9 = vmmov %vm10807_vm5  ;;  %vm10810_vm8 = vcmask 564224   ;;  %v6933_v42 = vpack.c.bf16 %v6915_v22, %v6912_v39 }
0x1b36   : > { %6781 = vst.msk [vmem:[#allocation2 + $0x8] sm:$0xff] %vm10796_vm0, %v9620_v57  ;;  %vm10811_vm0 = vmmov %vm10807_vm5 }
0x1b37   : > { %v6785_v59 = vpop.permute.xlu1 %6784  ;;  %v6783_v62 = vpop.permute.xlu0 %6782 }
0x1b38   : > { %v6789_v6 = vsel %vm10797_vm3, %v6785_v59, %v6787_v19  ;;  %v6788_v61 = vsel %vm10798_vm10, %v6783_v62, %v6785_v59  ;;  %6793 = vst.msk [vmem:[#allocation2 + $0x30] sm:$0xff] %vm10799_vm13, %v6783_v62  ;;  %vm10812_vm3 = vcmask 908288   ;;  %vm10814_vm13 = vcmask 1039360   ;;  %v6921_v19 = vld [vmem:[#allocation2 + $0x130] sm:$0xff] }
0x1b39   : > { %6795 = vst.msk [vmem:[#allocation2 + $0x40] sm:$0xff] %vm10800_vm15, %v6789_v6  ;;  %v6926_v14 = vpack.c.bf16 %v6788_v61, %v6773_v56  ;;  %vm10813_vm10 = vmmov %vm10812_vm3  ;;  %v6940_v56 = vld [vmem:[%s10820_s3] sm:$0xf] }
0x1b3a   : > { %6796 = vst.msk [vmem:[#allocation2 + $0x30] sm:$0xff] %vm10801_vm11, %v9620_v57  ;;  %vm10815_vm15 = vmmov %vm10814_vm13  ;;  %vm10816_vm11 = vcmask 900096  }
0x1b3b   : > { %v6800_v15 = vpop.permute.xlu1 %6799  ;;  %v6798_v51 = vpop.permute.xlu0 %6797  ;;  %6959 = vmatprep.subr.bf16.mxu0 %v6926_v14 }
0x1b3c   : > { %v6804_v48 = vsel %vm10802_vm6, %v6800_v15, %v6802_v44  ;;  %v6803_v7 = vsel %vm10803_vm7, %v6798_v51, %v6800_v15  ;;  %6808 = vst.msk [vmem:[#allocation2 + $0x58] sm:$0xff] %vm10804_vm2, %v6798_v51  ;;  %v6900_v10 = vld [vmem:[#allocation2 + $0x18] sm:$0xff]  ;;  %vm10817_vm6 = vmmov %vm10816_vm11  ;;  %vm10818_vm7 = vcmask 400384   ;;  %vm10819_vm2 = vcmask 891904  }
0x1b3d   : > { %6810 = vst.msk [vmem:[#allocation2 + $0x68] sm:$0xff] %vm10805_vm1, %v6804_v48  ;;  %v6898_v20 = vld [vmem:[#allocation2 + $0x8] sm:$0xff]  ;;  %vm10821_vm1 = vmmov %vm10819_vm2 }
0x1b3e   : > { %6811 = vst.msk [vmem:[#allocation2 + $0x58] sm:$0xff] %vm10806_vm12, %v9620_v57  ;;  %vm10822_vm12 = vcmask 556424  }
0x1b3f   : > { %v6815_v0 = vpop.permute.xlu1 %6814  ;;  %v6813_v63 = vpop.permute.xlu0 %6812 }
0x1b40   : > { %v6819_v8 = vsel %vm10807_vm5, %v6815_v0, %v6817_v46  ;;  %v6818_v9 = vsel %vm10808_vm9, %v6813_v63, %v6815_v0  ;;  %6823 = vst.msk [vmem:[#allocation2 + $0x80] sm:$0xff] %vm10809_vm4, %v6813_v63  ;;  %v6903_v12 = vld [vmem:[#allocation2 + $0x40] sm:$0xff]  ;;  %vm10823_vm5 = vcmask 1043456   ;;  %vm10825_vm4 = vcmask 588800  }
0x1b41   : > { %v6901_v25 = vld [vmem:[#allocation2 + $0x30] sm:$0xff]  ;;  %6825 = vst.msk [vmem:[#allocation2 + $0x90] sm:$0xff] %vm10810_vm8, %v6819_v8  ;;  %v6927_v4 = vpack.c.bf16 %v6903_v12, %v6900_v10  ;;  %v6929_v21 = vpack.c.bf16 %v6818_v9, %v6803_v7  ;;  %vm10824_vm9 = vmmov %vm10823_vm5 }
0x1b42   : > { %6826 = vst.msk [vmem:[#allocation2 + $0x80] sm:$0xff] %vm10811_vm0, %v9620_v57  ;;  %v6925_v2 = vpack.c.bf16 %v6901_v25, %v6898_v20  ;;  %vm10826_vm8 = vmmov %vm10823_vm5 }
0x1b43   : > { %7853 = vmatpush3.bf16.msra.mxu1 %v6927_v4  ;;  %v6882_v26 = vpop.permute.xlu1 %6881  ;;  %v6831_v40 = vpop.permute.xlu0 %6830  ;;  %vm10827_vm0 = vmmov %vm10825_vm4 }
0x1b44   : > { %6960 = vmatpush1.bf16.msra.mxu0 %v6925_v2  ;;  %7854 = vmatprep.subr.bf16.mxu1 %v9620_v57  ;;  %v6906_v30 = vld [vmem:[#allocation2 + $0x68] sm:$0xff] }
0x1b45   : > { %6961 = vmatprep.subr.bf16.mxu0 %v6929_v21  ;;  %v6904_v11 = vld [vmem:[#allocation2 + $0x58] sm:$0xff] }
0x1b47   : > { %v6850_v1 = vpop.permute.xlu1 %6849  ;;  %v6833_v29 = vpop.permute.xlu0 %6832 }
0x1b48   : > { %v6853_v45 = vsel %vm10812_vm3, %v6848_v52, %v6850_v1  ;;  %v6854_v24 = vsel %vm10813_vm10, %v6850_v1, %v6852_v54  ;;  %v6836_v13 = vsel %vm10814_vm13, %v6831_v40, %v6833_v29  ;;  %v6837_v28 = vsel %vm10815_vm15, %v6833_v29, %v6835_v43  ;;  %v6909_v32 = vld [vmem:[#allocation2 + $0x90] sm:$0xff]  ;;  %vm10830_vm3 = vmmov %vm10823_vm5 }
0x1b49   : > { %v6907_v33 = vld [vmem:[#allocation2 + $0x80] sm:$0xff]  ;;  %6860 = vst [vmem:[#allocation2 + $0xf8] sm:$0xff] %v6853_v45  ;;  %6843 = vst [vmem:[#allocation2 + $0xd0] sm:$0xff] %v6836_v13  ;;  %v6930_v58 = vpack.c.bf16 %v6909_v32, %v6906_v30  ;;  %v6932_v35 = vpack.c.bf16 %v6837_v28, %v10116_v55  ;;  %v6931_v55 = vpack.c.bf16 %v6836_v13, %v10113_v3  ;;  %vm7060_vm10 = vcmask 64512  }
0x1b4a   : > { %v6928_v34 = vpack.c.bf16 %v6907_v33, %v6904_v11  ;;  %v6936_v54 = vpack.c.bf16 %v6921_v19, %v6918_v60  ;;  %v7046_v11 = vld [vmem:[%s10828_s4] sm:$0x1]  ;;  %vm10831_vm13 = vmmov %vm10830_vm3  ;;  %vm7183_vm15 = vcmp.lt.s32.totalorder %v1361_v16, 324 }
0x1b4b   : > { %7855 = vmatpush3.bf16.msra.mxu1 %v6930_v58  ;;  %v6867_v27 = vpop.permute.xlu1 %6866  ;;  %v6865_v36 = vpop.permute.xlu0 %6864 }
0x1b4c   : > { %6962 = vmatpush1.bf16.msra.mxu0 %v6928_v34  ;;  %v6871_v37 = vsel %vm10816_vm11, %v6867_v27, %v10168_v47  ;;  %v6870_v38 = vsel %vm10817_vm6, %v6865_v36, %v6867_v27  ;;  %7856 = vmatprep.subr.bf16.mxu1 %v9620_v57 }
0x1b4d   : > { %6963 = vmatprep.subr.bf16.mxu0 %v6932_v35  ;;  %6877 = vst [vmem:[#allocation2 + $0x120] sm:$0xff] %v6870_v38  ;;  %v6935_v43 = vpack.c.bf16 %v6871_v37, %v6854_v24  ;;  %v6934_v3 = vpack.c.bf16 %v6870_v38, %v6853_v45 }
0x1b4f   : > { %7857 = vmatpush3.bf16.msra.mxu1 %v6933_v42  ;;  %v6886_v44 = vpop.permute.xlu1 %6885  ;;  %v6884_v46 = vpop.permute.xlu0 %6883 }
0x1b50   : > { %6964 = vmatpush1.bf16.msra.mxu0 %v6931_v55  ;;  %6896 = vst.msk [vmem:[#allocation2 + $0x158] sm:$0xff] %vm10818_vm7, %v6886_v44  ;;  %v6887_v47 = vsel %vm10819_vm2, %v6882_v26, %v6884_v46  ;;  %v6888_v52 = vsel %vm10821_vm1, %v6884_v46, %v6886_v44  ;;  %7858 = vmatprep.subr.bf16.mxu1 %v9620_v57 }
0x1b51   : > { %6965 = vmatprep.subr.bf16.mxu0 %v6935_v43  ;;  %6897 = vst.msk [vmem:[#allocation2 + $0x158] sm:$0xff] %vm10822_vm12, %v9620_v57  ;;  %6894 = vst [vmem:[#allocation2 + $0x148] sm:$0xff] %v6887_v47  ;;  %v6938_v49 = vpack.c.bf16 %v6888_v52, %v6888_v52  ;;  %v6937_v53 = vpack.c.bf16 %v6887_v47, %v6887_v47 }
0x1b53   : > { %7859 = vmatpush3.bf16.msra.mxu1 %v6936_v54  ;;  %v6951_v50 = vsel %vm10824_vm9, %v6937_v53, 0 }
0x1b54   : > { %6966 = vmatpush1.bf16.msra.mxu0 %v6934_v3  ;;  %7860 = vmatprep.subr.bf16.mxu1 %v9620_v57 }
0x1b55   : > { %7395 = vmatprep.subr.msk.bf16.mxu0 %vm10823_vm5, %v6938_v49 }
0x1b58   : > { %6968 = vmatpush1.bf16.msra.mxu0 %v6951_v50  ;;  %v6924_v59 = vld [vmem:[#allocation2 + $0x158] sm:$0xff] }
0x1b59   : > { %v6939_v62 = vpack.c.bf16 %v6924_v59, %v6924_v59 }
0x1b5b   : > { %7396 = vmatmul.mubr.msk.bf16.vlgmr.msra.gmra.mrb[76].mxu0 %vm10825_vm4, %v6940_v56  ;;  %v6957_v6 = vsel %vm10826_vm8, %v6939_v62, 0 }
0x1b5c   : > { %7105 = vmatprep.mubr.bf16.mxu0 %v8162_v5  ;;  %7861 = vmatpush3.bf16.msra.mxu1 %v6957_v6 }
0x1b5d   : > { %7866 = vmatprep.subr.bf16.mxu1 %v9620_v57 }
0x1b5f   : > { %7863 = vmatmul.mubr.msk.bf16.vlgmr.msra.gmra.mrb[56].mxu1 %vm10827_vm0, %v6940_v56 }
0x1b60   : > { %7868 = vmatprep.mubr.msk.bf16.mxu1 %vm10447_vm14, %v9620_v57  ;;  %v6945_v61 = vpop.permute.xlu0 %6944  ;;  %vm10829_vm14 = vmmov %vm10823_vm5  ;;  %v7054_v45 = vpop.permute.xlu1 %7053 }
0x1b61   : > { %v7059_v13 = vrot.slane %v7054_v45, %v1363_v18 }
0x1c2e   : > { %v6993_v14 = vpop.f32.mrb[76].mxu0 }
0x1c2f   : > { %v6994_v15 = vadd.f32 %v6993_v14, %v6945_v61  ;;  %v6995_v51 = vpop.f32.mrb[77].mxu0 }
0x1c30   : > { %v6996_v48 = vadd.f32 %v6995_v51, %v6945_v61  ;;  %v6997_v7 = vpop.f32.mrb[78].mxu0 }
0x1c31   : > { %v7040_v20 = vmax.f32 %v6994_v15, 0.0  ;;  %v6998_v0 = vpop.f32.mrb[79].mxu0 }
0x1c32   : > { %v7041_v63 = vmax.f32 %v6996_v48, 0.0  ;;  %v7034_v8 = vpop.f32.mrb[56].mxu1 }
0x1c33   : > { %v7043_v5 = vmul.f32 %v7040_v20, %v8530_v23  ;;  %v7035_v9 = vadd.f32 %v7034_v8, %v6945_v61  ;;  %v7864_v12 = vpop.f32.mrb[57].mxu1 }
0x1c34   : > { %v7044_v10 = vmul.f32 %v7041_v63, %v8551_v41  ;;  %v7037_v4 = vpop.f32.mrb[58].mxu1  ;;  %v8214_v41 = vmov 1966171168  }
0x1c35   : > { %v7047_v25 = vpack.c.bf16 %v7043_v5, %v7043_v5  ;;  %v7042_v57 = vmax.f32 %v7035_v9, 0.0  ;;  %v7865_v21 = vpop.f32.mrb[59].mxu1  ;;  %v7159_v29 = vunpack.c.l.s4 %v8214_v41 }
0x1c36   : > { %v7048_v2 = vpack.c.bf16 %v7044_v10, %v7044_v10 }
0x1c37   : > { %v7065_v26 = vsel %vm10829_vm14, %v7047_v25, 0  ;;  %v7045_v40 = vmul.f32 %v7042_v57, %v8537_v31  ;;  %v7160_v24 = vunpack.c.0.s8 %v7159_v29 }
0x1c38   : > { %7398 = vmatprep.subr.msk.bf16.mxu0 %vm10830_vm3, %v7048_v2 }
0x1c39   : > { %7074 = vmatpush1.bf16.msra.mxu0 %v7065_v26  ;;  %v7049_v23 = vpack.c.bf16 %v7045_v40, %v7045_v40  ;;  %v7163_v32 = vsub.s32 %v7160_v24, %v8524_v17 }
0x1c3b   : > { %v7071_v1 = vsel %vm10831_vm13, %v7049_v23, 0 }
0x1c3c   : > { %7399 = vmatmul.mubr.msk.bf16.vlgmr.msra.gmra.mrb[80].mxu0 %vm7060_vm10, %v7046_v11  ;;  %7867 = vmatpush3.bf16.msra.mxu1 %v7071_v1 }
0x1c3f   : > { %7869 = vmatmul.mubr.msk.bf16.vlgmr.msra.gmra.mrb[60].mxu1 %vm7060_vm10, %v7046_v11 }
0x1d0f   : > { %v7107_v31 = vpop.f32.mrb[80].mxu0 }
0x1d10   : > { %v7108_v28 = vadd.f32 %v7107_v31, %v7059_v13  ;;  %v7109_v30 = vpop.f32.mrb[81].mxu0 }
0x1d11   : > { %v7110_v33 = vadd.f32 %v7109_v30, %v7059_v13  ;;  %v7111_v58 = vpop.f32.mrb[82].mxu0 }
0x1d12   : > { %v7112_v34 = vpop.f32.mrb[83].mxu0  ;;  %v7148_v35 = vpop.f32.mrb[60].mxu1 }
0x1d13   : > { %v7157_v22 = vcombine.low %v7108_v28, %v7110_v33  ;;  %v7149_v27 = vadd.f32 %v7148_v35, %v7059_v13  ;;  %v7870_v36 = vpop.f32.mrb[61].mxu1 }
0x1d14   : > { %v7151_v38 = vpop.f32.mrb[62].mxu1 }
0x1d15   : > { %v7164_v37 = vrot.slane %v7157_v22, %v7163_v32  ;;  %v7171_v39 = vrot.slane %v7149_v27, %v7163_v32  ;;  %v7871_v60 = vpop.f32.mrb[63].mxu1 }
0x1d17   : > { %v7172_v19 = vcombine.low %v7164_v37, %v7171_v39 }
0x1d19   : > { %v7179_v18 = vrot.slane %v7172_v19, %v7163_v32 }
0x1d1b   : > { %7185 = vst.msk [vmem:[%s1042_s5] sm:$0x7] %vm7183_vm15, %v7179_v18 }
0x1d1c PF: > { %s81_s15 = sadd.s32 1, %s8117_s15  }
0x1d1d   : > { %p78_p4 = scmp.ge.s32.totalorder %s81_s15, 4  }
0x1d1f   :  { %80 = sbr.rel (!%p78_p4) target bundleno = 56 (0x38), region = 220 }

</bundles_post_ra>
